<compile_context>
chip_gen: v6e
topology: v6e:2x2x1
jax: 0.10.0
libtpu: 0.0.40
codegen_flags: <defaults>
</compile_context>

<pallas_src>
import jax
import jax.numpy as jnp
from jax.experimental import pallas as pl
from jax.experimental.pallas import tpu as pltpu

LN_EPS = 1e-5  # PyTorch nn.LayerNorm default

# Kernel parameter order (after folding input_layer into w1a/w2a).
_KPARAM_ORDER = [
    "w1a", "b1a", "g1a", "be1a", "w1b", "b1b", "g1b", "be1b",
    "w2a", "b2a", "g2a", "be2a", "w2b", "b2b", "g2b", "be2b",
    "wp1a", "wp1b", "bp1", "gp1", "bep1",
    "wp2", "bp2", "gp2", "bep2",
    "wp3", "bp3",
]


def _round_up(n, m):
    return ((n + m - 1) // m) * m


def _cdiv(a, b):
    return -(-a // b)


# --------------------------------------------------------------------------
# Kernel
# --------------------------------------------------------------------------
def _fused_kernel(
    x_ref,
    # path1 (first linear has input_layer folded in)
    w1a_ref, b1a_ref, g1a_ref, be1a_ref,
    w1b_ref, b1b_ref, g1b_ref, be1b_ref,
    # path2
    w2a_ref, b2a_ref, g2a_ref, be2a_ref,
    w2b_ref, b2b_ref, g2b_ref, be2b_ref,
    # pattern layers
    wp1a_ref, wp1b_ref, bp1_ref, gp1_ref, bep1_ref,
    wp2_ref, bp2_ref, gp2_ref, bep2_ref,
    wp3_ref, bp3_ref,
    out_ref,
):
    f32 = jnp.float32
    bf16 = jnp.bfloat16

    def linear(h_bf, w_ref, b_ref):
        # bf16 operands into the MXU, f32 accumulation, f32 bias.
        return jnp.dot(h_bf, w_ref[...], preferred_element_type=f32) + b_ref[...]

    def relu_ln_bf16(h, g_ref, b_ref):
        # ReLU + LayerNorm. Statistics in f32 (one-pass, clamped), affine in
        # bf16 so the result feeds the next matmul with no extra cast pass.
        h = jnp.maximum(h, 0.0)
        mu = jnp.mean(h, axis=-1, keepdims=True)
        var = jnp.mean(h * h, axis=-1, keepdims=True) - mu * mu
        var = jnp.maximum(var, 0.0)          # cancellation guard (rsqrt NaN)
        inv = jax.lax.rsqrt(var + LN_EPS)
        return (h - mu).astype(bf16) * inv.astype(bf16) * g_ref[...] + b_ref[...]

    # Hoist the bf16 cast of the input once; reused by both paths.
    x_bf = x_ref[...].astype(bf16)

    # path1: (folded input+Linear) -> ReLU -> LN -> Linear -> ReLU -> LN
    p1 = relu_ln_bf16(linear(x_bf, w1a_ref, b1a_ref), g1a_ref, be1a_ref)
    p1 = relu_ln_bf16(linear(p1, w1b_ref, b1b_ref), g1b_ref, be1b_ref)

    # path2: same structure, different weights
    p2 = relu_ln_bf16(linear(x_bf, w2a_ref, b2a_ref), g2a_ref, be2a_ref)
    p2 = relu_ln_bf16(linear(p2, w2b_ref, b2b_ref), g2b_ref, be2b_ref)

    # pattern_layers: Linear(2H, H) on cat([p1, p2]) fused as two half-matmuls.
    c = (
        jnp.dot(p1, wp1a_ref[...], preferred_element_type=f32)
        + jnp.dot(p2, wp1b_ref[...], preferred_element_type=f32)
        + bp1_ref[...]
    )
    c = relu_ln_bf16(c, gp1_ref, bep1_ref)
    # Dropout(0.2): identity in eval mode.
    c = relu_ln_bf16(linear(c, wp2_ref, bp2_ref), gp2_ref, bep2_ref)
    out_ref[...] = linear(c, wp3_ref, bp3_ref).astype(out_ref.dtype)


# --------------------------------------------------------------------------
# Wrapper
# --------------------------------------------------------------------------
def _const_spec(arr, single_buffer):
    # Weight / bias / LN params: full block, constant index_map -> loaded once
    # and kept VMEM-resident across all batch tiles. Constant blocks never
    # change, so single-buffering (Buffered(1)) halves their VMEM footprint.
    ndim = arr.ndim
    idx = lambda i, _n=ndim: (0,) * _n
    if single_buffer:
        return pl.BlockSpec(arr.shape, idx, pipeline_mode=pl.Buffered(1))
    return pl.BlockSpec(arr.shape, idx)


def _choose_tile(batch, batch_tile):
    n_tiles = _cdiv(batch, batch_tile)
    # v7x megacore: ensure >= 2 "parallel" grid steps so both TensorCores get
    # work, unless splitting would create an all-padding tile (batch <= 8).
    if n_tiles == 1 and batch > 8:
        n_tiles = 2
    tm = _round_up(_cdiv(batch, n_tiles), 8)
    return tm, n_tiles


def enhanced_pattern_learner_forward(
    x, kparams, output_size, *, batch_tile=512, vmem_limit_bytes=32 << 20
):
    """kparams: prepared params (see prepare_params). x: (B, in) or (in,)."""
    if x.ndim == 1:
        x = x[None, :]
    B, in_size = x.shape
    hidden = kparams["w1b"].shape[0]
    out_pad = kparams["bp3"].shape[-1]       # lane-dense (multiple of 128)

    tm, n_tiles = _choose_tile(B, batch_tile)
    padded_b = tm * n_tiles
    if padded_b != B:
        x = jnp.pad(x, ((0, padded_b - B), (0, 0)))

    # VMEM budget check (intended single-buffered weights):
    #   weights x1, x/out tiles double-buffered, activations + bf16 temporaries
    #   with a 50% margin for compiler scratch.
    weight_bytes = sum(
        kparams[k].size * kparams[k].dtype.itemsize for k in _KPARAM_ORDER
    )
    stream_bytes = 2 * tm * (in_size + out_pad) * 4
    act_bytes = int(1.5 * 36 * tm * hidden)
    assert weight_bytes + stream_bytes + act_bytes < vmem_limit_bytes, (
        "weights/activations too large for resident-weight kernel; "
        "reduce batch_tile or K/N-tile the matmuls"
    )

    args = [x] + [kparams[k] for k in _KPARAM_ORDER]

    def run(single_buffer):
        in_specs = [pl.BlockSpec((tm, in_size), lambda i: (i, 0))]
        in_specs += [_const_spec(kparams[k], single_buffer) for k in _KPARAM_ORDER]
        return pl.pallas_call(
            _fused_kernel,
            out_shape=jax.ShapeDtypeStruct((padded_b, out_pad), jnp.float32),
            grid=(n_tiles,),
            in_specs=in_specs,
            out_specs=pl.BlockSpec((tm, out_pad), lambda i: (i, 0)),
            compiler_params=pltpu.CompilerParams(
                dimension_semantics=("parallel",),   # v7x: 2 TCs split batch
                vmem_limit_bytes=vmem_limit_bytes,
            ),
        )(*args)

    try:
        out = run(single_buffer=True)
    except Exception:
        # Fallback if this JAX build rejects pipeline_mode=pl.Buffered(1).
        out = run(single_buffer=False)

    out = out[:B, :output_size]
    if out.shape[0] == 1:
        # mirrors: if output.shape[0] == 1: output = output.squeeze(0)
        out = out[0]
    return out


# --------------------------------------------------------------------------
# Parameters
# --------------------------------------------------------------------------
def init_params(key, input_size, output_size):
    """Module-level params (bf16 weights, f32 biases, bf16 LN gamma/beta)."""
    hidden = max(512, input_size * 2)
    half = hidden // 2
    ks = iter(jax.random.split(key, 10))

    def lin(k, fan_in, fan_out):
        kw, kb = jax.random.split(k)
        w = (jax.random.normal(kw, (fan_in, fan_out), jnp.float32) * 0.02)
        b = jax.random.normal(kb, (1, fan_out), jnp.float32) * 0.01
        return w.astype(jnp.bfloat16), b

    def ln(fan):
        # PyTorch default LayerNorm init: gamma=1, beta=0 (exact in bf16).
        return jnp.ones((1, fan), jnp.bfloat16), jnp.zeros((1, fan), jnp.bfloat16)

    p = {}
    p["w_in"], p["b_in"] = lin(next(ks), input_size, hidden)

    p["w1a"], p["b1a"] = lin(next(ks), hidden, hidden)
    p["g1a"], p["be1a"] = ln(hidden)
    p["w1b"], p["b1b"] = lin(next(ks), hidden, hidden)
    p["g1b"], p["be1b"] = ln(hidden)

    p["w2a"], p["b2a"] = lin(next(ks), hidden, hidden)
    p["g2a"], p["be2a"] = ln(hidden)
    p["w2b"], p["b2b"] = lin(next(ks), hidden, hidden)
    p["g2b"], p["be2b"] = ln(hidden)

    wp1, p["bp1"] = lin(next(ks), 2 * hidden, hidden)
    p["wp1a"], p["wp1b"] = wp1[:hidden], wp1[hidden:]
    p["gp1"], p["bep1"] = ln(hidden)

    p["wp2"], p["bp2"] = lin(next(ks), hidden, half)
    p["gp2"], p["bep2"] = ln(half)

    p["wp3"], p["bp3"] = lin(next(ks), half, output_size)
    return p


def prepare_params(params, output_size):
    """Kernel-ready params: fold input_layer into path first-linears and pad
    the output projection to a lane-dense (multiple of 128) width."""
    f32, bf16 = jnp.float32, jnp.bfloat16
    kp = {k: v for k, v in params.items() if k not in ("w_in", "b_in")}

    w_in = params["w_in"].astype(f32)
    b_in = params["b_in"]
    # x @ W_in @ W_a + (b_in @ W_a + b_a) == (x @ W_in + b_in) @ W_a + b_a
    for wkey, bkey in (("w1a", "b1a"), ("w2a", "b2a")):
        w = params[wkey].astype(f32)
        kp[wkey] = jnp.dot(w_in, w).astype(bf16)
        kp[bkey] = jnp.dot(b_in, w) + params[bkey]

    out_pad = _round_up(max(output_size, 1), 128)
    pad = out_pad - output_size
    if pad:
        kp["wp3"] = jnp.pad(params["wp3"], ((0, 0), (0, pad)))
        kp["bp3"] = jnp.pad(params["bp3"], ((0, 0), (0, pad)))
    return kp


# --------------------------------------------------------------------------
# Pure-JAX reference (mirrors the kernel's folded / bf16 math exactly)
# --------------------------------------------------------------------------
def reference_forward(x, kparams, output_size):
    bf16, f32 = jnp.bfloat16, jnp.float32

    def mm(h, w):
        return jnp.dot(h.astype(bf16), w.astype(bf16), preferred_element_type=f32)

    def relu_ln(h, g, b):
        h = jnp.maximum(h, 0.0)
        mu = jnp.mean(h, axis=-1, keepdims=True)
        var = jnp.maximum(jnp.mean(h * h, axis=-1, keepdims=True) - mu * mu, 0.0)
        inv = jax.lax.rsqrt(var + LN_EPS)
        return (h - mu).astype(bf16) * inv.astype(bf16) * g.astype(bf16) + b.astype(bf16)

    if x.ndim == 1:
        x = x[None, :]
    p1 = relu_ln(mm(x, kparams["w1a"]) + kparams["b1a"], kparams["g1a"], kparams["be1a"])
    p1 = relu_ln(mm(p1, kparams["w1b"]) + kparams["b1b"], kparams["g1b"], kparams["be1b"])
    p2 = relu_ln(mm(x, kparams["w2a"]) + kparams["b2a"], kparams["g2a"], kparams["be2a"])
    p2 = relu_ln(mm(p2, kparams["w2b"]) + kparams["b2b"], kparams["g2b"], kparams["be2b"])
    c = mm(p1, kparams["wp1a"]) + mm(p2, kparams["wp1b"]) + kparams["bp1"]
    c = relu_ln(c, kparams["gp1"], kparams["bep1"])
    c = relu_ln(mm(c, kparams["wp2"]) + kparams["bp2"], kparams["gp2"], kparams["bep2"])
    out = (mm(c, kparams["wp3"]) + kparams["bp3"])[:, :output_size]
    if out.shape[0] == 1:
        out = out[0]
    return out


if __name__ == "__main__":
    input_size = 16
    output_size = 16
    batch = 2

    key = jax.random.PRNGKey(0)
    kx, kp = jax.random.split(key)
    x = jax.random.normal(kx, (batch, input_size), jnp.float32)

    params = init_params(kp, input_size, output_size)
    kparams = prepare_params(params, output_size)

    out = enhanced_pattern_learner_forward(x, kparams, output_size)
    out = jax.block_until_ready(out)

    ref = reference_forward(x, kparams, output_size)
    assert out.shape == (batch, output_size), out.shape
    max_err = float(jnp.max(jnp.abs(out - ref)))
    assert jnp.allclose(out, ref, atol=1e-2, rtol=1e-2), max_err
    print("KERNEL_OK")
</pallas_src>

<mosaic_0001>
module attributes {stable_mosaic.version = 11 : i64} {
  func.func @_fused_kernel(%arg0: i32, %arg1: memref<8x16xf32, #tpu.memory_space<vmem>>, %arg2: memref<16x512xbf16, #tpu.memory_space<vmem>>, %arg3: memref<1x512xf32, #tpu.memory_space<vmem>>, %arg4: memref<1x512xbf16, #tpu.memory_space<vmem>>, %arg5: memref<1x512xbf16, #tpu.memory_space<vmem>>, %arg6: memref<512x512xbf16, #tpu.memory_space<vmem>>, %arg7: memref<1x512xf32, #tpu.memory_space<vmem>>, %arg8: memref<1x512xbf16, #tpu.memory_space<vmem>>, %arg9: memref<1x512xbf16, #tpu.memory_space<vmem>>, %arg10: memref<16x512xbf16, #tpu.memory_space<vmem>>, %arg11: memref<1x512xf32, #tpu.memory_space<vmem>>, %arg12: memref<1x512xbf16, #tpu.memory_space<vmem>>, %arg13: memref<1x512xbf16, #tpu.memory_space<vmem>>, %arg14: memref<512x512xbf16, #tpu.memory_space<vmem>>, %arg15: memref<1x512xf32, #tpu.memory_space<vmem>>, %arg16: memref<1x512xbf16, #tpu.memory_space<vmem>>, %arg17: memref<1x512xbf16, #tpu.memory_space<vmem>>, %arg18: memref<512x512xbf16, #tpu.memory_space<vmem>>, %arg19: memref<512x512xbf16, #tpu.memory_space<vmem>>, %arg20: memref<1x512xf32, #tpu.memory_space<vmem>>, %arg21: memref<1x512xbf16, #tpu.memory_space<vmem>>, %arg22: memref<1x512xbf16, #tpu.memory_space<vmem>>, %arg23: memref<512x256xbf16, #tpu.memory_space<vmem>>, %arg24: memref<1x256xf32, #tpu.memory_space<vmem>>, %arg25: memref<1x256xbf16, #tpu.memory_space<vmem>>, %arg26: memref<1x256xbf16, #tpu.memory_space<vmem>>, %arg27: memref<256x128xbf16, #tpu.memory_space<vmem>>, %arg28: memref<1x128xf32, #tpu.memory_space<vmem>>, %arg29: memref<8x128xf32, #tpu.memory_space<vmem>>) attributes {dimension_semantics = [#tpu.dimension_semantics<parallel>], iteration_bounds = array<i64: 1>, scalar_prefetch = 0 : i64, scratch_operands = 0 : i64, tpu.core_type = #tpu.core_type<tc>, window_params = [{transform_indices = @transform_0, window_bounds = array<i64: 8, 16>}, {pipeline_mode = #tpu.pipeline_mode<synchronous>, transform_indices = @transform_1, window_bounds = array<i64: 16, 512>}, {pipeline_mode = #tpu.pipeline_mode<synchronous>, transform_indices = @transform_2, window_bounds = array<i64: 1, 512>}, {pipeline_mode = #tpu.pipeline_mode<synchronous>, transform_indices = @transform_3, window_bounds = array<i64: 1, 512>}, {pipeline_mode = #tpu.pipeline_mode<synchronous>, transform_indices = @transform_4, window_bounds = array<i64: 1, 512>}, {pipeline_mode = #tpu.pipeline_mode<synchronous>, transform_indices = @transform_5, window_bounds = array<i64: 512, 512>}, {pipeline_mode = #tpu.pipeline_mode<synchronous>, transform_indices = @transform_6, window_bounds = array<i64: 1, 512>}, {pipeline_mode = #tpu.pipeline_mode<synchronous>, transform_indices = @transform_7, window_bounds = array<i64: 1, 512>}, {pipeline_mode = #tpu.pipeline_mode<synchronous>, transform_indices = @transform_8, window_bounds = array<i64: 1, 512>}, {pipeline_mode = #tpu.pipeline_mode<synchronous>, transform_indices = @transform_9, window_bounds = array<i64: 16, 512>}, {pipeline_mode = #tpu.pipeline_mode<synchronous>, transform_indices = @transform_10, window_bounds = array<i64: 1, 512>}, {pipeline_mode = #tpu.pipeline_mode<synchronous>, transform_indices = @transform_11, window_bounds = array<i64: 1, 512>}, {pipeline_mode = #tpu.pipeline_mode<synchronous>, transform_indices = @transform_12, window_bounds = array<i64: 1, 512>}, {pipeline_mode = #tpu.pipeline_mode<synchronous>, transform_indices = @transform_13, window_bounds = array<i64: 512, 512>}, {pipeline_mode = #tpu.pipeline_mode<synchronous>, transform_indices = @transform_14, window_bounds = array<i64: 1, 512>}, {pipeline_mode = #tpu.pipeline_mode<synchronous>, transform_indices = @transform_15, window_bounds = array<i64: 1, 512>}, {pipeline_mode = #tpu.pipeline_mode<synchronous>, transform_indices = @transform_16, window_bounds = array<i64: 1, 512>}, {pipeline_mode = #tpu.pipeline_mode<synchronous>, transform_indices = @transform_17, window_bounds = array<i64: 512, 512>}, {pipeline_mode = #tpu.pipeline_mode<synchronous>, transform_indices = @transform_18, window_bounds = array<i64: 512, 512>}, {pipeline_mode = #tpu.pipeline_mode<synchronous>, transform_indices = @transform_19, window_bounds = array<i64: 1, 512>}, {pipeline_mode = #tpu.pipeline_mode<synchronous>, transform_indices = @transform_20, window_bounds = array<i64: 1, 512>}, {pipeline_mode = #tpu.pipeline_mode<synchronous>, transform_indices = @transform_21, window_bounds = array<i64: 1, 512>}, {pipeline_mode = #tpu.pipeline_mode<synchronous>, transform_indices = @transform_22, window_bounds = array<i64: 512, 256>}, {pipeline_mode = #tpu.pipeline_mode<synchronous>, transform_indices = @transform_23, window_bounds = array<i64: 1, 256>}, {pipeline_mode = #tpu.pipeline_mode<synchronous>, transform_indices = @transform_24, window_bounds = array<i64: 1, 256>}, {pipeline_mode = #tpu.pipeline_mode<synchronous>, transform_indices = @transform_25, window_bounds = array<i64: 1, 256>}, {pipeline_mode = #tpu.pipeline_mode<synchronous>, transform_indices = @transform_26, window_bounds = array<i64: 256, 128>}, {pipeline_mode = #tpu.pipeline_mode<synchronous>, transform_indices = @transform_27, window_bounds = array<i64: 1, 128>}, {transform_indices = @transform_28, window_bounds = array<i64: 8, 128>}]} {
    %c0 = arith.constant 0 : index
    %c0_0 = arith.constant 0 : index
    %0 = vector.load %arg1[%c0, %c0_0] : memref<8x16xf32, #tpu.memory_space<vmem>>, vector<8x16xf32>
    %1 = arith.truncf %0 : vector<8x16xf32> to vector<8x16xbf16>
    %c0_1 = arith.constant 0 : index
    %c0_2 = arith.constant 0 : index
    %2 = vector.load %arg2[%c0_1, %c0_2] : memref<16x512xbf16, #tpu.memory_space<vmem>>, vector<16x512xbf16>
    %cst = arith.constant dense<0.000000e+00> : vector<8x512xf32>
    %3 = tpu.matmul %1, %2, %cst {dimension_numbers = #tpu.dot_dimension_numbers<[1], [0], [0], [1], [0, 0, 1, 1], [], []>} : vector<8x16xbf16>, vector<16x512xbf16>, vector<8x512xf32> -> vector<8x512xf32>
    %c0_3 = arith.constant 0 : index
    %c0_4 = arith.constant 0 : index
    %4 = vector.load %arg3[%c0_3, %c0_4] : memref<1x512xf32, #tpu.memory_space<vmem>>, vector<1x512xf32>
    %5 = vector.broadcast %4 : vector<1x512xf32> to vector<8x512xf32>
    %6 = arith.addf %3, %5 : vector<8x512xf32>
    %cst_5 = arith.constant 0.000000e+00 : f32
    %7 = vector.broadcast %cst_5 : f32 to vector<8x512xf32>
    %8 = arith.maximumf %6, %7 : vector<8x512xf32>
    %cst_6 = arith.constant dense<0.000000e+00> : vector<8xf32>
    %9 = vector.multi_reduction <add>, %8, %cst_6 [1] : vector<8x512xf32> to vector<8xf32>
    %10 = vector.shape_cast %9 : vector<8xf32> to vector<8x1xf32>
    %cst_7 = arith.constant 5.120000e+02 : f32
    %11 = vector.broadcast %cst_7 : f32 to vector<8x1xf32>
    %12 = arith.divf %10, %11 : vector<8x1xf32>
    %13 = arith.mulf %8, %8 : vector<8x512xf32>
    %cst_8 = arith.constant dense<0.000000e+00> : vector<8xf32>
    %14 = vector.multi_reduction <add>, %13, %cst_8 [1] : vector<8x512xf32> to vector<8xf32>
    %15 = vector.shape_cast %14 : vector<8xf32> to vector<8x1xf32>
    %cst_9 = arith.constant 5.120000e+02 : f32
    %16 = vector.broadcast %cst_9 : f32 to vector<8x1xf32>
    %17 = arith.divf %15, %16 : vector<8x1xf32>
    %18 = arith.mulf %12, %12 : vector<8x1xf32>
    %19 = arith.subf %17, %18 : vector<8x1xf32>
    %cst_10 = arith.constant 0.000000e+00 : f32
    %20 = vector.broadcast %cst_10 : f32 to vector<8x1xf32>
    %21 = arith.maximumf %19, %20 : vector<8x1xf32>
    %cst_11 = arith.constant 9.99999974E-6 : f32
    %22 = vector.broadcast %cst_11 : f32 to vector<8x1xf32>
    %23 = arith.addf %21, %22 : vector<8x1xf32>
    %24 = math.rsqrt %23 : vector<8x1xf32>
    %25 = vector.broadcast %12 : vector<8x1xf32> to vector<8x512xf32>
    %26 = arith.subf %8, %25 : vector<8x512xf32>
    %27 = arith.truncf %26 : vector<8x512xf32> to vector<8x512xbf16>
    %28 = arith.truncf %24 : vector<8x1xf32> to vector<8x1xbf16>
    %29 = vector.broadcast %28 : vector<8x1xbf16> to vector<8x512xbf16>
    %30 = arith.mulf %27, %29 : vector<8x512xbf16>
    %c0_12 = arith.constant 0 : index
    %c0_13 = arith.constant 0 : index
    %31 = vector.load %arg4[%c0_12, %c0_13] : memref<1x512xbf16, #tpu.memory_space<vmem>>, vector<1x512xbf16>
    %32 = vector.broadcast %31 : vector<1x512xbf16> to vector<8x512xbf16>
    %33 = arith.mulf %30, %32 : vector<8x512xbf16>
    %c0_14 = arith.constant 0 : index
    %c0_15 = arith.constant 0 : index
    %34 = vector.load %arg5[%c0_14, %c0_15] : memref<1x512xbf16, #tpu.memory_space<vmem>>, vector<1x512xbf16>
    %35 = vector.broadcast %34 : vector<1x512xbf16> to vector<8x512xbf16>
    %36 = arith.addf %33, %35 : vector<8x512xbf16>
    %c0_16 = arith.constant 0 : index
    %c0_17 = arith.constant 0 : index
    %37 = vector.load %arg6[%c0_16, %c0_17] : memref<512x512xbf16, #tpu.memory_space<vmem>>, vector<512x512xbf16>
    %cst_18 = arith.constant dense<0.000000e+00> : vector<8x512xf32>
    %38 = tpu.matmul %36, %37, %cst_18 {dimension_numbers = #tpu.dot_dimension_numbers<[1], [0], [0], [1], [0, 0, 1, 1], [], []>} : vector<8x512xbf16>, vector<512x512xbf16>, vector<8x512xf32> -> vector<8x512xf32>
    %c0_19 = arith.constant 0 : index
    %c0_20 = arith.constant 0 : index
    %39 = vector.load %arg7[%c0_19, %c0_20] : memref<1x512xf32, #tpu.memory_space<vmem>>, vector<1x512xf32>
    %40 = vector.broadcast %39 : vector<1x512xf32> to vector<8x512xf32>
    %41 = arith.addf %38, %40 : vector<8x512xf32>
    %cst_21 = arith.constant 0.000000e+00 : f32
    %42 = vector.broadcast %cst_21 : f32 to vector<8x512xf32>
    %43 = arith.maximumf %41, %42 : vector<8x512xf32>
    %cst_22 = arith.constant dense<0.000000e+00> : vector<8xf32>
    %44 = vector.multi_reduction <add>, %43, %cst_22 [1] : vector<8x512xf32> to vector<8xf32>
    %45 = vector.shape_cast %44 : vector<8xf32> to vector<8x1xf32>
    %cst_23 = arith.constant 5.120000e+02 : f32
    %46 = vector.broadcast %cst_23 : f32 to vector<8x1xf32>
    %47 = arith.divf %45, %46 : vector<8x1xf32>
    %48 = arith.mulf %43, %43 : vector<8x512xf32>
    %cst_24 = arith.constant dense<0.000000e+00> : vector<8xf32>
    %49 = vector.multi_reduction <add>, %48, %cst_24 [1] : vector<8x512xf32> to vector<8xf32>
    %50 = vector.shape_cast %49 : vector<8xf32> to vector<8x1xf32>
    %cst_25 = arith.constant 5.120000e+02 : f32
    %51 = vector.broadcast %cst_25 : f32 to vector<8x1xf32>
    %52 = arith.divf %50, %51 : vector<8x1xf32>
    %53 = arith.mulf %47, %47 : vector<8x1xf32>
    %54 = arith.subf %52, %53 : vector<8x1xf32>
    %cst_26 = arith.constant 0.000000e+00 : f32
    %55 = vector.broadcast %cst_26 : f32 to vector<8x1xf32>
    %56 = arith.maximumf %54, %55 : vector<8x1xf32>
    %cst_27 = arith.constant 9.99999974E-6 : f32
    %57 = vector.broadcast %cst_27 : f32 to vector<8x1xf32>
    %58 = arith.addf %56, %57 : vector<8x1xf32>
    %59 = math.rsqrt %58 : vector<8x1xf32>
    %60 = vector.broadcast %47 : vector<8x1xf32> to vector<8x512xf32>
    %61 = arith.subf %43, %60 : vector<8x512xf32>
    %62 = arith.truncf %61 : vector<8x512xf32> to vector<8x512xbf16>
    %63 = arith.truncf %59 : vector<8x1xf32> to vector<8x1xbf16>
    %64 = vector.broadcast %63 : vector<8x1xbf16> to vector<8x512xbf16>
    %65 = arith.mulf %62, %64 : vector<8x512xbf16>
    %c0_28 = arith.constant 0 : index
    %c0_29 = arith.constant 0 : index
    %66 = vector.load %arg8[%c0_28, %c0_29] : memref<1x512xbf16, #tpu.memory_space<vmem>>, vector<1x512xbf16>
    %67 = vector.broadcast %66 : vector<1x512xbf16> to vector<8x512xbf16>
    %68 = arith.mulf %65, %67 : vector<8x512xbf16>
    %c0_30 = arith.constant 0 : index
    %c0_31 = arith.constant 0 : index
    %69 = vector.load %arg9[%c0_30, %c0_31] : memref<1x512xbf16, #tpu.memory_space<vmem>>, vector<1x512xbf16>
    %70 = vector.broadcast %69 : vector<1x512xbf16> to vector<8x512xbf16>
    %71 = arith.addf %68, %70 : vector<8x512xbf16>
    %c0_32 = arith.constant 0 : index
    %c0_33 = arith.constant 0 : index
    %72 = vector.load %arg10[%c0_32, %c0_33] : memref<16x512xbf16, #tpu.memory_space<vmem>>, vector<16x512xbf16>
    %cst_34 = arith.constant dense<0.000000e+00> : vector<8x512xf32>
    %73 = tpu.matmul %1, %72, %cst_34 {dimension_numbers = #tpu.dot_dimension_numbers<[1], [0], [0], [1], [0, 0, 1, 1], [], []>} : vector<8x16xbf16>, vector<16x512xbf16>, vector<8x512xf32> -> vector<8x512xf32>
    %c0_35 = arith.constant 0 : index
    %c0_36 = arith.constant 0 : index
    %74 = vector.load %arg11[%c0_35, %c0_36] : memref<1x512xf32, #tpu.memory_space<vmem>>, vector<1x512xf32>
    %75 = vector.broadcast %74 : vector<1x512xf32> to vector<8x512xf32>
    %76 = arith.addf %73, %75 : vector<8x512xf32>
    %cst_37 = arith.constant 0.000000e+00 : f32
    %77 = vector.broadcast %cst_37 : f32 to vector<8x512xf32>
    %78 = arith.maximumf %76, %77 : vector<8x512xf32>
    %cst_38 = arith.constant dense<0.000000e+00> : vector<8xf32>
    %79 = vector.multi_reduction <add>, %78, %cst_38 [1] : vector<8x512xf32> to vector<8xf32>
    %80 = vector.shape_cast %79 : vector<8xf32> to vector<8x1xf32>
    %cst_39 = arith.constant 5.120000e+02 : f32
    %81 = vector.broadcast %cst_39 : f32 to vector<8x1xf32>
    %82 = arith.divf %80, %81 : vector<8x1xf32>
    %83 = arith.mulf %78, %78 : vector<8x512xf32>
    %cst_40 = arith.constant dense<0.000000e+00> : vector<8xf32>
    %84 = vector.multi_reduction <add>, %83, %cst_40 [1] : vector<8x512xf32> to vector<8xf32>
    %85 = vector.shape_cast %84 : vector<8xf32> to vector<8x1xf32>
    %cst_41 = arith.constant 5.120000e+02 : f32
    %86 = vector.broadcast %cst_41 : f32 to vector<8x1xf32>
    %87 = arith.divf %85, %86 : vector<8x1xf32>
    %88 = arith.mulf %82, %82 : vector<8x1xf32>
    %89 = arith.subf %87, %88 : vector<8x1xf32>
    %cst_42 = arith.constant 0.000000e+00 : f32
    %90 = vector.broadcast %cst_42 : f32 to vector<8x1xf32>
    %91 = arith.maximumf %89, %90 : vector<8x1xf32>
    %cst_43 = arith.constant 9.99999974E-6 : f32
    %92 = vector.broadcast %cst_43 : f32 to vector<8x1xf32>
    %93 = arith.addf %91, %92 : vector<8x1xf32>
    %94 = math.rsqrt %93 : vector<8x1xf32>
    %95 = vector.broadcast %82 : vector<8x1xf32> to vector<8x512xf32>
    %96 = arith.subf %78, %95 : vector<8x512xf32>
    %97 = arith.truncf %96 : vector<8x512xf32> to vector<8x512xbf16>
    %98 = arith.truncf %94 : vector<8x1xf32> to vector<8x1xbf16>
    %99 = vector.broadcast %98 : vector<8x1xbf16> to vector<8x512xbf16>
    %100 = arith.mulf %97, %99 : vector<8x512xbf16>
    %c0_44 = arith.constant 0 : index
    %c0_45 = arith.constant 0 : index
    %101 = vector.load %arg12[%c0_44, %c0_45] : memref<1x512xbf16, #tpu.memory_space<vmem>>, vector<1x512xbf16>
    %102 = vector.broadcast %101 : vector<1x512xbf16> to vector<8x512xbf16>
    %103 = arith.mulf %100, %102 : vector<8x512xbf16>
    %c0_46 = arith.constant 0 : index
    %c0_47 = arith.constant 0 : index
    %104 = vector.load %arg13[%c0_46, %c0_47] : memref<1x512xbf16, #tpu.memory_space<vmem>>, vector<1x512xbf16>
    %105 = vector.broadcast %104 : vector<1x512xbf16> to vector<8x512xbf16>
    %106 = arith.addf %103, %105 : vector<8x512xbf16>
    %c0_48 = arith.constant 0 : index
    %c0_49 = arith.constant 0 : index
    %107 = vector.load %arg14[%c0_48, %c0_49] : memref<512x512xbf16, #tpu.memory_space<vmem>>, vector<512x512xbf16>
    %cst_50 = arith.constant dense<0.000000e+00> : vector<8x512xf32>
    %108 = tpu.matmul %106, %107, %cst_50 {dimension_numbers = #tpu.dot_dimension_numbers<[1], [0], [0], [1], [0, 0, 1, 1], [], []>} : vector<8x512xbf16>, vector<512x512xbf16>, vector<8x512xf32> -> vector<8x512xf32>
    %c0_51 = arith.constant 0 : index
    %c0_52 = arith.constant 0 : index
    %109 = vector.load %arg15[%c0_51, %c0_52] : memref<1x512xf32, #tpu.memory_space<vmem>>, vector<1x512xf32>
    %110 = vector.broadcast %109 : vector<1x512xf32> to vector<8x512xf32>
    %111 = arith.addf %108, %110 : vector<8x512xf32>
    %cst_53 = arith.constant 0.000000e+00 : f32
    %112 = vector.broadcast %cst_53 : f32 to vector<8x512xf32>
    %113 = arith.maximumf %111, %112 : vector<8x512xf32>
    %cst_54 = arith.constant dense<0.000000e+00> : vector<8xf32>
    %114 = vector.multi_reduction <add>, %113, %cst_54 [1] : vector<8x512xf32> to vector<8xf32>
    %115 = vector.shape_cast %114 : vector<8xf32> to vector<8x1xf32>
    %cst_55 = arith.constant 5.120000e+02 : f32
    %116 = vector.broadcast %cst_55 : f32 to vector<8x1xf32>
    %117 = arith.divf %115, %116 : vector<8x1xf32>
    %118 = arith.mulf %113, %113 : vector<8x512xf32>
    %cst_56 = arith.constant dense<0.000000e+00> : vector<8xf32>
    %119 = vector.multi_reduction <add>, %118, %cst_56 [1] : vector<8x512xf32> to vector<8xf32>
    %120 = vector.shape_cast %119 : vector<8xf32> to vector<8x1xf32>
    %cst_57 = arith.constant 5.120000e+02 : f32
    %121 = vector.broadcast %cst_57 : f32 to vector<8x1xf32>
    %122 = arith.divf %120, %121 : vector<8x1xf32>
    %123 = arith.mulf %117, %117 : vector<8x1xf32>
    %124 = arith.subf %122, %123 : vector<8x1xf32>
    %cst_58 = arith.constant 0.000000e+00 : f32
    %125 = vector.broadcast %cst_58 : f32 to vector<8x1xf32>
    %126 = arith.maximumf %124, %125 : vector<8x1xf32>
    %cst_59 = arith.constant 9.99999974E-6 : f32
    %127 = vector.broadcast %cst_59 : f32 to vector<8x1xf32>
    %128 = arith.addf %126, %127 : vector<8x1xf32>
    %129 = math.rsqrt %128 : vector<8x1xf32>
    %130 = vector.broadcast %117 : vector<8x1xf32> to vector<8x512xf32>
    %131 = arith.subf %113, %130 : vector<8x512xf32>
    %132 = arith.truncf %131 : vector<8x512xf32> to vector<8x512xbf16>
    %133 = arith.truncf %129 : vector<8x1xf32> to vector<8x1xbf16>
    %134 = vector.broadcast %133 : vector<8x1xbf16> to vector<8x512xbf16>
    %135 = arith.mulf %132, %134 : vector<8x512xbf16>
    %c0_60 = arith.constant 0 : index
    %c0_61 = arith.constant 0 : index
    %136 = vector.load %arg16[%c0_60, %c0_61] : memref<1x512xbf16, #tpu.memory_space<vmem>>, vector<1x512xbf16>
    %137 = vector.broadcast %136 : vector<1x512xbf16> to vector<8x512xbf16>
    %138 = arith.mulf %135, %137 : vector<8x512xbf16>
    %c0_62 = arith.constant 0 : index
    %c0_63 = arith.constant 0 : index
    %139 = vector.load %arg17[%c0_62, %c0_63] : memref<1x512xbf16, #tpu.memory_space<vmem>>, vector<1x512xbf16>
    %140 = vector.broadcast %139 : vector<1x512xbf16> to vector<8x512xbf16>
    %141 = arith.addf %138, %140 : vector<8x512xbf16>
    %c0_64 = arith.constant 0 : index
    %c0_65 = arith.constant 0 : index
    %142 = vector.load %arg18[%c0_64, %c0_65] : memref<512x512xbf16, #tpu.memory_space<vmem>>, vector<512x512xbf16>
    %cst_66 = arith.constant dense<0.000000e+00> : vector<8x512xf32>
    %143 = tpu.matmul %71, %142, %cst_66 {dimension_numbers = #tpu.dot_dimension_numbers<[1], [0], [0], [1], [0, 0, 1, 1], [], []>} : vector<8x512xbf16>, vector<512x512xbf16>, vector<8x512xf32> -> vector<8x512xf32>
    %c0_67 = arith.constant 0 : index
    %c0_68 = arith.constant 0 : index
    %144 = vector.load %arg19[%c0_67, %c0_68] : memref<512x512xbf16, #tpu.memory_space<vmem>>, vector<512x512xbf16>
    %cst_69 = arith.constant dense<0.000000e+00> : vector<8x512xf32>
    %145 = tpu.matmul %141, %144, %cst_69 {dimension_numbers = #tpu.dot_dimension_numbers<[1], [0], [0], [1], [0, 0, 1, 1], [], []>} : vector<8x512xbf16>, vector<512x512xbf16>, vector<8x512xf32> -> vector<8x512xf32>
    %146 = arith.addf %143, %145 : vector<8x512xf32>
    %c0_70 = arith.constant 0 : index
    %c0_71 = arith.constant 0 : index
    %147 = vector.load %arg20[%c0_70, %c0_71] : memref<1x512xf32, #tpu.memory_space<vmem>>, vector<1x512xf32>
    %148 = vector.broadcast %147 : vector<1x512xf32> to vector<8x512xf32>
    %149 = arith.addf %146, %148 : vector<8x512xf32>
    %cst_72 = arith.constant 0.000000e+00 : f32
    %150 = vector.broadcast %cst_72 : f32 to vector<8x512xf32>
    %151 = arith.maximumf %149, %150 : vector<8x512xf32>
    %cst_73 = arith.constant dense<0.000000e+00> : vector<8xf32>
    %152 = vector.multi_reduction <add>, %151, %cst_73 [1] : vector<8x512xf32> to vector<8xf32>
    %153 = vector.shape_cast %152 : vector<8xf32> to vector<8x1xf32>
    %cst_74 = arith.constant 5.120000e+02 : f32
    %154 = vector.broadcast %cst_74 : f32 to vector<8x1xf32>
    %155 = arith.divf %153, %154 : vector<8x1xf32>
    %156 = arith.mulf %151, %151 : vector<8x512xf32>
    %cst_75 = arith.constant dense<0.000000e+00> : vector<8xf32>
    %157 = vector.multi_reduction <add>, %156, %cst_75 [1] : vector<8x512xf32> to vector<8xf32>
    %158 = vector.shape_cast %157 : vector<8xf32> to vector<8x1xf32>
    %cst_76 = arith.constant 5.120000e+02 : f32
    %159 = vector.broadcast %cst_76 : f32 to vector<8x1xf32>
    %160 = arith.divf %158, %159 : vector<8x1xf32>
    %161 = arith.mulf %155, %155 : vector<8x1xf32>
    %162 = arith.subf %160, %161 : vector<8x1xf32>
    %cst_77 = arith.constant 0.000000e+00 : f32
    %163 = vector.broadcast %cst_77 : f32 to vector<8x1xf32>
    %164 = arith.maximumf %162, %163 : vector<8x1xf32>
    %cst_78 = arith.constant 9.99999974E-6 : f32
    %165 = vector.broadcast %cst_78 : f32 to vector<8x1xf32>
    %166 = arith.addf %164, %165 : vector<8x1xf32>
    %167 = math.rsqrt %166 : vector<8x1xf32>
    %168 = vector.broadcast %155 : vector<8x1xf32> to vector<8x512xf32>
    %169 = arith.subf %151, %168 : vector<8x512xf32>
    %170 = arith.truncf %169 : vector<8x512xf32> to vector<8x512xbf16>
    %171 = arith.truncf %167 : vector<8x1xf32> to vector<8x1xbf16>
    %172 = vector.broadcast %171 : vector<8x1xbf16> to vector<8x512xbf16>
    %173 = arith.mulf %170, %172 : vector<8x512xbf16>
    %c0_79 = arith.constant 0 : index
    %c0_80 = arith.constant 0 : index
    %174 = vector.load %arg21[%c0_79, %c0_80] : memref<1x512xbf16, #tpu.memory_space<vmem>>, vector<1x512xbf16>
    %175 = vector.broadcast %174 : vector<1x512xbf16> to vector<8x512xbf16>
    %176 = arith.mulf %173, %175 : vector<8x512xbf16>
    %c0_81 = arith.constant 0 : index
    %c0_82 = arith.constant 0 : index
    %177 = vector.load %arg22[%c0_81, %c0_82] : memref<1x512xbf16, #tpu.memory_space<vmem>>, vector<1x512xbf16>
    %178 = vector.broadcast %177 : vector<1x512xbf16> to vector<8x512xbf16>
    %179 = arith.addf %176, %178 : vector<8x512xbf16>
    %c0_83 = arith.constant 0 : index
    %c0_84 = arith.constant 0 : index
    %180 = vector.load %arg23[%c0_83, %c0_84] : memref<512x256xbf16, #tpu.memory_space<vmem>>, vector<512x256xbf16>
    %cst_85 = arith.constant dense<0.000000e+00> : vector<8x256xf32>
    %181 = tpu.matmul %179, %180, %cst_85 {dimension_numbers = #tpu.dot_dimension_numbers<[1], [0], [0], [1], [0, 0, 1, 1], [], []>} : vector<8x512xbf16>, vector<512x256xbf16>, vector<8x256xf32> -> vector<8x256xf32>
    %c0_86 = arith.constant 0 : index
    %c0_87 = arith.constant 0 : index
    %182 = vector.load %arg24[%c0_86, %c0_87] : memref<1x256xf32, #tpu.memory_space<vmem>>, vector<1x256xf32>
    %183 = vector.broadcast %182 : vector<1x256xf32> to vector<8x256xf32>
    %184 = arith.addf %181, %183 : vector<8x256xf32>
    %cst_88 = arith.constant 0.000000e+00 : f32
    %185 = vector.broadcast %cst_88 : f32 to vector<8x256xf32>
    %186 = arith.maximumf %184, %185 : vector<8x256xf32>
    %cst_89 = arith.constant dense<0.000000e+00> : vector<8xf32>
    %187 = vector.multi_reduction <add>, %186, %cst_89 [1] : vector<8x256xf32> to vector<8xf32>
    %188 = vector.shape_cast %187 : vector<8xf32> to vector<8x1xf32>
    %cst_90 = arith.constant 2.560000e+02 : f32
    %189 = vector.broadcast %cst_90 : f32 to vector<8x1xf32>
    %190 = arith.divf %188, %189 : vector<8x1xf32>
    %191 = arith.mulf %186, %186 : vector<8x256xf32>
    %cst_91 = arith.constant dense<0.000000e+00> : vector<8xf32>
    %192 = vector.multi_reduction <add>, %191, %cst_91 [1] : vector<8x256xf32> to vector<8xf32>
    %193 = vector.shape_cast %192 : vector<8xf32> to vector<8x1xf32>
    %cst_92 = arith.constant 2.560000e+02 : f32
    %194 = vector.broadcast %cst_92 : f32 to vector<8x1xf32>
    %195 = arith.divf %193, %194 : vector<8x1xf32>
    %196 = arith.mulf %190, %190 : vector<8x1xf32>
    %197 = arith.subf %195, %196 : vector<8x1xf32>
    %cst_93 = arith.constant 0.000000e+00 : f32
    %198 = vector.broadcast %cst_93 : f32 to vector<8x1xf32>
    %199 = arith.maximumf %197, %198 : vector<8x1xf32>
    %cst_94 = arith.constant 9.99999974E-6 : f32
    %200 = vector.broadcast %cst_94 : f32 to vector<8x1xf32>
    %201 = arith.addf %199, %200 : vector<8x1xf32>
    %202 = math.rsqrt %201 : vector<8x1xf32>
    %203 = vector.broadcast %190 : vector<8x1xf32> to vector<8x256xf32>
    %204 = arith.subf %186, %203 : vector<8x256xf32>
    %205 = arith.truncf %204 : vector<8x256xf32> to vector<8x256xbf16>
    %206 = arith.truncf %202 : vector<8x1xf32> to vector<8x1xbf16>
    %207 = vector.broadcast %206 : vector<8x1xbf16> to vector<8x256xbf16>
    %208 = arith.mulf %205, %207 : vector<8x256xbf16>
    %c0_95 = arith.constant 0 : index
    %c0_96 = arith.constant 0 : index
    %209 = vector.load %arg25[%c0_95, %c0_96] : memref<1x256xbf16, #tpu.memory_space<vmem>>, vector<1x256xbf16>
    %210 = vector.broadcast %209 : vector<1x256xbf16> to vector<8x256xbf16>
    %211 = arith.mulf %208, %210 : vector<8x256xbf16>
    %c0_97 = arith.constant 0 : index
    %c0_98 = arith.constant 0 : index
    %212 = vector.load %arg26[%c0_97, %c0_98] : memref<1x256xbf16, #tpu.memory_space<vmem>>, vector<1x256xbf16>
    %213 = vector.broadcast %212 : vector<1x256xbf16> to vector<8x256xbf16>
    %214 = arith.addf %211, %213 : vector<8x256xbf16>
    %c0_99 = arith.constant 0 : index
    %c0_100 = arith.constant 0 : index
    %215 = vector.load %arg27[%c0_99, %c0_100] : memref<256x128xbf16, #tpu.memory_space<vmem>>, vector<256x128xbf16>
    %cst_101 = arith.constant dense<0.000000e+00> : vector<8x128xf32>
    %216 = tpu.matmul %214, %215, %cst_101 {dimension_numbers = #tpu.dot_dimension_numbers<[1], [0], [0], [1], [0, 0, 1, 1], [], []>} : vector<8x256xbf16>, vector<256x128xbf16>, vector<8x128xf32> -> vector<8x128xf32>
    %c0_102 = arith.constant 0 : index
    %c0_103 = arith.constant 0 : index
    %217 = vector.load %arg28[%c0_102, %c0_103] : memref<1x128xf32, #tpu.memory_space<vmem>>, vector<1x128xf32>
    %218 = vector.broadcast %217 : vector<1x128xf32> to vector<8x128xf32>
    %219 = arith.addf %216, %218 : vector<8x128xf32>
    %c0_104 = arith.constant 0 : index
    %c0_105 = arith.constant 0 : index
    %220 = vector.load %arg29[%c0_104, %c0_105] : memref<8x128xf32, #tpu.memory_space<vmem>>, vector<8x128xf32>
    tpu.vector_store %arg29[%c0_104, %c0_105], %219 {strides = array<i32>} : memref<8x128xf32, #tpu.memory_space<vmem>>, vector<8x128xf32>,
    return
  }
  func.func @transform_0(%arg0: i32) -> (i32, i32) {
    %c0_i32 = arith.constant 0 : i32
    %c0_i32_0 = arith.constant 0 : i32
    return %arg0, %c0_i32 : i32, i32
  }
  func.func @transform_1(%arg0: i32) -> (i32, i32) {
    %c0_i32 = arith.constant 0 : i32
    %c0_i32_0 = arith.constant 0 : i32
    %c0_i32_1 = arith.constant 0 : i32
    return %c0_i32, %c0_i32_0 : i32, i32
  }
  func.func @transform_2(%arg0: i32) -> (i32, i32) {
    %c0_i32 = arith.constant 0 : i32
    %c0_i32_0 = arith.constant 0 : i32
    %c0_i32_1 = arith.constant 0 : i32
    return %c0_i32, %c0_i32_0 : i32, i32
  }
  func.func @transform_3(%arg0: i32) -> (i32, i32) {
    %c0_i32 = arith.constant 0 : i32
    %c0_i32_0 = arith.constant 0 : i32
    %c0_i32_1 = arith.constant 0 : i32
    return %c0_i32, %c0_i32_0 : i32, i32
  }
  func.func @transform_4(%arg0: i32) -> (i32, i32) {
    %c0_i32 = arith.constant 0 : i32
    %c0_i32_0 = arith.constant 0 : i32
    %c0_i32_1 = arith.constant 0 : i32
    return %c0_i32, %c0_i32_0 : i32, i32
  }
  func.func @transform_5(%arg0: i32) -> (i32, i32) {
    %c0_i32 = arith.constant 0 : i32
    %c0_i32_0 = arith.constant 0 : i32
    %c0_i32_1 = arith.constant 0 : i32
    return %c0_i32, %c0_i32_0 : i32, i32
  }
  func.func @transform_6(%arg0: i32) -> (i32, i32) {
    %c0_i32 = arith.constant 0 : i32
    %c0_i32_0 = arith.constant 0 : i32
    %c0_i32_1 = arith.constant 0 : i32
    return %c0_i32, %c0_i32_0 : i32, i32
  }
  func.func @transform_7(%arg0: i32) -> (i32, i32) {
    %c0_i32 = arith.constant 0 : i32
    %c0_i32_0 = arith.constant 0 : i32
    %c0_i32_1 = arith.constant 0 : i32
    return %c0_i32, %c0_i32_0 : i32, i32
  }
  func.func @transform_8(%arg0: i32) -> (i32, i32) {
    %c0_i32 = arith.constant 0 : i32
    %c0_i32_0 = arith.constant 0 : i32
    %c0_i32_1 = arith.constant 0 : i32
    return %c0_i32, %c0_i32_0 : i32, i32
  }
  func.func @transform_9(%arg0: i32) -> (i32, i32) {
    %c0_i32 = arith.constant 0 : i32
    %c0_i32_0 = arith.constant 0 : i32
    %c0_i32_1 = arith.constant 0 : i32
    return %c0_i32, %c0_i32_0 : i32, i32
  }
  func.func @transform_10(%arg0: i32) -> (i32, i32) {
    %c0_i32 = arith.constant 0 : i32
    %c0_i32_0 = arith.constant 0 : i32
    %c0_i32_1 = arith.constant 0 : i32
    return %c0_i32, %c0_i32_0 : i32, i32
  }
  func.func @transform_11(%arg0: i32) -> (i32, i32) {
    %c0_i32 = arith.constant 0 : i32
    %c0_i32_0 = arith.constant 0 : i32
    %c0_i32_1 = arith.constant 0 : i32
    return %c0_i32, %c0_i32_0 : i32, i32
  }
  func.func @transform_12(%arg0: i32) -> (i32, i32) {
    %c0_i32 = arith.constant 0 : i32
    %c0_i32_0 = arith.constant 0 : i32
    %c0_i32_1 = arith.constant 0 : i32
    return %c0_i32, %c0_i32_0 : i32, i32
  }
  func.func @transform_13(%arg0: i32) -> (i32, i32) {
    %c0_i32 = arith.constant 0 : i32
    %c0_i32_0 = arith.constant 0 : i32
    %c0_i32_1 = arith.constant 0 : i32
    return %c0_i32, %c0_i32_0 : i32, i32
  }
  func.func @transform_14(%arg0: i32) -> (i32, i32) {
    %c0_i32 = arith.constant 0 : i32
    %c0_i32_0 = arith.constant 0 : i32
    %c0_i32_1 = arith.constant 0 : i32
    return %c0_i32, %c0_i32_0 : i32, i32
  }
  func.func @transform_15(%arg0: i32) -> (i32, i32) {
    %c0_i32 = arith.constant 0 : i32
    %c0_i32_0 = arith.constant 0 : i32
    %c0_i32_1 = arith.constant 0 : i32
    return %c0_i32, %c0_i32_0 : i32, i32
  }
  func.func @transform_16(%arg0: i32) -> (i32, i32) {
    %c0_i32 = arith.constant 0 : i32
    %c0_i32_0 = arith.constant 0 : i32
    %c0_i32_1 = arith.constant 0 : i32
    return %c0_i32, %c0_i32_0 : i32, i32
  }
  func.func @transform_17(%arg0: i32) -> (i32, i32) {
    %c0_i32 = arith.constant 0 : i32
    %c0_i32_0 = arith.constant 0 : i32
    %c0_i32_1 = arith.constant 0 : i32
    return %c0_i32, %c0_i32_0 : i32, i32
  }
  func.func @transform_18(%arg0: i32) -> (i32, i32) {
    %c0_i32 = arith.constant 0 : i32
    %c0_i32_0 = arith.constant 0 : i32
    %c0_i32_1 = arith.constant 0 : i32
    return %c0_i32, %c0_i32_0 : i32, i32
  }
  func.func @transform_19(%arg0: i32) -> (i32, i32) {
    %c0_i32 = arith.constant 0 : i32
    %c0_i32_0 = arith.constant 0 : i32
    %c0_i32_1 = arith.constant 0 : i32
    return %c0_i32, %c0_i32_0 : i32, i32
  }
  func.func @transform_20(%arg0: i32) -> (i32, i32) {
    %c0_i32 = arith.constant 0 : i32
    %c0_i32_0 = arith.constant 0 : i32
    %c0_i32_1 = arith.constant 0 : i32
    return %c0_i32, %c0_i32_0 : i32, i32
  }
  func.func @transform_21(%arg0: i32) -> (i32, i32) {
    %c0_i32 = arith.constant 0 : i32
    %c0_i32_0 = arith.constant 0 : i32
    %c0_i32_1 = arith.constant 0 : i32
    return %c0_i32, %c0_i32_0 : i32, i32
  }
  func.func @transform_22(%arg0: i32) -> (i32, i32) {
    %c0_i32 = arith.constant 0 : i32
    %c0_i32_0 = arith.constant 0 : i32
    %c0_i32_1 = arith.constant 0 : i32
    return %c0_i32, %c0_i32_0 : i32, i32
  }
  func.func @transform_23(%arg0: i32) -> (i32, i32) {
    %c0_i32 = arith.constant 0 : i32
    %c0_i32_0 = arith.constant 0 : i32
    %c0_i32_1 = arith.constant 0 : i32
    return %c0_i32, %c0_i32_0 : i32, i32
  }
  func.func @transform_24(%arg0: i32) -> (i32, i32) {
    %c0_i32 = arith.constant 0 : i32
    %c0_i32_0 = arith.constant 0 : i32
    %c0_i32_1 = arith.constant 0 : i32
    return %c0_i32, %c0_i32_0 : i32, i32
  }
  func.func @transform_25(%arg0: i32) -> (i32, i32) {
    %c0_i32 = arith.constant 0 : i32
    %c0_i32_0 = arith.constant 0 : i32
    %c0_i32_1 = arith.constant 0 : i32
    return %c0_i32, %c0_i32_0 : i32, i32
  }
  func.func @transform_26(%arg0: i32) -> (i32, i32) {
    %c0_i32 = arith.constant 0 : i32
    %c0_i32_0 = arith.constant 0 : i32
    %c0_i32_1 = arith.constant 0 : i32
    return %c0_i32, %c0_i32_0 : i32, i32
  }
  func.func @transform_27(%arg0: i32) -> (i32, i32) {
    %c0_i32 = arith.constant 0 : i32
    %c0_i32_0 = arith.constant 0 : i32
    %c0_i32_1 = arith.constant 0 : i32
    return %c0_i32, %c0_i32_0 : i32, i32
  }
  func.func @transform_28(%arg0: i32) -> (i32, i32) {
    %c0_i32 = arith.constant 0 : i32
    %c0_i32_0 = arith.constant 0 : i32
    return %arg0, %c0_i32 : i32, i32
  }
}

module attributes {stable_mosaic.version = 11 : i64} {
  func.func @_fused_kernel(%arg0: i32, %arg1: memref<8x16xf32, #tpu.memory_space<vmem>>, %arg2: memref<16x512xbf16, #tpu.memory_space<vmem>>, %arg3: memref<1x512xf32, #tpu.memory_space<vmem>>, %arg4: memref<1x512xbf16, #tpu.memory_space<vmem>>, %arg5: memref<1x512xbf16, #tpu.memory_space<vmem>>, %arg6: memref<512x512xbf16, #tpu.memory_space<vmem>>, %arg7: memref<1x512xf32, #tpu.memory_space<vmem>>, %arg8: memref<1x512xbf16, #tpu.memory_space<vmem>>, %arg9: memref<1x512xbf16, #tpu.memory_space<vmem>>, %arg10: memref<16x512xbf16, #tpu.memory_space<vmem>>, %arg11: memref<1x512xf32, #tpu.memory_space<vmem>>, %arg12: memref<1x512xbf16, #tpu.memory_space<vmem>>, %arg13: memref<1x512xbf16, #tpu.memory_space<vmem>>, %arg14: memref<512x512xbf16, #tpu.memory_space<vmem>>, %arg15: memref<1x512xf32, #tpu.memory_space<vmem>>, %arg16: memref<1x512xbf16, #tpu.memory_space<vmem>>, %arg17: memref<1x512xbf16, #tpu.memory_space<vmem>>, %arg18: memref<512x512xbf16, #tpu.memory_space<vmem>>, %arg19: memref<512x512xbf16, #tpu.memory_space<vmem>>, %arg20: memref<1x512xf32, #tpu.memory_space<vmem>>, %arg21: memref<1x512xbf16, #tpu.memory_space<vmem>>, %arg22: memref<1x512xbf16, #tpu.memory_space<vmem>>, %arg23: memref<512x256xbf16, #tpu.memory_space<vmem>>, %arg24: memref<1x256xf32, #tpu.memory_space<vmem>>, %arg25: memref<1x256xbf16, #tpu.memory_space<vmem>>, %arg26: memref<1x256xbf16, #tpu.memory_space<vmem>>, %arg27: memref<256x128xbf16, #tpu.memory_space<vmem>>, %arg28: memref<1x128xf32, #tpu.memory_space<vmem>>, %arg29: memref<8x128xf32, #tpu.memory_space<vmem>>) attributes {dimension_semantics = [#tpu.dimension_semantics<parallel>], iteration_bounds = array<i64: 1>, scalar_prefetch = 0 : i64, scratch_operands = 0 : i64, tpu.core_type = #tpu.core_type<tc>, window_params = [{transform_indices = @transform_0, window_bounds = array<i64: 8, 16>}, {pipeline_mode = #tpu.pipeline_mode<synchronous>, transform_indices = @transform_1, window_bounds = array<i64: 16, 512>}, {pipeline_mode = #tpu.pipeline_mode<synchronous>, transform_indices = @transform_2, window_bounds = array<i64: 1, 512>}, {pipeline_mode = #tpu.pipeline_mode<synchronous>, transform_indices = @transform_3, window_bounds = array<i64: 1, 512>}, {pipeline_mode = #tpu.pipeline_mode<synchronous>, transform_indices = @transform_4, window_bounds = array<i64: 1, 512>}, {pipeline_mode = #tpu.pipeline_mode<synchronous>, transform_indices = @transform_5, window_bounds = array<i64: 512, 512>}, {pipeline_mode = #tpu.pipeline_mode<synchronous>, transform_indices = @transform_6, window_bounds = array<i64: 1, 512>}, {pipeline_mode = #tpu.pipeline_mode<synchronous>, transform_indices = @transform_7, window_bounds = array<i64: 1, 512>}, {pipeline_mode = #tpu.pipeline_mode<synchronous>, transform_indices = @transform_8, window_bounds = array<i64: 1, 512>}, {pipeline_mode = #tpu.pipeline_mode<synchronous>, transform_indices = @transform_9, window_bounds = array<i64: 16, 512>}, {pipeline_mode = #tpu.pipeline_mode<synchronous>, transform_indices = @transform_10, window_bounds = array<i64: 1, 512>}, {pipeline_mode = #tpu.pipeline_mode<synchronous>, transform_indices = @transform_11, window_bounds = array<i64: 1, 512>}, {pipeline_mode = #tpu.pipeline_mode<synchronous>, transform_indices = @transform_12, window_bounds = array<i64: 1, 512>}, {pipeline_mode = #tpu.pipeline_mode<synchronous>, transform_indices = @transform_13, window_bounds = array<i64: 512, 512>}, {pipeline_mode = #tpu.pipeline_mode<synchronous>, transform_indices = @transform_14, window_bounds = array<i64: 1, 512>}, {pipeline_mode = #tpu.pipeline_mode<synchronous>, transform_indices = @transform_15, window_bounds = array<i64: 1, 512>}, {pipeline_mode = #tpu.pipeline_mode<synchronous>, transform_indices = @transform_16, window_bounds = array<i64: 1, 512>}, {pipeline_mode = #tpu.pipeline_mode<synchronous>, transform_indices = @transform_17, window_bounds = array<i64: 512, 512>}, {pipeline_mode = #tpu.pipeline_mode<synchronous>, transform_indices = @transform_18, window_bounds = array<i64: 512, 512>}, {pipeline_mode = #tpu.pipeline_mode<synchronous>, transform_indices = @transform_19, window_bounds = array<i64: 1, 512>}, {pipeline_mode = #tpu.pipeline_mode<synchronous>, transform_indices = @transform_20, window_bounds = array<i64: 1, 512>}, {pipeline_mode = #tpu.pipeline_mode<synchronous>, transform_indices = @transform_21, window_bounds = array<i64: 1, 512>}, {pipeline_mode = #tpu.pipeline_mode<synchronous>, transform_indices = @transform_22, window_bounds = array<i64: 512, 256>}, {pipeline_mode = #tpu.pipeline_mode<synchronous>, transform_indices = @transform_23, window_bounds = array<i64: 1, 256>}, {pipeline_mode = #tpu.pipeline_mode<synchronous>, transform_indices = @transform_24, window_bounds = array<i64: 1, 256>}, {pipeline_mode = #tpu.pipeline_mode<synchronous>, transform_indices = @transform_25, window_bounds = array<i64: 1, 256>}, {pipeline_mode = #tpu.pipeline_mode<synchronous>, transform_indices = @transform_26, window_bounds = array<i64: 256, 128>}, {pipeline_mode = #tpu.pipeline_mode<synchronous>, transform_indices = @transform_27, window_bounds = array<i64: 1, 128>}, {transform_indices = @transform_28, window_bounds = array<i64: 8, 128>}]} {
    %c0 = arith.constant 0 : index
    %c0_0 = arith.constant 0 : index
    %0 = vector.load %arg1[%c0, %c0_0] : memref<8x16xf32, #tpu.memory_space<vmem>>, vector<8x16xf32>
    %1 = arith.truncf %0 : vector<8x16xf32> to vector<8x16xbf16>
    %c0_1 = arith.constant 0 : index
    %c0_2 = arith.constant 0 : index
    %2 = vector.load %arg2[%c0_1, %c0_2] : memref<16x512xbf16, #tpu.memory_space<vmem>>, vector<16x512xbf16>
    %cst = arith.constant dense<0.000000e+00> : vector<8x512xf32>
    %3 = tpu.matmul %1, %2, %cst {dimension_numbers = #tpu.dot_dimension_numbers<[1], [0], [0], [1], [0, 0, 1, 1], [], []>} : vector<8x16xbf16>, vector<16x512xbf16>, vector<8x512xf32> -> vector<8x512xf32>
    %c0_3 = arith.constant 0 : index
    %c0_4 = arith.constant 0 : index
    %4 = vector.load %arg3[%c0_3, %c0_4] : memref<1x512xf32, #tpu.memory_space<vmem>>, vector<1x512xf32>
    %5 = vector.broadcast %4 : vector<1x512xf32> to vector<8x512xf32>
    %6 = arith.addf %3, %5 : vector<8x512xf32>
    %cst_5 = arith.constant 0.000000e+00 : f32
    %7 = vector.broadcast %cst_5 : f32 to vector<8x512xf32>
    %8 = arith.maximumf %6, %7 : vector<8x512xf32>
    %cst_6 = arith.constant dense<0.000000e+00> : vector<8xf32>
    %9 = vector.multi_reduction <add>, %8, %cst_6 [1] : vector<8x512xf32> to vector<8xf32>
    %10 = vector.shape_cast %9 : vector<8xf32> to vector<8x1xf32>
    %cst_7 = arith.constant 5.120000e+02 : f32
    %11 = vector.broadcast %cst_7 : f32 to vector<8x1xf32>
    %12 = arith.divf %10, %11 : vector<8x1xf32>
    %13 = arith.mulf %8, %8 : vector<8x512xf32>
    %cst_8 = arith.constant dense<0.000000e+00> : vector<8xf32>
    %14 = vector.multi_reduction <add>, %13, %cst_8 [1] : vector<8x512xf32> to vector<8xf32>
    %15 = vector.shape_cast %14 : vector<8xf32> to vector<8x1xf32>
    %cst_9 = arith.constant 5.120000e+02 : f32
    %16 = vector.broadcast %cst_9 : f32 to vector<8x1xf32>
    %17 = arith.divf %15, %16 : vector<8x1xf32>
    %18 = arith.mulf %12, %12 : vector<8x1xf32>
    %19 = arith.subf %17, %18 : vector<8x1xf32>
    %cst_10 = arith.constant 0.000000e+00 : f32
    %20 = vector.broadcast %cst_10 : f32 to vector<8x1xf32>
    %21 = arith.maximumf %19, %20 : vector<8x1xf32>
    %cst_11 = arith.constant 9.99999974E-6 : f32
    %22 = vector.broadcast %cst_11 : f32 to vector<8x1xf32>
    %23 = arith.addf %21, %22 : vector<8x1xf32>
    %24 = math.rsqrt %23 : vector<8x1xf32>
    %25 = vector.broadcast %12 : vector<8x1xf32> to vector<8x512xf32>
    %26 = arith.subf %8, %25 : vector<8x512xf32>
    %27 = arith.truncf %26 : vector<8x512xf32> to vector<8x512xbf16>
    %28 = arith.truncf %24 : vector<8x1xf32> to vector<8x1xbf16>
    %29 = vector.broadcast %28 : vector<8x1xbf16> to vector<8x512xbf16>
    %30 = arith.mulf %27, %29 : vector<8x512xbf16>
    %c0_12 = arith.constant 0 : index
    %c0_13 = arith.constant 0 : index
    %31 = vector.load %arg4[%c0_12, %c0_13] : memref<1x512xbf16, #tpu.memory_space<vmem>>, vector<1x512xbf16>
    %32 = vector.broadcast %31 : vector<1x512xbf16> to vector<8x512xbf16>
    %33 = arith.mulf %30, %32 : vector<8x512xbf16>
    %c0_14 = arith.constant 0 : index
    %c0_15 = arith.constant 0 : index
    %34 = vector.load %arg5[%c0_14, %c0_15] : memref<1x512xbf16, #tpu.memory_space<vmem>>, vector<1x512xbf16>
    %35 = vector.broadcast %34 : vector<1x512xbf16> to vector<8x512xbf16>
    %36 = arith.addf %33, %35 : vector<8x512xbf16>
    %c0_16 = arith.constant 0 : index
    %c0_17 = arith.constant 0 : index
    %37 = vector.load %arg6[%c0_16, %c0_17] : memref<512x512xbf16, #tpu.memory_space<vmem>>, vector<512x512xbf16>
    %cst_18 = arith.constant dense<0.000000e+00> : vector<8x512xf32>
    %38 = tpu.matmul %36, %37, %cst_18 {dimension_numbers = #tpu.dot_dimension_numbers<[1], [0], [0], [1], [0, 0, 1, 1], [], []>} : vector<8x512xbf16>, vector<512x512xbf16>, vector<8x512xf32> -> vector<8x512xf32>
    %c0_19 = arith.constant 0 : index
    %c0_20 = arith.constant 0 : index
    %39 = vector.load %arg7[%c0_19, %c0_20] : memref<1x512xf32, #tpu.memory_space<vmem>>, vector<1x512xf32>
    %40 = vector.broadcast %39 : vector<1x512xf32> to vector<8x512xf32>
    %41 = arith.addf %38, %40 : vector<8x512xf32>
    %cst_21 = arith.constant 0.000000e+00 : f32
    %42 = vector.broadcast %cst_21 : f32 to vector<8x512xf32>
    %43 = arith.maximumf %41, %42 : vector<8x512xf32>
    %cst_22 = arith.constant dense<0.000000e+00> : vector<8xf32>
    %44 = vector.multi_reduction <add>, %43, %cst_22 [1] : vector<8x512xf32> to vector<8xf32>
    %45 = vector.shape_cast %44 : vector<8xf32> to vector<8x1xf32>
    %cst_23 = arith.constant 5.120000e+02 : f32
    %46 = vector.broadcast %cst_23 : f32 to vector<8x1xf32>
    %47 = arith.divf %45, %46 : vector<8x1xf32>
    %48 = arith.mulf %43, %43 : vector<8x512xf32>
    %cst_24 = arith.constant dense<0.000000e+00> : vector<8xf32>
    %49 = vector.multi_reduction <add>, %48, %cst_24 [1] : vector<8x512xf32> to vector<8xf32>
    %50 = vector.shape_cast %49 : vector<8xf32> to vector<8x1xf32>
    %cst_25 = arith.constant 5.120000e+02 : f32
    %51 = vector.broadcast %cst_25 : f32 to vector<8x1xf32>
    %52 = arith.divf %50, %51 : vector<8x1xf32>
    %53 = arith.mulf %47, %47 : vector<8x1xf32>
    %54 = arith.subf %52, %53 : vector<8x1xf32>
    %cst_26 = arith.constant 0.000000e+00 : f32
    %55 = vector.broadcast %cst_26 : f32 to vector<8x1xf32>
    %56 = arith.maximumf %54, %55 : vector<8x1xf32>
    %cst_27 = arith.constant 9.99999974E-6 : f32
    %57 = vector.broadcast %cst_27 : f32 to vector<8x1xf32>
    %58 = arith.addf %56, %57 : vector<8x1xf32>
    %59 = math.rsqrt %58 : vector<8x1xf32>
    %60 = vector.broadcast %47 : vector<8x1xf32> to vector<8x512xf32>
    %61 = arith.subf %43, %60 : vector<8x512xf32>
    %62 = arith.truncf %61 : vector<8x512xf32> to vector<8x512xbf16>
    %63 = arith.truncf %59 : vector<8x1xf32> to vector<8x1xbf16>
    %64 = vector.broadcast %63 : vector<8x1xbf16> to vector<8x512xbf16>
    %65 = arith.mulf %62, %64 : vector<8x512xbf16>
    %c0_28 = arith.constant 0 : index
    %c0_29 = arith.constant 0 : index
    %66 = vector.load %arg8[%c0_28, %c0_29] : memref<1x512xbf16, #tpu.memory_space<vmem>>, vector<1x512xbf16>
    %67 = vector.broadcast %66 : vector<1x512xbf16> to vector<8x512xbf16>
    %68 = arith.mulf %65, %67 : vector<8x512xbf16>
    %c0_30 = arith.constant 0 : index
    %c0_31 = arith.constant 0 : index
    %69 = vector.load %arg9[%c0_30, %c0_31] : memref<1x512xbf16, #tpu.memory_space<vmem>>, vector<1x512xbf16>
    %70 = vector.broadcast %69 : vector<1x512xbf16> to vector<8x512xbf16>
    %71 = arith.addf %68, %70 : vector<8x512xbf16>
    %c0_32 = arith.constant 0 : index
    %c0_33 = arith.constant 0 : index
    %72 = vector.load %arg10[%c0_32, %c0_33] : memref<16x512xbf16, #tpu.memory_space<vmem>>, vector<16x512xbf16>
    %cst_34 = arith.constant dense<0.000000e+00> : vector<8x512xf32>
    %73 = tpu.matmul %1, %72, %cst_34 {dimension_numbers = #tpu.dot_dimension_numbers<[1], [0], [0], [1], [0, 0, 1, 1], [], []>} : vector<8x16xbf16>, vector<16x512xbf16>, vector<8x512xf32> -> vector<8x512xf32>
    %c0_35 = arith.constant 0 : index
    %c0_36 = arith.constant 0 : index
    %74 = vector.load %arg11[%c0_35, %c0_36] : memref<1x512xf32, #tpu.memory_space<vmem>>, vector<1x512xf32>
    %75 = vector.broadcast %74 : vector<1x512xf32> to vector<8x512xf32>
    %76 = arith.addf %73, %75 : vector<8x512xf32>
    %cst_37 = arith.constant 0.000000e+00 : f32
    %77 = vector.broadcast %cst_37 : f32 to vector<8x512xf32>
    %78 = arith.maximumf %76, %77 : vector<8x512xf32>
    %cst_38 = arith.constant dense<0.000000e+00> : vector<8xf32>
    %79 = vector.multi_reduction <add>, %78, %cst_38 [1] : vector<8x512xf32> to vector<8xf32>
    %80 = vector.shape_cast %79 : vector<8xf32> to vector<8x1xf32>
    %cst_39 = arith.constant 5.120000e+02 : f32
    %81 = vector.broadcast %cst_39 : f32 to vector<8x1xf32>
    %82 = arith.divf %80, %81 : vector<8x1xf32>
    %83 = arith.mulf %78, %78 : vector<8x512xf32>
    %cst_40 = arith.constant dense<0.000000e+00> : vector<8xf32>
    %84 = vector.multi_reduction <add>, %83, %cst_40 [1] : vector<8x512xf32> to vector<8xf32>
    %85 = vector.shape_cast %84 : vector<8xf32> to vector<8x1xf32>
    %cst_41 = arith.constant 5.120000e+02 : f32
    %86 = vector.broadcast %cst_41 : f32 to vector<8x1xf32>
    %87 = arith.divf %85, %86 : vector<8x1xf32>
    %88 = arith.mulf %82, %82 : vector<8x1xf32>
    %89 = arith.subf %87, %88 : vector<8x1xf32>
    %cst_42 = arith.constant 0.000000e+00 : f32
    %90 = vector.broadcast %cst_42 : f32 to vector<8x1xf32>
    %91 = arith.maximumf %89, %90 : vector<8x1xf32>
    %cst_43 = arith.constant 9.99999974E-6 : f32
    %92 = vector.broadcast %cst_43 : f32 to vector<8x1xf32>
    %93 = arith.addf %91, %92 : vector<8x1xf32>
    %94 = math.rsqrt %93 : vector<8x1xf32>
    %95 = vector.broadcast %82 : vector<8x1xf32> to vector<8x512xf32>
    %96 = arith.subf %78, %95 : vector<8x512xf32>
    %97 = arith.truncf %96 : vector<8x512xf32> to vector<8x512xbf16>
    %98 = arith.truncf %94 : vector<8x1xf32> to vector<8x1xbf16>
    %99 = vector.broadcast %98 : vector<8x1xbf16> to vector<8x512xbf16>
    %100 = arith.mulf %97, %99 : vector<8x512xbf16>
    %c0_44 = arith.constant 0 : index
    %c0_45 = arith.constant 0 : index
    %101 = vector.load %arg12[%c0_44, %c0_45] : memref<1x512xbf16, #tpu.memory_space<vmem>>, vector<1x512xbf16>
    %102 = vector.broadcast %101 : vector<1x512xbf16> to vector<8x512xbf16>
    %103 = arith.mulf %100, %102 : vector<8x512xbf16>
    %c0_46 = arith.constant 0 : index
    %c0_47 = arith.constant 0 : index
    %104 = vector.load %arg13[%c0_46, %c0_47] : memref<1x512xbf16, #tpu.memory_space<vmem>>, vector<1x512xbf16>
    %105 = vector.broadcast %104 : vector<1x512xbf16> to vector<8x512xbf16>
    %106 = arith.addf %103, %105 : vector<8x512xbf16>
    %c0_48 = arith.constant 0 : index
    %c0_49 = arith.constant 0 : index
    %107 = vector.load %arg14[%c0_48, %c0_49] : memref<512x512xbf16, #tpu.memory_space<vmem>>, vector<512x512xbf16>
    %cst_50 = arith.constant dense<0.000000e+00> : vector<8x512xf32>
    %108 = tpu.matmul %106, %107, %cst_50 {dimension_numbers = #tpu.dot_dimension_numbers<[1], [0], [0], [1], [0, 0, 1, 1], [], []>} : vector<8x512xbf16>, vector<512x512xbf16>, vector<8x512xf32> -> vector<8x512xf32>
    %c0_51 = arith.constant 0 : index
    %c0_52 = arith.constant 0 : index
    %109 = vector.load %arg15[%c0_51, %c0_52] : memref<1x512xf32, #tpu.memory_space<vmem>>, vector<1x512xf32>
    %110 = vector.broadcast %109 : vector<1x512xf32> to vector<8x512xf32>
    %111 = arith.addf %108, %110 : vector<8x512xf32>
    %cst_53 = arith.constant 0.000000e+00 : f32
    %112 = vector.broadcast %cst_53 : f32 to vector<8x512xf32>
    %113 = arith.maximumf %111, %112 : vector<8x512xf32>
    %cst_54 = arith.constant dense<0.000000e+00> : vector<8xf32>
    %114 = vector.multi_reduction <add>, %113, %cst_54 [1] : vector<8x512xf32> to vector<8xf32>
    %115 = vector.shape_cast %114 : vector<8xf32> to vector<8x1xf32>
    %cst_55 = arith.constant 5.120000e+02 : f32
    %116 = vector.broadcast %cst_55 : f32 to vector<8x1xf32>
    %117 = arith.divf %115, %116 : vector<8x1xf32>
    %118 = arith.mulf %113, %113 : vector<8x512xf32>
    %cst_56 = arith.constant dense<0.000000e+00> : vector<8xf32>
    %119 = vector.multi_reduction <add>, %118, %cst_56 [1] : vector<8x512xf32> to vector<8xf32>
    %120 = vector.shape_cast %119 : vector<8xf32> to vector<8x1xf32>
    %cst_57 = arith.constant 5.120000e+02 : f32
    %121 = vector.broadcast %cst_57 : f32 to vector<8x1xf32>
    %122 = arith.divf %120, %121 : vector<8x1xf32>
    %123 = arith.mulf %117, %117 : vector<8x1xf32>
    %124 = arith.subf %122, %123 : vector<8x1xf32>
    %cst_58 = arith.constant 0.000000e+00 : f32
    %125 = vector.broadcast %cst_58 : f32 to vector<8x1xf32>
    %126 = arith.maximumf %124, %125 : vector<8x1xf32>
    %cst_59 = arith.constant 9.99999974E-6 : f32
    %127 = vector.broadcast %cst_59 : f32 to vector<8x1xf32>
    %128 = arith.addf %126, %127 : vector<8x1xf32>
    %129 = math.rsqrt %128 : vector<8x1xf32>
    %130 = vector.broadcast %117 : vector<8x1xf32> to vector<8x512xf32>
    %131 = arith.subf %113, %130 : vector<8x512xf32>
    %132 = arith.truncf %131 : vector<8x512xf32> to vector<8x512xbf16>
    %133 = arith.truncf %129 : vector<8x1xf32> to vector<8x1xbf16>
    %134 = vector.broadcast %133 : vector<8x1xbf16> to vector<8x512xbf16>
    %135 = arith.mulf %132, %134 : vector<8x512xbf16>
    %c0_60 = arith.constant 0 : index
    %c0_61 = arith.constant 0 : index
    %136 = vector.load %arg16[%c0_60, %c0_61] : memref<1x512xbf16, #tpu.memory_space<vmem>>, vector<1x512xbf16>
    %137 = vector.broadcast %136 : vector<1x512xbf16> to vector<8x512xbf16>
    %138 = arith.mulf %135, %137 : vector<8x512xbf16>
    %c0_62 = arith.constant 0 : index
    %c0_63 = arith.constant 0 : index
    %139 = vector.load %arg17[%c0_62, %c0_63] : memref<1x512xbf16, #tpu.memory_space<vmem>>, vector<1x512xbf16>
    %140 = vector.broadcast %139 : vector<1x512xbf16> to vector<8x512xbf16>
    %141 = arith.addf %138, %140 : vector<8x512xbf16>
    %c0_64 = arith.constant 0 : index
    %c0_65 = arith.constant 0 : index
    %142 = vector.load %arg18[%c0_64, %c0_65] : memref<512x512xbf16, #tpu.memory_space<vmem>>, vector<512x512xbf16>
    %cst_66 = arith.constant dense<0.000000e+00> : vector<8x512xf32>
    %143 = tpu.matmul %71, %142, %cst_66 {dimension_numbers = #tpu.dot_dimension_numbers<[1], [0], [0], [1], [0, 0, 1, 1], [], []>} : vector<8x512xbf16>, vector<512x512xbf16>, vector<8x512xf32> -> vector<8x512xf32>
    %c0_67 = arith.constant 0 : index
    %c0_68 = arith.constant 0 : index
    %144 = vector.load %arg19[%c0_67, %c0_68] : memref<512x512xbf16, #tpu.memory_space<vmem>>, vector<512x512xbf16>
    %cst_69 = arith.constant dense<0.000000e+00> : vector<8x512xf32>
    %145 = tpu.matmul %141, %144, %cst_69 {dimension_numbers = #tpu.dot_dimension_numbers<[1], [0], [0], [1], [0, 0, 1, 1], [], []>} : vector<8x512xbf16>, vector<512x512xbf16>, vector<8x512xf32> -> vector<8x512xf32>
    %146 = arith.addf %143, %145 : vector<8x512xf32>
    %c0_70 = arith.constant 0 : index
    %c0_71 = arith.constant 0 : index
    %147 = vector.load %arg20[%c0_70, %c0_71] : memref<1x512xf32, #tpu.memory_space<vmem>>, vector<1x512xf32>
    %148 = vector.broadcast %147 : vector<1x512xf32> to vector<8x512xf32>
    %149 = arith.addf %146, %148 : vector<8x512xf32>
    %cst_72 = arith.constant 0.000000e+00 : f32
    %150 = vector.broadcast %cst_72 : f32 to vector<8x512xf32>
    %151 = arith.maximumf %149, %150 : vector<8x512xf32>
    %cst_73 = arith.constant dense<0.000000e+00> : vector<8xf32>
    %152 = vector.multi_reduction <add>, %151, %cst_73 [1] : vector<8x512xf32> to vector<8xf32>
    %153 = vector.shape_cast %152 : vector<8xf32> to vector<8x1xf32>
    %cst_74 = arith.constant 5.120000e+02 : f32
    %154 = vector.broadcast %cst_74 : f32 to vector<8x1xf32>
    %155 = arith.divf %153, %154 : vector<8x1xf32>
    %156 = arith.mulf %151, %151 : vector<8x512xf32>
    %cst_75 = arith.constant dense<0.000000e+00> : vector<8xf32>
    %157 = vector.multi_reduction <add>, %156, %cst_75 [1] : vector<8x512xf32> to vector<8xf32>
    %158 = vector.shape_cast %157 : vector<8xf32> to vector<8x1xf32>
    %cst_76 = arith.constant 5.120000e+02 : f32
    %159 = vector.broadcast %cst_76 : f32 to vector<8x1xf32>
    %160 = arith.divf %158, %159 : vector<8x1xf32>
    %161 = arith.mulf %155, %155 : vector<8x1xf32>
    %162 = arith.subf %160, %161 : vector<8x1xf32>
    %cst_77 = arith.constant 0.000000e+00 : f32
    %163 = vector.broadcast %cst_77 : f32 to vector<8x1xf32>
    %164 = arith.maximumf %162, %163 : vector<8x1xf32>
    %cst_78 = arith.constant 9.99999974E-6 : f32
    %165 = vector.broadcast %cst_78 : f32 to vector<8x1xf32>
    %166 = arith.addf %164, %165 : vector<8x1xf32>
    %167 = math.rsqrt %166 : vector<8x1xf32>
    %168 = vector.broadcast %155 : vector<8x1xf32> to vector<8x512xf32>
    %169 = arith.subf %151, %168 : vector<8x512xf32>
    %170 = arith.truncf %169 : vector<8x512xf32> to vector<8x512xbf16>
    %171 = arith.truncf %167 : vector<8x1xf32> to vector<8x1xbf16>
    %172 = vector.broadcast %171 : vector<8x1xbf16> to vector<8x512xbf16>
    %173 = arith.mulf %170, %172 : vector<8x512xbf16>
    %c0_79 = arith.constant 0 : index
    %c0_80 = arith.constant 0 : index
    %174 = vector.load %arg21[%c0_79, %c0_80] : memref<1x512xbf16, #tpu.memory_space<vmem>>, vector<1x512xbf16>
    %175 = vector.broadcast %174 : vector<1x512xbf16> to vector<8x512xbf16>
    %176 = arith.mulf %173, %175 : vector<8x512xbf16>
    %c0_81 = arith.constant 0 : index
    %c0_82 = arith.constant 0 : index
    %177 = vector.load %arg22[%c0_81, %c0_82] : memref<1x512xbf16, #tpu.memory_space<vmem>>, vector<1x512xbf16>
    %178 = vector.broadcast %177 : vector<1x512xbf16> to vector<8x512xbf16>
    %179 = arith.addf %176, %178 : vector<8x512xbf16>
    %c0_83 = arith.constant 0 : index
    %c0_84 = arith.constant 0 : index
    %180 = vector.load %arg23[%c0_83, %c0_84] : memref<512x256xbf16, #tpu.memory_space<vmem>>, vector<512x256xbf16>
    %cst_85 = arith.constant dense<0.000000e+00> : vector<8x256xf32>
    %181 = tpu.matmul %179, %180, %cst_85 {dimension_numbers = #tpu.dot_dimension_numbers<[1], [0], [0], [1], [0, 0, 1, 1], [], []>} : vector<8x512xbf16>, vector<512x256xbf16>, vector<8x256xf32> -> vector<8x256xf32>
    %c0_86 = arith.constant 0 : index
    %c0_87 = arith.constant 0 : index
    %182 = vector.load %arg24[%c0_86, %c0_87] : memref<1x256xf32, #tpu.memory_space<vmem>>, vector<1x256xf32>
    %183 = vector.broadcast %182 : vector<1x256xf32> to vector<8x256xf32>
    %184 = arith.addf %181, %183 : vector<8x256xf32>
    %cst_88 = arith.constant 0.000000e+00 : f32
    %185 = vector.broadcast %cst_88 : f32 to vector<8x256xf32>
    %186 = arith.maximumf %184, %185 : vector<8x256xf32>
    %cst_89 = arith.constant dense<0.000000e+00> : vector<8xf32>
    %187 = vector.multi_reduction <add>, %186, %cst_89 [1] : vector<8x256xf32> to vector<8xf32>
    %188 = vector.shape_cast %187 : vector<8xf32> to vector<8x1xf32>
    %cst_90 = arith.constant 2.560000e+02 : f32
    %189 = vector.broadcast %cst_90 : f32 to vector<8x1xf32>
    %190 = arith.divf %188, %189 : vector<8x1xf32>
    %191 = arith.mulf %186, %186 : vector<8x256xf32>
    %cst_91 = arith.constant dense<0.000000e+00> : vector<8xf32>
    %192 = vector.multi_reduction <add>, %191, %cst_91 [1] : vector<8x256xf32> to vector<8xf32>
    %193 = vector.shape_cast %192 : vector<8xf32> to vector<8x1xf32>
    %cst_92 = arith.constant 2.560000e+02 : f32
    %194 = vector.broadcast %cst_92 : f32 to vector<8x1xf32>
    %195 = arith.divf %193, %194 : vector<8x1xf32>
    %196 = arith.mulf %190, %190 : vector<8x1xf32>
    %197 = arith.subf %195, %196 : vector<8x1xf32>
    %cst_93 = arith.constant 0.000000e+00 : f32
    %198 = vector.broadcast %cst_93 : f32 to vector<8x1xf32>
    %199 = arith.maximumf %197, %198 : vector<8x1xf32>
    %cst_94 = arith.constant 9.99999974E-6 : f32
    %200 = vector.broadcast %cst_94 : f32 to vector<8x1xf32>
    %201 = arith.addf %199, %200 : vector<8x1xf32>
    %202 = math.rsqrt %201 : vector<8x1xf32>
    %203 = vector.broadcast %190 : vector<8x1xf32> to vector<8x256xf32>
    %204 = arith.subf %186, %203 : vector<8x256xf32>
    %205 = arith.truncf %204 : vector<8x256xf32> to vector<8x256xbf16>
    %206 = arith.truncf %202 : vector<8x1xf32> to vector<8x1xbf16>
    %207 = vector.broadcast %206 : vector<8x1xbf16> to vector<8x256xbf16>
    %208 = arith.mulf %205, %207 : vector<8x256xbf16>
    %c0_95 = arith.constant 0 : index
    %c0_96 = arith.constant 0 : index
    %209 = vector.load %arg25[%c0_95, %c0_96] : memref<1x256xbf16, #tpu.memory_space<vmem>>, vector<1x256xbf16>
    %210 = vector.broadcast %209 : vector<1x256xbf16> to vector<8x256xbf16>
    %211 = arith.mulf %208, %210 : vector<8x256xbf16>
    %c0_97 = arith.constant 0 : index
    %c0_98 = arith.constant 0 : index
    %212 = vector.load %arg26[%c0_97, %c0_98] : memref<1x256xbf16, #tpu.memory_space<vmem>>, vector<1x256xbf16>
    %213 = vector.broadcast %212 : vector<1x256xbf16> to vector<8x256xbf16>
    %214 = arith.addf %211, %213 : vector<8x256xbf16>
    %c0_99 = arith.constant 0 : index
    %c0_100 = arith.constant 0 : index
    %215 = vector.load %arg27[%c0_99, %c0_100] : memref<256x128xbf16, #tpu.memory_space<vmem>>, vector<256x128xbf16>
    %cst_101 = arith.constant dense<0.000000e+00> : vector<8x128xf32>
    %216 = tpu.matmul %214, %215, %cst_101 {dimension_numbers = #tpu.dot_dimension_numbers<[1], [0], [0], [1], [0, 0, 1, 1], [], []>} : vector<8x256xbf16>, vector<256x128xbf16>, vector<8x128xf32> -> vector<8x128xf32>
    %c0_102 = arith.constant 0 : index
    %c0_103 = arith.constant 0 : index
    %217 = vector.load %arg28[%c0_102, %c0_103] : memref<1x128xf32, #tpu.memory_space<vmem>>, vector<1x128xf32>
    %218 = vector.broadcast %217 : vector<1x128xf32> to vector<8x128xf32>
    %219 = arith.addf %216, %218 : vector<8x128xf32>
    %c0_104 = arith.constant 0 : index
    %c0_105 = arith.constant 0 : index
    %220 = vector.load %arg29[%c0_104, %c0_105] : memref<8x128xf32, #tpu.memory_space<vmem>>, vector<8x128xf32>
    tpu.vector_store %arg29[%c0_104, %c0_105], %219 {strides = array<i32>} : memref<8x128xf32, #tpu.memory_space<vmem>>, vector<8x128xf32>,
    return
  }
  func.func @transform_0(%arg0: i32) -> (i32, i32) {
    %c0_i32 = arith.constant 0 : i32
    %c0_i32_0 = arith.constant 0 : i32
    return %arg0, %c0_i32 : i32, i32
  }
  func.func @transform_1(%arg0: i32) -> (i32, i32) {
    %c0_i32 = arith.constant 0 : i32
    %c0_i32_0 = arith.constant 0 : i32
    %c0_i32_1 = arith.constant 0 : i32
    return %c0_i32, %c0_i32_0 : i32, i32
  }
  func.func @transform_2(%arg0: i32) -> (i32, i32) {
    %c0_i32 = arith.constant 0 : i32
    %c0_i32_0 = arith.constant 0 : i32
    %c0_i32_1 = arith.constant 0 : i32
    return %c0_i32, %c0_i32_0 : i32, i32
  }
  func.func @transform_3(%arg0: i32) -> (i32, i32) {
    %c0_i32 = arith.constant 0 : i32
    %c0_i32_0 = arith.constant 0 : i32
    %c0_i32_1 = arith.constant 0 : i32
    return %c0_i32, %c0_i32_0 : i32, i32
  }
  func.func @transform_4(%arg0: i32) -> (i32, i32) {
    %c0_i32 = arith.constant 0 : i32
    %c0_i32_0 = arith.constant 0 : i32
    %c0_i32_1 = arith.constant 0 : i32
    return %c0_i32, %c0_i32_0 : i32, i32
  }
  func.func @transform_5(%arg0: i32) -> (i32, i32) {
    %c0_i32 = arith.constant 0 : i32
    %c0_i32_0 = arith.constant 0 : i32
    %c0_i32_1 = arith.constant 0 : i32
    return %c0_i32, %c0_i32_0 : i32, i32
  }
  func.func @transform_6(%arg0: i32) -> (i32, i32) {
    %c0_i32 = arith.constant 0 : i32
    %c0_i32_0 = arith.constant 0 : i32
    %c0_i32_1 = arith.constant 0 : i32
    return %c0_i32, %c0_i32_0 : i32, i32
  }
  func.func @transform_7(%arg0: i32) -> (i32, i32) {
    %c0_i32 = arith.constant 0 : i32
    %c0_i32_0 = arith.constant 0 : i32
    %c0_i32_1 = arith.constant 0 : i32
    return %c0_i32, %c0_i32_0 : i32, i32
  }
  func.func @transform_8(%arg0: i32) -> (i32, i32) {
    %c0_i32 = arith.constant 0 : i32
    %c0_i32_0 = arith.constant 0 : i32
    %c0_i32_1 = arith.constant 0 : i32
    return %c0_i32, %c0_i32_0 : i32, i32
  }
  func.func @transform_9(%arg0: i32) -> (i32, i32) {
    %c0_i32 = arith.constant 0 : i32
    %c0_i32_0 = arith.constant 0 : i32
    %c0_i32_1 = arith.constant 0 : i32
    return %c0_i32, %c0_i32_0 : i32, i32
  }
  func.func @transform_10(%arg0: i32) -> (i32, i32) {
    %c0_i32 = arith.constant 0 : i32
    %c0_i32_0 = arith.constant 0 : i32
    %c0_i32_1 = arith.constant 0 : i32
    return %c0_i32, %c0_i32_0 : i32, i32
  }
  func.func @transform_11(%arg0: i32) -> (i32, i32) {
    %c0_i32 = arith.constant 0 : i32
    %c0_i32_0 = arith.constant 0 : i32
    %c0_i32_1 = arith.constant 0 : i32
    return %c0_i32, %c0_i32_0 : i32, i32
  }
  func.func @transform_12(%arg0: i32) -> (i32, i32) {
    %c0_i32 = arith.constant 0 : i32
    %c0_i32_0 = arith.constant 0 : i32
    %c0_i32_1 = arith.constant 0 : i32
    return %c0_i32, %c0_i32_0 : i32, i32
  }
  func.func @transform_13(%arg0: i32) -> (i32, i32) {
    %c0_i32 = arith.constant 0 : i32
    %c0_i32_0 = arith.constant 0 : i32
    %c0_i32_1 = arith.constant 0 : i32
    return %c0_i32, %c0_i32_0 : i32, i32
  }
  func.func @transform_14(%arg0: i32) -> (i32, i32) {
    %c0_i32 = arith.constant 0 : i32
    %c0_i32_0 = arith.constant 0 : i32
    %c0_i32_1 = arith.constant 0 : i32
    return %c0_i32, %c0_i32_0 : i32, i32
  }
  func.func @transform_15(%arg0: i32) -> (i32, i32) {
    %c0_i32 = arith.constant 0 : i32
    %c0_i32_0 = arith.constant 0 : i32
    %c0_i32_1 = arith.constant 0 : i32
    return %c0_i32, %c0_i32_0 : i32, i32
  }
  func.func @transform_16(%arg0: i32) -> (i32, i32) {
    %c0_i32 = arith.constant 0 : i32
    %c0_i32_0 = arith.constant 0 : i32
    %c0_i32_1 = arith.constant 0 : i32
    return %c0_i32, %c0_i32_0 : i32, i32
  }
  func.func @transform_17(%arg0: i32) -> (i32, i32) {
    %c0_i32 = arith.constant 0 : i32
    %c0_i32_0 = arith.constant 0 : i32
    %c0_i32_1 = arith.constant 0 : i32
    return %c0_i32, %c0_i32_0 : i32, i32
  }
  func.func @transform_18(%arg0: i32) -> (i32, i32) {
    %c0_i32 = arith.constant 0 : i32
    %c0_i32_0 = arith.constant 0 : i32
    %c0_i32_1 = arith.constant 0 : i32
    return %c0_i32, %c0_i32_0 : i32, i32
  }
  func.func @transform_19(%arg0: i32) -> (i32, i32) {
    %c0_i32 = arith.constant 0 : i32
    %c0_i32_0 = arith.constant 0 : i32
    %c0_i32_1 = arith.constant 0 : i32
    return %c0_i32, %c0_i32_0 : i32, i32
  }
  func.func @transform_20(%arg0: i32) -> (i32, i32) {
    %c0_i32 = arith.constant 0 : i32
    %c0_i32_0 = arith.constant 0 : i32
    %c0_i32_1 = arith.constant 0 : i32
    return %c0_i32, %c0_i32_0 : i32, i32
  }
  func.func @transform_21(%arg0: i32) -> (i32, i32) {
    %c0_i32 = arith.constant 0 : i32
    %c0_i32_0 = arith.constant 0 : i32
    %c0_i32_1 = arith.constant 0 : i32
    return %c0_i32, %c0_i32_0 : i32, i32
  }
  func.func @transform_22(%arg0: i32) -> (i32, i32) {
    %c0_i32 = arith.constant 0 : i32
    %c0_i32_0 = arith.constant 0 : i32
    %c0_i32_1 = arith.constant 0 : i32
    return %c0_i32, %c0_i32_0 : i32, i32
  }
  func.func @transform_23(%arg0: i32) -> (i32, i32) {
    %c0_i32 = arith.constant 0 : i32
    %c0_i32_0 = arith.constant 0 : i32
    %c0_i32_1 = arith.constant 0 : i32
    return %c0_i32, %c0_i32_0 : i32, i32
  }
  func.func @transform_24(%arg0: i32) -> (i32, i32) {
    %c0_i32 = arith.constant 0 : i32
    %c0_i32_0 = arith.constant 0 : i32
    %c0_i32_1 = arith.constant 0 : i32
    return %c0_i32, %c0_i32_0 : i32, i32
  }
  func.func @transform_25(%arg0: i32) -> (i32, i32) {
    %c0_i32 = arith.constant 0 : i32
    %c0_i32_0 = arith.constant 0 : i32
    %c0_i32_1 = arith.constant 0 : i32
    return %c0_i32, %c0_i32_0 : i32, i32
  }
  func.func @transform_26(%arg0: i32) -> (i32, i32) {
    %c0_i32 = arith.constant 0 : i32
    %c0_i32_0 = arith.constant 0 : i32
    %c0_i32_1 = arith.constant 0 : i32
    return %c0_i32, %c0_i32_0 : i32, i32
  }
  func.func @transform_27(%arg0: i32) -> (i32, i32) {
    %c0_i32 = arith.constant 0 : i32
    %c0_i32_0 = arith.constant 0 : i32
    %c0_i32_1 = arith.constant 0 : i32
    return %c0_i32, %c0_i32_0 : i32, i32
  }
  func.func @transform_28(%arg0: i32) -> (i32, i32) {
    %c0_i32 = arith.constant 0 : i32
    %c0_i32_0 = arith.constant 0 : i32
    return %arg0, %c0_i32 : i32, i32
  }
}

</mosaic_0001>

<bundles_post_ra>
// kernel: tpu_custom_call.1
= control target key start
LH: loop header
LB: loop body
LE: loop exit
PB: predicated region body
PF: predicated region fallthrough
CT: control target
= control target key end

     0   :  { %s8400_s0 = inlined_call_operand.hbm [shape: f32[8,16], index: 0, kind: input, shape index: {}]   ;;  %s8401_s1 = inlined_call_operand.hbm [shape: bf16[16,512], index: 1, kind: input, shape index: {}]   ;;  %s8402_s2 = inlined_call_operand.hbm [shape: f32[1,512], index: 2, kind: input, shape index: {}]   ;;  %s8403_s3 = inlined_call_operand.vmem [shape: bf16[1,512], index: 3, kind: input, shape index: {}]   ;;  %s8404_s4 = inlined_call_operand.hbm [shape: bf16[1,512], index: 4, kind: input, shape index: {}]   ;;  %s8405_s5 = inlined_call_operand.hbm [shape: bf16[512,512], index: 5, kind: input, shape index: {}]   ;;  %s8406_s6 = inlined_call_operand.vmem [shape: f32[1,512], index: 6, kind: input, shape index: {}]   ;;  %s8407_s7 = inlined_call_operand.vmem [shape: bf16[1,512], index: 7, kind: input, shape index: {}]   ;;  %s8408_s8 = inlined_call_operand.hbm [shape: bf16[1,512], index: 8, kind: input, shape index: {}]   ;;  %s8409_s9 = inlined_call_operand.hbm [shape: bf16[16,512], index: 9, kind: input, shape index: {}]   ;;  %s8410_s10 = inlined_call_operand.vmem [shape: f32[1,512], index: 10, kind: input, shape index: {}]   ;;  %s8411_s11 = inlined_call_operand.vmem [shape: bf16[1,512], index: 11, kind: input, shape index: {}]   ;;  %s8412_s12 = inlined_call_operand.hbm [shape: bf16[1,512], index: 12, kind: input, shape index: {}]   ;;  %s8413_s13 = inlined_call_operand.hbm [shape: bf16[512,512], index: 13, kind: input, shape index: {}]   ;;  %s8414_s14 = inlined_call_operand.vmem [shape: f32[1,512], index: 14, kind: input, shape index: {}]   ;;  %s8415_s15 = inlined_call_operand.hbm [shape: bf16[1,512], index: 15, kind: input, shape index: {}]   ;;  %s8416_s16 = inlined_call_operand.vmem [shape: bf16[1,512], index: 16, kind: input, shape index: {}]   ;;  %s8417_s17 = inlined_call_operand.hbm [shape: bf16[512,512], index: 17, kind: input, shape index: {}]   ;;  %s8418_s18 = inlined_call_operand.hbm [shape: bf16[512,512], index: 18, kind: input, shape index: {}]   ;;  %s8419_s19 = inlined_call_operand.vmem [shape: f32[1,512], index: 19, kind: input, shape index: {}]   ;;  %s8420_s20 = inlined_call_operand.vmem [shape: bf16[1,512], index: 20, kind: input, shape index: {}]   ;;  %s8421_s21 = inlined_call_operand.hbm [shape: bf16[1,512], index: 21, kind: input, shape index: {}]   ;;  %s8422_s22 = inlined_call_operand.hbm [shape: bf16[512,256], index: 22, kind: input, shape index: {}]   ;;  %s8423_s23 = inlined_call_operand.vmem [shape: f32[1,256], index: 23, kind: input, shape index: {}]   ;;  %s8424_s24 = inlined_call_operand.vmem [shape: bf16[1,256], index: 24, kind: input, shape index: {}]   ;;  %s8425_s25 = inlined_call_operand.vmem [shape: bf16[1,256], index: 25, kind: input, shape index: {}]   ;;  %s8426_s26 = inlined_call_operand.hbm [shape: bf16[256,128], index: 26, kind: input, shape index: {}]   ;;  %s8427_s27 = inlined_call_operand.vmem [shape: f32[1,128], index: 27, kind: input, shape index: {}]   ;;  %s8428_s28 = inlined_call_operand.hbm [shape: f32[8,128], index: 28, kind: output, shape index: {}]  }
   0x1   :  { %8431 = sst [smem:[#allocation36_spill]] %s8400_s0 }
   0x2   :  { %8432 = sst [smem:[#allocation37_spill]] %s8401_s1 }
   0x3   :  { %8433 = sst [smem:[#allocation38_spill]] %s8402_s2 }
   0x4   :  { %8434 = sst [smem:[#allocation39_spill]] %s8403_s3 }
   0x5   :  { %8435 = sst [smem:[#allocation40_spill]] %s8404_s4 }
   0x6   :  { %8436 = sst [smem:[#allocation41_spill]] %s8405_s5 }
   0x7   :  { %8437 = sst [smem:[#allocation42_spill]] %s8406_s6 }
   0x8   :  { %8438 = sst [smem:[#allocation43_spill]] %s8407_s7 }
   0x9   :  { %8439 = sst [smem:[#allocation44_spill]] %s8408_s8 }
   0xa   :  { %8440 = sst [smem:[#allocation45_spill]] %s8409_s9 }
   0xb   :  { %8441 = sst [smem:[#allocation46_spill]] %s8410_s10 }
   0xc   :  { %8442 = sst [smem:[#allocation47_spill]] %s8411_s11 }
   0xd   :  { %8443 = sst [smem:[#allocation48_spill]] %s8412_s12 }
   0xe   :  { %33 = vsyncpa [#allocation3], 0 }
   0xf   :  { %34 = vsyncpa [#allocation6], 0 }
  0x10   :  { %35 = vsyncpa [#allocation9], 0 }
  0x11   :  { %36 = vsyncpa [#allocation12], 0 }
  0x12   :  { %37 = vsyncpa [#allocation15], 0 }
  0x13   :  { %38 = vsyncpa [#allocation18], 0 }
  0x14   :  { %39 = vsyncpa [#allocation21], 0 }
  0x15   :  { %40 = vsyncpa [#allocation24], 0 }
  0x16   :  { %41 = vsyncpa [#allocation4], 0  ;;  %s7797_s8 = smov [#allocation5]  }
  0x17   :  { %s57_s5 = sshll.u32 %s7797_s8, 4  ;;  %s58_s5 = int_to_ptr.vmem [resolvable:$true] %s57_s5 }
  0x18   :  { %s7467_s9 = scalar_lea.vmem %s58_s5, 512  ;;  %p7472_p1 = scmp.lt.s32.totalorder %s58_s5, %s58_s5 }
  0x19   :  { %p7468_p0 = scmp.ne.s32.totalorder %s58_s5, %s7467_s9  ;;  %p7473_p2 = scmp.lt.s32.totalorder %s7467_s9, %s7467_s9 }
  0x1b   :  { %p7474_p3 = por %p7473_p2, %p7472_p1 }
  0x1d   :  { %p7475_p4 = pnand %p7474_p3, %p7468_p0 }
  0x1f   :  { %7478 = shalt.err (!%p7475_p4)
}
  0x20   :  { %s8429_s30 = smov 256   ;;  %s7799_s3 = smov 16  }
  0x21   :  { %s8444_s0 = sld [smem:[#allocation37_spill]]  ;;  %s7800_s11 = smov [#allocation8]  }
  0x22   :  { %s82_s29 = sshll.u32 %s7800_s11, 4  ;;  %s7801_s2 = smov [#allocation11]   ;;  %s83_s29 = int_to_ptr.vmem [resolvable:$true] %s82_s29 }
  0x23   :  { %s108_s7 = sshll.u32 %s7801_s2, 4  ;;  %s7487_s12 = scalar_lea.vmem %s83_s29, 64  ;;  %s109_s7 = int_to_ptr.vmem [resolvable:$true] %s108_s7 }
  0x24   :  { %p7488_p5 = scmp.ne.s32.totalorder %s83_s29, %s7487_s12  ;;  %p7492_p6 = scmp.lt.s32.totalorder %s83_s29, %s83_s29 }
  0x25   :  { %p7493_p7 = scmp.lt.s32.totalorder %s7487_s12, %s7487_s12 }
  0x27   :  { %63 = dma.hbm_to_vmem [thread:$0]  %s8444_s0, 512, %s58_s5, [#allocation6], %s8429_s30, %s8429_s30, %s7799_s3  }
  0x28   :  { %p7494_p8 = por %p7493_p7, %p7492_p6 }
  0x2a   :  { %p7495_p9 = pnand %p7494_p8, %p7488_p5 }
  0x2c   :  { %7498 = shalt.err (!%p7495_p9)
}
  0x2d   :  { %s8445_s8 = sld [smem:[#allocation40_spill]]  ;;  %s7507_s9 = scalar_lea.vmem %s109_s7, 64 }
  0x2e   :  { %p7508_p10 = scmp.ne.s32.totalorder %s109_s7, %s7507_s9  ;;  %p7512_p11 = scmp.lt.s32.totalorder %s109_s7, %s109_s7 }
  0x2f   :  { %p7513_p12 = scmp.lt.s32.totalorder %s7507_s9, %s7507_s9 }
  0x31   :  { %p7514_p13 = por %p7513_p12, %p7512_p11 }
  0x33   :  { %85 = dma.hbm_to_vmem [thread:$0]  %s8445_s8, 64, %s83_s29, [#allocation9]  }
  0x34   :  { %p7515_p0 = pnand %p7514_p13, %p7508_p10 }
  0x36   :  { %7518 = shalt.err (!%p7515_p0)
}
  0x37   :  { %s8446_s10 = sld [smem:[#allocation44_spill]]  ;;  %s7802_s0 = smov [#allocation14]  }
  0x38   :  { %s134_s11 = sshll.u32 %s7802_s0, 4  ;;  %s7803_s2 = smov [#allocation17]   ;;  %s135_s11 = int_to_ptr.vmem [resolvable:$true] %s134_s11 }
  0x39   :  { %s158_s12 = sshll.u32 %s7803_s2, 4  ;;  %s7527_s30 = scalar_lea.vmem %s135_s11, 64  ;;  %s159_s12 = int_to_ptr.vmem [resolvable:$true] %s158_s12 }
  0x3a   :  { %p7528_p1 = scmp.ne.s32.totalorder %s135_s11, %s7527_s30  ;;  %p7532_p2 = scmp.lt.s32.totalorder %s135_s11, %s135_s11 }
  0x3b   :  { %p7533_p3 = scmp.lt.s32.totalorder %s7527_s30, %s7527_s30 }
  0x3d   :  { %111 = dma.hbm_to_vmem [thread:$0]  %s8446_s10, 64, %s109_s7, [#allocation12]  }
  0x3e   :  { %p7534_p4 = por %p7533_p3, %p7532_p2 }
  0x40   :  { %p7535_p5 = pnand %p7534_p4, %p7528_p1 }
  0x42   :  { %7538 = shalt.err (!%p7535_p5)
}
  0x43   :  { %s8447_s4 = sld [smem:[#allocation48_spill]]  ;;  %s7547_s8 = scalar_lea.vmem %s159_s12, 64 }
  0x44   :  { %p7548_p6 = scmp.ne.s32.totalorder %s159_s12, %s7547_s8  ;;  %p7552_p7 = scmp.lt.s32.totalorder %s159_s12, %s159_s12 }
  0x45   :  { %p7553_p8 = scmp.lt.s32.totalorder %s7547_s8, %s7547_s8 }
  0x47   :  { %p7554_p9 = por %p7553_p8, %p7552_p7 }
  0x49   :  { %137 = dma.hbm_to_vmem [thread:$0]  %s8447_s4, 64, %s135_s11, [#allocation15]  }
  0x4a   :  { %p7555_p10 = pnand %p7554_p9, %p7548_p6 }
  0x4c   :  { %7558 = shalt.err (!%p7555_p10)
}
  0x4d   :  { %161 = dma.hbm_to_vmem [thread:$0]  %s8415_s15, 64, %s159_s12, [#allocation18]  }
  0x4e   :  { %s7804_s30 = smov [#allocation20]   ;;  %s7805_s6 = smov [#allocation23]  }
  0x4f   :  { %s181_s5 = sshll.u32 %s7804_s30, 4  ;;  %s207_s10 = sshll.u32 %s7805_s6, 4  ;;  %s182_s5 = int_to_ptr.vmem [resolvable:$true] %s181_s5  ;;  %s208_s10 = int_to_ptr.vmem [resolvable:$true] %s207_s10 }
  0x50   :  { %s7567_s0 = scalar_lea.vmem %s182_s5, 16384  ;;  %p7572_p12 = scmp.lt.s32.totalorder %s182_s5, %s182_s5 }
  0x51   :  { %p7568_p11 = scmp.ne.s32.totalorder %s182_s5, %s7567_s0  ;;  %p7573_p13 = scmp.lt.s32.totalorder %s7567_s0, %s7567_s0 }
  0x53   :  { %p7574_p0 = por %p7573_p13, %p7572_p12 }
  0x55   :  { %p7575_p1 = pnand %p7574_p0, %p7568_p11 }
  0x57   :  { %7578 = shalt.err (!%p7575_p1)
}
  0x58   :  { %s8448_s11 = smov 256   ;;  %s7587_s15 = scalar_lea.vmem %s208_s10, 8192 }
  0x59   :  { %187 = dma.hbm_to_vmem [thread:$0]  %s8418_s18, 16384, %s182_s5, [#allocation21], %s8448_s11, %s8448_s11, %s7799_s3  }
  0x5a   :  { %p7588_p2 = scmp.ne.s32.totalorder %s208_s10, %s7587_s15  ;;  %p7592_p3 = scmp.lt.s32.totalorder %s208_s10, %s208_s10 }
  0x5b   :  { %p7593_p4 = scmp.lt.s32.totalorder %s7587_s15, %s7587_s15 }
  0x5d   :  { %p7594_p5 = por %p7593_p4, %p7592_p3 }
  0x5f   :  { %p7595_p6 = pnand %p7594_p5, %p7588_p2 }
  0x61   :  { %7598 = shalt.err (!%p7595_p6)
}
  0x62   :  { %s7806_s12 = smov 128   ;;  %s7807_s1 = smov 8  }
  0x63   :  { %213 = dma.hbm_to_vmem [thread:$0]  %s8422_s22, 8192, %s208_s10, [#allocation24], %s7806_s12, %s7806_s12, %s7807_s1  }
  0x64   :  { %s7808_s7 = smov [#allocation2]   ;;  %s7809_s30 = smov [#allocation7]  }
  0x65   :  { %s48_s9 = sshll.u32 %s7808_s7, 4  ;;  %s70_s6 = sshll.u32 %s7809_s30, 4  ;;  %s49_s9 = int_to_ptr.vmem [resolvable:$true] %s48_s9  ;;  %s71_s6 = int_to_ptr.vmem [resolvable:$true] %s70_s6 }
  0x66   :  { %s7607_s18 = scalar_lea.vmem %s49_s9, 128  ;;  %p7612_p8 = scmp.lt.s32.totalorder %s49_s9, %s49_s9 }
  0x67   :  { %p7608_p7 = scmp.ne.s32.totalorder %s49_s9, %s7607_s18  ;;  %p7613_p9 = scmp.lt.s32.totalorder %s7607_s18, %s7607_s18 }
  0x69   :  { %p7614_p10 = por %p7613_p9, %p7612_p8 }
  0x6b   :  { %p7615_p11 = pnand %p7614_p10, %p7608_p7 }
  0x6d   :  { %7618 = shalt.err (!%p7615_p11)
}
  0x6e   :  { %s8449_s2 = sld [smem:[#allocation36_spill]]  ;;  %s7627_s29 = scalar_lea.vmem %s71_s6, 64 }
  0x6f   :  { %p7628_p12 = scmp.ne.s32.totalorder %s71_s6, %s7627_s29  ;;  %p7632_p13 = scmp.lt.s32.totalorder %s71_s6, %s71_s6 }
  0x70   :  { %p7633_p0 = scmp.lt.s32.totalorder %s7627_s29, %s7627_s29 }
  0x72   :  { %p7634_p1 = por %p7633_p0, %p7632_p13 }
  0x74   :  { %51 = dma.hbm_to_vmem [thread:$0]  %s8449_s2, 128, %s49_s9, [#allocation3]  }
  0x75   :  { %p7635_p2 = pnand %p7634_p1, %p7628_p12 }
  0x77   :  { %7638 = shalt.err (!%p7635_p2)
}
  0x78   :  { %s8450_s15 = sld [smem:[#allocation38_spill]]  ;;  %s7810_s12 = smov [#allocation10]  }
  0x79   :  { %s91_s1 = sshll.u32 %s7810_s12, 4  ;;  %s7811_s4 = smov [#allocation13]   ;;  %s92_s1 = int_to_ptr.vmem [resolvable:$true] %s91_s1 }
  0x7a   :  { %s117_s8 = sshll.u32 %s7811_s4, 4  ;;  %s7647_s7 = scalar_lea.vmem %s92_s1, 16384  ;;  %s118_s8 = int_to_ptr.vmem [resolvable:$true] %s117_s8 }
  0x7b   :  { %p7648_p3 = scmp.ne.s32.totalorder %s92_s1, %s7647_s7  ;;  %p7652_p4 = scmp.lt.s32.totalorder %s92_s1, %s92_s1 }
  0x7c   :  { %p7653_p5 = scmp.lt.s32.totalorder %s7647_s7, %s7647_s7 }
  0x7e   :  { %73 = dma.hbm_to_vmem [thread:$0]  %s8450_s15, 64, %s71_s6, [#allocation6]  }
  0x7f   :  { %p7654_p6 = por %p7653_p5, %p7652_p4 }
  0x81   :  { %p7655_p7 = pnand %p7654_p6, %p7648_p3 }
  0x83   :  { %7658 = shalt.err (!%p7655_p7)
}
  0x84   :  { %s8451_s18 = sld [smem:[#allocation41_spill]]  ;;  %s7667_s6 = scalar_lea.vmem %s118_s8, 512 }
  0x85   :  { %p7668_p8 = scmp.ne.s32.totalorder %s118_s8, %s7667_s6  ;;  %p7672_p9 = scmp.lt.s32.totalorder %s118_s8, %s118_s8 }
  0x86   :  { %p7673_p10 = scmp.lt.s32.totalorder %s7667_s6, %s7667_s6 }
  0x88   :  { %p7674_p11 = por %p7673_p10, %p7672_p9 }
  0x8a   :  { %97 = dma.hbm_to_vmem [thread:$0]  %s8451_s18, 16384, %s92_s1, [#allocation9], %s8448_s11, %s8448_s11, %s7799_s3  }
  0x8b   :  { %p7675_p12 = pnand %p7674_p11, %p7668_p8 }
  0x8d   :  { %7678 = shalt.err (!%p7675_p12)
}
  0x8e   :  { %s8452_s2 = sld [smem:[#allocation45_spill]]  ;;  %s7812_s29 = smov [#allocation16]  }
  0x8f   :  { %s143_s22 = sshll.u32 %s7812_s29, 4  ;;  %s7813_s10 = smov [#allocation19]   ;;  %s144_s22 = int_to_ptr.vmem [resolvable:$true] %s143_s22 }
  0x90   :  { %s169_s15 = sshll.u32 %s7813_s10, 4  ;;  %s7687_s12 = scalar_lea.vmem %s144_s22, 16384  ;;  %s170_s15 = int_to_ptr.vmem [resolvable:$true] %s169_s15 }
  0x91   :  { %p7688_p13 = scmp.ne.s32.totalorder %s144_s22, %s7687_s12  ;;  %p7692_p0 = scmp.lt.s32.totalorder %s144_s22, %s144_s22 }
  0x92   :  { %p7693_p1 = scmp.lt.s32.totalorder %s7687_s12, %s7687_s12 }
  0x94   :  { %123 = dma.hbm_to_vmem [thread:$0]  %s8452_s2, 512, %s118_s8, [#allocation12], %s8448_s11, %s8448_s11, %s7799_s3  }
  0x95   :  { %p7694_p2 = por %p7693_p1, %p7692_p0 }
  0x97   :  { %p7695_p3 = pnand %p7694_p2, %p7688_p13 }
  0x99   :  { %7698 = shalt.err (!%p7695_p3)
}
  0x9a   :  { %149 = dma.hbm_to_vmem [thread:$0]  %s8413_s13, 16384, %s144_s22, [#allocation15], %s8448_s11, %s8448_s11, %s7799_s3  }
  0x9b   :  { %s7707_s8 = scalar_lea.vmem %s170_s15, 16384  ;;  %p7712_p5 = scmp.lt.s32.totalorder %s170_s15, %s170_s15 }
  0x9c   :  { %p7708_p4 = scmp.ne.s32.totalorder %s170_s15, %s7707_s8  ;;  %p7713_p6 = scmp.lt.s32.totalorder %s7707_s8, %s7707_s8 }
  0x9e   :  { %p7714_p7 = por %p7713_p6, %p7712_p5 }
  0xa0   :  { %p7715_p8 = pnand %p7714_p7, %p7708_p4 }
  0xa2   :  { %7718 = shalt.err (!%p7715_p8)
}
  0xa3   :  { %175 = dma.hbm_to_vmem [thread:$0]  %s8417_s17, 16384, %s170_s15, [#allocation18], %s8448_s11, %s8448_s11, %s7799_s3  }
  0xa4   :  { %s7814_s30 = smov [#allocation22]   ;;  %s7815_s6 = smov [#allocation25]  }
  0xa5   :  { %s198_s18 = sshll.u32 %s7814_s30, 4  ;;  %s225_s13 = sshll.u32 %s7815_s6, 4  ;;  %s199_s18 = int_to_ptr.vmem [resolvable:$true] %s198_s18  ;;  %s226_s13 = int_to_ptr.vmem [resolvable:$true] %s225_s13 }
  0xa6   :  { %s7727_s5 = scalar_lea.vmem %s199_s18, 64  ;;  %p7732_p10 = scmp.lt.s32.totalorder %s199_s18, %s199_s18 }
  0xa7   :  { %p7728_p9 = scmp.ne.s32.totalorder %s199_s18, %s7727_s5  ;;  %p7733_p11 = scmp.lt.s32.totalorder %s7727_s5, %s7727_s5 }
  0xa9   :  { %p7734_p12 = por %p7733_p11, %p7732_p10 }
  0xab   :  { %p7735_p13 = pnand %p7734_p12, %p7728_p9 }
  0xad   :  { %7738 = shalt.err (!%p7735_p13)
}
  0xae   :  { %201 = dma.hbm_to_vmem [thread:$0]  %s8421_s21, 64, %s199_s18, [#allocation21]  }
  0xaf   :  { %s7747_s29 = scalar_lea.vmem %s226_s13, 2048  ;;  %p7752_p1 = scmp.lt.s32.totalorder %s226_s13, %s226_s13 }
  0xb0   :  { %p7748_p0 = scmp.ne.s32.totalorder %s226_s13, %s7747_s29  ;;  %p7753_p2 = scmp.lt.s32.totalorder %s7747_s29, %s7747_s29 }
  0xb2   :  { %p7754_p3 = por %p7753_p2, %p7752_p1 }
  0xb4   :  { %p7755_p4 = pnand %p7754_p3, %p7748_p0 }
  0xb6   :  { %7758 = shalt.err (!%p7755_p4)
}
  0xb7   :  { %s7816_s17 = smov 64   ;;  %s7817_s3 = smov 4  }
  0xb8   :  { %231 = dma.hbm_to_vmem [thread:$0]  %s8426_s26, 2048, %s226_s13, [#allocation24], %s7816_s17, %s7816_s17, %s7817_s3  }
  0xb9   :  { %7779 = dma.done.wait [#allocation3], 128  }
  0xba   :  { %7780 = vsyncadd [#allocation3], 4294967168 }
  0xbb   :  { %7781 = dma.done.wait [#allocation6], 576  }
  0xbc   :  { %7782 = vsyncadd [#allocation6], 4294966720 }
  0xbd   :  { %7783 = dma.done.wait [#allocation9], 16448  }
  0xbe   :  { %7784 = vsyncadd [#allocation9], 4294950848 }
  0xbf   :  { %7785 = dma.done.wait [#allocation12], 576  }
  0xc0   :  { %7786 = vsyncadd [#allocation12], 4294966720 }
  0xc1   :  { %7787 = dma.done.wait [#allocation15], 16448  }
  0xc2   :  { %7788 = vsyncadd [#allocation15], 4294950848 }
  0xc3   :  { %7789 = dma.done.wait [#allocation18], 16448  }
  0xc4   :  { %7790 = vsyncadd [#allocation18], 4294950848 }
  0xc5   :  { %7791 = dma.done.wait [#allocation21], 16448  }
  0xc6   :  { %7792 = vsyncadd [#allocation21], 4294950848 }
  0xc7   :  { %7793 = dma.done.wait [#allocation24], 10240  }
  0xc8   :  { %7794 = vsyncadd [#allocation24], 4294957056  ;;  %v7818_v0 = vmov 0   ;;  %v6555_v1 = vld [vmem:[#allocation5 + $0x4] ss:$16 sps:$4 sm:$0xff]   ;;  %v280_v3 = vld [vmem:[#allocation2] sm:$0xff]  ;;  %v288_v39 = vlaneseq }
  0xc9   :  { %364 = vmatprep.mubr.bf16.mxu1 %v7818_v0  ;;  %v6557_v2 = vld [vmem:[#allocation5] ss:$16 sps:$4 sm:$0xff]   ;;  %346 = vmatprep.subr.bf16.mxu1 %v6555_v1  ;;  %v8030_v4 = vpack.c.bf16 %v280_v3, %v280_v3  ;;  %v6560_v5 = vld [vmem:[#allocation5 + $0xc] ss:$16 sps:$4 sm:$0xff]   ;;  %vm328_vm0 = vcmask 130048   ;;  %s8453_s10 = sld [smem:[#allocation39_spill]] }
  0xca   :  { %347 = vmatpush1.bf16.msra.mxu1 %v6557_v2  ;;  %v6558_v6 = vld [vmem:[#allocation5 + $0x8] ss:$16 sps:$4 sm:$0xff]   ;;  %v6561_v7 = vld [vmem:[#allocation10 + $0xe4] ss:$16 sps:$4 sm:$0xff]   ;;  %v8037_v40 = vshrl.u32 %v288_v39, 7  ;;  %s8454_s1 = sld [smem:[#allocation42_spill]] }
  0xcb   :  { %387 = vmatprep.subr.bf16.mxu1 %v6560_v5  ;;  %v6563_v8 = vld [vmem:[#allocation10 + $0x2e0] ss:$16 sps:$4 sm:$0xff]   ;;  %v6565_v9 = vld [vmem:[#allocation10 + $0x2e4] ss:$16 sps:$4 sm:$0xff]   ;;  %1359 = vmatprep.subr.bf16.mxu0 %v6561_v7  ;;  %v286_v41 = vld [vmem:[#allocation7] sm:$0xf] }
  0xcc   :  { %v6566_v10 = vld [vmem:[#allocation10 + $0xe0] ss:$16 sps:$4 sm:$0xff]   ;;  %v6567_v11 = vld [vmem:[#allocation10 + $0xc4] ss:$16 sps:$4 sm:$0xff]   ;;  %v8040_v42 = vsub.s32 0, %v8037_v40  ;;  %v8043_v43 = vsub.s32 1, %v8037_v40 }
  0xcd   :  { %5896 = vmatmul.mubr.msk.bf16.vlgmr.msra.gmra.mxu1 %vm328_vm0, %v8030_v4  ;;  %v6571_v12 = vld [vmem:[#allocation10 + $0x2c4] ss:$16 sps:$4 sm:$0xff]   ;;  %1360 = vmatpush1.bf16.msra.mxu0 %v6566_v10  ;;  %v6569_v13 = vld [vmem:[#allocation10 + $0x2c0] ss:$16 sps:$4 sm:$0xff]   ;;  %v8048_v47 = vsub.s32 2, %v8037_v40  ;;  %v8051_v51 = vsub.s32 3, %v8037_v40 }
  0xce   :  { %388 = vmatpush1.bf16.msra.mxu1 %v6558_v6  ;;  %405 = vmatprep.mubr.bf16.mxu1 %v7818_v0  ;;  %v6572_v14 = vld [vmem:[#allocation10 + $0xc0] ss:$16 sps:$4 sm:$0xff]   ;;  %v6573_v15 = vld [vmem:[#allocation10 + $0xa4] ss:$16 sps:$4 sm:$0xff]   ;;  %v291_v44 = vrot.slane %v286_v41, %v8040_v42  ;;  %v295_v45 = vrot.slane %v286_v41, %v8043_v43  ;;  %s8455_s7 = sld [smem:[#allocation46_spill]] }
  0xcf   :  { %1400 = vmatprep.subr.bf16.mxu1 %v6565_v9  ;;  %1361 = vmatprep.subr.bf16.mxu0 %v6567_v11  ;;  %v6577_v16 = vld [vmem:[#allocation10 + $0x2a4] ss:$16 sps:$4 sm:$0xff]   ;;  %v6575_v17 = vld [vmem:[#allocation10 + $0x2a0] ss:$16 sps:$4 sm:$0xff]   ;;  %v299_v54 = vrot.slane %v286_v41, %v8048_v47  ;;  %v303_v57 = vrot.slane %v286_v41, %v8051_v51  ;;  %s8456_s18 = sld [smem:[#allocation47_spill]] }
  0xd0   :  { %v6578_v18 = vld [vmem:[#allocation10 + $0xa0] ss:$16 sps:$4 sm:$0xff]   ;;  %v6579_v19 = vld [vmem:[#allocation10 + $0x84] ss:$16 sps:$4 sm:$0xff]   ;;  %s8457_s2 = sld [smem:[#allocation43_spill]] }
  0xd1   :  { %1362 = vmatpush1.bf16.msra.mxu0 %v6572_v14  ;;  %v6583_v20 = vld [vmem:[#allocation10 + $0x284] ss:$16 sps:$4 sm:$0xff]   ;;  %v6581_v21 = vld [vmem:[#allocation10 + $0x280] ss:$16 sps:$4 sm:$0xff]  }
  0xd2   :  { %1363 = vmatprep.subr.bf16.mxu0 %v6573_v15  ;;  %v6584_v22 = vld [vmem:[#allocation10 + $0x80] ss:$16 sps:$4 sm:$0xff]   ;;  %v6585_v23 = vld [vmem:[#allocation10 + $0x64] ss:$16 sps:$4 sm:$0xff]  }
  0xd3   :  { %v6589_v24 = vld [vmem:[#allocation10 + $0x264] ss:$16 sps:$4 sm:$0xff]   ;;  %v6587_v25 = vld [vmem:[#allocation10 + $0x260] ss:$16 sps:$4 sm:$0xff]  }
  0xd4   :  { %v6590_v26 = vld [vmem:[#allocation10 + $0x60] ss:$16 sps:$4 sm:$0xff]   ;;  %v6591_v27 = vld [vmem:[#allocation10 + $0x44] ss:$16 sps:$4 sm:$0xff]  }
  0xd5   :  { %5897 = vmatmul.mubr.msk.bf16.vlgmr.msra.gmra.mxu1 %vm328_vm0, %v8030_v4  ;;  %1364 = vmatpush1.bf16.msra.mxu0 %v6578_v18  ;;  %v6595_v28 = vld [vmem:[#allocation10 + $0x244] ss:$16 sps:$4 sm:$0xff]   ;;  %v6593_v29 = vld [vmem:[#allocation10 + $0x240] ss:$16 sps:$4 sm:$0xff]  }
  0xd6   :  { %1401 = vmatpush1.bf16.msra.mxu1 %v6563_v8  ;;  %1365 = vmatprep.subr.bf16.mxu0 %v6579_v19  ;;  %v6596_v30 = vld [vmem:[#allocation10 + $0x40] ss:$16 sps:$4 sm:$0xff]   ;;  %v6597_v31 = vld [vmem:[#allocation10 + $0x24] ss:$16 sps:$4 sm:$0xff]  }
  0xd7   :  { %1402 = vmatprep.subr.bf16.mxu1 %v6571_v12  ;;  %v6601_v32 = vld [vmem:[#allocation10 + $0x224] ss:$16 sps:$4 sm:$0xff]   ;;  %v6599_v33 = vld [vmem:[#allocation10 + $0x220] ss:$16 sps:$4 sm:$0xff]  }
  0xd8   :  { %v6602_v34 = vld [vmem:[#allocation10 + $0x20] ss:$16 sps:$4 sm:$0xff]   ;;  %v6603_v35 = vld [vmem:[#allocation10 + $0x4] ss:$16 sps:$4 sm:$0xff]  }
  0xd9   :  { %1366 = vmatpush1.bf16.msra.mxu0 %v6584_v22  ;;  %v6607_v36 = vld [vmem:[#allocation10 + $0x204] ss:$16 sps:$4 sm:$0xff]   ;;  %v6605_v37 = vld [vmem:[#allocation10 + $0x200] ss:$16 sps:$4 sm:$0xff]  }
  0xda   :  { %1403 = vmatpush1.bf16.msra.mxu1 %v6569_v13  ;;  %1367 = vmatprep.subr.bf16.mxu0 %v6585_v23  ;;  %v6608_v38 = vld [vmem:[#allocation10] ss:$16 sps:$4 sm:$0xff]   ;;  %v6609_v14 = vld [vmem:[#allocation10 + $0x1e4] ss:$16 sps:$4 sm:$0xff]  }
  0xdb   :  { %1404 = vmatprep.subr.bf16.mxu1 %v6577_v16  ;;  %v6613_v15 = vld [vmem:[#allocation10 + $0x3e4] ss:$16 sps:$4 sm:$0xff]   ;;  %v6611_v16 = vld [vmem:[#allocation10 + $0x3e0] ss:$16 sps:$4 sm:$0xff]  }
  0xdc   :  { %v6615_v18 = vld [vmem:[#allocation10 + $0x1c4] ss:$16 sps:$4 sm:$0xff]   ;;  %v6647_v41 = vld [vmem:[#allocation10 + $0x320] ss:$16 sps:$4 sm:$0xff]  }
  0xdd   :  { %1368 = vmatpush1.bf16.msra.mxu0 %v6590_v26  ;;  %v6619_v19 = vld [vmem:[#allocation10 + $0x3c4] ss:$16 sps:$4 sm:$0xff]  }
  0xde   :  { %1405 = vmatpush1.bf16.msra.mxu1 %v6575_v17  ;;  %1369 = vmatprep.subr.bf16.mxu0 %v6591_v27  ;;  %v6614_v17 = vld [vmem:[#allocation10 + $0x1e0] ss:$16 sps:$4 sm:$0xff]   ;;  %v6621_v22 = vld [vmem:[#allocation10 + $0x1a4] ss:$16 sps:$4 sm:$0xff]  }
  0xdf   :  { %1406 = vmatprep.subr.bf16.mxu1 %v6583_v20  ;;  %v6617_v20 = vld [vmem:[#allocation10 + $0x3c0] ss:$16 sps:$4 sm:$0xff]   ;;  %v6625_v23 = vld [vmem:[#allocation10 + $0x3a4] ss:$16 sps:$4 sm:$0xff]  }
  0xe0   :  { %v6627_v26 = vld [vmem:[#allocation10 + $0x184] ss:$16 sps:$4 sm:$0xff]  }
  0xe1   :  { %1370 = vmatpush1.bf16.msra.mxu0 %v6596_v30  ;;  %v6631_v27 = vld [vmem:[#allocation10 + $0x384] ss:$16 sps:$4 sm:$0xff]  }
  0xe2   :  { %1407 = vmatpush1.bf16.msra.mxu1 %v6581_v21  ;;  %1371 = vmatprep.subr.bf16.mxu0 %v6597_v31  ;;  %v6620_v21 = vld [vmem:[#allocation10 + $0x1c0] ss:$16 sps:$4 sm:$0xff]   ;;  %v6633_v30 = vld [vmem:[#allocation10 + $0x164] ss:$16 sps:$4 sm:$0xff]  }
  0xe3   :  { %1408 = vmatprep.subr.bf16.mxu1 %v6589_v24  ;;  %v6623_v24 = vld [vmem:[#allocation10 + $0x3a0] ss:$16 sps:$4 sm:$0xff]   ;;  %v6637_v31 = vld [vmem:[#allocation10 + $0x364] ss:$16 sps:$4 sm:$0xff]  }
  0xe4   :  { %v6649_v39 = vld [vmem:[#allocation10 + $0x324] ss:$16 sps:$4 sm:$0xff]  }
  0xe5   :  { %1372 = vmatpush1.bf16.msra.mxu0 %v6602_v34  ;;  %v6639_v34 = vld [vmem:[#allocation10 + $0x144] ss:$16 sps:$4 sm:$0xff]  }
  0xe6   :  { %1409 = vmatpush1.bf16.msra.mxu1 %v6587_v25  ;;  %1373 = vmatprep.subr.bf16.mxu0 %v6603_v35  ;;  %v6626_v25 = vld [vmem:[#allocation10 + $0x1a0] ss:$16 sps:$4 sm:$0xff]   ;;  %v6643_v35 = vld [vmem:[#allocation10 + $0x344] ss:$16 sps:$4 sm:$0xff]  }
  0xe7   :  { %1410 = vmatprep.subr.bf16.mxu1 %v6595_v28  ;;  %v6629_v28 = vld [vmem:[#allocation10 + $0x380] ss:$16 sps:$4 sm:$0xff]  }
  0xe9   :  { %1374 = vmatpush1.bf16.msra.mxu0 %v6608_v38  ;;  %v6645_v38 = vld [vmem:[#allocation10 + $0x124] ss:$16 sps:$4 sm:$0xff]  }
  0xea   :  { %1411 = vmatpush1.bf16.msra.mxu1 %v6593_v29  ;;  %1375 = vmatprep.subr.bf16.mxu0 %v6609_v14  ;;  %v6632_v29 = vld [vmem:[#allocation10 + $0x180] ss:$16 sps:$4 sm:$0xff]  }
  0xeb   :  { %1412 = vmatprep.subr.bf16.mxu1 %v6601_v32  ;;  %v6635_v32 = vld [vmem:[#allocation10 + $0x360] ss:$16 sps:$4 sm:$0xff]  }
  0xed   :  { %1376 = vmatpush2.bf16.msra.mxu0 %v6614_v17 }
  0xee   :  { %1413 = vmatpush1.bf16.msra.mxu1 %v6599_v33  ;;  %1377 = vmatprep.subr.bf16.mxu0 %v6615_v18  ;;  %v6638_v33 = vld [vmem:[#allocation10 + $0x160] ss:$16 sps:$4 sm:$0xff]  }
  0xef   :  { %1414 = vmatprep.subr.bf16.mxu1 %v6607_v36  ;;  %v6641_v36 = vld [vmem:[#allocation10 + $0x340] ss:$16 sps:$4 sm:$0xff]  }
  0xf1   :  { %1378 = vmatpush2.bf16.msra.mxu0 %v6620_v21 }
  0xf2   :  { %1415 = vmatpush1.bf16.msra.mxu1 %v6605_v37  ;;  %1379 = vmatprep.subr.bf16.mxu0 %v6621_v22  ;;  %v6644_v37 = vld [vmem:[#allocation10 + $0x140] ss:$16 sps:$4 sm:$0xff]  }
  0xf3   :  { %1416 = vmatprep.subr.bf16.mxu1 %v6613_v15 }
  0xf5   :  { %1380 = vmatpush2.bf16.msra.mxu0 %v6626_v25 }
  0xf6   :  { %1417 = vmatpush2.bf16.msra.mxu1 %v6611_v16  ;;  %1381 = vmatprep.subr.bf16.mxu0 %v6627_v26 }
  0xf7   :  { %1418 = vmatprep.subr.bf16.mxu1 %v6619_v19 }
  0xf9   :  { %1382 = vmatpush2.bf16.msra.mxu0 %v6632_v29 }
  0xfa   :  { %1419 = vmatpush2.bf16.msra.mxu1 %v6617_v20  ;;  %1383 = vmatprep.subr.bf16.mxu0 %v6633_v30 }
  0xfb   :  { %1420 = vmatprep.subr.bf16.mxu1 %v6625_v23 }
  0xfd   :  { %1384 = vmatpush2.bf16.msra.mxu0 %v6638_v33 }
  0xfe   :  { %1421 = vmatpush2.bf16.msra.mxu1 %v6623_v24  ;;  %1385 = vmatprep.subr.bf16.mxu0 %v6639_v34 }
  0xff   :  { %1422 = vmatprep.subr.bf16.mxu1 %v6631_v27 }
 0x101   :  { %1386 = vmatpush2.bf16.msra.mxu0 %v6644_v37 }
 0x102   :  { %1423 = vmatpush2.bf16.msra.mxu1 %v6629_v28  ;;  %1387 = vmatprep.subr.bf16.mxu0 %v6645_v38 }
 0x103   :  { %1424 = vmatprep.subr.bf16.mxu1 %v6637_v31 }
 0x106   :  { %1425 = vmatpush2.bf16.msra.mxu1 %v6635_v32 }
 0x107   :  { %1426 = vmatprep.subr.bf16.mxu1 %v6643_v35 }
 0x10a   :  { %1427 = vmatpush2.bf16.msra.mxu1 %v6641_v36 }
 0x10b   :  { %1428 = vmatprep.subr.bf16.mxu1 %v6649_v39 }
 0x10e   :  { %1429 = vmatpush2.bf16.msra.mxu1 %v6647_v41 }
 0x18d   :  { %v366_v46 = vpop.f32.mrf.mxu1 }
 0x18e   :  { %v367_v49 = vadd.f32 %v366_v46, %v291_v44  ;;  %v6650_v44 = vld [vmem:[#allocation10 + $0x120] ss:$16 sps:$4 sm:$0xff]   ;;  %v6655_v46 = vld [vmem:[#allocation10 + $0x304] ss:$16 sps:$4 sm:$0xff]  }
 0x18f   :  { %v368_v48 = vpop.f32.mrf.mxu1  ;;  %1388 = vmatpush2.bf16.msra.mxu0 %v6650_v44  ;;  %1430 = vmatprep.subr.bf16.mxu1 %v6655_v46 }
 0x190   :  { %v369_v50 = vadd.f32 %v368_v48, %v295_v45  ;;  %v8056_v56 = vmax.f32 %v367_v49, 0.0  ;;  %v6651_v45 = vld [vmem:[#allocation10 + $0x104] ss:$16 sps:$4 sm:$0xff]   ;;  %v6653_v48 = vld [vmem:[#allocation10 + $0x300] ss:$16 sps:$4 sm:$0xff]  }
 0x191   :  { %v370_v52 = vpop.f32.mrf.mxu1  ;;  %v6656_v49 = vld [vmem:[#allocation10 + $0x100] ss:$16 sps:$4 sm:$0xff]   ;;  %1389 = vmatprep.subr.bf16.mxu0 %v6651_v45  ;;  %1431 = vmatpush2.bf16.msra.mxu1 %v6653_v48 }
 0x192   :  { %v8053_v53 = vmax.f32 %v369_v50, 0.0  ;;  %v425_v62 = vmul.f32 %v8056_v56, %v8056_v56  ;;  %v6659_v50 = vld [vmem:[#allocation10 + $0xec] ss:$16 sps:$4 sm:$0xff]  }
 0x193   :  { %v371_v55 = vpop.f32.mrf.mxu1  ;;  %1390 = vmatpush2.bf16.msra.mxu0 %v6656_v49  ;;  %v6662_v52 = vld [vmem:[#allocation10 + $0x2ec] ss:$16 sps:$4 sm:$0xff]  }
 0x194   :  { %v426_v59 = vmul.f32 %v8053_v53, %v8053_v53  ;;  %v418_v2 = vadd.f32 %v8053_v53, %v8056_v56  ;;  %1441 = vmatprep.subr.bf16.mxu0 %v6659_v50  ;;  %1482 = vmatprep.subr.bf16.mxu1 %v6662_v52 }
 0x195   :  { %v407_v58 = vpop.f32.mrf.mxu1 }
 0x196   :  { %v408_v60 = vadd.f32 %v407_v58, %v299_v54  ;;  %v429_v8 = vadd.f32 %v426_v59, %v425_v62 }
 0x197   :  { %v409_v61 = vpop.f32.mrf.mxu1 }
 0x198   :  { %v8063_v63 = vmax.f32 %v408_v60, 0.0  ;;  %v410_v1 = vadd.f32 %v409_v61, %v303_v57  ;;  %v7819_v57 = vmov 1966171168  }
 0x199   :  { %v411_v3 = vpop.f32.mrf.mxu1  ;;  %v464_v58 = vunpack.c.l.s4 %v7819_v57  ;;  %v6657_v57 = vld [vmem:[#allocation10 + $0xe8] ss:$16 sps:$4 sm:$0xff]  }
 0x19a   :  { %v8067_v5 = vmax.f32 %v410_v1, 0.0  ;;  %v419_v6 = vadd.f32 %v418_v2, %v8063_v63  ;;  %v427_v7 = vmul.f32 %v8063_v63, %v8063_v63  ;;  %v5898_v2 = vld.sshfl [vmem:[%s8453_s10] sm:$0x33 pattern:$0x75316420]  ;;  %s7820_s10 = smov [#allocation26]  }
 0x19b   :  { %v412_v9 = vpop.f32.mrf.mxu1  ;;  %v465_v62 = vunpack.c.0.s8 %v464_v58  ;;  %v6660_v58 = vld [vmem:[#allocation10 + $0x2e8] ss:$16 sps:$4 sm:$0xff]   ;;  %s5876_s15 = sshll.u32 %s7820_s10, 4  ;;  %s5877_s15 = int_to_ptr.vmem [resolvable:$true] %s5876_s15 }
 0x19c   :  { %v420_v10 = vadd.f32 %v419_v6, %v8067_v5  ;;  %v428_v11 = vmul.f32 %v8067_v5, %v8067_v5  ;;  %v430_v12 = vadd.f32 %v429_v8, %v427_v7  ;;  %v5899_v6 = vld.sshfl [vmem:[#allocation8] sm:$0x33 pattern:$0x75316420]  ;;  %v462_v8 = vcombine.high %v5898_v2, %v5898_v2  ;;  %s7759_s12 = scalar_lea.vmem %s5877_s15, 128  ;;  %p7764_p6 = scmp.lt.s32.totalorder %s5877_s15, %s5877_s15 }
 0x19d   :  { %v8079_v7 = vsub.s32 %v465_v62, %v8037_v40  ;;  %v6668_v62 = vld [vmem:[#allocation10 + $0x2cc] ss:$16 sps:$4 sm:$0xff]   ;;  %p7760_p5 = scmp.ne.s32.totalorder %s5877_s15, %s7759_s12  ;;  %p7765_p7 = scmp.lt.s32.totalorder %s7759_s12, %s7759_s12 }
 0x19e   :  { %421 = vadd.xlane.f32.xlu0 %v420_v10  ;;  %v431_v13 = vadd.f32 %v430_v12, %v428_v11  ;;  %v520_v10 = vcombine.high %v5899_v6, %v5899_v6 }
 0x19f   :  { %v476_v11 = vrot.slane %v462_v8, %v8079_v7  ;;  %v469_v12 = vrot.slane %v5898_v2, %v8079_v7  ;;  %v527_v14 = vrot.slane %v5899_v6, %v8079_v7  ;;  %v6666_v2 = vld [vmem:[#allocation10 + $0x2c8] ss:$16 sps:$4 sm:$0xff]   ;;  %v6674_v6 = vld [vmem:[#allocation10 + $0x2ac] ss:$16 sps:$4 sm:$0xff]   ;;  %p7766_p8 = por %p7765_p7, %p7764_p6 }
 0x1a0   :  { %v6669_v8 = vld [vmem:[#allocation10 + $0xa8] ss:$16 sps:$4 sm:$0xff]  }
 0x1a1   :  { %v478_v15 = vcombine.high %v476_v11, %v476_v11  ;;  %v477_v16 = vcombine.high %v469_v12, %v469_v12  ;;  %v535_v18 = vcombine.high %v527_v14, %v527_v14  ;;  %v487_v19 = vpack.i.b16 %v476_v11, %v476_v11  ;;  %v6680_v11 = vld [vmem:[#allocation10 + $0x28c] ss:$16 sps:$4 sm:$0xff]   ;;  %p7767_p9 = pnand %p7766_p8, %p7760_p5 }
 0x1a2   :  { %432 = vadd.xlane.f32.xlu0 %v431_v13  ;;  %v534_v13 = vrot.slane %v520_v10, %v8079_v7  ;;  %v480_v21 = vpack.i.b16 %v469_v12, %v469_v12  ;;  %v538_v28 = vpack.i.b16 %v527_v14, %v527_v14  ;;  %v6677_v10 = vld [vmem:[#allocation10 + $0x8c] ss:$16 sps:$4 sm:$0xff]   ;;  %v6675_v12 = vld [vmem:[#allocation10 + $0x88] ss:$16 sps:$4 sm:$0xff]  }
 0x1a3   :  { %v501_v20 = vpack.i.b16 %v478_v15, %v478_v15  ;;  %v494_v22 = vpack.i.b16 %v477_v16, %v477_v16  ;;  %v552_v29 = vpack.i.b16 %v535_v18, %v535_v18  ;;  %v492_v30 = vrot.slane %v487_v19, %v8040_v42  ;;  %v6683_v14 = vld [vmem:[#allocation10 + $0x6c] ss:$16 sps:$4 sm:$0xff]   ;;  %v6681_v16 = vld [vmem:[#allocation10 + $0x68] ss:$16 sps:$4 sm:$0xff]  }
 0x1a4   :  { %v536_v17 = vcombine.high %v534_v13, %v534_v13  ;;  %v545_v26 = vpack.i.b16 %v534_v13, %v534_v13  ;;  %v543_v38 = vrot.slane %v538_v28, %v8040_v42  ;;  %v6678_v13 = vld [vmem:[#allocation10 + $0x288] ss:$16 sps:$4 sm:$0xff]   ;;  %v6686_v15 = vld [vmem:[#allocation10 + $0x26c] ss:$16 sps:$4 sm:$0xff]  }
 0x1a5   :  { %v506_v33 = vrot.slane %v501_v20, %v8040_v42  ;;  %v499_v34 = vrot.slane %v494_v22, %v8040_v42  ;;  %v557_v39 = vrot.slane %v552_v29, %v8040_v42  ;;  %v6689_v18 = vld [vmem:[#allocation10 + $0x4c] ss:$16 sps:$4 sm:$0xff]   ;;  %v6690_v20 = vld [vmem:[#allocation10 + $0x248] ss:$16 sps:$4 sm:$0xff]  }
 0x1a6   :  { %v559_v27 = vpack.i.b16 %v536_v17, %v536_v17  ;;  %v6684_v17 = vld [vmem:[#allocation10 + $0x268] ss:$16 sps:$4 sm:$0xff]   ;;  %v6692_v19 = vld [vmem:[#allocation10 + $0x24c] ss:$16 sps:$4 sm:$0xff]  }
 0x1a7   :  { %v6698_v22 = vld [vmem:[#allocation10 + $0x22c] ss:$16 sps:$4 sm:$0xff]   ;;  %v6702_v28 = vld [vmem:[#allocation10 + $0x208] ss:$16 sps:$4 sm:$0xff]  }
 0x1a8   :  { %v564_v37 = vrot.slane %v559_v27, %v8040_v42  ;;  %v6699_v27 = vld [vmem:[#allocation10 + $0x8] ss:$16 sps:$4 sm:$0xff]   ;;  %v6707_v29 = vld [vmem:[#allocation10 + $0x1ec] ss:$16 sps:$4 sm:$0xff]  }
 0x227   :  { %v422_v54 = vpop.xlane.xlu0 %421 }
 0x228   :  { %v424_v55 = vmul.f32 0.001953125, %v422_v54 }
 0x22a   :  { %v435_v60 = vmul.f32 %v424_v55, %v424_v55  ;;  %v441_v40 = vsub.f32 %v8053_v53, %v424_v55  ;;  %v442_v23 = vsub.f32 %v8063_v63, %v424_v55  ;;  %v443_v24 = vsub.f32 %v8067_v5, %v424_v55 }
 0x22b   :  { %v433_v59 = vpop.xlane.xlu0 %432  ;;  %v440_v25 = vsub.f32 %v8056_v56, %v424_v55  ;;  %v485_v53 = vrot.slane %v480_v21, %v8040_v42  ;;  %v550_v56 = vrot.slane %v545_v26, %v8040_v42  ;;  %v6695_v21 = vld [vmem:[#allocation10 + $0x2c] ss:$16 sps:$4 sm:$0xff]  }
 0x22c   :  { %v434_v61 = vmul.f32 0.001953125, %v433_v59  ;;  %v445_v32 = vpack.c.bf16 %v441_v40, %v441_v40  ;;  %v447_v63 = vpack.c.bf16 %v443_v24, %v443_v24  ;;  %v446_v5 = vpack.c.bf16 %v442_v23, %v442_v23  ;;  %v6687_v40 = vld [vmem:[#allocation10 + $0x48] ss:$16 sps:$4 sm:$0xff]   ;;  %v6704_v26 = vld [vmem:[#allocation10 + $0x20c] ss:$16 sps:$4 sm:$0xff]  }
 0x22d   :  { %v444_v36 = vpack.c.bf16 %v440_v25, %v440_v25  ;;  %v6693_v23 = vld [vmem:[#allocation10 + $0x28] ss:$16 sps:$4 sm:$0xff]   ;;  %v6701_v25 = vld [vmem:[#allocation10 + $0xc] ss:$16 sps:$4 sm:$0xff]  }
 0x22e   :  { %v436_v1 = vsub.f32 %v434_v61, %v435_v60  ;;  %v6665_v61 = vld [vmem:[#allocation10 + $0xcc] ss:$16 sps:$4 sm:$0xff]   ;;  %v6696_v24 = vld [vmem:[#allocation10 + $0x228] ss:$16 sps:$4 sm:$0xff]  }
 0x230   :  { %v437_v3 = vmax.f32 %v436_v1, 0.0  ;;  %v6663_v1 = vld [vmem:[#allocation10 + $0xc8] ss:$16 sps:$4 sm:$0xff]  }
 0x232   :  { %v438_v9 = vadd.f32 1e-05, %v437_v3  ;;  %v6671_v3 = vld [vmem:[#allocation10 + $0xac] ss:$16 sps:$4 sm:$0xff]  }
 0x234   :  { %7447 = vrsqrt.f32 %v438_v9  ;;  %v6672_v9 = vld [vmem:[#allocation10 + $0x2a8] ss:$16 sps:$4 sm:$0xff]  }
 0x241   :  { %v7448_v31 = vpop.eup %7447 }
 0x242   :  { %v448_v35 = vpack.c.bf16 %v7448_v31, %v7448_v31  ;;  %v6705_v31 = vld [vmem:[#allocation10 + $0x1e8] ss:$16 sps:$4 sm:$0xff]  }
 0x244   :  { %v450_v41 = vmul.bf16 %v448_v35, %v445_v32  ;;  %v452_v44 = vmul.bf16 %v448_v35, %v447_v63  ;;  %v449_v45 = vmul.bf16 %v448_v35, %v444_v36  ;;  %v451_v46 = vmul.bf16 %v448_v35, %v446_v5  ;;  %v6708_v32 = vld [vmem:[#allocation10 + $0x3e8] ss:$16 sps:$4 sm:$0xff]   ;;  %v6719_v63 = vld [vmem:[#allocation10 + $0x1ac] ss:$16 sps:$4 sm:$0xff]  }
 0x245   :  { %v6714_v35 = vld [vmem:[#allocation10 + $0x3c8] ss:$16 sps:$4 sm:$0xff]   ;;  %v6722_v36 = vld [vmem:[#allocation10 + $0x3ac] ss:$16 sps:$4 sm:$0xff]  }
 0x246   :  { %v508_v48 = vmul.bf16 %v492_v30, %v450_v41  ;;  %v510_v49 = vmul.bf16 %v506_v33, %v452_v44  ;;  %v507_v50 = vmul.bf16 %v485_v53, %v449_v45  ;;  %v509_v52 = vmul.bf16 %v499_v34, %v451_v46  ;;  %v6710_v30 = vld [vmem:[#allocation10 + $0x3ec] ss:$16 sps:$4 sm:$0xff]   ;;  %v6711_v34 = vld [vmem:[#allocation10 + $0x1c8] ss:$16 sps:$4 sm:$0xff]  }
 0x247   :  { %v6713_v33 = vld [vmem:[#allocation10 + $0x1cc] ss:$16 sps:$4 sm:$0xff]   ;;  %v6717_v5 = vld [vmem:[#allocation10 + $0x1a8] ss:$16 sps:$4 sm:$0xff]  }
 0x248   :  { %v566_v54 = vadd.bf16 %v550_v56, %v508_v48  ;;  %v568_v55 = vadd.bf16 %v564_v37, %v510_v49  ;;  %v8097_v59 = vadd.bf16 %v543_v38, %v507_v50  ;;  %v8099_v60 = vadd.bf16 %v557_v39, %v509_v52  ;;  %v6716_v53 = vld [vmem:[#allocation10 + $0x3cc] ss:$16 sps:$4 sm:$0xff]   ;;  %v6720_v56 = vld [vmem:[#allocation10 + $0x3a8] ss:$16 sps:$4 sm:$0xff]  }
 0x249   :  { %v6725_v37 = vld [vmem:[#allocation10 + $0x18c] ss:$16 sps:$4 sm:$0xff]   ;;  %v6723_v39 = vld [vmem:[#allocation10 + $0x188] ss:$16 sps:$4 sm:$0xff]  }
 0x24a   :  { %1391 = vmatprep.mubr.bf16.mxu0 %v566_v54  ;;  %1432 = vmatprep.mubr.bf16.mxu1 %v568_v55  ;;  %v6728_v38 = vld [vmem:[#allocation10 + $0x38c] ss:$16 sps:$4 sm:$0xff]   ;;  %v6726_v41 = vld [vmem:[#allocation10 + $0x388] ss:$16 sps:$4 sm:$0xff]  }
 0x24b   :  { %1392 = vmatmul.mubr.bf16.vlgmr.msra.gmra.mxu0 %v8097_v59  ;;  %1433 = vmatmul.mubr.bf16.vlgmr.msra.gmra.mxu1 %v8099_v60  ;;  %v6731_v44 = vld [vmem:[#allocation10 + $0x16c] ss:$16 sps:$4 sm:$0xff]   ;;  %v6729_v46 = vld [vmem:[#allocation10 + $0x168] ss:$16 sps:$4 sm:$0xff]  }
 0x24c   :  { %1442 = vmatpush1.bf16.msra.mxu0 %v6657_v57  ;;  %1483 = vmatpush1.bf16.msra.mxu1 %v6660_v58  ;;  %v6734_v45 = vld [vmem:[#allocation10 + $0x36c] ss:$16 sps:$4 sm:$0xff]   ;;  %v6732_v48 = vld [vmem:[#allocation10 + $0x368] ss:$16 sps:$4 sm:$0xff]  }
 0x24d   :  { %1473 = vmatprep.mubr.bf16.mxu0 %v566_v54  ;;  %1514 = vmatprep.mubr.bf16.mxu1 %v568_v55  ;;  %v6737_v49 = vld [vmem:[#allocation10 + $0x14c] ss:$16 sps:$4 sm:$0xff]   ;;  %v6735_v52 = vld [vmem:[#allocation10 + $0x148] ss:$16 sps:$4 sm:$0xff]  }
 0x24e   :  { %1443 = vmatprep.subr.bf16.mxu0 %v6665_v61  ;;  %1484 = vmatprep.subr.bf16.mxu1 %v6668_v62  ;;  %v6740_v50 = vld [vmem:[#allocation10 + $0x34c] ss:$16 sps:$4 sm:$0xff]   ;;  %v6738_v54 = vld [vmem:[#allocation10 + $0x348] ss:$16 sps:$4 sm:$0xff]  }
 0x24f   :  { %v6743_v55 = vld [vmem:[#allocation10 + $0x12c] ss:$16 sps:$4 sm:$0xff]   ;;  %v6741_v58 = vld [vmem:[#allocation10 + $0x128] ss:$16 sps:$4 sm:$0xff]  }
 0x250   :  { %1444 = vmatpush1.bf16.msra.mxu0 %v6663_v1  ;;  %1485 = vmatpush1.bf16.msra.mxu1 %v6666_v2  ;;  %v6746_v57 = vld [vmem:[#allocation10 + $0x32c] ss:$16 sps:$4 sm:$0xff]   ;;  %v6744_v61 = vld [vmem:[#allocation10 + $0x328] ss:$16 sps:$4 sm:$0xff]  }
 0x251   :  { %1445 = vmatprep.subr.bf16.mxu0 %v6671_v3  ;;  %1486 = vmatprep.subr.bf16.mxu1 %v6674_v6  ;;  %v6749_v62 = vld [vmem:[#allocation10 + $0x10c] ss:$16 sps:$4 sm:$0xff]   ;;  %v6747_v2 = vld [vmem:[#allocation10 + $0x108] ss:$16 sps:$4 sm:$0xff]  }
 0x252   :  { %v6752_v1 = vld [vmem:[#allocation10 + $0x30c] ss:$16 sps:$4 sm:$0xff]   ;;  %v6750_v3 = vld [vmem:[#allocation10 + $0x308] ss:$16 sps:$4 sm:$0xff]  }
 0x253   :  { %v6755_v6 = vld [vmem:[#allocation13 + $0x4] ss:$16 sps:$4 sm:$0xff]  }
 0x254   :  { %1446 = vmatpush1.bf16.msra.mxu0 %v6669_v8  ;;  %1487 = vmatpush1.bf16.msra.mxu1 %v6672_v9  ;;  %v6753_v8 = vld [vmem:[#allocation13] ss:$16 sps:$4 sm:$0xff]   ;;  %v6758_v9 = vld [vmem:[#allocation13 + $0xc] ss:$16 sps:$4 sm:$0xff]  }
 0x255   :  { %1447 = vmatprep.subr.bf16.mxu0 %v6677_v10  ;;  %1488 = vmatprep.subr.bf16.mxu1 %v6680_v11  ;;  %v6756_v10 = vld [vmem:[#allocation13 + $0x8] ss:$16 sps:$4 sm:$0xff]   ;;  %v6759_v11 = vld [vmem:[#allocation16 + $0xe0] ss:$16 sps:$4 sm:$0xff]  }
 0x258   :  { %1448 = vmatpush1.bf16.msra.mxu0 %v6675_v12  ;;  %1489 = vmatpush1.bf16.msra.mxu1 %v6678_v13  ;;  %v6761_v12 = vld [vmem:[#allocation16 + $0xe4] ss:$16 sps:$4 sm:$0xff]   ;;  %v6762_v13 = vld [vmem:[#allocation16 + $0x2e0] ss:$16 sps:$4 sm:$0xff]  }
 0x259   :  { %1449 = vmatprep.subr.bf16.mxu0 %v6683_v14  ;;  %1490 = vmatprep.subr.bf16.mxu1 %v6686_v15  ;;  %v6767_v14 = vld [vmem:[#allocation16 + $0xc4] ss:$16 sps:$4 sm:$0xff]   ;;  %v6765_v15 = vld [vmem:[#allocation16 + $0xc0] ss:$16 sps:$4 sm:$0xff]  }
 0x25c   :  { %1450 = vmatpush1.bf16.msra.mxu0 %v6681_v16  ;;  %1491 = vmatpush1.bf16.msra.mxu1 %v6684_v17  ;;  %v6768_v16 = vld [vmem:[#allocation16 + $0x2c0] ss:$16 sps:$4 sm:$0xff]   ;;  %v6773_v17 = vld [vmem:[#allocation16 + $0xa4] ss:$16 sps:$4 sm:$0xff]  }
 0x25d   :  { %1451 = vmatprep.subr.bf16.mxu0 %v6689_v18  ;;  %1492 = vmatprep.subr.bf16.mxu1 %v6692_v19  ;;  %v6776_v18 = vld [vmem:[#allocation16 + $0x2a4] ss:$16 sps:$4 sm:$0xff]  }
 0x25e   :  { %v6779_v19 = vld [vmem:[#allocation16 + $0x84] ss:$16 sps:$4 sm:$0xff]  }
 0x260   :  { %1452 = vmatpush1.bf16.msra.mxu0 %v6687_v40  ;;  %1493 = vmatpush1.bf16.msra.mxu1 %v6690_v20  ;;  %v6782_v40 = vld [vmem:[#allocation16 + $0x284] ss:$16 sps:$4 sm:$0xff]   ;;  %v6777_v20 = vld [vmem:[#allocation16 + $0x80] ss:$16 sps:$4 sm:$0xff]  }
 0x261   :  { %1453 = vmatprep.subr.bf16.mxu0 %v6695_v21  ;;  %1494 = vmatprep.subr.bf16.mxu1 %v6698_v22  ;;  %v6780_v21 = vld [vmem:[#allocation16 + $0x280] ss:$16 sps:$4 sm:$0xff]   ;;  %v6785_v22 = vld [vmem:[#allocation16 + $0x64] ss:$16 sps:$4 sm:$0xff]  }
 0x264   :  { %1454 = vmatpush1.bf16.msra.mxu0 %v6693_v23  ;;  %1495 = vmatpush1.bf16.msra.mxu1 %v6696_v24  ;;  %v6788_v23 = vld [vmem:[#allocation16 + $0x264] ss:$16 sps:$4 sm:$0xff]   ;;  %v6783_v24 = vld [vmem:[#allocation16 + $0x60] ss:$16 sps:$4 sm:$0xff]  }
 0x265   :  { %1455 = vmatprep.subr.bf16.mxu0 %v6701_v25  ;;  %1496 = vmatprep.subr.bf16.mxu1 %v6704_v26  ;;  %v6786_v25 = vld [vmem:[#allocation16 + $0x260] ss:$16 sps:$4 sm:$0xff]   ;;  %v6791_v26 = vld [vmem:[#allocation16 + $0x44] ss:$16 sps:$4 sm:$0xff]  }
 0x268   :  { %1456 = vmatpush1.bf16.msra.mxu0 %v6699_v27  ;;  %1497 = vmatpush1.bf16.msra.mxu1 %v6702_v28  ;;  %v6794_v27 = vld [vmem:[#allocation16 + $0x244] ss:$16 sps:$4 sm:$0xff]   ;;  %v6789_v28 = vld [vmem:[#allocation16 + $0x40] ss:$16 sps:$4 sm:$0xff]  }
 0x269   :  { %1457 = vmatprep.subr.bf16.mxu0 %v6707_v29  ;;  %1498 = vmatprep.subr.bf16.mxu1 %v6710_v30  ;;  %v6792_v29 = vld [vmem:[#allocation16 + $0x240] ss:$16 sps:$4 sm:$0xff]   ;;  %v6797_v30 = vld [vmem:[#allocation16 + $0x24] ss:$16 sps:$4 sm:$0xff]  }
 0x26c   :  { %1458 = vmatpush2.bf16.msra.mxu0 %v6705_v31  ;;  %1499 = vmatpush2.bf16.msra.mxu1 %v6708_v32  ;;  %v6800_v31 = vld [vmem:[#allocation16 + $0x224] ss:$16 sps:$4 sm:$0xff]   ;;  %v6795_v32 = vld [vmem:[#allocation16 + $0x20] ss:$16 sps:$4 sm:$0xff]  }
 0x26d   :  { %1459 = vmatprep.subr.bf16.mxu0 %v6713_v33  ;;  %1500 = vmatprep.subr.bf16.mxu1 %v6716_v53  ;;  %v6798_v33 = vld [vmem:[#allocation16 + $0x220] ss:$16 sps:$4 sm:$0xff]   ;;  %v6803_v53 = vld [vmem:[#allocation16 + $0x4] ss:$16 sps:$4 sm:$0xff]  }
 0x270   :  { %1460 = vmatpush2.bf16.msra.mxu0 %v6711_v34  ;;  %1501 = vmatpush2.bf16.msra.mxu1 %v6714_v35  ;;  %v6806_v34 = vld [vmem:[#allocation16 + $0x204] ss:$16 sps:$4 sm:$0xff]   ;;  %v6801_v35 = vld [vmem:[#allocation16] ss:$16 sps:$4 sm:$0xff]  }
 0x271   :  { %1461 = vmatprep.subr.bf16.mxu0 %v6719_v63  ;;  %1502 = vmatprep.subr.bf16.mxu1 %v6722_v36  ;;  %v6804_v63 = vld [vmem:[#allocation16 + $0x200] ss:$16 sps:$4 sm:$0xff]   ;;  %v697_v36 = vld [vmem:[%s8454_s1] sm:$0xf] }
 0x274   :  { %1462 = vmatpush2.bf16.msra.mxu0 %v6717_v5  ;;  %1503 = vmatpush2.bf16.msra.mxu1 %v6720_v56  ;;  %v702_v5 = vrot.slane %v697_v36, %v8040_v42  ;;  %v706_v56 = vrot.slane %v697_v36, %v8043_v43 }
 0x275   :  { %1463 = vmatprep.subr.bf16.mxu0 %v6725_v37  ;;  %1504 = vmatprep.subr.bf16.mxu1 %v6728_v38 }
 0x278   :  { %1464 = vmatpush2.bf16.msra.mxu0 %v6723_v39  ;;  %1505 = vmatpush2.bf16.msra.mxu1 %v6726_v41 }
 0x279   :  { %1465 = vmatprep.subr.bf16.mxu0 %v6731_v44  ;;  %1506 = vmatprep.subr.bf16.mxu1 %v6734_v45 }
 0x27c   :  { %1466 = vmatpush2.bf16.msra.mxu0 %v6729_v46  ;;  %1507 = vmatpush2.bf16.msra.mxu1 %v6732_v48 }
 0x27d   :  { %1467 = vmatprep.subr.bf16.mxu0 %v6737_v49  ;;  %1508 = vmatprep.subr.bf16.mxu1 %v6740_v50 }
 0x280   :  { %1468 = vmatpush2.bf16.msra.mxu0 %v6735_v52  ;;  %1509 = vmatpush2.bf16.msra.mxu1 %v6738_v54 }
 0x281   :  { %1469 = vmatprep.subr.bf16.mxu0 %v6743_v55  ;;  %1510 = vmatprep.subr.bf16.mxu1 %v6746_v57  ;;  %v710_v55 = vrot.slane %v697_v36, %v8048_v47  ;;  %v714_v57 = vrot.slane %v697_v36, %v8051_v51 }
 0x284   :  { %1470 = vmatpush2.bf16.msra.mxu0 %v6741_v58  ;;  %1511 = vmatpush2.bf16.msra.mxu1 %v6744_v61 }
 0x285   :  { %1471 = vmatprep.subr.bf16.mxu0 %v6749_v62  ;;  %1512 = vmatprep.subr.bf16.mxu1 %v6752_v1 }
 0x288   :  { %1472 = vmatpush2.bf16.msra.mxu0 %v6747_v2  ;;  %1513 = vmatpush2.bf16.msra.mxu1 %v6750_v3 }
 0x289   :  { %1737 = vmatprep.subr.bf16.mxu1 %v6755_v6  ;;  %2749 = vmatprep.subr.bf16.mxu0 %v6761_v12 }
 0x28b   :  { %1474 = vmatmul.mubr.bf16.vlgmr.msra.gmra.mxu0 %v8097_v59  ;;  %1515 = vmatmul.mubr.bf16.vlgmr.msra.gmra.mxu1 %v8099_v60  ;;  %v6764_v59 = vld [vmem:[#allocation16 + $0x2e4] ss:$16 sps:$4 sm:$0xff]  }
 0x28c   :  { %1738 = vmatpush1.bf16.msra.mxu1 %v6753_v8  ;;  %1755 = vmatprep.mubr.bf16.mxu1 %v7818_v0  ;;  %v6770_v60 = vld [vmem:[#allocation16 + $0x2c4] ss:$16 sps:$4 sm:$0xff]  }
 0x28d   :  { %1778 = vmatprep.subr.bf16.mxu1 %v6758_v9  ;;  %2750 = vmatpush1.bf16.msra.mxu0 %v6759_v11 }
 0x28e   :  { %2751 = vmatprep.subr.bf16.mxu0 %v6767_v14 }
 0x291   :  { %2752 = vmatpush1.bf16.msra.mxu0 %v6765_v15 }
 0x292   :  { %2753 = vmatprep.subr.bf16.mxu0 %v6773_v17 }
 0x293   :  { %6034 = vmatmul.mubr.msk.bf16.vlgmr.msra.gmra.mxu1 %vm328_vm0, %v8030_v4 }
 0x294   :  { %1779 = vmatpush1.bf16.msra.mxu1 %v6756_v10  ;;  %1796 = vmatprep.mubr.bf16.mxu1 %v7818_v0  ;;  %v6771_v0 = vld [vmem:[#allocation16 + $0xa0] ss:$16 sps:$4 sm:$0xff]   ;;  %v1681_v10 = vld [vmem:[%s8455_s7] sm:$0xf] }
 0x295   :  { %2790 = vmatprep.subr.bf16.mxu1 %v6764_v59  ;;  %2754 = vmatpush1.bf16.msra.mxu0 %v6771_v0  ;;  %v1686_v59 = vrot.slane %v1681_v10, %v8040_v42  ;;  %v1690_v14 = vrot.slane %v1681_v10, %v8043_v43 }
 0x296   :  { %2755 = vmatprep.subr.bf16.mxu0 %v6779_v19 }
 0x299   :  { %2756 = vmatpush1.bf16.msra.mxu0 %v6777_v20  ;;  %v1698_v20 = vrot.slane %v1681_v10, %v8051_v51 }
 0x29a   :  { %2757 = vmatprep.subr.bf16.mxu0 %v6785_v22 }
 0x29b   :  { %6035 = vmatmul.mubr.msk.bf16.vlgmr.msra.gmra.mxu1 %vm328_vm0, %v8030_v4  ;;  %v6774_v4 = vld [vmem:[#allocation16 + $0x2a0] ss:$16 sps:$4 sm:$0xff]  }
 0x29c   :  { %2791 = vmatpush1.bf16.msra.mxu1 %v6762_v13 }
 0x29d   :  { %2792 = vmatprep.subr.bf16.mxu1 %v6770_v60  ;;  %2758 = vmatpush1.bf16.msra.mxu0 %v6783_v24 }
 0x29e   :  { %2759 = vmatprep.subr.bf16.mxu0 %v6791_v26 }
 0x2a0   :  { %2793 = vmatpush1.bf16.msra.mxu1 %v6768_v16 }
 0x2a1   :  { %2794 = vmatprep.subr.bf16.mxu1 %v6776_v18  ;;  %2760 = vmatpush1.bf16.msra.mxu0 %v6789_v28 }
 0x2a2   :  { %2761 = vmatprep.subr.bf16.mxu0 %v6797_v30 }
 0x2a4   :  { %2795 = vmatpush1.bf16.msra.mxu1 %v6774_v4  ;;  %v1694_v4 = vrot.slane %v1681_v10, %v8048_v47  ;;  %v6837_v10 = vld [vmem:[#allocation16 + $0x140] ss:$16 sps:$4 sm:$0xff]  }
 0x2a5   :  { %2796 = vmatprep.subr.bf16.mxu1 %v6782_v40  ;;  %2762 = vmatpush1.bf16.msra.mxu0 %v6795_v32 }
 0x2a6   :  { %2763 = vmatprep.subr.bf16.mxu0 %v6803_v53 }
 0x2a8   :  { %2797 = vmatpush1.bf16.msra.mxu1 %v6780_v21 }
 0x2a9   :  { %2798 = vmatprep.subr.bf16.mxu1 %v6788_v23  ;;  %2764 = vmatpush1.bf16.msra.mxu0 %v6801_v35 }
 0x2ac   :  { %2799 = vmatpush1.bf16.msra.mxu1 %v6786_v25 }
 0x2ad   :  { %2800 = vmatprep.subr.bf16.mxu1 %v6794_v27 }
 0x2b0   :  { %2801 = vmatpush1.bf16.msra.mxu1 %v6792_v29 }
 0x2b1   :  { %2802 = vmatprep.subr.bf16.mxu1 %v6800_v31 }
 0x2b4   :  { %2803 = vmatpush1.bf16.msra.mxu1 %v6798_v33 }
 0x2b5   :  { %2804 = vmatprep.subr.bf16.mxu1 %v6806_v34 }
 0x2b8   :  { %2805 = vmatpush1.bf16.msra.mxu1 %v6804_v63 }
 0x30b   :  { %v1393_v37 = vpop.f32.mrf.mxu0  ;;  %v1434_v38 = vpop.f32.mrf.mxu1 }
 0x30c   :  { %v1394_v39 = vadd.f32 %v1393_v37, %v702_v5  ;;  %v6809_v5 = vld [vmem:[#allocation16 + $0x1e4] ss:$16 sps:$4 sm:$0xff]   ;;  %v6807_v37 = vld [vmem:[#allocation16 + $0x1e0] ss:$16 sps:$4 sm:$0xff]  }
 0x30d   :  { %v1395_v41 = vpop.f32.mrf.mxu0  ;;  %v1436_v44 = vpop.f32.mrf.mxu1  ;;  %2765 = vmatprep.subr.bf16.mxu0 %v6809_v5 }
 0x30e   :  { %v8116_v45 = vadd.f32 %v1434_v38, %v1394_v39  ;;  %v1396_v46 = vadd.f32 %v1395_v41, %v706_v56  ;;  %v6812_v56 = vld [vmem:[#allocation16 + $0x3e4] ss:$16 sps:$4 sm:$0xff]   ;;  %v6810_v38 = vld [vmem:[#allocation16 + $0x3e0] ss:$16 sps:$4 sm:$0xff]   ;;  %2766 = vmatpush2.bf16.msra.mxu0 %v6807_v37 }
 0x30f   :  { %v1397_v48 = vpop.f32.mrf.mxu0  ;;  %v1438_v49 = vpop.f32.mrf.mxu1  ;;  %2806 = vmatprep.subr.bf16.mxu1 %v6812_v56  ;;  %v6815_v39 = vld [vmem:[#allocation16 + $0x1c4] ss:$16 sps:$4 sm:$0xff]  }
 0x310   :  { %v8118_v50 = vadd.f32 %v1436_v44, %v1396_v46  ;;  %2807 = vmatpush2.bf16.msra.mxu1 %v6810_v38  ;;  %v6818_v41 = vld [vmem:[#allocation16 + $0x3c4] ss:$16 sps:$4 sm:$0xff]   ;;  %v6813_v44 = vld [vmem:[#allocation16 + $0x1c0] ss:$16 sps:$4 sm:$0xff]   ;;  %2767 = vmatprep.subr.bf16.mxu0 %v6815_v39 }
 0x311   :  { %v1398_v52 = vpop.f32.mrf.mxu0  ;;  %v1439_v54 = vpop.f32.mrf.mxu1  ;;  %v6816_v46 = vld [vmem:[#allocation16 + $0x3c0] ss:$16 sps:$4 sm:$0xff]   ;;  %2808 = vmatprep.subr.bf16.mxu1 %v6818_v41  ;;  %v6821_v48 = vld [vmem:[#allocation16 + $0x1a4] ss:$16 sps:$4 sm:$0xff]  }
 0x312   :  { %2768 = vmatpush2.bf16.msra.mxu0 %v6813_v44  ;;  %v6824_v49 = vld [vmem:[#allocation16 + $0x3a4] ss:$16 sps:$4 sm:$0xff]   ;;  %v6819_v52 = vld [vmem:[#allocation16 + $0x1a0] ss:$16 sps:$4 sm:$0xff]  }
 0x313   :  { %v6822_v54 = vld [vmem:[#allocation16 + $0x3a0] ss:$16 sps:$4 sm:$0xff]   ;;  %2769 = vmatprep.subr.bf16.mxu0 %v6821_v48 }
 0x314   :  { %2809 = vmatpush2.bf16.msra.mxu1 %v6816_v46 }
 0x315   :  { %2810 = vmatprep.subr.bf16.mxu1 %v6824_v49 }
 0x316   :  { %2770 = vmatpush2.bf16.msra.mxu0 %v6819_v52 }
 0x318   :  { %2811 = vmatpush2.bf16.msra.mxu1 %v6822_v54 }
 0x34b   :  { %v1475_v58 = vpop.f32.mrf.mxu0  ;;  %v1516_v61 = vpop.f32.mrf.mxu1 }
 0x34c   :  { %v1476_v62 = vadd.f32 %v1475_v58, %v710_v55  ;;  %v6827_v55 = vld [vmem:[#allocation16 + $0x184] ss:$16 sps:$4 sm:$0xff]   ;;  %v6825_v58 = vld [vmem:[#allocation16 + $0x180] ss:$16 sps:$4 sm:$0xff]  }
 0x34d   :  { %v1477_v1 = vpop.f32.mrf.mxu0  ;;  %v1518_v2 = vpop.f32.mrf.mxu1  ;;  %2771 = vmatprep.subr.bf16.mxu0 %v6827_v55 }
 0x34e   :  { %v8122_v3 = vadd.f32 %v1516_v61, %v1476_v62  ;;  %v1478_v6 = vadd.f32 %v1477_v1, %v714_v57  ;;  %v6830_v57 = vld [vmem:[#allocation16 + $0x384] ss:$16 sps:$4 sm:$0xff]   ;;  %v6828_v61 = vld [vmem:[#allocation16 + $0x380] ss:$16 sps:$4 sm:$0xff]   ;;  %2772 = vmatpush2.bf16.msra.mxu0 %v6825_v58 }
 0x34f   :  { %v1479_v8 = vpop.f32.mrf.mxu0  ;;  %v1520_v9 = vpop.f32.mrf.mxu1  ;;  %2812 = vmatprep.subr.bf16.mxu1 %v6830_v57  ;;  %v6833_v62 = vld [vmem:[#allocation16 + $0x164] ss:$16 sps:$4 sm:$0xff]  }
 0x350   :  { %v8127_v11 = vadd.f32 %v1518_v2, %v1478_v6  ;;  %2813 = vmatpush2.bf16.msra.mxu1 %v6828_v61  ;;  %v6836_v1 = vld [vmem:[#allocation16 + $0x364] ss:$16 sps:$4 sm:$0xff]   ;;  %v6831_v2 = vld [vmem:[#allocation16 + $0x160] ss:$16 sps:$4 sm:$0xff]   ;;  %2773 = vmatprep.subr.bf16.mxu0 %v6833_v62 }
 0x351   :  { %v1480_v12 = vpop.f32.mrf.mxu0  ;;  %v1521_v13 = vpop.f32.mrf.mxu1  ;;  %v6834_v6 = vld [vmem:[#allocation16 + $0x360] ss:$16 sps:$4 sm:$0xff]   ;;  %2814 = vmatprep.subr.bf16.mxu1 %v6836_v1  ;;  %v6839_v8 = vld [vmem:[#allocation16 + $0x144] ss:$16 sps:$4 sm:$0xff]  }
 0x352   :  { %2774 = vmatpush2.bf16.msra.mxu0 %v6831_v2  ;;  %v6842_v9 = vld [vmem:[#allocation16 + $0x344] ss:$16 sps:$4 sm:$0xff]   ;;  %v6840_v12 = vld [vmem:[#allocation16 + $0x340] ss:$16 sps:$4 sm:$0xff]  }
 0x353   :  { %v1757_v60 = vpop.f32.mrf.mxu1  ;;  %2775 = vmatprep.subr.bf16.mxu0 %v6839_v8  ;;  %v6845_v13 = vld [vmem:[#allocation16 + $0x124] ss:$16 sps:$4 sm:$0xff]  }
 0x354   :  { %v1758_v16 = vadd.f32 %v1757_v60, %v1686_v59  ;;  %2815 = vmatpush2.bf16.msra.mxu1 %v6834_v6  ;;  %v6848_v59 = vld [vmem:[#allocation16 + $0x324] ss:$16 sps:$4 sm:$0xff]   ;;  %v6846_v60 = vld [vmem:[#allocation16 + $0x320] ss:$16 sps:$4 sm:$0xff]  }
 0x355   :  { %v1759_v15 = vpop.f32.mrf.mxu1  ;;  %2816 = vmatprep.subr.bf16.mxu1 %v6842_v9 }
 0x356   :  { %v1760_v17 = vadd.f32 %v1759_v15, %v1690_v14  ;;  %v8134_v40 = vmax.f32 %v1758_v16, 0.0  ;;  %2776 = vmatpush2.bf16.msra.mxu0 %v6837_v10  ;;  %v6843_v14 = vld [vmem:[#allocation16 + $0x120] ss:$16 sps:$4 sm:$0xff]   ;;  %v6851_v15 = vld [vmem:[#allocation16 + $0x104] ss:$16 sps:$4 sm:$0xff]  }
 0x357   :  { %v1761_v18 = vpop.f32.mrf.mxu1  ;;  %2777 = vmatprep.subr.bf16.mxu0 %v6845_v13  ;;  %v6849_v16 = vld [vmem:[#allocation16 + $0x100] ss:$16 sps:$4 sm:$0xff]  }
 0x358   :  { %v8131_v0 = vmax.f32 %v1760_v17, 0.0  ;;  %v1815_v25 = vmul.f32 %v8134_v40, %v8134_v40  ;;  %2817 = vmatpush2.bf16.msra.mxu1 %v6840_v12  ;;  %v6852_v17 = vld [vmem:[#allocation16 + $0x300] ss:$16 sps:$4 sm:$0xff]   ;;  %v6854_v18 = vld [vmem:[#allocation16 + $0x304] ss:$16 sps:$4 sm:$0xff]  }
 0x359   :  { %v1762_v19 = vpop.f32.mrf.mxu1  ;;  %2818 = vmatprep.subr.bf16.mxu1 %v6848_v59 }
 0x35a   :  { %v1816_v22 = vmul.f32 %v8131_v0, %v8131_v0  ;;  %v1809_v28 = vadd.f32 %v8131_v0, %v8134_v40  ;;  %2778 = vmatpush2.bf16.msra.mxu0 %v6843_v14  ;;  %v6860_v19 = vld [vmem:[#allocation16 + $0x2ec] ss:$16 sps:$4 sm:$0xff]  }
 0x35b   :  { %v1798_v21 = vpop.f32.mrf.mxu1  ;;  %2779 = vmatprep.subr.bf16.mxu0 %v6851_v15 }
 0x35c   :  { %v1799_v23 = vadd.f32 %v1798_v21, %v1694_v4  ;;  %v1819_v33 = vadd.f32 %v1816_v22, %v1815_v25  ;;  %2819 = vmatpush2.bf16.msra.mxu1 %v6846_v60  ;;  %v6857_v4 = vld [vmem:[#allocation16 + $0xec] ss:$16 sps:$4 sm:$0xff]  }
 0x35d   :  { %v1800_v24 = vpop.f32.mrf.mxu1  ;;  %2820 = vmatprep.subr.bf16.mxu1 %v6854_v18 }
 0x35e   :  { %v8141_v26 = vmax.f32 %v1799_v23, 0.0  ;;  %v1801_v27 = vadd.f32 %v1800_v24, %v1698_v20  ;;  %2780 = vmatpush2.bf16.msra.mxu0 %v6849_v16 }
 0x35f   :  { %v1802_v29 = vpop.f32.mrf.mxu1  ;;  %2831 = vmatprep.subr.bf16.mxu0 %v6857_v4 }
 0x360   :  { %v8145_v30 = vmax.f32 %v1801_v27, 0.0  ;;  %v1810_v31 = vadd.f32 %v1809_v28, %v8141_v26  ;;  %v1817_v32 = vmul.f32 %v8141_v26, %v8141_v26  ;;  %2821 = vmatpush2.bf16.msra.mxu1 %v6852_v17  ;;  %v6036_v27 = vld.sshfl [vmem:[%s8456_s18] sm:$0x33 pattern:$0x75316420] }
 0x361   :  { %v1803_v53 = vpop.f32.mrf.mxu1  ;;  %2872 = vmatprep.subr.bf16.mxu1 %v6860_v19  ;;  %v6037_v29 = vld.sshfl [vmem:[#allocation14] sm:$0x33 pattern:$0x75316420] }
 0x362   :  { %v1811_v34 = vadd.f32 %v1810_v31, %v8145_v30  ;;  %v1818_v35 = vmul.f32 %v8145_v30, %v8145_v30  ;;  %v1820_v63 = vadd.f32 %v1819_v33, %v1817_v32  ;;  %v1852_v31 = vcombine.high %v6036_v27, %v6036_v27 }
 0x363   :  { %v1910_v33 = vcombine.high %v6037_v29, %v6037_v29 }
 0x364   :  { %1812 = vadd.xlane.f32.xlu1 %v1811_v34  ;;  %v1821_v36 = vadd.f32 %v1820_v63, %v1818_v35  ;;  %v1866_v53 = vrot.slane %v1852_v31, %v8079_v7  ;;  %v1859_v34 = vrot.slane %v6036_v27, %v8079_v7  ;;  %v1917_v63 = vrot.slane %v6037_v29, %v8079_v7  ;;  %v6866_v27 = vld [vmem:[#allocation16 + $0x2cc] ss:$16 sps:$4 sm:$0xff]   ;;  %v6864_v29 = vld [vmem:[#allocation16 + $0x2c8] ss:$16 sps:$4 sm:$0xff]  }
 0x365   :  { %v1924_v35 = vrot.slane %v1910_v33, %v8079_v7  ;;  %v6869_v31 = vld [vmem:[#allocation16 + $0xac] ss:$16 sps:$4 sm:$0xff]   ;;  %v6867_v33 = vld [vmem:[#allocation16 + $0xa8] ss:$16 sps:$4 sm:$0xff]  }
 0x366   :  { %v1867_v5 = vcombine.high %v1859_v34, %v1859_v34  ;;  %v1925_v37 = vcombine.high %v1917_v63, %v1917_v63  ;;  %v1877_v38 = vpack.i.b16 %v1866_v53, %v1866_v53  ;;  %v1870_v44 = vpack.i.b16 %v1859_v34, %v1859_v34  ;;  %v6875_v34 = vld [vmem:[#allocation16 + $0x8c] ss:$16 sps:$4 sm:$0xff]  }
 0x367   :  { %v1926_v56 = vcombine.high %v1924_v35, %v1924_v35  ;;  %v1935_v54 = vpack.i.b16 %v1924_v35, %v1924_v35  ;;  %v1928_v57 = vpack.i.b16 %v1917_v63, %v1917_v63  ;;  %v6878_v35 = vld [vmem:[#allocation16 + $0x28c] ss:$16 sps:$4 sm:$0xff]   ;;  %v6873_v63 = vld [vmem:[#allocation16 + $0x88] ss:$16 sps:$4 sm:$0xff]  }
 0x368   :  { %1822 = vadd.xlane.f32.xlu1 %v1821_v36  ;;  %v1868_v36 = vcombine.high %v1866_v53, %v1866_v53  ;;  %v1884_v46 = vpack.i.b16 %v1867_v5, %v1867_v5  ;;  %v1942_v58 = vpack.i.b16 %v1925_v37, %v1925_v37  ;;  %v1882_v61 = vrot.slane %v1877_v38, %v8040_v42  ;;  %v6870_v53 = vld [vmem:[#allocation16 + $0x2a8] ss:$16 sps:$4 sm:$0xff]   ;;  %v6881_v5 = vld [vmem:[#allocation16 + $0x6c] ss:$16 sps:$4 sm:$0xff]  }
 0x369   :  { %v1949_v55 = vpack.i.b16 %v1926_v56, %v1926_v56  ;;  %v1933_v12 = vrot.slane %v1928_v57, %v8040_v42  ;;  %v6884_v56 = vld [vmem:[#allocation16 + $0x26c] ss:$16 sps:$4 sm:$0xff]   ;;  %v6879_v37 = vld [vmem:[#allocation16 + $0x68] ss:$16 sps:$4 sm:$0xff]  }
 0x36a   :  { %v1891_v41 = vpack.i.b16 %v1868_v36, %v1868_v36  ;;  %v1889_v6 = vrot.slane %v1884_v46, %v8040_v42  ;;  %v1947_v13 = vrot.slane %v1942_v58, %v8040_v42  ;;  %v6876_v36 = vld [vmem:[#allocation16 + $0x288] ss:$16 sps:$4 sm:$0xff]   ;;  %v6902_v57 = vld [vmem:[#allocation16 + $0x20c] ss:$16 sps:$4 sm:$0xff]  }
 0x36b   :  { %v1954_v10 = vrot.slane %v1949_v55, %v8040_v42  ;;  %v6882_v38 = vld [vmem:[#allocation16 + $0x268] ss:$16 sps:$4 sm:$0xff]   ;;  %v6899_v55 = vld [vmem:[#allocation16 + $0xc] ss:$16 sps:$4 sm:$0xff]  }
 0x36c   :  { %v1896_v2 = vrot.slane %v1891_v41, %v8040_v42  ;;  %v6890_v41 = vld [vmem:[#allocation16 + $0x24c] ss:$16 sps:$4 sm:$0xff]   ;;  %v6888_v46 = vld [vmem:[#allocation16 + $0x248] ss:$16 sps:$4 sm:$0xff]  }
 0x36d   :  { %v6897_v58 = vld [vmem:[#allocation16 + $0x8] ss:$16 sps:$4 sm:$0xff]  }
 0x3ed   :  { %v1813_v20 = vpop.xlane.xlu1 %1812 }
 0x3ee   :  { %v1814_v21 = vmul.f32 0.001953125, %v1813_v20 }
 0x3f0   :  { %v1825_v23 = vmul.f32 %v1814_v21, %v1814_v21  ;;  %v1831_v39 = vsub.f32 %v8131_v0, %v1814_v21  ;;  %v1830_v48 = vsub.f32 %v8134_v40, %v1814_v21  ;;  %v1832_v49 = vsub.f32 %v8141_v26, %v1814_v21 }
 0x3f1   :  { %v1823_v22 = vpop.xlane.xlu1 %1822  ;;  %v1833_v52 = vsub.f32 %v8145_v30, %v1814_v21  ;;  %v1875_v0 = vrot.slane %v1870_v44, %v8040_v42  ;;  %v1940_v30 = vrot.slane %v1935_v54, %v8040_v42  ;;  %v6855_v21 = vld [vmem:[#allocation16 + $0xe8] ss:$16 sps:$4 sm:$0xff]  }
 0x3f2   :  { %v1824_v24 = vmul.f32 0.001953125, %v1823_v22  ;;  %v1835_v1 = vpack.c.bf16 %v1831_v39, %v1831_v39  ;;  %v1834_v9 = vpack.c.bf16 %v1830_v48, %v1830_v48  ;;  %v1836_v26 = vpack.c.bf16 %v1832_v49, %v1832_v49  ;;  %v6858_v22 = vld [vmem:[#allocation16 + $0x2e8] ss:$16 sps:$4 sm:$0xff]   ;;  %v6887_v39 = vld [vmem:[#allocation16 + $0x4c] ss:$16 sps:$4 sm:$0xff]  }
 0x3f3   :  { %v1837_v40 = vpack.c.bf16 %v1833_v52, %v1833_v52  ;;  %v6885_v44 = vld [vmem:[#allocation16 + $0x48] ss:$16 sps:$4 sm:$0xff]   ;;  %v6893_v48 = vld [vmem:[#allocation16 + $0x2c] ss:$16 sps:$4 sm:$0xff]  }
 0x3f4   :  { %v1826_v25 = vsub.f32 %v1824_v24, %v1825_v23  ;;  %v6896_v49 = vld [vmem:[#allocation16 + $0x22c] ss:$16 sps:$4 sm:$0xff]   ;;  %v6891_v52 = vld [vmem:[#allocation16 + $0x28] ss:$16 sps:$4 sm:$0xff]  }
 0x3f5   :  { %v6894_v54 = vld [vmem:[#allocation16 + $0x228] ss:$16 sps:$4 sm:$0xff]  }
 0x3f6   :  { %v1827_v28 = vmax.f32 %v1826_v25, 0.0  ;;  %v6863_v25 = vld [vmem:[#allocation16 + $0xcc] ss:$16 sps:$4 sm:$0xff]  }
 0x3f8   :  { %v1828_v32 = vadd.f32 1e-05, %v1827_v28  ;;  %v6861_v28 = vld [vmem:[#allocation16 + $0xc8] ss:$16 sps:$4 sm:$0xff]  }
 0x3fa   :  { %7449 = vrsqrt.f32 %v1828_v32  ;;  %v6872_v32 = vld [vmem:[#allocation16 + $0x2ac] ss:$16 sps:$4 sm:$0xff]  }
 0x407   :  { %v7450_v62 = vpop.eup %7449 }
 0x408   :  { %v1838_v8 = vpack.c.bf16 %v7450_v62, %v7450_v62  ;;  %v6905_v62 = vld [vmem:[#allocation16 + $0x1ec] ss:$16 sps:$4 sm:$0xff]  }
 0x40a   :  { %v1840_v59 = vmul.bf16 %v1838_v8, %v1835_v1  ;;  %v1842_v14 = vmul.bf16 %v1838_v8, %v1837_v40  ;;  %v1839_v60 = vmul.bf16 %v1838_v8, %v1834_v9  ;;  %v1841_v15 = vmul.bf16 %v1838_v8, %v1836_v26  ;;  %v6908_v1 = vld [vmem:[#allocation16 + $0x3ec] ss:$16 sps:$4 sm:$0xff]   ;;  %v6909_v40 = vld [vmem:[#allocation16 + $0x1c8] ss:$16 sps:$4 sm:$0xff]  }
 0x40b   :  { %v6914_v8 = vld [vmem:[#allocation16 + $0x3cc] ss:$16 sps:$4 sm:$0xff]   ;;  %v6912_v9 = vld [vmem:[#allocation16 + $0x3c8] ss:$16 sps:$4 sm:$0xff]  }
 0x40c   :  { %v1898_v16 = vmul.bf16 %v1882_v61, %v1840_v59  ;;  %v1900_v17 = vmul.bf16 %v1896_v2, %v1842_v14  ;;  %v1897_v18 = vmul.bf16 %v1875_v0, %v1839_v60  ;;  %v1899_v4 = vmul.bf16 %v1889_v6, %v1841_v15  ;;  %v6900_v61 = vld [vmem:[#allocation16 + $0x208] ss:$16 sps:$4 sm:$0xff]   ;;  %v6911_v6 = vld [vmem:[#allocation16 + $0x1cc] ss:$16 sps:$4 sm:$0xff]  }
 0x40d   :  { %v6903_v2 = vld [vmem:[#allocation16 + $0x1e8] ss:$16 sps:$4 sm:$0xff]   ;;  %v6917_v26 = vld [vmem:[#allocation16 + $0x1ac] ss:$16 sps:$4 sm:$0xff]  }
 0x40e   :  { %v1956_v19 = vadd.bf16 %v1940_v30, %v1898_v16  ;;  %v1958_v20 = vadd.bf16 %v1954_v10, %v1900_v17  ;;  %v8172_v23 = vadd.bf16 %v1933_v12, %v1897_v18  ;;  %v8174_v24 = vadd.bf16 %v1947_v13, %v1899_v4  ;;  %v6906_v0 = vld [vmem:[#allocation16 + $0x3e8] ss:$16 sps:$4 sm:$0xff]   ;;  %v6920_v30 = vld [vmem:[#allocation16 + $0x3ac] ss:$16 sps:$4 sm:$0xff]  }
 0x40f   :  { %v6915_v10 = vld [vmem:[#allocation16 + $0x1a8] ss:$16 sps:$4 sm:$0xff]   ;;  %v6923_v13 = vld [vmem:[#allocation16 + $0x18c] ss:$16 sps:$4 sm:$0xff]  }
 0x410   :  { %2781 = vmatprep.mubr.bf16.mxu0 %v1956_v19  ;;  %2822 = vmatprep.mubr.bf16.mxu1 %v1958_v20  ;;  %v6918_v12 = vld [vmem:[#allocation16 + $0x3a8] ss:$16 sps:$4 sm:$0xff]   ;;  %v6926_v59 = vld [vmem:[#allocation16 + $0x38c] ss:$16 sps:$4 sm:$0xff]  }
 0x411   :  { %2782 = vmatmul.mubr.bf16.vlgmr.msra.gmra.mxu0 %v8172_v23  ;;  %2823 = vmatmul.mubr.bf16.vlgmr.msra.gmra.mxu1 %v8174_v24  ;;  %v6921_v14 = vld [vmem:[#allocation16 + $0x188] ss:$16 sps:$4 sm:$0xff]   ;;  %v6929_v15 = vld [vmem:[#allocation16 + $0x16c] ss:$16 sps:$4 sm:$0xff]  }
 0x412   :  { %2832 = vmatpush1.bf16.msra.mxu0 %v6855_v21  ;;  %2873 = vmatpush1.bf16.msra.mxu1 %v6858_v22  ;;  %v6924_v60 = vld [vmem:[#allocation16 + $0x388] ss:$16 sps:$4 sm:$0xff]   ;;  %v6932_v16 = vld [vmem:[#allocation16 + $0x36c] ss:$16 sps:$4 sm:$0xff]  }
 0x413   :  { %2863 = vmatprep.mubr.bf16.mxu0 %v1956_v19  ;;  %2904 = vmatprep.mubr.bf16.mxu1 %v1958_v20  ;;  %v6927_v17 = vld [vmem:[#allocation16 + $0x168] ss:$16 sps:$4 sm:$0xff]   ;;  %v6935_v4 = vld [vmem:[#allocation16 + $0x14c] ss:$16 sps:$4 sm:$0xff]  }
 0x414   :  { %2833 = vmatprep.subr.bf16.mxu0 %v6863_v25  ;;  %2874 = vmatprep.subr.bf16.mxu1 %v6866_v27  ;;  %v6930_v18 = vld [vmem:[#allocation16 + $0x368] ss:$16 sps:$4 sm:$0xff]   ;;  %v6938_v19 = vld [vmem:[#allocation16 + $0x34c] ss:$16 sps:$4 sm:$0xff]  }
 0x415   :  { %v6933_v20 = vld [vmem:[#allocation16 + $0x148] ss:$16 sps:$4 sm:$0xff]   ;;  %v6941_v22 = vld [vmem:[#allocation16 + $0x12c] ss:$16 sps:$4 sm:$0xff]  }
 0x416   :  { %2834 = vmatpush1.bf16.msra.mxu0 %v6861_v28  ;;  %2875 = vmatpush1.bf16.msra.mxu1 %v6864_v29  ;;  %v6936_v21 = vld [vmem:[#allocation16 + $0x348] ss:$16 sps:$4 sm:$0xff]   ;;  %v6944_v25 = vld [vmem:[#allocation16 + $0x32c] ss:$16 sps:$4 sm:$0xff]  }
 0x417   :  { %2835 = vmatprep.subr.bf16.mxu0 %v6869_v31  ;;  %2876 = vmatprep.subr.bf16.mxu1 %v6872_v32  ;;  %v6939_v27 = vld [vmem:[#allocation16 + $0x128] ss:$16 sps:$4 sm:$0xff]   ;;  %v6947_v29 = vld [vmem:[#allocation16 + $0x10c] ss:$16 sps:$4 sm:$0xff]  }
 0x418   :  { %v6942_v28 = vld [vmem:[#allocation16 + $0x328] ss:$16 sps:$4 sm:$0xff]   ;;  %v6950_v31 = vld [vmem:[#allocation16 + $0x30c] ss:$16 sps:$4 sm:$0xff]  }
 0x419   :  { %v6945_v32 = vld [vmem:[#allocation16 + $0x108] ss:$16 sps:$4 sm:$0xff]  }
 0x41a   :  { %2836 = vmatpush1.bf16.msra.mxu0 %v6867_v33  ;;  %2877 = vmatpush1.bf16.msra.mxu1 %v6870_v53  ;;  %v6948_v33 = vld [vmem:[#allocation16 + $0x308] ss:$16 sps:$4 sm:$0xff]   ;;  %v6951_v53 = vld [vmem:[#allocation20 + $0xe0] ss:$16 sps:$4 sm:$0xff]  }
 0x41b   :  { %2837 = vmatprep.subr.bf16.mxu0 %v6875_v34  ;;  %2878 = vmatprep.subr.bf16.mxu1 %v6878_v35  ;;  %v6953_v34 = vld [vmem:[#allocation20 + $0xe4] ss:$16 sps:$4 sm:$0xff]   ;;  %v6954_v35 = vld [vmem:[#allocation20 + $0x2e0] ss:$16 sps:$4 sm:$0xff]  }
 0x41e   :  { %2838 = vmatpush1.bf16.msra.mxu0 %v6873_v63  ;;  %2879 = vmatpush1.bf16.msra.mxu1 %v6876_v36  ;;  %v6956_v63 = vld [vmem:[#allocation20 + $0x2e4] ss:$16 sps:$4 sm:$0xff]  }
 0x41f   :  { %2839 = vmatprep.subr.bf16.mxu0 %v6881_v5  ;;  %2880 = vmatprep.subr.bf16.mxu1 %v6884_v56  ;;  %v6959_v36 = vld [vmem:[#allocation20 + $0xc4] ss:$16 sps:$4 sm:$0xff]   ;;  %v6957_v56 = vld [vmem:[#allocation20 + $0xc0] ss:$16 sps:$4 sm:$0xff]  }
 0x420   :  { %v6962_v5 = vld [vmem:[#allocation20 + $0x2c4] ss:$16 sps:$4 sm:$0xff]  }
 0x422   :  { %2840 = vmatpush1.bf16.msra.mxu0 %v6879_v37  ;;  %2881 = vmatpush1.bf16.msra.mxu1 %v6882_v38  ;;  %v6960_v37 = vld [vmem:[#allocation20 + $0x2c0] ss:$16 sps:$4 sm:$0xff]   ;;  %v6965_v38 = vld [vmem:[#allocation20 + $0xa4] ss:$16 sps:$4 sm:$0xff]  }
 0x423   :  { %2841 = vmatprep.subr.bf16.mxu0 %v6887_v39  ;;  %2882 = vmatprep.subr.bf16.mxu1 %v6890_v41  ;;  %v6968_v39 = vld [vmem:[#allocation20 + $0x2a4] ss:$16 sps:$4 sm:$0xff]  }
 0x424   :  { %v6971_v41 = vld [vmem:[#allocation20 + $0x84] ss:$16 sps:$4 sm:$0xff]  }
 0x426   :  { %2842 = vmatpush1.bf16.msra.mxu0 %v6885_v44  ;;  %2883 = vmatpush1.bf16.msra.mxu1 %v6888_v46  ;;  %v6974_v44 = vld [vmem:[#allocation20 + $0x284] ss:$16 sps:$4 sm:$0xff]   ;;  %v6969_v46 = vld [vmem:[#allocation20 + $0x80] ss:$16 sps:$4 sm:$0xff]  }
 0x427   :  { %2843 = vmatprep.subr.bf16.mxu0 %v6893_v48  ;;  %2884 = vmatprep.subr.bf16.mxu1 %v6896_v49  ;;  %v6972_v48 = vld [vmem:[#allocation20 + $0x280] ss:$16 sps:$4 sm:$0xff]   ;;  %v6977_v49 = vld [vmem:[#allocation20 + $0x64] ss:$16 sps:$4 sm:$0xff]  }
 0x42a   :  { %2844 = vmatpush1.bf16.msra.mxu0 %v6891_v52  ;;  %2885 = vmatpush1.bf16.msra.mxu1 %v6894_v54  ;;  %v6980_v52 = vld [vmem:[#allocation20 + $0x264] ss:$16 sps:$4 sm:$0xff]   ;;  %v6975_v54 = vld [vmem:[#allocation20 + $0x60] ss:$16 sps:$4 sm:$0xff]  }
 0x42b   :  { %2845 = vmatprep.subr.bf16.mxu0 %v6899_v55  ;;  %2886 = vmatprep.subr.bf16.mxu1 %v6902_v57  ;;  %v6978_v55 = vld [vmem:[#allocation20 + $0x260] ss:$16 sps:$4 sm:$0xff]   ;;  %v6983_v57 = vld [vmem:[#allocation20 + $0x44] ss:$16 sps:$4 sm:$0xff]  }
 0x42e   :  { %2846 = vmatpush1.bf16.msra.mxu0 %v6897_v58  ;;  %2887 = vmatpush1.bf16.msra.mxu1 %v6900_v61  ;;  %v6986_v58 = vld [vmem:[#allocation20 + $0x244] ss:$16 sps:$4 sm:$0xff]   ;;  %v6981_v61 = vld [vmem:[#allocation20 + $0x40] ss:$16 sps:$4 sm:$0xff]  }
 0x42f   :  { %2847 = vmatprep.subr.bf16.mxu0 %v6905_v62  ;;  %2888 = vmatprep.subr.bf16.mxu1 %v6908_v1  ;;  %v6984_v62 = vld [vmem:[#allocation20 + $0x240] ss:$16 sps:$4 sm:$0xff]   ;;  %v6989_v1 = vld [vmem:[#allocation20 + $0x24] ss:$16 sps:$4 sm:$0xff]  }
 0x432   :  { %2848 = vmatpush2.bf16.msra.mxu0 %v6903_v2  ;;  %2889 = vmatpush2.bf16.msra.mxu1 %v6906_v0  ;;  %v6992_v2 = vld [vmem:[#allocation20 + $0x224] ss:$16 sps:$4 sm:$0xff]   ;;  %v6987_v0 = vld [vmem:[#allocation20 + $0x20] ss:$16 sps:$4 sm:$0xff]  }
 0x433   :  { %2849 = vmatprep.subr.bf16.mxu0 %v6911_v6  ;;  %2890 = vmatprep.subr.bf16.mxu1 %v6914_v8  ;;  %v6990_v6 = vld [vmem:[#allocation20 + $0x220] ss:$16 sps:$4 sm:$0xff]   ;;  %v6995_v8 = vld [vmem:[#allocation20 + $0x4] ss:$16 sps:$4 sm:$0xff]  }
 0x436   :  { %2850 = vmatpush2.bf16.msra.mxu0 %v6909_v40  ;;  %2891 = vmatpush2.bf16.msra.mxu1 %v6912_v9  ;;  %v6998_v40 = vld [vmem:[#allocation20 + $0x204] ss:$16 sps:$4 sm:$0xff]   ;;  %v6993_v9 = vld [vmem:[#allocation20] ss:$16 sps:$4 sm:$0xff]  }
 0x437   :  { %2851 = vmatprep.subr.bf16.mxu0 %v6917_v26  ;;  %2892 = vmatprep.subr.bf16.mxu1 %v6920_v30  ;;  %v6996_v26 = vld [vmem:[#allocation20 + $0x200] ss:$16 sps:$4 sm:$0xff]  }
 0x43a   :  { %2852 = vmatpush2.bf16.msra.mxu0 %v6915_v10  ;;  %2893 = vmatpush2.bf16.msra.mxu1 %v6918_v12 }
 0x43b   :  { %2853 = vmatprep.subr.bf16.mxu0 %v6923_v13  ;;  %2894 = vmatprep.subr.bf16.mxu1 %v6926_v59 }
 0x43e   :  { %2854 = vmatpush2.bf16.msra.mxu0 %v6921_v14  ;;  %2895 = vmatpush2.bf16.msra.mxu1 %v6924_v60 }
 0x43f   :  { %2855 = vmatprep.subr.bf16.mxu0 %v6929_v15  ;;  %2896 = vmatprep.subr.bf16.mxu1 %v6932_v16  ;;  %v2087_v16 = vld [vmem:[%s8414_s14] sm:$0xf] }
 0x442   :  { %2856 = vmatpush2.bf16.msra.mxu0 %v6927_v17  ;;  %2897 = vmatpush2.bf16.msra.mxu1 %v6930_v18  ;;  %v2096_v17 = vrot.slane %v2087_v16, %v8043_v43  ;;  %v2092_v18 = vrot.slane %v2087_v16, %v8040_v42 }
 0x443   :  { %2857 = vmatprep.subr.bf16.mxu0 %v6935_v4  ;;  %2898 = vmatprep.subr.bf16.mxu1 %v6938_v19 }
 0x446   :  { %2858 = vmatpush2.bf16.msra.mxu0 %v6933_v20  ;;  %2899 = vmatpush2.bf16.msra.mxu1 %v6936_v21 }
 0x447   :  { %2859 = vmatprep.subr.bf16.mxu0 %v6941_v22  ;;  %2900 = vmatprep.subr.bf16.mxu1 %v6944_v25  ;;  %v2100_v22 = vrot.slane %v2087_v16, %v8048_v47 }
 0x44a   :  { %2860 = vmatpush2.bf16.msra.mxu0 %v6939_v27  ;;  %2901 = vmatpush2.bf16.msra.mxu1 %v6942_v28  ;;  %v2104_v27 = vrot.slane %v2087_v16, %v8051_v51  ;;  %v8190_v28 = vmax.f32 %v8118_v50, 0.0  ;;  %v7011_v16 = vld [vmem:[#allocation20 + $0x1a0] ss:$16 sps:$4 sm:$0xff]  }
 0x44b   :  { %2861 = vmatprep.subr.bf16.mxu0 %v6947_v29  ;;  %2902 = vmatprep.subr.bf16.mxu1 %v6950_v31 }
 0x44c   :  { %v1534_v50 = vmul.f32 %v8190_v28, %v8190_v28 }
 0x44e   :  { %2862 = vmatpush2.bf16.msra.mxu0 %v6945_v32  ;;  %2903 = vmatpush2.bf16.msra.mxu1 %v6948_v33 }
 0x44f   :  { %3963 = vmatprep.subr.bf16.mxu0 %v6953_v34  ;;  %4004 = vmatprep.subr.bf16.mxu1 %v6956_v63  ;;  %v8198_v34 = vmax.f32 %v8122_v3, 0.0 }
 0x451   :  { %2864 = vmatmul.mubr.bf16.vlgmr.msra.gmra.mxu0 %v8172_v23  ;;  %2905 = vmatmul.mubr.bf16.vlgmr.msra.gmra.mxu1 %v8174_v24  ;;  %v6963_v23 = vld [vmem:[#allocation20 + $0xa0] ss:$16 sps:$4 sm:$0xff]  }
 0x452   :  { %3964 = vmatpush1.bf16.msra.mxu0 %v6951_v53  ;;  %4005 = vmatpush1.bf16.msra.mxu1 %v6954_v35  ;;  %v6966_v24 = vld [vmem:[#allocation20 + $0x2a0] ss:$16 sps:$4 sm:$0xff]   ;;  %v8195_v53 = vmax.f32 %v8116_v45, 0.0 }
 0x453   :  { %3965 = vmatprep.subr.bf16.mxu0 %v6959_v36  ;;  %4006 = vmatprep.subr.bf16.mxu1 %v6962_v5 }
 0x456   :  { %3966 = vmatpush1.bf16.msra.mxu0 %v6957_v56  ;;  %4007 = vmatpush1.bf16.msra.mxu1 %v6960_v37 }
 0x457   :  { %3967 = vmatprep.subr.bf16.mxu0 %v6965_v38  ;;  %4008 = vmatprep.subr.bf16.mxu1 %v6968_v39 }
 0x45a   :  { %3968 = vmatpush1.bf16.msra.mxu0 %v6963_v23  ;;  %4009 = vmatpush1.bf16.msra.mxu1 %v6966_v24  ;;  %v1533_v24 = vmul.f32 %v8195_v53, %v8195_v53 }
 0x45b   :  { %3969 = vmatprep.subr.bf16.mxu0 %v6971_v41  ;;  %4010 = vmatprep.subr.bf16.mxu1 %v6974_v44  ;;  %v8213_v41 = vmax.f32 %v8127_v11, 0.0 }
 0x45e   :  { %3970 = vmatpush1.bf16.msra.mxu0 %v6969_v46  ;;  %4011 = vmatpush1.bf16.msra.mxu1 %v6972_v48  ;;  %v1527_v48 = vadd.f32 %v8190_v28, %v8195_v53 }
 0x45f   :  { %3971 = vmatprep.subr.bf16.mxu0 %v6977_v49  ;;  %4012 = vmatprep.subr.bf16.mxu1 %v6980_v52  ;;  %v1535_v49 = vmul.f32 %v8198_v34, %v8198_v34 }
 0x462   :  { %3972 = vmatpush1.bf16.msra.mxu0 %v6975_v54  ;;  %4013 = vmatpush1.bf16.msra.mxu1 %v6978_v55 }
 0x463   :  { %3973 = vmatprep.subr.bf16.mxu0 %v6983_v57  ;;  %4014 = vmatprep.subr.bf16.mxu1 %v6986_v58  ;;  %v1537_v58 = vadd.f32 %v1534_v50, %v1533_v24  ;;  %v7038_v50 = vld [vmem:[#allocation20 + $0x320] ss:$16 sps:$4 sm:$0xff]   ;;  %v7052_v24 = vld [vmem:[#allocation20 + $0x2ec] ss:$16 sps:$4 sm:$0xff]  }
 0x466   :  { %3974 = vmatpush1.bf16.msra.mxu0 %v6981_v61  ;;  %4015 = vmatpush1.bf16.msra.mxu1 %v6984_v62 }
 0x467   :  { %3975 = vmatprep.subr.bf16.mxu0 %v6989_v1  ;;  %4016 = vmatprep.subr.bf16.mxu1 %v6992_v2  ;;  %v1528_v1 = vadd.f32 %v1527_v48, %v8198_v34 }
 0x46a   :  { %3976 = vmatpush1.bf16.msra.mxu0 %v6987_v0  ;;  %4017 = vmatpush1.bf16.msra.mxu1 %v6990_v6  ;;  %v1536_v0 = vmul.f32 %v8213_v41, %v8213_v41  ;;  %v1538_v6 = vadd.f32 %v1537_v58, %v1535_v49  ;;  %v6167_v58 = vld.sshfl [vmem:[%s8416_s16] sm:$0x33 pattern:$0x75316420] }
 0x46b   :  { %3977 = vmatprep.subr.bf16.mxu0 %v6995_v8  ;;  %4018 = vmatprep.subr.bf16.mxu1 %v6998_v40  ;;  %v1529_v8 = vadd.f32 %v1528_v1, %v8213_v41 }
 0x46c   :  { %v1539_v40 = vadd.f32 %v1538_v6, %v1536_v0  ;;  %v3018_v6 = vcombine.high %v6167_v58, %v6167_v58 }
 0x46e   :  { %3978 = vmatpush1.bf16.msra.mxu0 %v6993_v9  ;;  %4019 = vmatpush1.bf16.msra.mxu1 %v6996_v26  ;;  %v7001_v9 = vld [vmem:[#allocation20 + $0x1e4] ss:$16 sps:$4 sm:$0xff]  }
 0x46f   :  { %v7004_v26 = vld [vmem:[#allocation20 + $0x3e4] ss:$16 sps:$4 sm:$0xff]   ;;  %3979 = vmatprep.subr.bf16.mxu0 %v7001_v9 }
 0x470   :  { %4020 = vmatprep.subr.bf16.mxu1 %v7004_v26 }
 0x4d1   :  { %v2783_v30 = vpop.f32.mrf.mxu0  ;;  %v2824_v10 = vpop.f32.mrf.mxu1 }
 0x4d2   :  { %v2784_v19 = vadd.f32 %v2783_v30, %v2092_v18  ;;  %v6999_v30 = vld [vmem:[#allocation20 + $0x1e0] ss:$16 sps:$4 sm:$0xff]   ;;  %v7019_v18 = vld [vmem:[#allocation20 + $0x184] ss:$16 sps:$4 sm:$0xff]  }
 0x4d3   :  { %v2785_v12 = vpop.f32.mrf.mxu0  ;;  %v2826_v13 = vpop.f32.mrf.mxu1  ;;  %3980 = vmatpush2.bf16.msra.mxu0 %v6999_v30  ;;  %v3032_v30 = vrot.slane %v3018_v6, %v8079_v7 }
 0x4d4   :  { %v2786_v4 = vadd.f32 %v2785_v12, %v2096_v17  ;;  %v2825_v21 = vadd.f32 %v2824_v10, %v2784_v19  ;;  %v7002_v10 = vld [vmem:[#allocation20 + $0x3e0] ss:$16 sps:$4 sm:$0xff]   ;;  %v7007_v12 = vld [vmem:[#allocation20 + $0x1c4] ss:$16 sps:$4 sm:$0xff]  }
 0x4d5   :  { %v2787_v59 = vpop.f32.mrf.mxu0  ;;  %v2828_v14 = vpop.f32.mrf.mxu1  ;;  %4021 = vmatpush2.bf16.msra.mxu1 %v7002_v10  ;;  %3981 = vmatprep.subr.bf16.mxu0 %v7007_v12  ;;  %v7014_v17 = vld [vmem:[#allocation20 + $0x3a0] ss:$16 sps:$4 sm:$0xff]  }
 0x4d6   :  { %v2827_v20 = vadd.f32 %v2826_v13, %v2786_v4  ;;  %v8192_v32 = vmax.f32 %v2825_v21, 0.0  ;;  %v7010_v13 = vld [vmem:[#allocation20 + $0x3c4] ss:$16 sps:$4 sm:$0xff]   ;;  %v7005_v59 = vld [vmem:[#allocation20 + $0x1c0] ss:$16 sps:$4 sm:$0xff]  }
 0x4d7   :  { %v2788_v60 = vpop.f32.mrf.mxu0  ;;  %v2829_v15 = vpop.f32.mrf.mxu1  ;;  %v7008_v14 = vld [vmem:[#allocation20 + $0x3c0] ss:$16 sps:$4 sm:$0xff]   ;;  %4022 = vmatprep.subr.bf16.mxu1 %v7010_v13  ;;  %3982 = vmatpush2.bf16.msra.mxu0 %v7005_v59  ;;  %v7022_v4 = vld [vmem:[#allocation20 + $0x384] ss:$16 sps:$4 sm:$0xff]  }
 0x4d8   :  { %v8186_v25 = vmax.f32 %v2827_v20, 0.0  ;;  %v2923_v39 = vmul.f32 %v8192_v32, %v8192_v32  ;;  %v7013_v60 = vld [vmem:[#allocation20 + $0x1a4] ss:$16 sps:$4 sm:$0xff]   ;;  %v7017_v19 = vld [vmem:[#allocation20 + $0x180] ss:$16 sps:$4 sm:$0xff]  }
 0x4d9   :  { %4023 = vmatpush2.bf16.msra.mxu1 %v7008_v14  ;;  %v7016_v15 = vld [vmem:[#allocation20 + $0x3a4] ss:$16 sps:$4 sm:$0xff]   ;;  %3983 = vmatprep.subr.bf16.mxu0 %v7013_v60  ;;  %v7020_v20 = vld [vmem:[#allocation20 + $0x380] ss:$16 sps:$4 sm:$0xff]   ;;  %v3025_v14 = vrot.slane %v6167_v58, %v8079_v7  ;;  %v3034_v60 = vcombine.high %v3032_v30, %v3032_v30 }
 0x4da   :  { %v2924_v36 = vmul.f32 %v8186_v25, %v8186_v25  ;;  %v2917_v3 = vadd.f32 %v8186_v25, %v8192_v32  ;;  %4024 = vmatprep.subr.bf16.mxu1 %v7016_v15  ;;  %v7025_v21 = vld [vmem:[#allocation20 + $0x164] ss:$16 sps:$4 sm:$0xff]  }
 0x4db   :  { %3984 = vmatpush2.bf16.msra.mxu0 %v7011_v16  ;;  %v8245_v16 = vld.sshfl [vmem:[%s8457_s2] sm:$0x33 pattern:$0x75316420] }
 0x4dc   :  { %v2927_v57 = vadd.f32 %v2924_v36, %v2923_v39  ;;  %3985 = vmatprep.subr.bf16.mxu0 %v7019_v18  ;;  %v7037_v36 = vld [vmem:[#allocation20 + $0x124] ss:$16 sps:$4 sm:$0xff]   ;;  %v7041_v39 = vld [vmem:[#allocation20 + $0x100] ss:$16 sps:$4 sm:$0xff]  }
 0x4dd   :  { %4025 = vmatpush2.bf16.msra.mxu1 %v7014_v17 }
 0x4de   :  { %4026 = vmatprep.subr.bf16.mxu1 %v7022_v4  ;;  %v3033_v4 = vcombine.high %v3025_v14, %v3025_v14 }
 0x4df   :  { %3986 = vmatpush2.bf16.msra.mxu0 %v7017_v19  ;;  %v1577_v19 = vrot.slane %v8245_v16, %v8079_v7 }
 0x4e0   :  { %3987 = vmatprep.subr.bf16.mxu0 %v7025_v21  ;;  %v3057_v21 = vpack.i.b16 %v3034_v60, %v3034_v60 }
 0x4e1   :  { %4027 = vmatpush2.bf16.msra.mxu1 %v7020_v20  ;;  %v3043_v20 = vpack.i.b16 %v3032_v30, %v3032_v30 }
 0x511   :  { %v2865_v29 = vpop.f32.mrf.mxu0  ;;  %v2906_v31 = vpop.f32.mrf.mxu1 }
 0x512   :  { %v2866_v33 = vadd.f32 %v2865_v29, %v2100_v22  ;;  %v7028_v22 = vld [vmem:[#allocation20 + $0x364] ss:$16 sps:$4 sm:$0xff]   ;;  %v7026_v29 = vld [vmem:[#allocation20 + $0x360] ss:$16 sps:$4 sm:$0xff]  }
 0x513   :  { %v2867_v35 = vpop.f32.mrf.mxu0  ;;  %v2908_v63 = vpop.f32.mrf.mxu1  ;;  %4028 = vmatprep.subr.bf16.mxu1 %v7028_v22 }
 0x514   :  { %v2907_v5 = vadd.f32 %v2906_v31, %v2866_v33  ;;  %v2868_v56 = vadd.f32 %v2867_v35, %v2104_v27  ;;  %v7023_v27 = vld [vmem:[#allocation20 + $0x160] ss:$16 sps:$4 sm:$0xff]   ;;  %4029 = vmatpush2.bf16.msra.mxu1 %v7026_v29  ;;  %v7031_v31 = vld [vmem:[#allocation20 + $0x144] ss:$16 sps:$4 sm:$0xff]  }
 0x515   :  { %v2869_v37 = vpop.f32.mrf.mxu0  ;;  %v2910_v38 = vpop.f32.mrf.mxu1  ;;  %3988 = vmatpush2.bf16.msra.mxu0 %v7023_v27  ;;  %v7034_v33 = vld [vmem:[#allocation20 + $0x344] ss:$16 sps:$4 sm:$0xff]   ;;  %v7029_v35 = vld [vmem:[#allocation20 + $0x140] ss:$16 sps:$4 sm:$0xff]  }
 0x516   :  { %v8206_v45 = vmax.f32 %v2907_v5, 0.0  ;;  %v2909_v23 = vadd.f32 %v2908_v63, %v2868_v56  ;;  %v7032_v63 = vld [vmem:[#allocation20 + $0x340] ss:$16 sps:$4 sm:$0xff]   ;;  %3989 = vmatprep.subr.bf16.mxu0 %v7031_v31  ;;  %4030 = vmatprep.subr.bf16.mxu1 %v7034_v33  ;;  %v7040_v5 = vld [vmem:[#allocation20 + $0x324] ss:$16 sps:$4 sm:$0xff]   ;;  %v3036_v33 = vpack.i.b16 %v3025_v14, %v3025_v14 }
 0x517   :  { %v2870_v44 = vpop.f32.mrf.mxu0  ;;  %v2911_v46 = vpop.f32.mrf.mxu1  ;;  %v7035_v56 = vld [vmem:[#allocation20 + $0x120] ss:$16 sps:$4 sm:$0xff]   ;;  %v7043_v37 = vld [vmem:[#allocation20 + $0x104] ss:$16 sps:$4 sm:$0xff]  }
 0x518   :  { %v8219_v52 = vmax.f32 %v2909_v23, 0.0  ;;  %v2918_v54 = vadd.f32 %v2917_v3, %v8206_v45  ;;  %v2925_v55 = vmul.f32 %v8206_v45, %v8206_v45  ;;  %4031 = vmatpush2.bf16.msra.mxu1 %v7032_v63  ;;  %v7046_v38 = vld [vmem:[#allocation20 + $0x304] ss:$16 sps:$4 sm:$0xff]   ;;  %v7044_v23 = vld [vmem:[#allocation20 + $0x300] ss:$16 sps:$4 sm:$0xff]  }
 0x519   :  { %3990 = vmatpush2.bf16.msra.mxu0 %v7029_v35  ;;  %4032 = vmatprep.subr.bf16.mxu1 %v7040_v5  ;;  %v7049_v3 = vld [vmem:[#allocation20 + $0xec] ss:$16 sps:$4 sm:$0xff]   ;;  %v8249_v29 = vld.sshfl [vmem:[#allocation11] sm:$0x33 pattern:$0x75316420] }
 0x51a   :  { %v2919_v11 = vadd.f32 %v2918_v54, %v8219_v52  ;;  %v2926_v61 = vmul.f32 %v8219_v52, %v8219_v52  ;;  %v2928_v62 = vadd.f32 %v2927_v57, %v2925_v55  ;;  %3991 = vmatprep.subr.bf16.mxu0 %v7037_v36  ;;  %v6166_v55 = vld.sshfl [vmem:[#allocation17] sm:$0x33 pattern:$0x75316420]  ;;  %v1635_v35 = vrot.slane %v8249_v29, %v8079_v7 }
 0x51b   :  { %v2960_v1 = vcombine.high %v6166_v55, %v6166_v55  ;;  %v2967_v10 = vrot.slane %v6166_v55, %v8079_v7 }
 0x51c   :  { %2920 = vadd.xlane.f32.xlu0 %v2919_v11  ;;  %v2929_v2 = vadd.f32 %v2928_v62, %v2926_v61  ;;  %4033 = vmatpush2.bf16.msra.mxu1 %v7038_v50 }
 0x51d   :  { %3992 = vmatpush2.bf16.msra.mxu0 %v7035_v56  ;;  %4034 = vmatprep.subr.bf16.mxu1 %v7046_v38  ;;  %v2974_v26 = vrot.slane %v2960_v1, %v8079_v7  ;;  %v2975_v15 = vcombine.high %v2967_v10, %v2967_v10  ;;  %v2978_v22 = vpack.i.b16 %v2967_v10, %v2967_v10 }
 0x51e   :  { %2930 = vadd.xlane.f32.xlu1 %v2929_v2  ;;  %3993 = vmatprep.subr.bf16.mxu0 %v7043_v37  ;;  %v3050_v37 = vpack.i.b16 %v3033_v4, %v3033_v4  ;;  %v1585_v38 = vcombine.high %v1577_v19, %v1577_v19 }
 0x51f   :  { %v2976_v59 = vcombine.high %v2974_v26, %v2974_v26  ;;  %v2985_v17 = vpack.i.b16 %v2974_v26, %v2974_v26  ;;  %v2992_v27 = vpack.i.b16 %v2975_v15, %v2975_v15  ;;  %v7047_v15 = vld [vmem:[#allocation20 + $0xe8] ss:$16 sps:$4 sm:$0xff]  }
 0x520   :  { %1530 = vadd.xlane.f32.xlu0 %v1529_v8  ;;  %4035 = vmatpush2.bf16.msra.mxu1 %v7044_v23  ;;  %v2983_v23 = vrot.slane %v2978_v22, %v8040_v42  ;;  %v3055_v58 = vrot.slane %v3050_v37, %v8040_v42  ;;  %v7055_v22 = vld [vmem:[#allocation20 + $0xcc] ss:$16 sps:$4 sm:$0xff]  }
 0x521   :  { %3994 = vmatpush2.bf16.msra.mxu0 %v7041_v39  ;;  %4086 = vmatprep.subr.bf16.mxu1 %v7052_v24  ;;  %v2999_v18 = vpack.i.b16 %v2976_v59, %v2976_v59  ;;  %v2990_v56 = vrot.slane %v2985_v17, %v8040_v42  ;;  %v3048_v39 = vrot.slane %v3043_v20, %v8040_v42  ;;  %v7050_v17 = vld [vmem:[#allocation20 + $0x2e8] ss:$16 sps:$4 sm:$0xff]  }
 0x522   :  { %1540 = vadd.xlane.f32.xlu1 %v1539_v40  ;;  %4045 = vmatprep.subr.bf16.mxu0 %v7049_v3  ;;  %v2997_v3 = vrot.slane %v2992_v27, %v8040_v42  ;;  %v7058_v27 = vld [vmem:[#allocation20 + $0x2cc] ss:$16 sps:$4 sm:$0xff]  }
 0x523   :  { %v3004_v50 = vrot.slane %v2999_v18, %v8040_v42 }
 0x5a5   :  { %v2921_v44 = vpop.xlane.xlu0 %2920 }
 0x5a6   :  { %v2922_v46 = vmul.f32 0.001953125, %v2921_v44  ;;  %v1588_v44 = vpack.i.b16 %v1577_v19, %v1577_v19 }
 0x5a7   :  { %v2931_v48 = vpop.xlane.xlu1 %2930 }
 0x5a8   :  { %v2932_v49 = vmul.f32 0.001953125, %v2931_v48  ;;  %v2933_v54 = vmul.f32 %v2922_v46, %v2922_v46  ;;  %v2938_v31 = vsub.f32 %v8192_v32, %v2922_v46  ;;  %v2940_v63 = vsub.f32 %v8206_v45, %v2922_v46 }
 0x5a9   :  { %v1531_v57 = vpop.xlane.xlu0 %1530  ;;  %v2939_v36 = vsub.f32 %v8186_v25, %v2922_v46  ;;  %v2941_v5 = vsub.f32 %v8219_v52, %v2922_v46  ;;  %v3062_v32 = vrot.slane %v3057_v21, %v8040_v42  ;;  %v3041_v25 = vrot.slane %v3036_v33, %v8040_v42 }
 0x5aa   :  { %v2934_v11 = vsub.f32 %v2932_v49, %v2933_v54  ;;  %v8234_v61 = vmul.f32 0.001953125, %v1531_v57  ;;  %v2942_v45 = vpack.c.bf16 %v2938_v31, %v2938_v31  ;;  %v1643_v52 = vcombine.high %v1635_v35, %v1635_v35 }
 0x5ab   :  { %v1541_v62 = vpop.xlane.xlu1 %1540  ;;  %v2943_v48 = vpack.c.bf16 %v2939_v36, %v2939_v36  ;;  %v2945_v49 = vpack.c.bf16 %v2941_v5, %v2941_v5  ;;  %v2944_v54 = vpack.c.bf16 %v2940_v63, %v2940_v63  ;;  %v1593_v6 = vrot.slane %v1588_v44, %v8040_v42  ;;  %v7056_v63 = vld [vmem:[#allocation20 + $0x2c8] ss:$16 sps:$4 sm:$0xff]   ;;  %v7061_v5 = vld [vmem:[#allocation20 + $0xac] ss:$16 sps:$4 sm:$0xff]  }
 0x5ac   :  { %v2935_v2 = vmax.f32 %v2934_v11, 0.0  ;;  %v1542_v0 = vmul.f32 0.001953125, %v1541_v62  ;;  %v1543_v8 = vmul.f32 %v8234_v61, %v8234_v61  ;;  %v1548_v55 = vsub.f32 %v8195_v53, %v8234_v61  ;;  %v7071_v44 = vld [vmem:[#allocation20 + $0x68] ss:$16 sps:$4 sm:$0xff]  }
 0x5ad   :  { %v1550_v57 = vsub.f32 %v8198_v34, %v8234_v61  ;;  %v1602_v11 = vpack.i.b16 %v1585_v38, %v1585_v38  ;;  %v7059_v38 = vld [vmem:[#allocation20 + $0xa8] ss:$16 sps:$4 sm:$0xff]  }
 0x5ae   :  { %v2936_v40 = vadd.f32 1e-05, %v2935_v2  ;;  %v1544_v9 = vsub.f32 %v1542_v0, %v1543_v8  ;;  %v1646_v8 = vpack.i.b16 %v1635_v35, %v1635_v35  ;;  %v7053_v35 = vld [vmem:[#allocation20 + $0xc8] ss:$16 sps:$4 sm:$0xff]  }
 0x5af   :  { %v1554_v34 = vpack.c.bf16 %v1550_v57, %v1550_v57  ;;  %v1607_v59 = vrot.slane %v1602_v11, %v8040_v42  ;;  %v7088_v57 = vld [vmem:[#allocation20 + $0x22c] ss:$16 sps:$4 sm:$0xff]   ;;  %v7086_v11 = vld [vmem:[#allocation20 + $0x228] ss:$16 sps:$4 sm:$0xff]  }
 0x5b0   :  { %7451 = vrsqrt.f32 %v2936_v40  ;;  %v1545_v12 = vmax.f32 %v1544_v9, 0.0  ;;  %v1660_v40 = vpack.i.b16 %v1643_v52, %v1643_v52  ;;  %v1651_v20 = vrot.slane %v1646_v8, %v8040_v42  ;;  %v7074_v52 = vld [vmem:[#allocation20 + $0x268] ss:$16 sps:$4 sm:$0xff]   ;;  %v7100_v8 = vld [vmem:[#allocation20 + $0x3ec] ss:$16 sps:$4 sm:$0xff]  }
 0x5b2   :  { %v1546_v13 = vadd.f32 1e-05, %v1545_v12  ;;  %v1665_v31 = vrot.slane %v1660_v40, %v8040_v42  ;;  %v7095_v40 = vld [vmem:[#allocation20 + $0x1e8] ss:$16 sps:$4 sm:$0xff]  }
 0x5b4   :  { %7453 = vrsqrt.f32 %v1546_v13  ;;  %v1552_v13 = vpack.c.bf16 %v1548_v55, %v1548_v55  ;;  %v7085_v55 = vld [vmem:[#allocation20 + $0x2c] ss:$16 sps:$4 sm:$0xff]  }
 0x5bd   :  { %v7452_v24 = vpop.eup %7451 }
 0x5be   :  { %v2946_v46 = vpack.c.bf16 %v7452_v24, %v7452_v24  ;;  %v7068_v24 = vld [vmem:[#allocation20 + $0x288] ss:$16 sps:$4 sm:$0xff]  }
 0x5c0   :  { %v2948_v62 = vmul.bf16 %v2946_v46, %v2943_v48  ;;  %v2950_v1 = vmul.bf16 %v2946_v46, %v2945_v49  ;;  %v2947_v2 = vmul.bf16 %v2946_v46, %v2942_v45  ;;  %v2949_v0 = vmul.bf16 %v2946_v46, %v2944_v54  ;;  %v7073_v45 = vld [vmem:[#allocation20 + $0x6c] ss:$16 sps:$4 sm:$0xff]   ;;  %v7077_v49 = vld [vmem:[#allocation20 + $0x48] ss:$16 sps:$4 sm:$0xff]  }
 0x5c1   :  { %v7454_v9 = vpop.eup %7453  ;;  %v7079_v46 = vld [vmem:[#allocation20 + $0x4c] ss:$16 sps:$4 sm:$0xff]   ;;  %v7080_v54 = vld [vmem:[#allocation20 + $0x248] ss:$16 sps:$4 sm:$0xff]  }
 0x5c2   :  { %v3006_v26 = vmul.bf16 %v2990_v56, %v2948_v62  ;;  %v3008_v30 = vmul.bf16 %v3004_v50, %v2950_v1  ;;  %v3005_v10 = vmul.bf16 %v2983_v23, %v2947_v2  ;;  %v3007_v12 = vmul.bf16 %v2997_v3, %v2949_v0  ;;  %v7064_v56 = vld [vmem:[#allocation20 + $0x2ac] ss:$16 sps:$4 sm:$0xff]   ;;  %v7065_v3 = vld [vmem:[#allocation20 + $0x88] ss:$16 sps:$4 sm:$0xff]  }
 0x5c3   :  { %v8270_v53 = vpack.c.bf16 %v7454_v9, %v7454_v9  ;;  %v7070_v23 = vld [vmem:[#allocation20 + $0x28c] ss:$16 sps:$4 sm:$0xff]   ;;  %v7089_v2 = vld [vmem:[#allocation20 + $0x8] ss:$16 sps:$4 sm:$0xff]  }
 0x5c4   :  { %v3064_v14 = vadd.bf16 %v3048_v39, %v3006_v26  ;;  %v3066_v60 = vadd.bf16 %v3062_v32, %v3008_v30  ;;  %v8273_v18 = vadd.bf16 %v3041_v25, %v3005_v10  ;;  %v8275_v4 = vadd.bf16 %v3055_v58, %v3007_v12  ;;  %v7062_v39 = vld [vmem:[#allocation20 + $0x2a8] ss:$16 sps:$4 sm:$0xff]   ;;  %v7067_v32 = vld [vmem:[#allocation20 + $0x8c] ss:$16 sps:$4 sm:$0xff]  }
 0x5c5   :  { %v1557_v19 = vmul.bf16 %v8270_v53, %v1552_v13  ;;  %v1559_v21 = vmul.bf16 %v8270_v53, %v1554_v34  ;;  %v7076_v25 = vld [vmem:[#allocation20 + $0x26c] ss:$16 sps:$4 sm:$0xff]   ;;  %v7083_v58 = vld [vmem:[#allocation20 + $0x28] ss:$16 sps:$4 sm:$0xff]  }
 0x5c6   :  { %3995 = vmatprep.mubr.bf16.mxu0 %v3064_v14  ;;  %4036 = vmatprep.mubr.bf16.mxu1 %v3066_v60  ;;  %v7082_v48 = vld [vmem:[#allocation20 + $0x24c] ss:$16 sps:$4 sm:$0xff]   ;;  %v7092_v0 = vld [vmem:[#allocation20 + $0x208] ss:$16 sps:$4 sm:$0xff]  }
 0x5c7   :  { %3996 = vmatmul.mubr.bf16.vlgmr.msra.gmra.mxu0 %v8273_v18  ;;  %4037 = vmatmul.mubr.bf16.vlgmr.msra.gmra.mxu1 %v8275_v4  ;;  %v1615_v33 = vmul.bf16 %v1593_v6, %v1557_v19  ;;  %v1617_v36 = vmul.bf16 %v1607_v59, %v1559_v21  ;;  %v7091_v62 = vld [vmem:[#allocation20 + $0xc] ss:$16 sps:$4 sm:$0xff]   ;;  %v7098_v9 = vld [vmem:[#allocation20 + $0x3e8] ss:$16 sps:$4 sm:$0xff]  }
 0x5c8   :  { %4046 = vmatpush1.bf16.msra.mxu0 %v7047_v15  ;;  %4087 = vmatpush1.bf16.msra.mxu1 %v7050_v17  ;;  %v7094_v1 = vld [vmem:[#allocation20 + $0x20c] ss:$16 sps:$4 sm:$0xff]   ;;  %v7101_v10 = vld [vmem:[#allocation20 + $0x1c8] ss:$16 sps:$4 sm:$0xff]   ;;  %v1570_v17 = vcombine.high %v8245_v16, %v8245_v16 }
 0x5c9   :  { %4077 = vmatprep.mubr.bf16.mxu0 %v3064_v14  ;;  %4118 = vmatprep.mubr.bf16.mxu1 %v3066_v60  ;;  %v8283_v50 = vadd.bf16 %v1651_v20, %v1615_v33  ;;  %v8285_v37 = vadd.bf16 %v1665_v31, %v1617_v36  ;;  %v7097_v6 = vld [vmem:[#allocation20 + $0x1ec] ss:$16 sps:$4 sm:$0xff]   ;;  %v7104_v12 = vld [vmem:[#allocation20 + $0x3c8] ss:$16 sps:$4 sm:$0xff]   ;;  %v1628_v31 = vcombine.high %v8249_v29, %v8249_v29 }
 0x5ca   :  { %4047 = vmatprep.subr.bf16.mxu0 %v7055_v22  ;;  %4088 = vmatprep.subr.bf16.mxu1 %v7058_v27  ;;  %v7103_v26 = vld [vmem:[#allocation20 + $0x1cc] ss:$16 sps:$4 sm:$0xff]   ;;  %v7107_v59 = vld [vmem:[#allocation20 + $0x1a8] ss:$16 sps:$4 sm:$0xff]   ;;  %v1584_v27 = vrot.slane %v1570_v17, %v8079_v7  ;;  %v7164_v17 = vld [vmem:[#allocation19 + $0x280] ss:$16 sps:$4 sm:$0xff]  }
 0x5cb   :  { %v7106_v30 = vld [vmem:[#allocation20 + $0x3cc] ss:$16 sps:$4 sm:$0xff]   ;;  %v7110_v14 = vld [vmem:[#allocation20 + $0x3a8] ss:$16 sps:$4 sm:$0xff]   ;;  %v1642_v36 = vrot.slane %v1628_v31, %v8079_v7  ;;  %v7178_v31 = vld [vmem:[#allocation19 + $0x244] ss:$16 sps:$4 sm:$0xff]  }
 0x5cc   :  { %4048 = vmatpush1.bf16.msra.mxu0 %v7053_v35  ;;  %4089 = vmatpush1.bf16.msra.mxu1 %v7056_v63  ;;  %v7109_v13 = vld [vmem:[#allocation20 + $0x1ac] ss:$16 sps:$4 sm:$0xff]   ;;  %v7113_v19 = vld [vmem:[#allocation20 + $0x188] ss:$16 sps:$4 sm:$0xff]  }
 0x5cd   :  { %4049 = vmatprep.subr.bf16.mxu0 %v7061_v5  ;;  %4090 = vmatprep.subr.bf16.mxu1 %v7064_v56  ;;  %v7112_v34 = vld [vmem:[#allocation20 + $0x3ac] ss:$16 sps:$4 sm:$0xff]   ;;  %v7116_v20 = vld [vmem:[#allocation20 + $0x388] ss:$16 sps:$4 sm:$0xff]   ;;  %v1586_v5 = vcombine.high %v1584_v27, %v1584_v27 }
 0x5ce   :  { %v7115_v60 = vld [vmem:[#allocation20 + $0x18c] ss:$16 sps:$4 sm:$0xff]   ;;  %v7119_v33 = vld [vmem:[#allocation20 + $0x168] ss:$16 sps:$4 sm:$0xff]  }
 0x5cf   :  { %v7118_v15 = vld [vmem:[#allocation20 + $0x38c] ss:$16 sps:$4 sm:$0xff]   ;;  %v7122_v35 = vld [vmem:[#allocation20 + $0x368] ss:$16 sps:$4 sm:$0xff]  }
 0x5d0   :  { %4050 = vmatpush1.bf16.msra.mxu0 %v7059_v38  ;;  %4091 = vmatpush1.bf16.msra.mxu1 %v7062_v39  ;;  %v7121_v21 = vld [vmem:[#allocation20 + $0x16c] ss:$16 sps:$4 sm:$0xff]   ;;  %v7125_v56 = vld [vmem:[#allocation20 + $0x148] ss:$16 sps:$4 sm:$0xff]   ;;  %v1549_v39 = vsub.f32 %v8190_v28, %v8234_v61 }
 0x5d1   :  { %4051 = vmatprep.subr.bf16.mxu0 %v7067_v32  ;;  %4092 = vmatprep.subr.bf16.mxu1 %v7070_v23  ;;  %v7124_v22 = vld [vmem:[#allocation20 + $0x36c] ss:$16 sps:$4 sm:$0xff]   ;;  %v7128_v38 = vld [vmem:[#allocation20 + $0x348] ss:$16 sps:$4 sm:$0xff]   ;;  %v1551_v23 = vsub.f32 %v8213_v41, %v8234_v61 }
 0x5d2   :  { %v7127_v16 = vld [vmem:[#allocation20 + $0x14c] ss:$16 sps:$4 sm:$0xff]  }
 0x5d3   :  { %v7130_v63 = vld [vmem:[#allocation20 + $0x34c] ss:$16 sps:$4 sm:$0xff]   ;;  %v1555_v28 = vpack.c.bf16 %v1551_v23, %v1551_v23  ;;  %v7196_v23 = vld [vmem:[#allocation19 + $0x3e4] ss:$16 sps:$4 sm:$0xff]  }
 0x5d4   :  { %4052 = vmatpush1.bf16.msra.mxu0 %v7065_v3  ;;  %4093 = vmatpush1.bf16.msra.mxu1 %v7068_v24  ;;  %v7133_v29 = vld [vmem:[#allocation20 + $0x12c] ss:$16 sps:$4 sm:$0xff]   ;;  %v1595_v3 = vpack.i.b16 %v1584_v27, %v1584_v27  ;;  %v1609_v24 = vpack.i.b16 %v1586_v5, %v1586_v5  ;;  %v7175_v27 = vld [vmem:[#allocation19 + $0x44] ss:$16 sps:$4 sm:$0xff]   ;;  %v7182_v5 = vld [vmem:[#allocation19 + $0x220] ss:$16 sps:$4 sm:$0xff]  }
 0x5d5   :  { %4053 = vmatprep.subr.bf16.mxu0 %v7073_v45  ;;  %4094 = vmatprep.subr.bf16.mxu1 %v7076_v25  ;;  %v7136_v32 = vld [vmem:[#allocation20 + $0x32c] ss:$16 sps:$4 sm:$0xff]   ;;  %v1644_v45 = vcombine.high %v1642_v36, %v1642_v36  ;;  %v7131_v25 = vld [vmem:[#allocation20 + $0x128] ss:$16 sps:$4 sm:$0xff]   ;;  %v1560_v41 = vmul.bf16 %v8270_v53, %v1555_v28  ;;  %v7203_v28 = vld [vmem:[#allocation19 + $0x1a0] ss:$16 sps:$4 sm:$0xff]  }
 0x5d6   :  { %v1614_v61 = vrot.slane %v1609_v24, %v8040_v42  ;;  %v7194_v24 = vld [vmem:[#allocation19 + $0x3e0] ss:$16 sps:$4 sm:$0xff]  }
 0x5d8   :  { %4054 = vmatpush1.bf16.msra.mxu0 %v7071_v44  ;;  %4095 = vmatpush1.bf16.msra.mxu1 %v7074_v52  ;;  %v7134_v44 = vld [vmem:[#allocation20 + $0x328] ss:$16 sps:$4 sm:$0xff]   ;;  %v1553_v52 = vpack.c.bf16 %v1549_v39, %v1549_v39  ;;  %v7185_v39 = vld [vmem:[#allocation19] ss:$16 sps:$4 sm:$0xff]  }
 0x5d9   :  { %4055 = vmatprep.subr.bf16.mxu0 %v7079_v46  ;;  %4096 = vmatprep.subr.bf16.mxu1 %v7082_v48  ;;  %v7139_v46 = vld [vmem:[#allocation20 + $0x10c] ss:$16 sps:$4 sm:$0xff]  }
 0x5da   :  { %v7142_v48 = vld [vmem:[#allocation20 + $0x30c] ss:$16 sps:$4 sm:$0xff]  }
 0x5dc   :  { %4056 = vmatpush1.bf16.msra.mxu0 %v7077_v49  ;;  %4097 = vmatpush1.bf16.msra.mxu1 %v7080_v54  ;;  %v1558_v49 = vmul.bf16 %v8270_v53, %v1553_v52  ;;  %v1600_v54 = vrot.slane %v1595_v3, %v8040_v42  ;;  %v7143_v53 = vld [vmem:[#allocation19 + $0xe0] ss:$16 sps:$4 sm:$0xff]  }
 0x5dd   :  { %4057 = vmatprep.subr.bf16.mxu0 %v7085_v55  ;;  %4098 = vmatprep.subr.bf16.mxu1 %v7088_v57  ;;  %v1653_v55 = vpack.i.b16 %v1642_v36, %v1642_v36  ;;  %v1667_v57 = vpack.i.b16 %v1644_v45, %v1644_v45  ;;  %v7179_v36 = vld [vmem:[#allocation19 + $0x20] ss:$16 sps:$4 sm:$0xff]   ;;  %v7199_v45 = vld [vmem:[#allocation19 + $0x1c4] ss:$16 sps:$4 sm:$0xff]  }
 0x5de   :  { %v7191_v3 = vld [vmem:[#allocation19 + $0x1e0] ss:$16 sps:$4 sm:$0xff]  }
 0x5df   :  { %v7200_v52 = vld [vmem:[#allocation19 + $0x3c0] ss:$16 sps:$4 sm:$0xff]  }
 0x5e0   :  { %4058 = vmatpush1.bf16.msra.mxu0 %v7083_v58  ;;  %4099 = vmatpush1.bf16.msra.mxu1 %v7086_v11  ;;  %v7137_v58 = vld [vmem:[#allocation20 + $0x108] ss:$16 sps:$4 sm:$0xff]  }
 0x5e1   :  { %4059 = vmatprep.subr.bf16.mxu0 %v7091_v62  ;;  %4100 = vmatprep.subr.bf16.mxu1 %v7094_v1  ;;  %v7140_v11 = vld [vmem:[#allocation20 + $0x308] ss:$16 sps:$4 sm:$0xff]   ;;  %v7145_v62 = vld [vmem:[#allocation19 + $0xe4] ss:$16 sps:$4 sm:$0xff]  }
 0x5e2   :  { %v7148_v1 = vld [vmem:[#allocation19 + $0x2e4] ss:$16 sps:$4 sm:$0xff]  }
 0x5e4   :  { %4060 = vmatpush1.bf16.msra.mxu0 %v7089_v2  ;;  %4101 = vmatpush1.bf16.msra.mxu1 %v7092_v0  ;;  %v1616_v2 = vmul.bf16 %v1600_v54, %v1558_v49  ;;  %v1658_v0 = vrot.slane %v1653_v55, %v8040_v42  ;;  %v7206_v49 = vld [vmem:[#allocation19 + $0x3a0] ss:$16 sps:$4 sm:$0xff]   ;;  %v7211_v54 = vld [vmem:[#allocation19 + $0x184] ss:$16 sps:$4 sm:$0xff]  }
 0x5e5   :  { %4061 = vmatprep.subr.bf16.mxu0 %v7097_v6  ;;  %4102 = vmatprep.subr.bf16.mxu1 %v7100_v8  ;;  %v1618_v6 = vmul.bf16 %v1614_v61, %v1560_v41  ;;  %v1672_v8 = vrot.slane %v1667_v57, %v8040_v42  ;;  %v7214_v55 = vld [vmem:[#allocation19 + $0x384] ss:$16 sps:$4 sm:$0xff]   ;;  %v7209_v41 = vld [vmem:[#allocation19 + $0x180] ss:$16 sps:$4 sm:$0xff]  }
 0x5e6   :  { %v7212_v61 = vld [vmem:[#allocation19 + $0x380] ss:$16 sps:$4 sm:$0xff]   ;;  %v7217_v57 = vld [vmem:[#allocation19 + $0x164] ss:$16 sps:$4 sm:$0xff]  }
 0x5e8   :  { %4062 = vmatpush2.bf16.msra.mxu0 %v7095_v40  ;;  %4103 = vmatpush2.bf16.msra.mxu1 %v7098_v9  ;;  %v7146_v40 = vld [vmem:[#allocation19 + $0x2e0] ss:$16 sps:$4 sm:$0xff]   ;;  %v8303_v9 = vadd.bf16 %v1658_v0, %v1616_v2  ;;  %v7226_v2 = vld [vmem:[#allocation19 + $0x344] ss:$16 sps:$4 sm:$0xff]  }
 0x5e9   :  { %4063 = vmatprep.subr.bf16.mxu0 %v7103_v26  ;;  %4104 = vmatprep.subr.bf16.mxu1 %v7106_v30  ;;  %v7151_v26 = vld [vmem:[#allocation19 + $0xc4] ss:$16 sps:$4 sm:$0xff]   ;;  %v7221_v0 = vld [vmem:[#allocation19 + $0x140] ss:$16 sps:$4 sm:$0xff]  }
 0x5ea   :  { %v7154_v30 = vld [vmem:[#allocation19 + $0x2c4] ss:$16 sps:$4 sm:$0xff]  }
 0x5ec   :  { %4064 = vmatpush2.bf16.msra.mxu0 %v7101_v10  ;;  %4105 = vmatpush2.bf16.msra.mxu1 %v7104_v12  ;;  %v8307_v10 = vadd.bf16 %v1672_v8, %v1618_v6  ;;  %v7149_v12 = vld [vmem:[#allocation19 + $0xc0] ss:$16 sps:$4 sm:$0xff]   ;;  %v7229_v8 = vld [vmem:[#allocation19 + $0x124] ss:$16 sps:$4 sm:$0xff]  }
 0x5ed   :  { %4065 = vmatprep.subr.bf16.mxu0 %v7109_v13  ;;  %4106 = vmatprep.subr.bf16.mxu1 %v7112_v34  ;;  %v7152_v13 = vld [vmem:[#allocation19 + $0x2c0] ss:$16 sps:$4 sm:$0xff]   ;;  %v7157_v34 = vld [vmem:[#allocation19 + $0xa4] ss:$16 sps:$4 sm:$0xff]  }
 0x5ee   :  { %v7224_v6 = vld [vmem:[#allocation19 + $0x340] ss:$16 sps:$4 sm:$0xff]  }
 0x5f0   :  { %4066 = vmatpush2.bf16.msra.mxu0 %v7107_v59  ;;  %4107 = vmatpush2.bf16.msra.mxu1 %v7110_v14  ;;  %v7160_v59 = vld [vmem:[#allocation19 + $0x2a4] ss:$16 sps:$4 sm:$0xff]   ;;  %v7155_v14 = vld [vmem:[#allocation19 + $0xa0] ss:$16 sps:$4 sm:$0xff]  }
 0x5f1   :  { %4067 = vmatprep.subr.bf16.mxu0 %v7115_v60  ;;  %4108 = vmatprep.subr.bf16.mxu1 %v7118_v15  ;;  %v7166_v60 = vld [vmem:[#allocation19 + $0x284] ss:$16 sps:$4 sm:$0xff]   ;;  %v7161_v15 = vld [vmem:[#allocation19 + $0x80] ss:$16 sps:$4 sm:$0xff]  }
 0x5f4   :  { %4068 = vmatpush2.bf16.msra.mxu0 %v7113_v19  ;;  %4109 = vmatpush2.bf16.msra.mxu1 %v7116_v20  ;;  %v7169_v19 = vld [vmem:[#allocation19 + $0x64] ss:$16 sps:$4 sm:$0xff]  }
 0x5f5   :  { %4069 = vmatprep.subr.bf16.mxu0 %v7121_v21  ;;  %4110 = vmatprep.subr.bf16.mxu1 %v7124_v22  ;;  %v7172_v20 = vld [vmem:[#allocation19 + $0x264] ss:$16 sps:$4 sm:$0xff]   ;;  %v7167_v21 = vld [vmem:[#allocation19 + $0x60] ss:$16 sps:$4 sm:$0xff]  }
 0x5f6   :  { %v7170_v22 = vld [vmem:[#allocation19 + $0x260] ss:$16 sps:$4 sm:$0xff]  }
 0x5f8   :  { %4070 = vmatpush2.bf16.msra.mxu0 %v7119_v33  ;;  %4111 = vmatpush2.bf16.msra.mxu1 %v7122_v35  ;;  %v7173_v33 = vld [vmem:[#allocation19 + $0x40] ss:$16 sps:$4 sm:$0xff]  }
 0x5f9   :  { %4071 = vmatprep.subr.bf16.mxu0 %v7127_v16  ;;  %4112 = vmatprep.subr.bf16.mxu1 %v7130_v63  ;;  %v7176_v35 = vld [vmem:[#allocation19 + $0x240] ss:$16 sps:$4 sm:$0xff]   ;;  %v7181_v16 = vld [vmem:[#allocation19 + $0x24] ss:$16 sps:$4 sm:$0xff]  }
 0x5fa   :  { %v7184_v63 = vld [vmem:[#allocation19 + $0x224] ss:$16 sps:$4 sm:$0xff]  }
 0x5fc   :  { %4072 = vmatpush2.bf16.msra.mxu0 %v7125_v56  ;;  %4113 = vmatpush2.bf16.msra.mxu1 %v7128_v38  ;;  %v7187_v56 = vld [vmem:[#allocation19 + $0x4] ss:$16 sps:$4 sm:$0xff]  }
 0x5fd   :  { %4073 = vmatprep.subr.bf16.mxu0 %v7133_v29  ;;  %4114 = vmatprep.subr.bf16.mxu1 %v7136_v32  ;;  %v7190_v38 = vld [vmem:[#allocation19 + $0x204] ss:$16 sps:$4 sm:$0xff]   ;;  %v7188_v29 = vld [vmem:[#allocation19 + $0x200] ss:$16 sps:$4 sm:$0xff]  }
 0x5fe   :  { %v7193_v32 = vld [vmem:[#allocation19 + $0x1e4] ss:$16 sps:$4 sm:$0xff]  }
 0x600   :  { %4074 = vmatpush2.bf16.msra.mxu0 %v7131_v25  ;;  %4115 = vmatpush2.bf16.msra.mxu1 %v7134_v44  ;;  %v7202_v25 = vld [vmem:[#allocation19 + $0x3c4] ss:$16 sps:$4 sm:$0xff]   ;;  %v7197_v44 = vld [vmem:[#allocation19 + $0x1c0] ss:$16 sps:$4 sm:$0xff]  }
 0x601   :  { %4075 = vmatprep.subr.bf16.mxu0 %v7139_v46  ;;  %4116 = vmatprep.subr.bf16.mxu1 %v7142_v48  ;;  %v7205_v46 = vld [vmem:[#allocation19 + $0x1a4] ss:$16 sps:$4 sm:$0xff]  }
 0x602   :  { %v7208_v48 = vld [vmem:[#allocation19 + $0x3a4] ss:$16 sps:$4 sm:$0xff]  }
 0x604   :  { %4076 = vmatpush2.bf16.msra.mxu0 %v7137_v58  ;;  %4117 = vmatpush2.bf16.msra.mxu1 %v7140_v11  ;;  %v7220_v58 = vld [vmem:[#allocation19 + $0x364] ss:$16 sps:$4 sm:$0xff]   ;;  %v7215_v11 = vld [vmem:[#allocation19 + $0x160] ss:$16 sps:$4 sm:$0xff]  }
 0x605   :  { %4767 = vmatprep.subr.bf16.mxu0 %v7145_v62  ;;  %4808 = vmatprep.subr.bf16.mxu1 %v7148_v1  ;;  %v7218_v62 = vld [vmem:[#allocation19 + $0x360] ss:$16 sps:$4 sm:$0xff]   ;;  %v7223_v1 = vld [vmem:[#allocation19 + $0x144] ss:$16 sps:$4 sm:$0xff]  }
 0x607   :  { %4078 = vmatmul.mubr.bf16.vlgmr.msra.gmra.mxu0 %v8273_v18  ;;  %4119 = vmatmul.mubr.bf16.vlgmr.msra.gmra.mxu1 %v8275_v4  ;;  %v7158_v18 = vld [vmem:[#allocation19 + $0x2a0] ss:$16 sps:$4 sm:$0xff]   ;;  %v7163_v4 = vld [vmem:[#allocation19 + $0x84] ss:$16 sps:$4 sm:$0xff]  }
 0x608   :  { %4768 = vmatpush1.bf16.msra.mxu0 %v7143_v53  ;;  %4799 = vmatprep.mubr.bf16.mxu0 %v8303_v9  ;;  %v7232_v53 = vld [vmem:[#allocation19 + $0x324] ss:$16 sps:$4 sm:$0xff]  }
 0x609   :  { %4809 = vmatpush1.bf16.msra.mxu1 %v7146_v40  ;;  %4840 = vmatprep.mubr.bf16.mxu1 %v8307_v10  ;;  %v7227_v40 = vld [vmem:[#allocation19 + $0x120] ss:$16 sps:$4 sm:$0xff]  }
 0x60a   :  { %4769 = vmatprep.subr.bf16.mxu0 %v7151_v26  ;;  %4810 = vmatprep.subr.bf16.mxu1 %v7154_v30  ;;  %v7230_v26 = vld [vmem:[#allocation19 + $0x320] ss:$16 sps:$4 sm:$0xff]   ;;  %v7235_v30 = vld [vmem:[#allocation19 + $0x104] ss:$16 sps:$4 sm:$0xff]  }
 0x60c   :  { %4770 = vmatpush1.bf16.msra.mxu0 %v7149_v12  ;;  %v7238_v12 = vld [vmem:[#allocation19 + $0x304] ss:$16 sps:$4 sm:$0xff]  }
 0x60d   :  { %4811 = vmatpush1.bf16.msra.mxu1 %v7152_v13  ;;  %4771 = vmatprep.subr.bf16.mxu0 %v7157_v34  ;;  %v7233_v13 = vld [vmem:[#allocation19 + $0x100] ss:$16 sps:$4 sm:$0xff]  }
 0x60e   :  { %4812 = vmatprep.subr.bf16.mxu1 %v7160_v59  ;;  %v7236_v34 = vld [vmem:[#allocation19 + $0x300] ss:$16 sps:$4 sm:$0xff]   ;;  %v7241_v59 = vld [vmem:[#allocation19 + $0xec] ss:$16 sps:$4 sm:$0xff]  }
 0x610   :  { %4772 = vmatpush1.bf16.msra.mxu0 %v7155_v14  ;;  %v7244_v14 = vld [vmem:[#allocation19 + $0x2ec] ss:$16 sps:$4 sm:$0xff]  }
 0x611   :  { %4813 = vmatpush1.bf16.msra.mxu1 %v7158_v18  ;;  %4773 = vmatprep.subr.bf16.mxu0 %v7163_v4  ;;  %v7239_v18 = vld [vmem:[#allocation19 + $0xe8] ss:$16 sps:$4 sm:$0xff]  }
 0x612   :  { %4814 = vmatprep.subr.bf16.mxu1 %v7166_v60  ;;  %v7242_v4 = vld [vmem:[#allocation19 + $0x2e8] ss:$16 sps:$4 sm:$0xff]   ;;  %v7247_v60 = vld [vmem:[#allocation19 + $0xcc] ss:$16 sps:$4 sm:$0xff]  }
 0x614   :  { %4774 = vmatpush1.bf16.msra.mxu0 %v7161_v15  ;;  %v7250_v15 = vld [vmem:[#allocation19 + $0x2cc] ss:$16 sps:$4 sm:$0xff]  }
 0x615   :  { %4815 = vmatpush1.bf16.msra.mxu1 %v7164_v17  ;;  %4775 = vmatprep.subr.bf16.mxu0 %v7169_v19  ;;  %v7245_v17 = vld [vmem:[#allocation19 + $0xc8] ss:$16 sps:$4 sm:$0xff]  }
 0x616   :  { %4816 = vmatprep.subr.bf16.mxu1 %v7172_v20  ;;  %v7248_v19 = vld [vmem:[#allocation19 + $0x2c8] ss:$16 sps:$4 sm:$0xff]   ;;  %v7253_v20 = vld [vmem:[#allocation19 + $0xac] ss:$16 sps:$4 sm:$0xff]  }
 0x618   :  { %4776 = vmatpush1.bf16.msra.mxu0 %v7167_v21  ;;  %v7256_v21 = vld [vmem:[#allocation19 + $0x2ac] ss:$16 sps:$4 sm:$0xff]  }
 0x619   :  { %4817 = vmatpush1.bf16.msra.mxu1 %v7170_v22  ;;  %4777 = vmatprep.subr.bf16.mxu0 %v7175_v27  ;;  %v7251_v22 = vld [vmem:[#allocation19 + $0xa8] ss:$16 sps:$4 sm:$0xff]  }
 0x61a   :  { %4818 = vmatprep.subr.bf16.mxu1 %v7178_v31  ;;  %v7254_v27 = vld [vmem:[#allocation19 + $0x2a8] ss:$16 sps:$4 sm:$0xff]   ;;  %v7259_v31 = vld [vmem:[#allocation19 + $0x8c] ss:$16 sps:$4 sm:$0xff]  }
 0x61c   :  { %4778 = vmatpush1.bf16.msra.mxu0 %v7173_v33  ;;  %v7262_v33 = vld [vmem:[#allocation19 + $0x28c] ss:$16 sps:$4 sm:$0xff]  }
 0x61d   :  { %4819 = vmatpush1.bf16.msra.mxu1 %v7176_v35  ;;  %4779 = vmatprep.subr.bf16.mxu0 %v7181_v16  ;;  %v7257_v35 = vld [vmem:[#allocation19 + $0x88] ss:$16 sps:$4 sm:$0xff]   ;;  %v7265_v16 = vld [vmem:[#allocation19 + $0x6c] ss:$16 sps:$4 sm:$0xff]  }
 0x61e   :  { %4820 = vmatprep.subr.bf16.mxu1 %v7184_v63  ;;  %v7268_v63 = vld [vmem:[#allocation19 + $0x26c] ss:$16 sps:$4 sm:$0xff]  }
 0x620   :  { %4780 = vmatpush1.bf16.msra.mxu0 %v7179_v36  ;;  %v7266_v36 = vld [vmem:[#allocation19 + $0x268] ss:$16 sps:$4 sm:$0xff]  }
 0x621   :  { %4821 = vmatpush1.bf16.msra.mxu1 %v7182_v5  ;;  %4781 = vmatprep.subr.bf16.mxu0 %v7187_v56  ;;  %v7271_v5 = vld [vmem:[#allocation19 + $0x4c] ss:$16 sps:$4 sm:$0xff]  }
 0x622   :  { %4822 = vmatprep.subr.bf16.mxu1 %v7190_v38  ;;  %v7274_v56 = vld [vmem:[#allocation19 + $0x24c] ss:$16 sps:$4 sm:$0xff]   ;;  %v7269_v38 = vld [vmem:[#allocation19 + $0x48] ss:$16 sps:$4 sm:$0xff]  }
 0x624   :  { %4782 = vmatpush1.bf16.msra.mxu0 %v7185_v39  ;;  %v7272_v39 = vld [vmem:[#allocation19 + $0x248] ss:$16 sps:$4 sm:$0xff]  }
 0x625   :  { %4823 = vmatpush1.bf16.msra.mxu1 %v7188_v29  ;;  %4783 = vmatprep.subr.bf16.mxu0 %v7193_v32  ;;  %v7277_v29 = vld [vmem:[#allocation19 + $0x2c] ss:$16 sps:$4 sm:$0xff]  }
 0x626   :  { %4824 = vmatprep.subr.bf16.mxu1 %v7196_v23  ;;  %v7280_v32 = vld [vmem:[#allocation19 + $0x22c] ss:$16 sps:$4 sm:$0xff]   ;;  %v7275_v23 = vld [vmem:[#allocation19 + $0x28] ss:$16 sps:$4 sm:$0xff]  }
 0x628   :  { %4784 = vmatpush2.bf16.msra.mxu0 %v7191_v3  ;;  %v7278_v3 = vld [vmem:[#allocation19 + $0x228] ss:$16 sps:$4 sm:$0xff]  }
 0x629   :  { %4825 = vmatpush2.bf16.msra.mxu1 %v7194_v24  ;;  %4785 = vmatprep.subr.bf16.mxu0 %v7199_v45  ;;  %v7283_v24 = vld [vmem:[#allocation19 + $0xc] ss:$16 sps:$4 sm:$0xff]  }
 0x62a   :  { %4826 = vmatprep.subr.bf16.mxu1 %v7202_v25  ;;  %v7286_v45 = vld [vmem:[#allocation19 + $0x20c] ss:$16 sps:$4 sm:$0xff]   ;;  %v7281_v25 = vld [vmem:[#allocation19 + $0x8] ss:$16 sps:$4 sm:$0xff]  }
 0x62c   :  { %4786 = vmatpush2.bf16.msra.mxu0 %v7197_v44  ;;  %v7284_v44 = vld [vmem:[#allocation19 + $0x208] ss:$16 sps:$4 sm:$0xff]  }
 0x62d   :  { %4827 = vmatpush2.bf16.msra.mxu1 %v7200_v52  ;;  %4787 = vmatprep.subr.bf16.mxu0 %v7205_v46  ;;  %v7289_v52 = vld [vmem:[#allocation19 + $0x1ec] ss:$16 sps:$4 sm:$0xff]  }
 0x62e   :  { %4828 = vmatprep.subr.bf16.mxu1 %v7208_v48  ;;  %v7292_v46 = vld [vmem:[#allocation19 + $0x3ec] ss:$16 sps:$4 sm:$0xff]   ;;  %v7287_v48 = vld [vmem:[#allocation19 + $0x1e8] ss:$16 sps:$4 sm:$0xff]  }
 0x630   :  { %4788 = vmatpush2.bf16.msra.mxu0 %v7203_v28  ;;  %v7290_v28 = vld [vmem:[#allocation19 + $0x3e8] ss:$16 sps:$4 sm:$0xff]  }
 0x631   :  { %4829 = vmatpush2.bf16.msra.mxu1 %v7206_v49  ;;  %4789 = vmatprep.subr.bf16.mxu0 %v7211_v54  ;;  %v7295_v49 = vld [vmem:[#allocation19 + $0x1cc] ss:$16 sps:$4 sm:$0xff]  }
 0x632   :  { %4830 = vmatprep.subr.bf16.mxu1 %v7214_v55  ;;  %v7298_v54 = vld [vmem:[#allocation19 + $0x3cc] ss:$16 sps:$4 sm:$0xff]   ;;  %v7293_v55 = vld [vmem:[#allocation19 + $0x1c8] ss:$16 sps:$4 sm:$0xff]  }
 0x634   :  { %4790 = vmatpush2.bf16.msra.mxu0 %v7209_v41  ;;  %v7296_v41 = vld [vmem:[#allocation19 + $0x3c8] ss:$16 sps:$4 sm:$0xff]  }
 0x635   :  { %4831 = vmatpush2.bf16.msra.mxu1 %v7212_v61  ;;  %4791 = vmatprep.subr.bf16.mxu0 %v7217_v57  ;;  %v7301_v61 = vld [vmem:[#allocation19 + $0x1ac] ss:$16 sps:$4 sm:$0xff]  }
 0x636   :  { %4832 = vmatprep.subr.bf16.mxu1 %v7220_v58  ;;  %v7304_v57 = vld [vmem:[#allocation19 + $0x3ac] ss:$16 sps:$4 sm:$0xff]   ;;  %v7299_v58 = vld [vmem:[#allocation19 + $0x1a8] ss:$16 sps:$4 sm:$0xff]  }
 0x638   :  { %4792 = vmatpush2.bf16.msra.mxu0 %v7215_v11  ;;  %v7302_v11 = vld [vmem:[#allocation19 + $0x3a8] ss:$16 sps:$4 sm:$0xff]  }
 0x639   :  { %4833 = vmatpush2.bf16.msra.mxu1 %v7218_v62  ;;  %4793 = vmatprep.subr.bf16.mxu0 %v7223_v1  ;;  %v7307_v62 = vld [vmem:[#allocation19 + $0x18c] ss:$16 sps:$4 sm:$0xff]  }
 0x63a   :  { %4834 = vmatprep.subr.bf16.mxu1 %v7226_v2  ;;  %v7310_v1 = vld [vmem:[#allocation19 + $0x38c] ss:$16 sps:$4 sm:$0xff]   ;;  %v7305_v2 = vld [vmem:[#allocation19 + $0x188] ss:$16 sps:$4 sm:$0xff]  }
 0x63c   :  { %4794 = vmatpush2.bf16.msra.mxu0 %v7221_v0  ;;  %v7308_v0 = vld [vmem:[#allocation19 + $0x388] ss:$16 sps:$4 sm:$0xff]  }
 0x63d   :  { %4835 = vmatpush2.bf16.msra.mxu1 %v7224_v6  ;;  %4795 = vmatprep.subr.bf16.mxu0 %v7229_v8  ;;  %v7313_v6 = vld [vmem:[#allocation19 + $0x16c] ss:$16 sps:$4 sm:$0xff]  }
 0x63e   :  { %4836 = vmatprep.subr.bf16.mxu1 %v7232_v53  ;;  %v7316_v8 = vld [vmem:[#allocation19 + $0x36c] ss:$16 sps:$4 sm:$0xff]   ;;  %v7311_v53 = vld [vmem:[#allocation19 + $0x168] ss:$16 sps:$4 sm:$0xff]  }
 0x640   :  { %4796 = vmatpush2.bf16.msra.mxu0 %v7227_v40  ;;  %v7314_v40 = vld [vmem:[#allocation19 + $0x368] ss:$16 sps:$4 sm:$0xff]  }
 0x641   :  { %4837 = vmatpush2.bf16.msra.mxu1 %v7230_v26  ;;  %4797 = vmatprep.subr.bf16.mxu0 %v7235_v30  ;;  %v7319_v26 = vld [vmem:[#allocation19 + $0x14c] ss:$16 sps:$4 sm:$0xff]  }
 0x642   :  { %4838 = vmatprep.subr.bf16.mxu1 %v7238_v12  ;;  %v7322_v30 = vld [vmem:[#allocation19 + $0x34c] ss:$16 sps:$4 sm:$0xff]   ;;  %v7317_v12 = vld [vmem:[#allocation19 + $0x148] ss:$16 sps:$4 sm:$0xff]  }
 0x644   :  { %4798 = vmatpush2.bf16.msra.mxu0 %v7233_v13  ;;  %v7320_v13 = vld [vmem:[#allocation19 + $0x348] ss:$16 sps:$4 sm:$0xff]  }
 0x645   :  { %4839 = vmatpush2.bf16.msra.mxu1 %v7236_v34  ;;  %4849 = vmatprep.subr.bf16.mxu0 %v7241_v59  ;;  %v7325_v34 = vld [vmem:[#allocation19 + $0x12c] ss:$16 sps:$4 sm:$0xff]  }
 0x646   :  { %4890 = vmatprep.subr.bf16.mxu1 %v7244_v14  ;;  %v7328_v59 = vld [vmem:[#allocation19 + $0x32c] ss:$16 sps:$4 sm:$0xff]   ;;  %v7323_v14 = vld [vmem:[#allocation19 + $0x128] ss:$16 sps:$4 sm:$0xff]  }
 0x647   :  { %4800 = vmatmul.mubr.bf16.vlgmr.msra.gmra.mxu0 %v8283_v50 }
 0x648   :  { %4841 = vmatmul.mubr.bf16.vlgmr.msra.gmra.mxu1 %v8285_v37  ;;  %4850 = vmatpush1.bf16.msra.mxu0 %v7239_v18  ;;  %v7326_v18 = vld [vmem:[#allocation19 + $0x328] ss:$16 sps:$4 sm:$0xff]  }
 0x649   :  { %4881 = vmatprep.mubr.bf16.mxu0 %v8303_v9  ;;  %4891 = vmatpush1.bf16.msra.mxu1 %v7242_v4  ;;  %v7260_v9 = vld [vmem:[#allocation19 + $0x288] ss:$16 sps:$4 sm:$0xff]   ;;  %v7331_v4 = vld [vmem:[#allocation19 + $0x10c] ss:$16 sps:$4 sm:$0xff]  }
 0x64a   :  { %4922 = vmatprep.mubr.bf16.mxu1 %v8307_v10  ;;  %4851 = vmatprep.subr.bf16.mxu0 %v7247_v60  ;;  %v7263_v10 = vld [vmem:[#allocation19 + $0x68] ss:$16 sps:$4 sm:$0xff]   ;;  %v7334_v60 = vld [vmem:[#allocation19 + $0x30c] ss:$16 sps:$4 sm:$0xff]  }
 0x64b   :  { %4892 = vmatprep.subr.bf16.mxu1 %v7250_v15  ;;  %v7329_v15 = vld [vmem:[#allocation19 + $0x108] ss:$16 sps:$4 sm:$0xff]  }
 0x64c   :  { %4852 = vmatpush1.bf16.msra.mxu0 %v7245_v17  ;;  %v7332_v17 = vld [vmem:[#allocation19 + $0x308] ss:$16 sps:$4 sm:$0xff]  }
 0x64d   :  { %4893 = vmatpush1.bf16.msra.mxu1 %v7248_v19  ;;  %4853 = vmatprep.subr.bf16.mxu0 %v7253_v20 }
 0x64e   :  { %4894 = vmatprep.subr.bf16.mxu1 %v7256_v21 }
 0x650   :  { %4854 = vmatpush1.bf16.msra.mxu0 %v7251_v22 }
 0x651   :  { %4895 = vmatpush1.bf16.msra.mxu1 %v7254_v27  ;;  %4855 = vmatprep.subr.bf16.mxu0 %v7259_v31 }
 0x652   :  { %4896 = vmatprep.subr.bf16.mxu1 %v7262_v33 }
 0x654   :  { %4856 = vmatpush1.bf16.msra.mxu0 %v7257_v35 }
 0x655   :  { %4897 = vmatpush1.bf16.msra.mxu1 %v7260_v9  ;;  %4857 = vmatprep.subr.bf16.mxu0 %v7265_v16 }
 0x656   :  { %4898 = vmatprep.subr.bf16.mxu1 %v7268_v63 }
 0x658   :  { %4858 = vmatpush1.bf16.msra.mxu0 %v7263_v10 }
 0x659   :  { %4899 = vmatpush1.bf16.msra.mxu1 %v7266_v36  ;;  %4859 = vmatprep.subr.bf16.mxu0 %v7271_v5 }
 0x65a   :  { %4900 = vmatprep.subr.bf16.mxu1 %v7274_v56 }
 0x65c   :  { %4860 = vmatpush1.bf16.msra.mxu0 %v7269_v38 }
 0x65d   :  { %4901 = vmatpush1.bf16.msra.mxu1 %v7272_v39  ;;  %4861 = vmatprep.subr.bf16.mxu0 %v7277_v29 }
 0x65e   :  { %4902 = vmatprep.subr.bf16.mxu1 %v7280_v32  ;;  %v7335_v32 = vld [vmem:[#allocation23 + $0x70] ss:$8 sps:$4 sm:$0xff]  }
 0x660   :  { %4862 = vmatpush1.bf16.msra.mxu0 %v7275_v23  ;;  %v7337_v23 = vld [vmem:[#allocation23 + $0x74] ss:$8 sps:$4 sm:$0xff]  }
 0x661   :  { %4903 = vmatpush1.bf16.msra.mxu1 %v7278_v3  ;;  %4863 = vmatprep.subr.bf16.mxu0 %v7283_v24  ;;  %v7338_v3 = vld [vmem:[#allocation23 + $0x170] ss:$8 sps:$4 sm:$0xff]   ;;  %v7340_v24 = vld [vmem:[#allocation23 + $0x174] ss:$8 sps:$4 sm:$0xff]  }
 0x662   :  { %4904 = vmatprep.subr.bf16.mxu1 %v7286_v45  ;;  %v7343_v45 = vld [vmem:[#allocation23 + $0x64] ss:$8 sps:$4 sm:$0xff]  }
 0x664   :  { %4864 = vmatpush1.bf16.msra.mxu0 %v7281_v25  ;;  %v7346_v25 = vld [vmem:[#allocation23 + $0x164] ss:$8 sps:$4 sm:$0xff]  }
 0x665   :  { %4905 = vmatpush1.bf16.msra.mxu1 %v7284_v44  ;;  %4865 = vmatprep.subr.bf16.mxu0 %v7289_v52  ;;  %v7341_v44 = vld [vmem:[#allocation23 + $0x60] ss:$8 sps:$4 sm:$0xff]  }
 0x666   :  { %4906 = vmatprep.subr.bf16.mxu1 %v7292_v46  ;;  %v7344_v52 = vld [vmem:[#allocation23 + $0x160] ss:$8 sps:$4 sm:$0xff]   ;;  %v7349_v46 = vld [vmem:[#allocation23 + $0x54] ss:$8 sps:$4 sm:$0xff]  }
 0x668   :  { %4866 = vmatpush2.bf16.msra.mxu0 %v7287_v48  ;;  %v7352_v48 = vld [vmem:[#allocation23 + $0x154] ss:$8 sps:$4 sm:$0xff]  }
 0x669   :  { %4907 = vmatpush2.bf16.msra.mxu1 %v7290_v28  ;;  %4867 = vmatprep.subr.bf16.mxu0 %v7295_v49  ;;  %v7347_v28 = vld [vmem:[#allocation23 + $0x50] ss:$8 sps:$4 sm:$0xff]  }
 0x66a   :  { %4908 = vmatprep.subr.bf16.mxu1 %v7298_v54  ;;  %v7350_v49 = vld [vmem:[#allocation23 + $0x150] ss:$8 sps:$4 sm:$0xff]   ;;  %v7355_v54 = vld [vmem:[#allocation23 + $0x44] ss:$8 sps:$4 sm:$0xff]  }
 0x66c   :  { %4868 = vmatpush2.bf16.msra.mxu0 %v7293_v55  ;;  %v7358_v55 = vld [vmem:[#allocation23 + $0x144] ss:$8 sps:$4 sm:$0xff]  }
 0x66d   :  { %4909 = vmatpush2.bf16.msra.mxu1 %v7296_v41  ;;  %4869 = vmatprep.subr.bf16.mxu0 %v7301_v61  ;;  %v7353_v41 = vld [vmem:[#allocation23 + $0x40] ss:$8 sps:$4 sm:$0xff]  }
 0x66e   :  { %4910 = vmatprep.subr.bf16.mxu1 %v7304_v57  ;;  %v7356_v61 = vld [vmem:[#allocation23 + $0x140] ss:$8 sps:$4 sm:$0xff]   ;;  %v7361_v57 = vld [vmem:[#allocation23 + $0x34] ss:$8 sps:$4 sm:$0xff]  }
 0x670   :  { %4870 = vmatpush2.bf16.msra.mxu0 %v7299_v58  ;;  %v7364_v58 = vld [vmem:[#allocation23 + $0x134] ss:$8 sps:$4 sm:$0xff]  }
 0x671   :  { %4911 = vmatpush2.bf16.msra.mxu1 %v7302_v11  ;;  %4871 = vmatprep.subr.bf16.mxu0 %v7307_v62  ;;  %v7359_v11 = vld [vmem:[#allocation23 + $0x30] ss:$8 sps:$4 sm:$0xff]  }
 0x672   :  { %4912 = vmatprep.subr.bf16.mxu1 %v7310_v1  ;;  %v7362_v62 = vld [vmem:[#allocation23 + $0x130] ss:$8 sps:$4 sm:$0xff]   ;;  %v7367_v1 = vld [vmem:[#allocation23 + $0x24] ss:$8 sps:$4 sm:$0xff]  }
 0x674   :  { %4872 = vmatpush2.bf16.msra.mxu0 %v7305_v2  ;;  %v7370_v2 = vld [vmem:[#allocation23 + $0x124] ss:$8 sps:$4 sm:$0xff]  }
 0x675   :  { %4913 = vmatpush2.bf16.msra.mxu1 %v7308_v0  ;;  %4873 = vmatprep.subr.bf16.mxu0 %v7313_v6  ;;  %v7365_v0 = vld [vmem:[#allocation23 + $0x20] ss:$8 sps:$4 sm:$0xff]  }
 0x676   :  { %4914 = vmatprep.subr.bf16.mxu1 %v7316_v8  ;;  %v7368_v6 = vld [vmem:[#allocation23 + $0x120] ss:$8 sps:$4 sm:$0xff]   ;;  %v7373_v8 = vld [vmem:[#allocation23 + $0x14] ss:$8 sps:$4 sm:$0xff]  }
 0x678   :  { %4874 = vmatpush2.bf16.msra.mxu0 %v7311_v53  ;;  %v7376_v53 = vld [vmem:[#allocation23 + $0x114] ss:$8 sps:$4 sm:$0xff]  }
 0x679   :  { %4915 = vmatpush2.bf16.msra.mxu1 %v7314_v40  ;;  %4875 = vmatprep.subr.bf16.mxu0 %v7319_v26  ;;  %v7371_v40 = vld [vmem:[#allocation23 + $0x10] ss:$8 sps:$4 sm:$0xff]  }
 0x67a   :  { %4916 = vmatprep.subr.bf16.mxu1 %v7322_v30  ;;  %v7374_v26 = vld [vmem:[#allocation23 + $0x110] ss:$8 sps:$4 sm:$0xff]   ;;  %v7379_v30 = vld [vmem:[#allocation23 + $0x4] ss:$8 sps:$4 sm:$0xff]  }
 0x67c   :  { %4876 = vmatpush2.bf16.msra.mxu0 %v7317_v12  ;;  %v7382_v12 = vld [vmem:[#allocation23 + $0x104] ss:$8 sps:$4 sm:$0xff]  }
 0x67d   :  { %4917 = vmatpush2.bf16.msra.mxu1 %v7320_v13  ;;  %4877 = vmatprep.subr.bf16.mxu0 %v7325_v34  ;;  %v7377_v13 = vld [vmem:[#allocation23] ss:$8 sps:$4 sm:$0xff]  }
 0x67e   :  { %4918 = vmatprep.subr.bf16.mxu1 %v7328_v59  ;;  %v7380_v34 = vld [vmem:[#allocation23 + $0x100] ss:$8 sps:$4 sm:$0xff]  }
 0x680   :  { %4878 = vmatpush2.bf16.msra.mxu0 %v7323_v14 }
 0x681   :  { %4919 = vmatpush2.bf16.msra.mxu1 %v7326_v18  ;;  %4879 = vmatprep.subr.bf16.mxu0 %v7331_v4 }
 0x682   :  { %4920 = vmatprep.subr.bf16.mxu1 %v7334_v60 }
 0x684   :  { %4880 = vmatpush2.bf16.msra.mxu0 %v7329_v15 }
 0x685   :  { %4921 = vmatpush2.bf16.msra.mxu1 %v7332_v17  ;;  %5507 = vmatprep.subr.bf16.mxu0 %v7337_v23 }
 0x686   :  { %5548 = vmatprep.subr.bf16.mxu1 %v7340_v24 }
 0x687   :  { %4882 = vmatmul.mubr.bf16.vlgmr.msra.gmra.mxu0 %v8283_v50  ;;  %v3997_v19 = vpop.f32.mrf.mxu0  ;;  %v4038_v20 = vpop.f32.mrf.mxu1 }
 0x688   :  { %4923 = vmatmul.mubr.bf16.vlgmr.msra.gmra.mxu1 %v8285_v37  ;;  %v8317_v21 = vadd.f32 %v4038_v20, %v3997_v19  ;;  %5508 = vmatpush1.bf16.msra.mxu0 %v7335_v32 }
 0x689   :  { %v3999_v22 = vpop.f32.mrf.mxu0  ;;  %v4040_v27 = vpop.f32.mrf.mxu1  ;;  %5549 = vmatpush1.bf16.msra.mxu1 %v7338_v3  ;;  %5509 = vmatprep.subr.bf16.mxu0 %v7343_v45 }
 0x68a   :  { %v8319_v31 = vadd.f32 %v4040_v27, %v3999_v22  ;;  %5550 = vmatprep.subr.bf16.mxu1 %v7346_v25  ;;  %v4931_v27 = vld [vmem:[%s8419_s19] sm:$0xf] }
 0x68b   :  { %v4001_v33 = vpop.f32.mrf.mxu0  ;;  %v4042_v35 = vpop.f32.mrf.mxu1  ;;  %v4948_v3 = vrot.slane %v4931_v27, %v8051_v51 }
 0x68c   :  { %5510 = vmatpush1.bf16.msra.mxu0 %v7341_v44  ;;  %v4940_v35 = vrot.slane %v4931_v27, %v8043_v43 }
 0x68d   :  { %v4002_v9 = vpop.f32.mrf.mxu0  ;;  %v4043_v16 = vpop.f32.mrf.mxu1  ;;  %5551 = vmatpush1.bf16.msra.mxu1 %v7344_v52  ;;  %5511 = vmatprep.subr.bf16.mxu0 %v7349_v46 }
 0x68e   :  { %5552 = vmatprep.subr.bf16.mxu1 %v7352_v48  ;;  %v4936_v16 = vrot.slane %v4931_v27, %v8040_v42 }
 0x690   :  { %5512 = vmatpush1.bf16.msra.mxu0 %v7347_v28 }
 0x691   :  { %5553 = vmatpush1.bf16.msra.mxu1 %v7350_v49  ;;  %5513 = vmatprep.subr.bf16.mxu0 %v7355_v54 }
 0x692   :  { %5554 = vmatprep.subr.bf16.mxu1 %v7358_v55 }
 0x694   :  { %5514 = vmatpush1.bf16.msra.mxu0 %v7353_v41 }
 0x695   :  { %5555 = vmatpush1.bf16.msra.mxu1 %v7356_v61  ;;  %5515 = vmatprep.subr.bf16.mxu0 %v7361_v57 }
 0x696   :  { %5556 = vmatprep.subr.bf16.mxu1 %v7364_v58 }
 0x698   :  { %5516 = vmatpush1.bf16.msra.mxu0 %v7359_v11  ;;  %v7385_v11 = vld [vmem:[#allocation23 + $0xf4] ss:$8 sps:$4 sm:$0xff]  }
 0x699   :  { %5557 = vmatpush1.bf16.msra.mxu1 %v7362_v62  ;;  %5517 = vmatprep.subr.bf16.mxu0 %v7367_v1  ;;  %v7388_v62 = vld [vmem:[#allocation23 + $0x1f4] ss:$8 sps:$4 sm:$0xff]   ;;  %v7383_v1 = vld [vmem:[#allocation23 + $0xf0] ss:$8 sps:$4 sm:$0xff]  }
 0x69a   :  { %5558 = vmatprep.subr.bf16.mxu1 %v7370_v2  ;;  %v7386_v2 = vld [vmem:[#allocation23 + $0x1f0] ss:$8 sps:$4 sm:$0xff]  }
 0x69c   :  { %5518 = vmatpush1.bf16.msra.mxu0 %v7365_v0  ;;  %v7391_v0 = vld [vmem:[#allocation23 + $0xe4] ss:$8 sps:$4 sm:$0xff]  }
 0x69d   :  { %5559 = vmatpush1.bf16.msra.mxu1 %v7368_v6  ;;  %5519 = vmatprep.subr.bf16.mxu0 %v7373_v8  ;;  %v7394_v6 = vld [vmem:[#allocation23 + $0x1e4] ss:$8 sps:$4 sm:$0xff]   ;;  %v7389_v8 = vld [vmem:[#allocation23 + $0xe0] ss:$8 sps:$4 sm:$0xff]  }
 0x69e   :  { %5560 = vmatprep.subr.bf16.mxu1 %v7376_v53  ;;  %v7392_v53 = vld [vmem:[#allocation23 + $0x1e0] ss:$8 sps:$4 sm:$0xff]  }
 0x6a0   :  { %5520 = vmatpush1.bf16.msra.mxu0 %v7371_v40  ;;  %v7397_v40 = vld [vmem:[#allocation23 + $0xd4] ss:$8 sps:$4 sm:$0xff]  }
 0x6a1   :  { %5561 = vmatpush1.bf16.msra.mxu1 %v7374_v26  ;;  %5521 = vmatprep.subr.bf16.mxu0 %v7379_v30  ;;  %v7400_v26 = vld [vmem:[#allocation23 + $0x1d4] ss:$8 sps:$4 sm:$0xff]   ;;  %v7395_v30 = vld [vmem:[#allocation23 + $0xd0] ss:$8 sps:$4 sm:$0xff]  }
 0x6a2   :  { %5562 = vmatprep.subr.bf16.mxu1 %v7382_v12  ;;  %v7398_v12 = vld [vmem:[#allocation23 + $0x1d0] ss:$8 sps:$4 sm:$0xff]  }
 0x6a4   :  { %5522 = vmatpush1.bf16.msra.mxu0 %v7377_v13  ;;  %v7403_v13 = vld [vmem:[#allocation23 + $0xc4] ss:$8 sps:$4 sm:$0xff]  }
 0x6a5   :  { %5563 = vmatpush1.bf16.msra.mxu1 %v7380_v34  ;;  %5523 = vmatprep.subr.bf16.mxu0 %v7385_v11  ;;  %v7406_v34 = vld [vmem:[#allocation23 + $0x1c4] ss:$8 sps:$4 sm:$0xff]  }
 0x6a6   :  { %5564 = vmatprep.subr.bf16.mxu1 %v7388_v62 }
 0x6a8   :  { %5524 = vmatpush2.bf16.msra.mxu0 %v7383_v1 }
 0x6a9   :  { %5565 = vmatpush2.bf16.msra.mxu1 %v7386_v2  ;;  %5525 = vmatprep.subr.bf16.mxu0 %v7391_v0 }
 0x6aa   :  { %5566 = vmatprep.subr.bf16.mxu1 %v7394_v6 }
 0x6ac   :  { %5526 = vmatpush2.bf16.msra.mxu0 %v7389_v8 }
 0x6ad   :  { %5567 = vmatpush2.bf16.msra.mxu1 %v7392_v53  ;;  %5527 = vmatprep.subr.bf16.mxu0 %v7397_v40 }
 0x6ae   :  { %5568 = vmatprep.subr.bf16.mxu1 %v7400_v26 }
 0x6b0   :  { %5528 = vmatpush2.bf16.msra.mxu0 %v7395_v30 }
 0x6b1   :  { %5569 = vmatpush2.bf16.msra.mxu1 %v7398_v12  ;;  %5529 = vmatprep.subr.bf16.mxu0 %v7403_v13 }
 0x6b2   :  { %5570 = vmatprep.subr.bf16.mxu1 %v7406_v34 }
 0x6c7   :  { %v4079_v63 = vpop.f32.mrf.mxu0  ;;  %v4120_v10 = vpop.f32.mrf.mxu1 }
 0x6c8   :  { %v8321_v36 = vadd.f32 %v4120_v10, %v4079_v63 }
 0x6c9   :  { %v4081_v5 = vpop.f32.mrf.mxu0  ;;  %v4122_v50 = vpop.f32.mrf.mxu1 }
 0x6ca   :  { %v8323_v56 = vadd.f32 %v4122_v50, %v4081_v5 }
 0x6cb   :  { %v4083_v38 = vpop.f32.mrf.mxu0  ;;  %v4124_v37 = vpop.f32.mrf.mxu1 }
 0x6cd   :  { %v4084_v39 = vpop.f32.mrf.mxu0  ;;  %v4125_v29 = vpop.f32.mrf.mxu1 }
 0x707   :  { %v4801_v59 = vpop.f32.mrf.mxu0 }
 0x708   :  { %v4842_v14 = vpop.f32.mrf.mxu1  ;;  %v4802_v22 = vadd.f32 %v4801_v59, %v8317_v21  ;;  %v4944_v21 = vrot.slane %v4931_v27, %v8048_v47  ;;  %v7401_v59 = vld [vmem:[#allocation23 + $0xc0] ss:$8 sps:$4 sm:$0xff]   ;;  %v7419_v27 = vld [vmem:[#allocation23 + $0x90] ss:$8 sps:$4 sm:$0xff]  }
 0x709   :  { %v4803_v18 = vpop.f32.mrf.mxu0  ;;  %5530 = vmatpush2.bf16.msra.mxu0 %v7401_v59 }
 0x70a   :  { %v4844_v4 = vpop.f32.mrf.mxu1  ;;  %v4804_v20 = vadd.f32 %v4803_v18, %v8319_v31  ;;  %v4843_v9 = vadd.f32 %v4842_v14, %v4802_v22  ;;  %v7404_v14 = vld [vmem:[#allocation23 + $0x1c0] ss:$8 sps:$4 sm:$0xff]   ;;  %v7409_v18 = vld [vmem:[#allocation23 + $0xb4] ss:$8 sps:$4 sm:$0xff]  }
 0x70b   :  { %v4805_v60 = vpop.f32.mrf.mxu0  ;;  %5571 = vmatpush2.bf16.msra.mxu1 %v7404_v14  ;;  %5531 = vmatprep.subr.bf16.mxu0 %v7409_v18  ;;  %v7416_v22 = vld [vmem:[#allocation23 + $0x1a0] ss:$8 sps:$4 sm:$0xff]  }
 0x70c   :  { %v4846_v15 = vpop.f32.mrf.mxu1  ;;  %v4845_v33 = vadd.f32 %v4844_v4, %v4804_v20  ;;  %v4953_v10 = vadd.f32 %v4936_v16, %v4843_v9  ;;  %v7412_v4 = vld [vmem:[#allocation23 + $0x1b4] ss:$8 sps:$4 sm:$0xff]   ;;  %v7407_v60 = vld [vmem:[#allocation23 + $0xb0] ss:$8 sps:$4 sm:$0xff]   ;;  %v7413_v20 = vld [vmem:[#allocation23 + $0xa0] ss:$8 sps:$4 sm:$0xff]  }
 0x70d   :  { %v4806_v17 = vpop.f32.mrf.mxu0  ;;  %v7410_v15 = vld [vmem:[#allocation23 + $0x1b0] ss:$8 sps:$4 sm:$0xff]   ;;  %5572 = vmatprep.subr.bf16.mxu1 %v7412_v4  ;;  %5532 = vmatpush2.bf16.msra.mxu0 %v7407_v60  ;;  %v7424_v9 = vld [vmem:[#allocation23 + $0x194] ss:$8 sps:$4 sm:$0xff]   ;;  %v7427_v16 = vld [vmem:[#allocation23 + $0x84] ss:$8 sps:$4 sm:$0xff]  }
 0x70e   :  { %v4847_v19 = vpop.f32.mrf.mxu1  ;;  %v4954_v63 = vadd.f32 %v4940_v35, %v4845_v33  ;;  %v8336_v39 = vmax.f32 %v4953_v10, 0.0  ;;  %v7415_v17 = vld [vmem:[#allocation23 + $0xa4] ss:$8 sps:$4 sm:$0xff]   ;;  %v7421_v33 = vld [vmem:[#allocation23 + $0x94] ss:$8 sps:$4 sm:$0xff]  }
 0x70f   :  { %5573 = vmatpush2.bf16.msra.mxu1 %v7410_v15  ;;  %v7418_v19 = vld [vmem:[#allocation23 + $0x1a4] ss:$8 sps:$4 sm:$0xff]   ;;  %5533 = vmatprep.subr.bf16.mxu0 %v7415_v17  ;;  %v7422_v35 = vld [vmem:[#allocation23 + $0x190] ss:$8 sps:$4 sm:$0xff]   ;;  %v7425_v10 = vld [vmem:[#allocation23 + $0x80] ss:$8 sps:$4 sm:$0xff]  }
 0x710   :  { %v8332_v50 = vmax.f32 %v4954_v63, 0.0  ;;  %5574 = vmatprep.subr.bf16.mxu1 %v7418_v19  ;;  %v7430_v63 = vld [vmem:[#allocation23 + $0x184] ss:$8 sps:$4 sm:$0xff]  }
 0x711   :  { %5534 = vmatpush2.bf16.msra.mxu0 %v7413_v20 }
 0x712   :  { %v4968_v52 = vmul.f32 %v8332_v50, %v8332_v50  ;;  %v4961_v28 = vadd.f32 %v8332_v50, %v8336_v39  ;;  %5535 = vmatprep.subr.bf16.mxu0 %v7421_v33 }
 0x713   :  { %5575 = vmatpush2.bf16.msra.mxu1 %v7416_v22 }
 0x714   :  { %5576 = vmatprep.subr.bf16.mxu1 %v7424_v9 }
 0x715   :  { %5536 = vmatpush2.bf16.msra.mxu0 %v7419_v27 }
 0x716   :  { %5537 = vmatprep.subr.bf16.mxu0 %v7427_v16 }
 0x717   :  { %5577 = vmatpush2.bf16.msra.mxu1 %v7422_v35 }
 0x718   :  { %5578 = vmatprep.subr.bf16.mxu1 %v7430_v63  ;;  %v5175_v63 = vld [vmem:[%s8423_s23] sm:$0x3] }
 0x719   :  { %5538 = vmatpush2.bf16.msra.mxu0 %v7425_v10  ;;  %v5180_v10 = vrot.slane %v5175_v63, %v8040_v42 }
 0x747   :  { %v4883_v5 = vpop.f32.mrf.mxu0 }
 0x748   :  { %v4884_v38 = vadd.f32 %v4883_v5, %v8321_v36  ;;  %v4924_v31 = vpop.f32.mrf.mxu1  ;;  %v7428_v5 = vld [vmem:[#allocation23 + $0x180] ss:$8 sps:$4 sm:$0xff]  }
 0x749   :  { %v4885_v37 = vpop.f32.mrf.mxu0  ;;  %5579 = vmatpush2.bf16.msra.mxu1 %v7428_v5  ;;  %v5184_v5 = vrot.slane %v5175_v63, %v8043_v43  ;;  %v7431_v43 = vld [vmem:[#allocation25 + $0x78] sm:$0xff]  }
 0x74a   :  { %v4925_v29 = vadd.f32 %v4924_v31, %v4884_v38  ;;  %v4886_v32 = vadd.f32 %v4885_v37, %v8323_v56  ;;  %v4926_v23 = vpop.f32.mrf.mxu1  ;;  %v4967_v56 = vmul.f32 %v8336_v39, %v8336_v39  ;;  %6509 = vmatprep.subr.bf16.mxu0 %v7431_v43 }
 0x74b   :  { %v4887_v24 = vpop.f32.mrf.mxu0 }
 0x74c   :  { %v4955_v45 = vadd.f32 %v4944_v21, %v4925_v29  ;;  %v4927_v25 = vadd.f32 %v4926_v23, %v4886_v32  ;;  %v4928_v44 = vpop.f32.mrf.mxu1  ;;  %v4971_v55 = vadd.f32 %v4968_v52, %v4967_v56  ;;  %v6424_v23 = vld.sshfl [vmem:[%s8420_s20] sm:$0x33 pattern:$0x75316420] }
 0x74d   :  { %v4888_v36 = vpop.f32.mrf.mxu0  ;;  %v6425_v24 = vld.sshfl [vmem:[#allocation22] sm:$0x33 pattern:$0x75316420] }
 0x74e   :  { %v8342_v46 = vmax.f32 %v4955_v45, 0.0  ;;  %v4956_v47 = vadd.f32 %v4948_v3, %v4927_v25  ;;  %v4929_v48 = vpop.f32.mrf.mxu1  ;;  %v5004_v45 = vcombine.high %v6424_v23, %v6424_v23  ;;  %v5062_v44 = vcombine.high %v6425_v24, %v6425_v24 }
 0x74f   :  { %v5011_v36 = vrot.slane %v6424_v23, %v8079_v7  ;;  %v5069_v48 = vrot.slane %v6425_v24, %v8079_v7 }
 0x750   :  { %v8348_v49 = vmax.f32 %v4956_v47, 0.0  ;;  %v4962_v51 = vadd.f32 %v4961_v28, %v8342_v46  ;;  %v4969_v54 = vmul.f32 %v8342_v46, %v8342_v46  ;;  %v5018_v52 = vrot.slane %v5004_v45, %v8079_v7 }
 0x751   :  { %v5076_v47 = vrot.slane %v5062_v44, %v8079_v7  ;;  %v5019_v56 = vcombine.high %v5011_v36, %v5011_v36  ;;  %v5080_v6 = vpack.i.b16 %v5069_v48, %v5069_v48 }
 0x752   :  { %v4963_v41 = vadd.f32 %v4962_v51, %v8348_v49  ;;  %v4970_v61 = vmul.f32 %v8348_v49, %v8348_v49  ;;  %v4972_v57 = vadd.f32 %v4971_v55, %v4969_v54  ;;  %v5020_v28 = vcombine.high %v5018_v52, %v5018_v52 }
 0x753   :  { %v5078_v51 = vcombine.high %v5076_v47, %v5076_v47  ;;  %v5077_v54 = vcombine.high %v5069_v48, %v5069_v48  ;;  %v5029_v55 = vpack.i.b16 %v5018_v52, %v5018_v52  ;;  %v5087_v2 = vpack.i.b16 %v5076_v47, %v5076_v47 }
 0x754   :  { %4964 = vadd.xlane.f32.xlu0 %v4963_v41  ;;  %v4973_v58 = vadd.f32 %v4972_v57, %v4970_v61  ;;  %v5043_v61 = vpack.i.b16 %v5020_v28, %v5020_v28  ;;  %v5022_v57 = vpack.i.b16 %v5011_v36, %v5011_v36  ;;  %v5085_v14 = vrot.slane %v5080_v6, %v8040_v42  ;;  %v7444_v6 = vld [vmem:[#allocation25 + $0x8] sm:$0xff]  }
 0x755   :  { %v5101_v0 = vpack.i.b16 %v5078_v51, %v5078_v51  ;;  %v5094_v8 = vpack.i.b16 %v5077_v54, %v5077_v54  ;;  %v5034_v53 = vrot.slane %v5029_v55, %v8040_v42  ;;  %v7432_v51 = vld [vmem:[#allocation25 + $0x38] sm:$0xff]   ;;  %v7433_v54 = vld [vmem:[#allocation25 + $0x70] sm:$0xff]  }
 0x756   :  { %4974 = vadd.xlane.f32.xlu1 %v4973_v58  ;;  %v5036_v58 = vpack.i.b16 %v5019_v56, %v5019_v56  ;;  %v5048_v26 = vrot.slane %v5043_v61, %v8040_v42  ;;  %v7434_v55 = vld [vmem:[#allocation25 + $0x30] sm:$0xff]   ;;  %v7436_v61 = vld [vmem:[#allocation25 + $0x28] sm:$0xff]  }
 0x757   :  { %v5106_v59 = vrot.slane %v5101_v0, %v8040_v42  ;;  %v5099_v18 = vrot.slane %v5094_v8, %v8040_v42  ;;  %v7443_v0 = vld [vmem:[#allocation25 + $0x48] sm:$0xff]   ;;  %v7445_v8 = vld [vmem:[#allocation25 + $0x40] sm:$0xff]  }
 0x758   :  { %v5041_v12 = vrot.slane %v5036_v58, %v8040_v42  ;;  %v7438_v58 = vld [vmem:[#allocation25 + $0x20] sm:$0xff]  }
 0x7dd   :  { %v4965_v38 = vpop.xlane.xlu0 %4964 }
 0x7de   :  { %v4966_v31 = vmul.f32 0.001953125, %v4965_v38 }
 0x7df   :  { %v4975_v21 = vpop.xlane.xlu1 %4974 }
 0x7e0   :  { %v4976_v37 = vmul.f32 0.001953125, %v4975_v21  ;;  %v4977_v29 = vmul.f32 %v4966_v31, %v4966_v31  ;;  %v4982_v41 = vsub.f32 %v8336_v39, %v4966_v31  ;;  %v4984_v11 = vsub.f32 %v8342_v46, %v4966_v31 }
 0x7e1   :  { %v4983_v62 = vsub.f32 %v8332_v50, %v4966_v31  ;;  %v4985_v1 = vsub.f32 %v8348_v49, %v4966_v31  ;;  %v5027_v39 = vrot.slane %v5022_v57, %v8040_v42  ;;  %v5092_v49 = vrot.slane %v5087_v2, %v8040_v42  ;;  %v7437_v57 = vld [vmem:[#allocation25 + $0x60] sm:$0xff]   ;;  %v7442_v2 = vld [vmem:[#allocation25 + $0x10] sm:$0xff]  }
 0x7e2   :  { %v4978_v32 = vsub.f32 %v4976_v37, %v4977_v29  ;;  %v4986_v30 = vpack.c.bf16 %v4982_v41, %v4982_v41  ;;  %v4988_v50 = vpack.c.bf16 %v4984_v11, %v4984_v11  ;;  %v7435_v41 = vld [vmem:[#allocation25 + $0x68] sm:$0xff]   ;;  %v7439_v11 = vld [vmem:[#allocation25 + $0x58] sm:$0xff]  }
 0x7e3   :  { %v4987_v46 = vpack.c.bf16 %v4983_v62, %v4983_v62  ;;  %v4989_v34 = vpack.c.bf16 %v4985_v1, %v4985_v1  ;;  %v7440_v62 = vld [vmem:[#allocation25 + $0x18] sm:$0xff]   ;;  %v7441_v1 = vld [vmem:[#allocation25 + $0x50] sm:$0xff]  }
 0x7e4   :  { %v4979_v3 = vmax.f32 %v4978_v32, 0.0 }
 0x7e6   :  { %v4980_v25 = vadd.f32 1e-05, %v4979_v3 }
 0x7e8   :  { %7455 = vrsqrt.f32 %v4980_v25 }
 0x7f5   :  { %v7456_v40 = vpop.eup %7455 }
 0x7f6   :  { %v4990_v13 = vpack.c.bf16 %v7456_v40, %v7456_v40 }
 0x7f8   :  { %v4992_v4 = vmul.bf16 %v4990_v13, %v4987_v46  ;;  %v4994_v60 = vmul.bf16 %v4990_v13, %v4989_v34  ;;  %v4991_v15 = vmul.bf16 %v4990_v13, %v4986_v30  ;;  %v4993_v17 = vmul.bf16 %v4990_v13, %v4988_v50  ;;  %v6490_v50 = vld.sshfl [vmem:[%s8424_s24] sm:$0x11 pattern:$0x75316420] }
 0x7fa   :  { %v5050_v19 = vmul.bf16 %v5034_v53, %v4992_v4  ;;  %v5052_v20 = vmul.bf16 %v5048_v26, %v4994_v60  ;;  %v5049_v22 = vmul.bf16 %v5027_v39, %v4991_v15  ;;  %v5051_v27 = vmul.bf16 %v5041_v12, %v4993_v17  ;;  %v7446_v53 = vld [vmem:[#allocation25] sm:$0xff]  }
 0x7fb   :  { %v5630_v4 = vrot.slane %v6490_v50, %v8079_v7 }
 0x7fc   :  { %v5108_v33 = vadd.bf16 %v5092_v49, %v5050_v19  ;;  %v5110_v35 = vadd.bf16 %v5106_v59, %v5052_v20  ;;  %v5107_v9 = vadd.bf16 %v5085_v14, %v5049_v22  ;;  %v5109_v16 = vadd.bf16 %v5099_v18, %v5051_v27  ;;  %v6491_v59 = vld.sshfl [vmem:[%s8425_s25] sm:$0x11 pattern:$0x75316420] }
 0x7fd   :  { %v5623_v49 = vcombine.high %v6490_v50, %v6490_v50  ;;  %v5663_v14 = vcombine.high %v6491_v59, %v6491_v59  ;;  %v5670_v15 = vrot.slane %v6491_v59, %v8079_v7  ;;  %v5639_v22 = vpack.i.b16 %v5630_v4, %v5630_v4 }
 0x7fe   :  { %5539 = vmatprep.mubr.bf16.mxu0 %v5108_v33  ;;  %5580 = vmatprep.mubr.bf16.mxu1 %v5110_v35 }
 0x7ff   :  { %5540 = vmatmul.mubr.bf16.vlgmr.msra.gmra.mxu0 %v5107_v9  ;;  %5581 = vmatmul.mubr.bf16.vlgmr.msra.gmra.mxu1 %v5109_v16  ;;  %v5637_v18 = vrot.slane %v5623_v49, %v8079_v7  ;;  %v5677_v60 = vrot.slane %v5663_v14, %v8079_v7  ;;  %v5679_v33 = vpack.i.b16 %v5670_v15, %v5670_v15 }
 0x800   :  { %6510 = vmatpush3.bf16.msra.mxu0 %v7432_v51 }
 0x801   :  { %6511 = vmatprep.subr.bf16.mxu0 %v7433_v54  ;;  %v5646_v17 = vpack.i.b16 %v5637_v18, %v5637_v18  ;;  %v5686_v27 = vpack.i.b16 %v5677_v60, %v5677_v60  ;;  %v5684_v7 = vrot.slane %v5679_v33, %v8040_v42 }
 0x803   :  { %v5651_v9 = vrot.slane %v5646_v17, %v8040_v42 }
 0x804   :  { %6512 = vmatpush3.bf16.msra.mxu0 %v7434_v55 }
 0x805   :  { %6513 = vmatprep.subr.bf16.mxu0 %v7435_v41 }
 0x808   :  { %6514 = vmatpush3.bf16.msra.mxu0 %v7436_v61 }
 0x809   :  { %6515 = vmatprep.subr.bf16.mxu0 %v7437_v57 }
 0x80c   :  { %6516 = vmatpush3.bf16.msra.mxu0 %v7438_v58 }
 0x80d   :  { %6517 = vmatprep.subr.bf16.mxu0 %v7439_v11 }
 0x810   :  { %6518 = vmatpush3.bf16.msra.mxu0 %v7440_v62 }
 0x811   :  { %6519 = vmatprep.subr.bf16.mxu0 %v7441_v1 }
 0x814   :  { %6520 = vmatpush3.bf16.msra.mxu0 %v7442_v2 }
 0x815   :  { %6521 = vmatprep.subr.bf16.mxu0 %v7443_v0 }
 0x818   :  { %6522 = vmatpush3.bf16.msra.mxu0 %v7444_v6 }
 0x819   :  { %6523 = vmatprep.subr.bf16.mxu0 %v7445_v8 }
 0x81c   :  { %6524 = vmatpush3.bf16.msra.mxu0 %v7446_v53 }
 0x8bf   :  { %v5541_v38 = vpop.f32.mrf.mxu0  ;;  %v5582_v31 = vpop.f32.mrf.mxu1 }
 0x8c0   :  { %v5542_v21 = vadd.f32 %v5541_v38, %v5180_v10 }
 0x8c1   :  { %v5543_v37 = vpop.f32.mrf.mxu0  ;;  %v5584_v29 = vpop.f32.mrf.mxu1 }
 0x8c2   :  { %v5583_v32 = vadd.f32 %v5582_v31, %v5542_v21  ;;  %v5544_v23 = vadd.f32 %v5543_v37, %v5184_v5  ;;  %v5644_v5 = vrot.slane %v5639_v22, %v8040_v42  ;;  %v5691_v21 = vrot.slane %v5686_v27, %v8040_v42 }
 0x8c3   :  { %v5545_v3 = vpop.f32.mrf.mxu0  ;;  %v5586_v24 = vpop.f32.mrf.mxu1 }
 0x8c4   :  { %v5589_v45 = vmax.f32 %v5583_v32, 0.0  ;;  %v5585_v25 = vadd.f32 %v5584_v29, %v5544_v23  ;;  %v6492_v24 = vld [vmem:[%s8427_s27] ss:$0 sm:$0xff] }
 0x8c5   :  { %v5546_v44 = vpop.f32.mrf.mxu0  ;;  %v5587_v52 = vpop.f32.mrf.mxu1 }
 0x8c6   :  { %v5590_v36 = vmax.f32 %v5585_v25, 0.0  ;;  %v5596_v48 = vmul.f32 %v5589_v45, %v5589_v45 }
 0x8c8   :  { %v5591_v47 = vadd.f32 %v5590_v36, %v5589_v45  ;;  %v5597_v28 = vmul.f32 %v5590_v36, %v5590_v36 }
 0x8ca   :  { %5592 = vadd.xlane.f32.xlu0 %v5591_v47  ;;  %v5598_v56 = vadd.f32 %v5597_v28, %v5596_v48 }
 0x8cc   :  { %5599 = vadd.xlane.f32.xlu1 %v5598_v56 }
 0x953   :  { %v5593_v40 = vpop.xlane.xlu0 %5592 }
 0x954   :  { %v5595_v26 = vmul.f32 0.00390625, %v5593_v40 }
 0x955   :  { %v5600_v30 = vpop.xlane.xlu1 %5599 }
 0x956   :  { %v5601_v39 = vmul.f32 0.00390625, %v5600_v30  ;;  %v5602_v12 = vmul.f32 %v5595_v26, %v5595_v26  ;;  %v5607_v19 = vsub.f32 %v5589_v45, %v5595_v26  ;;  %v5608_v20 = vsub.f32 %v5590_v36, %v5595_v26 }
 0x958   :  { %v5603_v13 = vsub.f32 %v5601_v39, %v5602_v12  ;;  %v5609_v16 = vpack.c.bf16 %v5607_v19, %v5607_v19  ;;  %v5610_v63 = vpack.c.bf16 %v5608_v20, %v5608_v20 }
 0x95a   :  { %v5604_v46 = vmax.f32 %v5603_v13, 0.0 }
 0x95c   :  { %v5605_v34 = vadd.f32 1e-05, %v5604_v46 }
 0x95e   :  { %7457 = vrsqrt.f32 %v5605_v34 }
 0x96b   :  { %v7458_v35 = vpop.eup %7457 }
 0x96c   :  { %v5611_v10 = vpack.c.bf16 %v7458_v35, %v7458_v35 }
 0x96e   :  { %v5612_v38 = vmul.bf16 %v5611_v10, %v5609_v16  ;;  %v5613_v31 = vmul.bf16 %v5611_v10, %v5610_v63 }
 0x970   :  { %v5653_v37 = vmul.bf16 %v5651_v9, %v5613_v31  ;;  %v5652_v29 = vmul.bf16 %v5644_v5, %v5612_v38 }
 0x972   :  { %v5693_v32 = vadd.bf16 %v5691_v21, %v5653_v37  ;;  %v5692_v23 = vadd.bf16 %v5684_v7, %v5652_v29 }
 0x974   :  { %5861 = vmatprep.mubr.bf16.mxu0 %v5693_v32 }
 0x975   :  { %5862 = vmatmul.mubr.bf16.vlgmr.msra.gmra.mxu0 %v5692_v23 }
 0xa35   :  { %v6525_v3 = vpop.f32.mrf.mxu0 }
 0xa37   :  { %v6526_v45 = vpop.f32.mrf.mxu0 }
 0xa38   :  { %v6527_v25 = vadd.f32 %v6526_v45, %v6525_v3 }
 0xa39   :  { %v6528_v44 = vpop.f32.mrf.mxu0 }
 0xa3a   :  { %v5864_v52 = vadd.f32 %v6527_v25, %v6492_v24 }
 0xa3b   :  { %v6529_v36 = vpop.f32.mrf.mxu0 }
 0xa3c   :  { %5869 = vst [vmem:[#allocation26] sm:$0xff] %v5864_v52 }
 0xa3d   :  { %7770 = shalt.err (!%p7767_p9)
}
 0xa3e   :  { %5879 = dma.vmem_to_hbm [thread:$0]  %s5877_s15, 128, %s8428_s28, [#allocation4]  }
 0xa3f   :  { %7795 = dma.done.wait [#allocation4], 128  }
 0xa40   :  { %7796 = vsyncadd [#allocation4], 4294967168 }
 0xa41   :  { %5883 = vsyncpa [#allocation3], 1 }
 0xa42   :  { %5884 = vsyncpa [#allocation6], 1 }
 0xa43   :  { %5885 = vsyncpa [#allocation9], 1 }
 0xa44   :  { %5886 = vsyncpa [#allocation12], 1 }
 0xa45   :  { %5887 = vsyncpa [#allocation15], 1 }
 0xa46   :  { %5888 = vsyncpa [#allocation18], 1 }
 0xa47   :  { %5889 = vsyncpa [#allocation21], 1 }
 0xa48   :  { %5890 = vsyncpa [#allocation24], 1 }
 0xa49   :  { %5891 = vsyncpa [#allocation4], 1 }

// kernel: tpu_custom_call.1
= control target key start
LH: loop header
LB: loop body
LE: loop exit
PB: predicated region body
PF: predicated region fallthrough
CT: control target
= control target key end

     0   :  { %s8400_s0 = inlined_call_operand.hbm [shape: f32[8,16], index: 0, kind: input, shape index: {}]   ;;  %s8401_s1 = inlined_call_operand.hbm [shape: bf16[16,512], index: 1, kind: input, shape index: {}]   ;;  %s8402_s2 = inlined_call_operand.hbm [shape: f32[1,512], index: 2, kind: input, shape index: {}]   ;;  %s8403_s3 = inlined_call_operand.vmem [shape: bf16[1,512], index: 3, kind: input, shape index: {}]   ;;  %s8404_s4 = inlined_call_operand.hbm [shape: bf16[1,512], index: 4, kind: input, shape index: {}]   ;;  %s8405_s5 = inlined_call_operand.hbm [shape: bf16[512,512], index: 5, kind: input, shape index: {}]   ;;  %s8406_s6 = inlined_call_operand.vmem [shape: f32[1,512], index: 6, kind: input, shape index: {}]   ;;  %s8407_s7 = inlined_call_operand.vmem [shape: bf16[1,512], index: 7, kind: input, shape index: {}]   ;;  %s8408_s8 = inlined_call_operand.hbm [shape: bf16[1,512], index: 8, kind: input, shape index: {}]   ;;  %s8409_s9 = inlined_call_operand.hbm [shape: bf16[16,512], index: 9, kind: input, shape index: {}]   ;;  %s8410_s10 = inlined_call_operand.vmem [shape: f32[1,512], index: 10, kind: input, shape index: {}]   ;;  %s8411_s11 = inlined_call_operand.vmem [shape: bf16[1,512], index: 11, kind: input, shape index: {}]   ;;  %s8412_s12 = inlined_call_operand.hbm [shape: bf16[1,512], index: 12, kind: input, shape index: {}]   ;;  %s8413_s13 = inlined_call_operand.hbm [shape: bf16[512,512], index: 13, kind: input, shape index: {}]   ;;  %s8414_s14 = inlined_call_operand.vmem [shape: f32[1,512], index: 14, kind: input, shape index: {}]   ;;  %s8415_s15 = inlined_call_operand.hbm [shape: bf16[1,512], index: 15, kind: input, shape index: {}]   ;;  %s8416_s16 = inlined_call_operand.vmem [shape: bf16[1,512], index: 16, kind: input, shape index: {}]   ;;  %s8417_s17 = inlined_call_operand.hbm [shape: bf16[512,512], index: 17, kind: input, shape index: {}]   ;;  %s8418_s18 = inlined_call_operand.hbm [shape: bf16[512,512], index: 18, kind: input, shape index: {}]   ;;  %s8419_s19 = inlined_call_operand.vmem [shape: f32[1,512], index: 19, kind: input, shape index: {}]   ;;  %s8420_s20 = inlined_call_operand.vmem [shape: bf16[1,512], index: 20, kind: input, shape index: {}]   ;;  %s8421_s21 = inlined_call_operand.hbm [shape: bf16[1,512], index: 21, kind: input, shape index: {}]   ;;  %s8422_s22 = inlined_call_operand.hbm [shape: bf16[512,256], index: 22, kind: input, shape index: {}]   ;;  %s8423_s23 = inlined_call_operand.vmem [shape: f32[1,256], index: 23, kind: input, shape index: {}]   ;;  %s8424_s24 = inlined_call_operand.vmem [shape: bf16[1,256], index: 24, kind: input, shape index: {}]   ;;  %s8425_s25 = inlined_call_operand.vmem [shape: bf16[1,256], index: 25, kind: input, shape index: {}]   ;;  %s8426_s26 = inlined_call_operand.hbm [shape: bf16[256,128], index: 26, kind: input, shape index: {}]   ;;  %s8427_s27 = inlined_call_operand.vmem [shape: f32[1,128], index: 27, kind: input, shape index: {}]   ;;  %s8428_s28 = inlined_call_operand.hbm [shape: f32[8,128], index: 28, kind: output, shape index: {}]  }
   0x1   :  { %8431 = sst [smem:[#allocation36_spill]] %s8400_s0 }
   0x2   :  { %8432 = sst [smem:[#allocation37_spill]] %s8401_s1 }
   0x3   :  { %8433 = sst [smem:[#allocation38_spill]] %s8402_s2 }
   0x4   :  { %8434 = sst [smem:[#allocation39_spill]] %s8403_s3 }
   0x5   :  { %8435 = sst [smem:[#allocation40_spill]] %s8404_s4 }
   0x6   :  { %8436 = sst [smem:[#allocation41_spill]] %s8405_s5 }
   0x7   :  { %8437 = sst [smem:[#allocation42_spill]] %s8406_s6 }
   0x8   :  { %8438 = sst [smem:[#allocation43_spill]] %s8407_s7 }
   0x9   :  { %8439 = sst [smem:[#allocation44_spill]] %s8408_s8 }
   0xa   :  { %8440 = sst [smem:[#allocation45_spill]] %s8409_s9 }
   0xb   :  { %8441 = sst [smem:[#allocation46_spill]] %s8410_s10 }
   0xc   :  { %8442 = sst [smem:[#allocation47_spill]] %s8411_s11 }
   0xd   :  { %8443 = sst [smem:[#allocation48_spill]] %s8412_s12 }
   0xe   :  { %33 = vsyncpa [#allocation3], 0 }
   0xf   :  { %34 = vsyncpa [#allocation6], 0 }
  0x10   :  { %35 = vsyncpa [#allocation9], 0 }
  0x11   :  { %36 = vsyncpa [#allocation12], 0 }
  0x12   :  { %37 = vsyncpa [#allocation15], 0 }
  0x13   :  { %38 = vsyncpa [#allocation18], 0 }
  0x14   :  { %39 = vsyncpa [#allocation21], 0 }
  0x15   :  { %40 = vsyncpa [#allocation24], 0 }
  0x16   :  { %41 = vsyncpa [#allocation4], 0  ;;  %s7797_s8 = smov [#allocation5]  }
  0x17   :  { %s57_s5 = sshll.u32 %s7797_s8, 4  ;;  %s58_s5 = int_to_ptr.vmem [resolvable:$true] %s57_s5 }
  0x18   :  { %s7467_s9 = scalar_lea.vmem %s58_s5, 512  ;;  %p7472_p1 = scmp.lt.s32.totalorder %s58_s5, %s58_s5 }
  0x19   :  { %p7468_p0 = scmp.ne.s32.totalorder %s58_s5, %s7467_s9  ;;  %p7473_p2 = scmp.lt.s32.totalorder %s7467_s9, %s7467_s9 }
  0x1b   :  { %p7474_p3 = por %p7473_p2, %p7472_p1 }
  0x1d   :  { %p7475_p4 = pnand %p7474_p3, %p7468_p0 }
  0x1f   :  { %7478 = shalt.err (!%p7475_p4)
}
  0x20   :  { %s8429_s30 = smov 256   ;;  %s7799_s3 = smov 16  }
  0x21   :  { %s8444_s0 = sld [smem:[#allocation37_spill]]  ;;  %s7800_s11 = smov [#allocation8]  }
  0x22   :  { %s82_s29 = sshll.u32 %s7800_s11, 4  ;;  %s7801_s2 = smov [#allocation11]   ;;  %s83_s29 = int_to_ptr.vmem [resolvable:$true] %s82_s29 }
  0x23   :  { %s108_s7 = sshll.u32 %s7801_s2, 4  ;;  %s7487_s12 = scalar_lea.vmem %s83_s29, 64  ;;  %s109_s7 = int_to_ptr.vmem [resolvable:$true] %s108_s7 }
  0x24   :  { %p7488_p5 = scmp.ne.s32.totalorder %s83_s29, %s7487_s12  ;;  %p7492_p6 = scmp.lt.s32.totalorder %s83_s29, %s83_s29 }
  0x25   :  { %p7493_p7 = scmp.lt.s32.totalorder %s7487_s12, %s7487_s12 }
  0x27   :  { %63 = dma.hbm_to_vmem [thread:$0]  %s8444_s0, 512, %s58_s5, [#allocation6], %s8429_s30, %s8429_s30, %s7799_s3  }
  0x28   :  { %p7494_p8 = por %p7493_p7, %p7492_p6 }
  0x2a   :  { %p7495_p9 = pnand %p7494_p8, %p7488_p5 }
  0x2c   :  { %7498 = shalt.err (!%p7495_p9)
}
  0x2d   :  { %s8445_s8 = sld [smem:[#allocation40_spill]]  ;;  %s7507_s9 = scalar_lea.vmem %s109_s7, 64 }
  0x2e   :  { %p7508_p10 = scmp.ne.s32.totalorder %s109_s7, %s7507_s9  ;;  %p7512_p11 = scmp.lt.s32.totalorder %s109_s7, %s109_s7 }
  0x2f   :  { %p7513_p12 = scmp.lt.s32.totalorder %s7507_s9, %s7507_s9 }
  0x31   :  { %p7514_p13 = por %p7513_p12, %p7512_p11 }
  0x33   :  { %85 = dma.hbm_to_vmem [thread:$0]  %s8445_s8, 64, %s83_s29, [#allocation9]  }
  0x34   :  { %p7515_p0 = pnand %p7514_p13, %p7508_p10 }
  0x36   :  { %7518 = shalt.err (!%p7515_p0)
}
  0x37   :  { %s8446_s10 = sld [smem:[#allocation44_spill]]  ;;  %s7802_s0 = smov [#allocation14]  }
  0x38   :  { %s134_s11 = sshll.u32 %s7802_s0, 4  ;;  %s7803_s2 = smov [#allocation17]   ;;  %s135_s11 = int_to_ptr.vmem [resolvable:$true] %s134_s11 }
  0x39   :  { %s158_s12 = sshll.u32 %s7803_s2, 4  ;;  %s7527_s30 = scalar_lea.vmem %s135_s11, 64  ;;  %s159_s12 = int_to_ptr.vmem [resolvable:$true] %s158_s12 }
  0x3a   :  { %p7528_p1 = scmp.ne.s32.totalorder %s135_s11, %s7527_s30  ;;  %p7532_p2 = scmp.lt.s32.totalorder %s135_s11, %s135_s11 }
  0x3b   :  { %p7533_p3 = scmp.lt.s32.totalorder %s7527_s30, %s7527_s30 }
  0x3d   :  { %111 = dma.hbm_to_vmem [thread:$0]  %s8446_s10, 64, %s109_s7, [#allocation12]  }
  0x3e   :  { %p7534_p4 = por %p7533_p3, %p7532_p2 }
  0x40   :  { %p7535_p5 = pnand %p7534_p4, %p7528_p1 }
  0x42   :  { %7538 = shalt.err (!%p7535_p5)
}
  0x43   :  { %s8447_s4 = sld [smem:[#allocation48_spill]]  ;;  %s7547_s8 = scalar_lea.vmem %s159_s12, 64 }
  0x44   :  { %p7548_p6 = scmp.ne.s32.totalorder %s159_s12, %s7547_s8  ;;  %p7552_p7 = scmp.lt.s32.totalorder %s159_s12, %s159_s12 }
  0x45   :  { %p7553_p8 = scmp.lt.s32.totalorder %s7547_s8, %s7547_s8 }
  0x47   :  { %p7554_p9 = por %p7553_p8, %p7552_p7 }
  0x49   :  { %137 = dma.hbm_to_vmem [thread:$0]  %s8447_s4, 64, %s135_s11, [#allocation15]  }
  0x4a   :  { %p7555_p10 = pnand %p7554_p9, %p7548_p6 }
  0x4c   :  { %7558 = shalt.err (!%p7555_p10)
}
  0x4d   :  { %161 = dma.hbm_to_vmem [thread:$0]  %s8415_s15, 64, %s159_s12, [#allocation18]  }
  0x4e   :  { %s7804_s30 = smov [#allocation20]   ;;  %s7805_s6 = smov [#allocation23]  }
  0x4f   :  { %s181_s5 = sshll.u32 %s7804_s30, 4  ;;  %s207_s10 = sshll.u32 %s7805_s6, 4  ;;  %s182_s5 = int_to_ptr.vmem [resolvable:$true] %s181_s5  ;;  %s208_s10 = int_to_ptr.vmem [resolvable:$true] %s207_s10 }
  0x50   :  { %s7567_s0 = scalar_lea.vmem %s182_s5, 16384  ;;  %p7572_p12 = scmp.lt.s32.totalorder %s182_s5, %s182_s5 }
  0x51   :  { %p7568_p11 = scmp.ne.s32.totalorder %s182_s5, %s7567_s0  ;;  %p7573_p13 = scmp.lt.s32.totalorder %s7567_s0, %s7567_s0 }
  0x53   :  { %p7574_p0 = por %p7573_p13, %p7572_p12 }
  0x55   :  { %p7575_p1 = pnand %p7574_p0, %p7568_p11 }
  0x57   :  { %7578 = shalt.err (!%p7575_p1)
}
  0x58   :  { %s8448_s11 = smov 256   ;;  %s7587_s15 = scalar_lea.vmem %s208_s10, 8192 }
  0x59   :  { %187 = dma.hbm_to_vmem [thread:$0]  %s8418_s18, 16384, %s182_s5, [#allocation21], %s8448_s11, %s8448_s11, %s7799_s3  }
  0x5a   :  { %p7588_p2 = scmp.ne.s32.totalorder %s208_s10, %s7587_s15  ;;  %p7592_p3 = scmp.lt.s32.totalorder %s208_s10, %s208_s10 }
  0x5b   :  { %p7593_p4 = scmp.lt.s32.totalorder %s7587_s15, %s7587_s15 }
  0x5d   :  { %p7594_p5 = por %p7593_p4, %p7592_p3 }
  0x5f   :  { %p7595_p6 = pnand %p7594_p5, %p7588_p2 }
  0x61   :  { %7598 = shalt.err (!%p7595_p6)
}
  0x62   :  { %s7806_s12 = smov 128   ;;  %s7807_s1 = smov 8  }
  0x63   :  { %213 = dma.hbm_to_vmem [thread:$0]  %s8422_s22, 8192, %s208_s10, [#allocation24], %s7806_s12, %s7806_s12, %s7807_s1  }
  0x64   :  { %s7808_s7 = smov [#allocation2]   ;;  %s7809_s30 = smov [#allocation7]  }
  0x65   :  { %s48_s9 = sshll.u32 %s7808_s7, 4  ;;  %s70_s6 = sshll.u32 %s7809_s30, 4  ;;  %s49_s9 = int_to_ptr.vmem [resolvable:$true] %s48_s9  ;;  %s71_s6 = int_to_ptr.vmem [resolvable:$true] %s70_s6 }
  0x66   :  { %s7607_s18 = scalar_lea.vmem %s49_s9, 128  ;;  %p7612_p8 = scmp.lt.s32.totalorder %s49_s9, %s49_s9 }
  0x67   :  { %p7608_p7 = scmp.ne.s32.totalorder %s49_s9, %s7607_s18  ;;  %p7613_p9 = scmp.lt.s32.totalorder %s7607_s18, %s7607_s18 }
  0x69   :  { %p7614_p10 = por %p7613_p9, %p7612_p8 }
  0x6b   :  { %p7615_p11 = pnand %p7614_p10, %p7608_p7 }
  0x6d   :  { %7618 = shalt.err (!%p7615_p11)
}
  0x6e   :  { %s8449_s2 = sld [smem:[#allocation36_spill]]  ;;  %s7627_s29 = scalar_lea.vmem %s71_s6, 64 }
  0x6f   :  { %p7628_p12 = scmp.ne.s32.totalorder %s71_s6, %s7627_s29  ;;  %p7632_p13 = scmp.lt.s32.totalorder %s71_s6, %s71_s6 }
  0x70   :  { %p7633_p0 = scmp.lt.s32.totalorder %s7627_s29, %s7627_s29 }
  0x72   :  { %p7634_p1 = por %p7633_p0, %p7632_p13 }
  0x74   :  { %51 = dma.hbm_to_vmem [thread:$0]  %s8449_s2, 128, %s49_s9, [#allocation3]  }
  0x75   :  { %p7635_p2 = pnand %p7634_p1, %p7628_p12 }
  0x77   :  { %7638 = shalt.err (!%p7635_p2)
}
  0x78   :  { %s8450_s15 = sld [smem:[#allocation38_spill]]  ;;  %s7810_s12 = smov [#allocation10]  }
  0x79   :  { %s91_s1 = sshll.u32 %s7810_s12, 4  ;;  %s7811_s4 = smov [#allocation13]   ;;  %s92_s1 = int_to_ptr.vmem [resolvable:$true] %s91_s1 }
  0x7a   :  { %s117_s8 = sshll.u32 %s7811_s4, 4  ;;  %s7647_s7 = scalar_lea.vmem %s92_s1, 16384  ;;  %s118_s8 = int_to_ptr.vmem [resolvable:$true] %s117_s8 }
  0x7b   :  { %p7648_p3 = scmp.ne.s32.totalorder %s92_s1, %s7647_s7  ;;  %p7652_p4 = scmp.lt.s32.totalorder %s92_s1, %s92_s1 }
  0x7c   :  { %p7653_p5 = scmp.lt.s32.totalorder %s7647_s7, %s7647_s7 }
  0x7e   :  { %73 = dma.hbm_to_vmem [thread:$0]  %s8450_s15, 64, %s71_s6, [#allocation6]  }
  0x7f   :  { %p7654_p6 = por %p7653_p5, %p7652_p4 }
  0x81   :  { %p7655_p7 = pnand %p7654_p6, %p7648_p3 }
  0x83   :  { %7658 = shalt.err (!%p7655_p7)
}
  0x84   :  { %s8451_s18 = sld [smem:[#allocation41_spill]]  ;;  %s7667_s6 = scalar_lea.vmem %s118_s8, 512 }
  0x85   :  { %p7668_p8 = scmp.ne.s32.totalorder %s118_s8, %s7667_s6  ;;  %p7672_p9 = scmp.lt.s32.totalorder %s118_s8, %s118_s8 }
  0x86   :  { %p7673_p10 = scmp.lt.s32.totalorder %s7667_s6, %s7667_s6 }
  0x88   :  { %p7674_p11 = por %p7673_p10, %p7672_p9 }
  0x8a   :  { %97 = dma.hbm_to_vmem [thread:$0]  %s8451_s18, 16384, %s92_s1, [#allocation9], %s8448_s11, %s8448_s11, %s7799_s3  }
  0x8b   :  { %p7675_p12 = pnand %p7674_p11, %p7668_p8 }
  0x8d   :  { %7678 = shalt.err (!%p7675_p12)
}
  0x8e   :  { %s8452_s2 = sld [smem:[#allocation45_spill]]  ;;  %s7812_s29 = smov [#allocation16]  }
  0x8f   :  { %s143_s22 = sshll.u32 %s7812_s29, 4  ;;  %s7813_s10 = smov [#allocation19]   ;;  %s144_s22 = int_to_ptr.vmem [resolvable:$true] %s143_s22 }
  0x90   :  { %s169_s15 = sshll.u32 %s7813_s10, 4  ;;  %s7687_s12 = scalar_lea.vmem %s144_s22, 16384  ;;  %s170_s15 = int_to_ptr.vmem [resolvable:$true] %s169_s15 }
  0x91   :  { %p7688_p13 = scmp.ne.s32.totalorder %s144_s22, %s7687_s12  ;;  %p7692_p0 = scmp.lt.s32.totalorder %s144_s22, %s144_s22 }
  0x92   :  { %p7693_p1 = scmp.lt.s32.totalorder %s7687_s12, %s7687_s12 }
  0x94   :  { %123 = dma.hbm_to_vmem [thread:$0]  %s8452_s2, 512, %s118_s8, [#allocation12], %s8448_s11, %s8448_s11, %s7799_s3  }
  0x95   :  { %p7694_p2 = por %p7693_p1, %p7692_p0 }
  0x97   :  { %p7695_p3 = pnand %p7694_p2, %p7688_p13 }
  0x99   :  { %7698 = shalt.err (!%p7695_p3)
}
  0x9a   :  { %149 = dma.hbm_to_vmem [thread:$0]  %s8413_s13, 16384, %s144_s22, [#allocation15], %s8448_s11, %s8448_s11, %s7799_s3  }
  0x9b   :  { %s7707_s8 = scalar_lea.vmem %s170_s15, 16384  ;;  %p7712_p5 = scmp.lt.s32.totalorder %s170_s15, %s170_s15 }
  0x9c   :  { %p7708_p4 = scmp.ne.s32.totalorder %s170_s15, %s7707_s8  ;;  %p7713_p6 = scmp.lt.s32.totalorder %s7707_s8, %s7707_s8 }
  0x9e   :  { %p7714_p7 = por %p7713_p6, %p7712_p5 }
  0xa0   :  { %p7715_p8 = pnand %p7714_p7, %p7708_p4 }
  0xa2   :  { %7718 = shalt.err (!%p7715_p8)
}
  0xa3   :  { %175 = dma.hbm_to_vmem [thread:$0]  %s8417_s17, 16384, %s170_s15, [#allocation18], %s8448_s11, %s8448_s11, %s7799_s3  }
  0xa4   :  { %s7814_s30 = smov [#allocation22]   ;;  %s7815_s6 = smov [#allocation25]  }
  0xa5   :  { %s198_s18 = sshll.u32 %s7814_s30, 4  ;;  %s225_s13 = sshll.u32 %s7815_s6, 4  ;;  %s199_s18 = int_to_ptr.vmem [resolvable:$true] %s198_s18  ;;  %s226_s13 = int_to_ptr.vmem [resolvable:$true] %s225_s13 }
  0xa6   :  { %s7727_s5 = scalar_lea.vmem %s199_s18, 64  ;;  %p7732_p10 = scmp.lt.s32.totalorder %s199_s18, %s199_s18 }
  0xa7   :  { %p7728_p9 = scmp.ne.s32.totalorder %s199_s18, %s7727_s5  ;;  %p7733_p11 = scmp.lt.s32.totalorder %s7727_s5, %s7727_s5 }
  0xa9   :  { %p7734_p12 = por %p7733_p11, %p7732_p10 }
  0xab   :  { %p7735_p13 = pnand %p7734_p12, %p7728_p9 }
  0xad   :  { %7738 = shalt.err (!%p7735_p13)
}
  0xae   :  { %201 = dma.hbm_to_vmem [thread:$0]  %s8421_s21, 64, %s199_s18, [#allocation21]  }
  0xaf   :  { %s7747_s29 = scalar_lea.vmem %s226_s13, 2048  ;;  %p7752_p1 = scmp.lt.s32.totalorder %s226_s13, %s226_s13 }
  0xb0   :  { %p7748_p0 = scmp.ne.s32.totalorder %s226_s13, %s7747_s29  ;;  %p7753_p2 = scmp.lt.s32.totalorder %s7747_s29, %s7747_s29 }
  0xb2   :  { %p7754_p3 = por %p7753_p2, %p7752_p1 }
  0xb4   :  { %p7755_p4 = pnand %p7754_p3, %p7748_p0 }
  0xb6   :  { %7758 = shalt.err (!%p7755_p4)
}
  0xb7   :  { %s7816_s17 = smov 64   ;;  %s7817_s3 = smov 4  }
  0xb8   :  { %231 = dma.hbm_to_vmem [thread:$0]  %s8426_s26, 2048, %s226_s13, [#allocation24], %s7816_s17, %s7816_s17, %s7817_s3  }
  0xb9   :  { %7779 = dma.done.wait [#allocation3], 128  }
  0xba   :  { %7780 = vsyncadd [#allocation3], 4294967168 }
  0xbb   :  { %7781 = dma.done.wait [#allocation6], 576  }
  0xbc   :  { %7782 = vsyncadd [#allocation6], 4294966720 }
  0xbd   :  { %7783 = dma.done.wait [#allocation9], 16448  }
  0xbe   :  { %7784 = vsyncadd [#allocation9], 4294950848 }
  0xbf   :  { %7785 = dma.done.wait [#allocation12], 576  }
  0xc0   :  { %7786 = vsyncadd [#allocation12], 4294966720 }
  0xc1   :  { %7787 = dma.done.wait [#allocation15], 16448  }
  0xc2   :  { %7788 = vsyncadd [#allocation15], 4294950848 }
  0xc3   :  { %7789 = dma.done.wait [#allocation18], 16448  }
  0xc4   :  { %7790 = vsyncadd [#allocation18], 4294950848 }
  0xc5   :  { %7791 = dma.done.wait [#allocation21], 16448  }
  0xc6   :  { %7792 = vsyncadd [#allocation21], 4294950848 }
  0xc7   :  { %7793 = dma.done.wait [#allocation24], 10240  }
  0xc8   :  { %7794 = vsyncadd [#allocation24], 4294957056  ;;  %v7818_v0 = vmov 0   ;;  %v6555_v1 = vld [vmem:[#allocation5 + $0x4] ss:$16 sps:$4 sm:$0xff]   ;;  %v280_v3 = vld [vmem:[#allocation2] sm:$0xff]  ;;  %v288_v39 = vlaneseq }
  0xc9   :  { %364 = vmatprep.mubr.bf16.mxu1 %v7818_v0  ;;  %v6557_v2 = vld [vmem:[#allocation5] ss:$16 sps:$4 sm:$0xff]   ;;  %346 = vmatprep.subr.bf16.mxu1 %v6555_v1  ;;  %v8030_v4 = vpack.c.bf16 %v280_v3, %v280_v3  ;;  %v6560_v5 = vld [vmem:[#allocation5 + $0xc] ss:$16 sps:$4 sm:$0xff]   ;;  %vm328_vm0 = vcmask 130048   ;;  %s8453_s10 = sld [smem:[#allocation39_spill]] }
  0xca   :  { %347 = vmatpush1.bf16.msra.mxu1 %v6557_v2  ;;  %v6558_v6 = vld [vmem:[#allocation5 + $0x8] ss:$16 sps:$4 sm:$0xff]   ;;  %v6561_v7 = vld [vmem:[#allocation10 + $0xe4] ss:$16 sps:$4 sm:$0xff]   ;;  %v8037_v40 = vshrl.u32 %v288_v39, 7  ;;  %s8454_s1 = sld [smem:[#allocation42_spill]] }
  0xcb   :  { %387 = vmatprep.subr.bf16.mxu1 %v6560_v5  ;;  %v6563_v8 = vld [vmem:[#allocation10 + $0x2e0] ss:$16 sps:$4 sm:$0xff]   ;;  %v6565_v9 = vld [vmem:[#allocation10 + $0x2e4] ss:$16 sps:$4 sm:$0xff]   ;;  %1359 = vmatprep.subr.bf16.mxu0 %v6561_v7  ;;  %v286_v41 = vld [vmem:[#allocation7] sm:$0xf] }
  0xcc   :  { %v6566_v10 = vld [vmem:[#allocation10 + $0xe0] ss:$16 sps:$4 sm:$0xff]   ;;  %v6567_v11 = vld [vmem:[#allocation10 + $0xc4] ss:$16 sps:$4 sm:$0xff]   ;;  %v8040_v42 = vsub.s32 0, %v8037_v40  ;;  %v8043_v43 = vsub.s32 1, %v8037_v40 }
  0xcd   :  { %5896 = vmatmul.mubr.msk.bf16.vlgmr.msra.gmra.mxu1 %vm328_vm0, %v8030_v4  ;;  %v6571_v12 = vld [vmem:[#allocation10 + $0x2c4] ss:$16 sps:$4 sm:$0xff]   ;;  %1360 = vmatpush1.bf16.msra.mxu0 %v6566_v10  ;;  %v6569_v13 = vld [vmem:[#allocation10 + $0x2c0] ss:$16 sps:$4 sm:$0xff]   ;;  %v8048_v47 = vsub.s32 2, %v8037_v40  ;;  %v8051_v51 = vsub.s32 3, %v8037_v40 }
  0xce   :  { %388 = vmatpush1.bf16.msra.mxu1 %v6558_v6  ;;  %405 = vmatprep.mubr.bf16.mxu1 %v7818_v0  ;;  %v6572_v14 = vld [vmem:[#allocation10 + $0xc0] ss:$16 sps:$4 sm:$0xff]   ;;  %v6573_v15 = vld [vmem:[#allocation10 + $0xa4] ss:$16 sps:$4 sm:$0xff]   ;;  %v291_v44 = vrot.slane %v286_v41, %v8040_v42  ;;  %v295_v45 = vrot.slane %v286_v41, %v8043_v43  ;;  %s8455_s7 = sld [smem:[#allocation46_spill]] }
  0xcf   :  { %1400 = vmatprep.subr.bf16.mxu1 %v6565_v9  ;;  %1361 = vmatprep.subr.bf16.mxu0 %v6567_v11  ;;  %v6577_v16 = vld [vmem:[#allocation10 + $0x2a4] ss:$16 sps:$4 sm:$0xff]   ;;  %v6575_v17 = vld [vmem:[#allocation10 + $0x2a0] ss:$16 sps:$4 sm:$0xff]   ;;  %v299_v54 = vrot.slane %v286_v41, %v8048_v47  ;;  %v303_v57 = vrot.slane %v286_v41, %v8051_v51  ;;  %s8456_s18 = sld [smem:[#allocation47_spill]] }
  0xd0   :  { %v6578_v18 = vld [vmem:[#allocation10 + $0xa0] ss:$16 sps:$4 sm:$0xff]   ;;  %v6579_v19 = vld [vmem:[#allocation10 + $0x84] ss:$16 sps:$4 sm:$0xff]   ;;  %s8457_s2 = sld [smem:[#allocation43_spill]] }
  0xd1   :  { %1362 = vmatpush1.bf16.msra.mxu0 %v6572_v14  ;;  %v6583_v20 = vld [vmem:[#allocation10 + $0x284] ss:$16 sps:$4 sm:$0xff]   ;;  %v6581_v21 = vld [vmem:[#allocation10 + $0x280] ss:$16 sps:$4 sm:$0xff]  }
  0xd2   :  { %1363 = vmatprep.subr.bf16.mxu0 %v6573_v15  ;;  %v6584_v22 = vld [vmem:[#allocation10 + $0x80] ss:$16 sps:$4 sm:$0xff]   ;;  %v6585_v23 = vld [vmem:[#allocation10 + $0x64] ss:$16 sps:$4 sm:$0xff]  }
  0xd3   :  { %v6589_v24 = vld [vmem:[#allocation10 + $0x264] ss:$16 sps:$4 sm:$0xff]   ;;  %v6587_v25 = vld [vmem:[#allocation10 + $0x260] ss:$16 sps:$4 sm:$0xff]  }
  0xd4   :  { %v6590_v26 = vld [vmem:[#allocation10 + $0x60] ss:$16 sps:$4 sm:$0xff]   ;;  %v6591_v27 = vld [vmem:[#allocation10 + $0x44] ss:$16 sps:$4 sm:$0xff]  }
  0xd5   :  { %5897 = vmatmul.mubr.msk.bf16.vlgmr.msra.gmra.mxu1 %vm328_vm0, %v8030_v4  ;;  %1364 = vmatpush1.bf16.msra.mxu0 %v6578_v18  ;;  %v6595_v28 = vld [vmem:[#allocation10 + $0x244] ss:$16 sps:$4 sm:$0xff]   ;;  %v6593_v29 = vld [vmem:[#allocation10 + $0x240] ss:$16 sps:$4 sm:$0xff]  }
  0xd6   :  { %1401 = vmatpush1.bf16.msra.mxu1 %v6563_v8  ;;  %1365 = vmatprep.subr.bf16.mxu0 %v6579_v19  ;;  %v6596_v30 = vld [vmem:[#allocation10 + $0x40] ss:$16 sps:$4 sm:$0xff]   ;;  %v6597_v31 = vld [vmem:[#allocation10 + $0x24] ss:$16 sps:$4 sm:$0xff]  }
  0xd7   :  { %1402 = vmatprep.subr.bf16.mxu1 %v6571_v12  ;;  %v6601_v32 = vld [vmem:[#allocation10 + $0x224] ss:$16 sps:$4 sm:$0xff]   ;;  %v6599_v33 = vld [vmem:[#allocation10 + $0x220] ss:$16 sps:$4 sm:$0xff]  }
  0xd8   :  { %v6602_v34 = vld [vmem:[#allocation10 + $0x20] ss:$16 sps:$4 sm:$0xff]   ;;  %v6603_v35 = vld [vmem:[#allocation10 + $0x4] ss:$16 sps:$4 sm:$0xff]  }
  0xd9   :  { %1366 = vmatpush1.bf16.msra.mxu0 %v6584_v22  ;;  %v6607_v36 = vld [vmem:[#allocation10 + $0x204] ss:$16 sps:$4 sm:$0xff]   ;;  %v6605_v37 = vld [vmem:[#allocation10 + $0x200] ss:$16 sps:$4 sm:$0xff]  }
  0xda   :  { %1403 = vmatpush1.bf16.msra.mxu1 %v6569_v13  ;;  %1367 = vmatprep.subr.bf16.mxu0 %v6585_v23  ;;  %v6608_v38 = vld [vmem:[#allocation10] ss:$16 sps:$4 sm:$0xff]   ;;  %v6609_v14 = vld [vmem:[#allocation10 + $0x1e4] ss:$16 sps:$4 sm:$0xff]  }
  0xdb   :  { %1404 = vmatprep.subr.bf16.mxu1 %v6577_v16  ;;  %v6613_v15 = vld [vmem:[#allocation10 + $0x3e4] ss:$16 sps:$4 sm:$0xff]   ;;  %v6611_v16 = vld [vmem:[#allocation10 + $0x3e0] ss:$16 sps:$4 sm:$0xff]  }
  0xdc   :  { %v6615_v18 = vld [vmem:[#allocation10 + $0x1c4] ss:$16 sps:$4 sm:$0xff]   ;;  %v6647_v41 = vld [vmem:[#allocation10 + $0x320] ss:$16 sps:$4 sm:$0xff]  }
  0xdd   :  { %1368 = vmatpush1.bf16.msra.mxu0 %v6590_v26  ;;  %v6619_v19 = vld [vmem:[#allocation10 + $0x3c4] ss:$16 sps:$4 sm:$0xff]  }
  0xde   :  { %1405 = vmatpush1.bf16.msra.mxu1 %v6575_v17  ;;  %1369 = vmatprep.subr.bf16.mxu0 %v6591_v27  ;;  %v6614_v17 = vld [vmem:[#allocation10 + $0x1e0] ss:$16 sps:$4 sm:$0xff]   ;;  %v6621_v22 = vld [vmem:[#allocation10 + $0x1a4] ss:$16 sps:$4 sm:$0xff]  }
  0xdf   :  { %1406 = vmatprep.subr.bf16.mxu1 %v6583_v20  ;;  %v6617_v20 = vld [vmem:[#allocation10 + $0x3c0] ss:$16 sps:$4 sm:$0xff]   ;;  %v6625_v23 = vld [vmem:[#allocation10 + $0x3a4] ss:$16 sps:$4 sm:$0xff]  }
  0xe0   :  { %v6627_v26 = vld [vmem:[#allocation10 + $0x184] ss:$16 sps:$4 sm:$0xff]  }
  0xe1   :  { %1370 = vmatpush1.bf16.msra.mxu0 %v6596_v30  ;;  %v6631_v27 = vld [vmem:[#allocation10 + $0x384] ss:$16 sps:$4 sm:$0xff]  }
  0xe2   :  { %1407 = vmatpush1.bf16.msra.mxu1 %v6581_v21  ;;  %1371 = vmatprep.subr.bf16.mxu0 %v6597_v31  ;;  %v6620_v21 = vld [vmem:[#allocation10 + $0x1c0] ss:$16 sps:$4 sm:$0xff]   ;;  %v6633_v30 = vld [vmem:[#allocation10 + $0x164] ss:$16 sps:$4 sm:$0xff]  }
  0xe3   :  { %1408 = vmatprep.subr.bf16.mxu1 %v6589_v24  ;;  %v6623_v24 = vld [vmem:[#allocation10 + $0x3a0] ss:$16 sps:$4 sm:$0xff]   ;;  %v6637_v31 = vld [vmem:[#allocation10 + $0x364] ss:$16 sps:$4 sm:$0xff]  }
  0xe4   :  { %v6649_v39 = vld [vmem:[#allocation10 + $0x324] ss:$16 sps:$4 sm:$0xff]  }
  0xe5   :  { %1372 = vmatpush1.bf16.msra.mxu0 %v6602_v34  ;;  %v6639_v34 = vld [vmem:[#allocation10 + $0x144] ss:$16 sps:$4 sm:$0xff]  }
  0xe6   :  { %1409 = vmatpush1.bf16.msra.mxu1 %v6587_v25  ;;  %1373 = vmatprep.subr.bf16.mxu0 %v6603_v35  ;;  %v6626_v25 = vld [vmem:[#allocation10 + $0x1a0] ss:$16 sps:$4 sm:$0xff]   ;;  %v6643_v35 = vld [vmem:[#allocation10 + $0x344] ss:$16 sps:$4 sm:$0xff]  }
  0xe7   :  { %1410 = vmatprep.subr.bf16.mxu1 %v6595_v28  ;;  %v6629_v28 = vld [vmem:[#allocation10 + $0x380] ss:$16 sps:$4 sm:$0xff]  }
  0xe9   :  { %1374 = vmatpush1.bf16.msra.mxu0 %v6608_v38  ;;  %v6645_v38 = vld [vmem:[#allocation10 + $0x124] ss:$16 sps:$4 sm:$0xff]  }
  0xea   :  { %1411 = vmatpush1.bf16.msra.mxu1 %v6593_v29  ;;  %1375 = vmatprep.subr.bf16.mxu0 %v6609_v14  ;;  %v6632_v29 = vld [vmem:[#allocation10 + $0x180] ss:$16 sps:$4 sm:$0xff]  }
  0xeb   :  { %1412 = vmatprep.subr.bf16.mxu1 %v6601_v32  ;;  %v6635_v32 = vld [vmem:[#allocation10 + $0x360] ss:$16 sps:$4 sm:$0xff]  }
  0xed   :  { %1376 = vmatpush2.bf16.msra.mxu0 %v6614_v17 }
  0xee   :  { %1413 = vmatpush1.bf16.msra.mxu1 %v6599_v33  ;;  %1377 = vmatprep.subr.bf16.mxu0 %v6615_v18  ;;  %v6638_v33 = vld [vmem:[#allocation10 + $0x160] ss:$16 sps:$4 sm:$0xff]  }
  0xef   :  { %1414 = vmatprep.subr.bf16.mxu1 %v6607_v36  ;;  %v6641_v36 = vld [vmem:[#allocation10 + $0x340] ss:$16 sps:$4 sm:$0xff]  }
  0xf1   :  { %1378 = vmatpush2.bf16.msra.mxu0 %v6620_v21 }
  0xf2   :  { %1415 = vmatpush1.bf16.msra.mxu1 %v6605_v37  ;;  %1379 = vmatprep.subr.bf16.mxu0 %v6621_v22  ;;  %v6644_v37 = vld [vmem:[#allocation10 + $0x140] ss:$16 sps:$4 sm:$0xff]  }
  0xf3   :  { %1416 = vmatprep.subr.bf16.mxu1 %v6613_v15 }
  0xf5   :  { %1380 = vmatpush2.bf16.msra.mxu0 %v6626_v25 }
  0xf6   :  { %1417 = vmatpush2.bf16.msra.mxu1 %v6611_v16  ;;  %1381 = vmatprep.subr.bf16.mxu0 %v6627_v26 }
  0xf7   :  { %1418 = vmatprep.subr.bf16.mxu1 %v6619_v19 }
  0xf9   :  { %1382 = vmatpush2.bf16.msra.mxu0 %v6632_v29 }
  0xfa   :  { %1419 = vmatpush2.bf16.msra.mxu1 %v6617_v20  ;;  %1383 = vmatprep.subr.bf16.mxu0 %v6633_v30 }
  0xfb   :  { %1420 = vmatprep.subr.bf16.mxu1 %v6625_v23 }
  0xfd   :  { %1384 = vmatpush2.bf16.msra.mxu0 %v6638_v33 }
  0xfe   :  { %1421 = vmatpush2.bf16.msra.mxu1 %v6623_v24  ;;  %1385 = vmatprep.subr.bf16.mxu0 %v6639_v34 }
  0xff   :  { %1422 = vmatprep.subr.bf16.mxu1 %v6631_v27 }
 0x101   :  { %1386 = vmatpush2.bf16.msra.mxu0 %v6644_v37 }
 0x102   :  { %1423 = vmatpush2.bf16.msra.mxu1 %v6629_v28  ;;  %1387 = vmatprep.subr.bf16.mxu0 %v6645_v38 }
 0x103   :  { %1424 = vmatprep.subr.bf16.mxu1 %v6637_v31 }
 0x106   :  { %1425 = vmatpush2.bf16.msra.mxu1 %v6635_v32 }
 0x107   :  { %1426 = vmatprep.subr.bf16.mxu1 %v6643_v35 }
 0x10a   :  { %1427 = vmatpush2.bf16.msra.mxu1 %v6641_v36 }
 0x10b   :  { %1428 = vmatprep.subr.bf16.mxu1 %v6649_v39 }
 0x10e   :  { %1429 = vmatpush2.bf16.msra.mxu1 %v6647_v41 }
 0x18d   :  { %v366_v46 = vpop.f32.mrf.mxu1 }
 0x18e   :  { %v367_v49 = vadd.f32 %v366_v46, %v291_v44  ;;  %v6650_v44 = vld [vmem:[#allocation10 + $0x120] ss:$16 sps:$4 sm:$0xff]   ;;  %v6655_v46 = vld [vmem:[#allocation10 + $0x304] ss:$16 sps:$4 sm:$0xff]  }
 0x18f   :  { %v368_v48 = vpop.f32.mrf.mxu1  ;;  %1388 = vmatpush2.bf16.msra.mxu0 %v6650_v44  ;;  %1430 = vmatprep.subr.bf16.mxu1 %v6655_v46 }
 0x190   :  { %v369_v50 = vadd.f32 %v368_v48, %v295_v45  ;;  %v8056_v56 = vmax.f32 %v367_v49, 0.0  ;;  %v6651_v45 = vld [vmem:[#allocation10 + $0x104] ss:$16 sps:$4 sm:$0xff]   ;;  %v6653_v48 = vld [vmem:[#allocation10 + $0x300] ss:$16 sps:$4 sm:$0xff]  }
 0x191   :  { %v370_v52 = vpop.f32.mrf.mxu1  ;;  %v6656_v49 = vld [vmem:[#allocation10 + $0x100] ss:$16 sps:$4 sm:$0xff]   ;;  %1389 = vmatprep.subr.bf16.mxu0 %v6651_v45  ;;  %1431 = vmatpush2.bf16.msra.mxu1 %v6653_v48 }
 0x192   :  { %v8053_v53 = vmax.f32 %v369_v50, 0.0  ;;  %v425_v62 = vmul.f32 %v8056_v56, %v8056_v56  ;;  %v6659_v50 = vld [vmem:[#allocation10 + $0xec] ss:$16 sps:$4 sm:$0xff]  }
 0x193   :  { %v371_v55 = vpop.f32.mrf.mxu1  ;;  %1390 = vmatpush2.bf16.msra.mxu0 %v6656_v49  ;;  %v6662_v52 = vld [vmem:[#allocation10 + $0x2ec] ss:$16 sps:$4 sm:$0xff]  }
 0x194   :  { %v426_v59 = vmul.f32 %v8053_v53, %v8053_v53  ;;  %v418_v2 = vadd.f32 %v8053_v53, %v8056_v56  ;;  %1441 = vmatprep.subr.bf16.mxu0 %v6659_v50  ;;  %1482 = vmatprep.subr.bf16.mxu1 %v6662_v52 }
 0x195   :  { %v407_v58 = vpop.f32.mrf.mxu1 }
 0x196   :  { %v408_v60 = vadd.f32 %v407_v58, %v299_v54  ;;  %v429_v8 = vadd.f32 %v426_v59, %v425_v62 }
 0x197   :  { %v409_v61 = vpop.f32.mrf.mxu1 }
 0x198   :  { %v8063_v63 = vmax.f32 %v408_v60, 0.0  ;;  %v410_v1 = vadd.f32 %v409_v61, %v303_v57  ;;  %v7819_v57 = vmov 1966171168  }
 0x199   :  { %v411_v3 = vpop.f32.mrf.mxu1  ;;  %v464_v58 = vunpack.c.l.s4 %v7819_v57  ;;  %v6657_v57 = vld [vmem:[#allocation10 + $0xe8] ss:$16 sps:$4 sm:$0xff]  }
 0x19a   :  { %v8067_v5 = vmax.f32 %v410_v1, 0.0  ;;  %v419_v6 = vadd.f32 %v418_v2, %v8063_v63  ;;  %v427_v7 = vmul.f32 %v8063_v63, %v8063_v63  ;;  %v5898_v2 = vld.sshfl [vmem:[%s8453_s10] sm:$0x33 pattern:$0x75316420]  ;;  %s7820_s10 = smov [#allocation26]  }
 0x19b   :  { %v412_v9 = vpop.f32.mrf.mxu1  ;;  %v465_v62 = vunpack.c.0.s8 %v464_v58  ;;  %v6660_v58 = vld [vmem:[#allocation10 + $0x2e8] ss:$16 sps:$4 sm:$0xff]   ;;  %s5876_s15 = sshll.u32 %s7820_s10, 4  ;;  %s5877_s15 = int_to_ptr.vmem [resolvable:$true] %s5876_s15 }
 0x19c   :  { %v420_v10 = vadd.f32 %v419_v6, %v8067_v5  ;;  %v428_v11 = vmul.f32 %v8067_v5, %v8067_v5  ;;  %v430_v12 = vadd.f32 %v429_v8, %v427_v7  ;;  %v5899_v6 = vld.sshfl [vmem:[#allocation8] sm:$0x33 pattern:$0x75316420]  ;;  %v462_v8 = vcombine.high %v5898_v2, %v5898_v2  ;;  %s7759_s12 = scalar_lea.vmem %s5877_s15, 128  ;;  %p7764_p6 = scmp.lt.s32.totalorder %s5877_s15, %s5877_s15 }
 0x19d   :  { %v8079_v7 = vsub.s32 %v465_v62, %v8037_v40  ;;  %v6668_v62 = vld [vmem:[#allocation10 + $0x2cc] ss:$16 sps:$4 sm:$0xff]   ;;  %p7760_p5 = scmp.ne.s32.totalorder %s5877_s15, %s7759_s12  ;;  %p7765_p7 = scmp.lt.s32.totalorder %s7759_s12, %s7759_s12 }
 0x19e   :  { %421 = vadd.xlane.f32.xlu0 %v420_v10  ;;  %v431_v13 = vadd.f32 %v430_v12, %v428_v11  ;;  %v520_v10 = vcombine.high %v5899_v6, %v5899_v6 }
 0x19f   :  { %v476_v11 = vrot.slane %v462_v8, %v8079_v7  ;;  %v469_v12 = vrot.slane %v5898_v2, %v8079_v7  ;;  %v527_v14 = vrot.slane %v5899_v6, %v8079_v7  ;;  %v6666_v2 = vld [vmem:[#allocation10 + $0x2c8] ss:$16 sps:$4 sm:$0xff]   ;;  %v6674_v6 = vld [vmem:[#allocation10 + $0x2ac] ss:$16 sps:$4 sm:$0xff]   ;;  %p7766_p8 = por %p7765_p7, %p7764_p6 }
 0x1a0   :  { %v6669_v8 = vld [vmem:[#allocation10 + $0xa8] ss:$16 sps:$4 sm:$0xff]  }
 0x1a1   :  { %v478_v15 = vcombine.high %v476_v11, %v476_v11  ;;  %v477_v16 = vcombine.high %v469_v12, %v469_v12  ;;  %v535_v18 = vcombine.high %v527_v14, %v527_v14  ;;  %v487_v19 = vpack.i.b16 %v476_v11, %v476_v11  ;;  %v6680_v11 = vld [vmem:[#allocation10 + $0x28c] ss:$16 sps:$4 sm:$0xff]   ;;  %p7767_p9 = pnand %p7766_p8, %p7760_p5 }
 0x1a2   :  { %432 = vadd.xlane.f32.xlu0 %v431_v13  ;;  %v534_v13 = vrot.slane %v520_v10, %v8079_v7  ;;  %v480_v21 = vpack.i.b16 %v469_v12, %v469_v12  ;;  %v538_v28 = vpack.i.b16 %v527_v14, %v527_v14  ;;  %v6677_v10 = vld [vmem:[#allocation10 + $0x8c] ss:$16 sps:$4 sm:$0xff]   ;;  %v6675_v12 = vld [vmem:[#allocation10 + $0x88] ss:$16 sps:$4 sm:$0xff]  }
 0x1a3   :  { %v501_v20 = vpack.i.b16 %v478_v15, %v478_v15  ;;  %v494_v22 = vpack.i.b16 %v477_v16, %v477_v16  ;;  %v552_v29 = vpack.i.b16 %v535_v18, %v535_v18  ;;  %v492_v30 = vrot.slane %v487_v19, %v8040_v42  ;;  %v6683_v14 = vld [vmem:[#allocation10 + $0x6c] ss:$16 sps:$4 sm:$0xff]   ;;  %v6681_v16 = vld [vmem:[#allocation10 + $0x68] ss:$16 sps:$4 sm:$0xff]  }
 0x1a4   :  { %v536_v17 = vcombine.high %v534_v13, %v534_v13  ;;  %v545_v26 = vpack.i.b16 %v534_v13, %v534_v13  ;;  %v543_v38 = vrot.slane %v538_v28, %v8040_v42  ;;  %v6678_v13 = vld [vmem:[#allocation10 + $0x288] ss:$16 sps:$4 sm:$0xff]   ;;  %v6686_v15 = vld [vmem:[#allocation10 + $0x26c] ss:$16 sps:$4 sm:$0xff]  }
 0x1a5   :  { %v506_v33 = vrot.slane %v501_v20, %v8040_v42  ;;  %v499_v34 = vrot.slane %v494_v22, %v8040_v42  ;;  %v557_v39 = vrot.slane %v552_v29, %v8040_v42  ;;  %v6689_v18 = vld [vmem:[#allocation10 + $0x4c] ss:$16 sps:$4 sm:$0xff]   ;;  %v6690_v20 = vld [vmem:[#allocation10 + $0x248] ss:$16 sps:$4 sm:$0xff]  }
 0x1a6   :  { %v559_v27 = vpack.i.b16 %v536_v17, %v536_v17  ;;  %v6684_v17 = vld [vmem:[#allocation10 + $0x268] ss:$16 sps:$4 sm:$0xff]   ;;  %v6692_v19 = vld [vmem:[#allocation10 + $0x24c] ss:$16 sps:$4 sm:$0xff]  }
 0x1a7   :  { %v6698_v22 = vld [vmem:[#allocation10 + $0x22c] ss:$16 sps:$4 sm:$0xff]   ;;  %v6702_v28 = vld [vmem:[#allocation10 + $0x208] ss:$16 sps:$4 sm:$0xff]  }
 0x1a8   :  { %v564_v37 = vrot.slane %v559_v27, %v8040_v42  ;;  %v6699_v27 = vld [vmem:[#allocation10 + $0x8] ss:$16 sps:$4 sm:$0xff]   ;;  %v6707_v29 = vld [vmem:[#allocation10 + $0x1ec] ss:$16 sps:$4 sm:$0xff]  }
 0x227   :  { %v422_v54 = vpop.xlane.xlu0 %421 }
 0x228   :  { %v424_v55 = vmul.f32 0.001953125, %v422_v54 }
 0x22a   :  { %v435_v60 = vmul.f32 %v424_v55, %v424_v55  ;;  %v441_v40 = vsub.f32 %v8053_v53, %v424_v55  ;;  %v442_v23 = vsub.f32 %v8063_v63, %v424_v55  ;;  %v443_v24 = vsub.f32 %v8067_v5, %v424_v55 }
 0x22b   :  { %v433_v59 = vpop.xlane.xlu0 %432  ;;  %v440_v25 = vsub.f32 %v8056_v56, %v424_v55  ;;  %v485_v53 = vrot.slane %v480_v21, %v8040_v42  ;;  %v550_v56 = vrot.slane %v545_v26, %v8040_v42  ;;  %v6695_v21 = vld [vmem:[#allocation10 + $0x2c] ss:$16 sps:$4 sm:$0xff]  }
 0x22c   :  { %v434_v61 = vmul.f32 0.001953125, %v433_v59  ;;  %v445_v32 = vpack.c.bf16 %v441_v40, %v441_v40  ;;  %v447_v63 = vpack.c.bf16 %v443_v24, %v443_v24  ;;  %v446_v5 = vpack.c.bf16 %v442_v23, %v442_v23  ;;  %v6687_v40 = vld [vmem:[#allocation10 + $0x48] ss:$16 sps:$4 sm:$0xff]   ;;  %v6704_v26 = vld [vmem:[#allocation10 + $0x20c] ss:$16 sps:$4 sm:$0xff]  }
 0x22d   :  { %v444_v36 = vpack.c.bf16 %v440_v25, %v440_v25  ;;  %v6693_v23 = vld [vmem:[#allocation10 + $0x28] ss:$16 sps:$4 sm:$0xff]   ;;  %v6701_v25 = vld [vmem:[#allocation10 + $0xc] ss:$16 sps:$4 sm:$0xff]  }
 0x22e   :  { %v436_v1 = vsub.f32 %v434_v61, %v435_v60  ;;  %v6665_v61 = vld [vmem:[#allocation10 + $0xcc] ss:$16 sps:$4 sm:$0xff]   ;;  %v6696_v24 = vld [vmem:[#allocation10 + $0x228] ss:$16 sps:$4 sm:$0xff]  }
 0x230   :  { %v437_v3 = vmax.f32 %v436_v1, 0.0  ;;  %v6663_v1 = vld [vmem:[#allocation10 + $0xc8] ss:$16 sps:$4 sm:$0xff]  }
 0x232   :  { %v438_v9 = vadd.f32 1e-05, %v437_v3  ;;  %v6671_v3 = vld [vmem:[#allocation10 + $0xac] ss:$16 sps:$4 sm:$0xff]  }
 0x234   :  { %7447 = vrsqrt.f32 %v438_v9  ;;  %v6672_v9 = vld [vmem:[#allocation10 + $0x2a8] ss:$16 sps:$4 sm:$0xff]  }
 0x241   :  { %v7448_v31 = vpop.eup %7447 }
 0x242   :  { %v448_v35 = vpack.c.bf16 %v7448_v31, %v7448_v31  ;;  %v6705_v31 = vld [vmem:[#allocation10 + $0x1e8] ss:$16 sps:$4 sm:$0xff]  }
 0x244   :  { %v450_v41 = vmul.bf16 %v448_v35, %v445_v32  ;;  %v452_v44 = vmul.bf16 %v448_v35, %v447_v63  ;;  %v449_v45 = vmul.bf16 %v448_v35, %v444_v36  ;;  %v451_v46 = vmul.bf16 %v448_v35, %v446_v5  ;;  %v6708_v32 = vld [vmem:[#allocation10 + $0x3e8] ss:$16 sps:$4 sm:$0xff]   ;;  %v6719_v63 = vld [vmem:[#allocation10 + $0x1ac] ss:$16 sps:$4 sm:$0xff]  }
 0x245   :  { %v6714_v35 = vld [vmem:[#allocation10 + $0x3c8] ss:$16 sps:$4 sm:$0xff]   ;;  %v6722_v36 = vld [vmem:[#allocation10 + $0x3ac] ss:$16 sps:$4 sm:$0xff]  }
 0x246   :  { %v508_v48 = vmul.bf16 %v492_v30, %v450_v41  ;;  %v510_v49 = vmul.bf16 %v506_v33, %v452_v44  ;;  %v507_v50 = vmul.bf16 %v485_v53, %v449_v45  ;;  %v509_v52 = vmul.bf16 %v499_v34, %v451_v46  ;;  %v6710_v30 = vld [vmem:[#allocation10 + $0x3ec] ss:$16 sps:$4 sm:$0xff]   ;;  %v6711_v34 = vld [vmem:[#allocation10 + $0x1c8] ss:$16 sps:$4 sm:$0xff]  }
 0x247   :  { %v6713_v33 = vld [vmem:[#allocation10 + $0x1cc] ss:$16 sps:$4 sm:$0xff]   ;;  %v6717_v5 = vld [vmem:[#allocation10 + $0x1a8] ss:$16 sps:$4 sm:$0xff]  }
 0x248   :  { %v566_v54 = vadd.bf16 %v550_v56, %v508_v48  ;;  %v568_v55 = vadd.bf16 %v564_v37, %v510_v49  ;;  %v8097_v59 = vadd.bf16 %v543_v38, %v507_v50  ;;  %v8099_v60 = vadd.bf16 %v557_v39, %v509_v52  ;;  %v6716_v53 = vld [vmem:[#allocation10 + $0x3cc] ss:$16 sps:$4 sm:$0xff]   ;;  %v6720_v56 = vld [vmem:[#allocation10 + $0x3a8] ss:$16 sps:$4 sm:$0xff]  }
 0x249   :  { %v6725_v37 = vld [vmem:[#allocation10 + $0x18c] ss:$16 sps:$4 sm:$0xff]   ;;  %v6723_v39 = vld [vmem:[#allocation10 + $0x188] ss:$16 sps:$4 sm:$0xff]  }
 0x24a   :  { %1391 = vmatprep.mubr.bf16.mxu0 %v566_v54  ;;  %1432 = vmatprep.mubr.bf16.mxu1 %v568_v55  ;;  %v6728_v38 = vld [vmem:[#allocation10 + $0x38c] ss:$16 sps:$4 sm:$0xff]   ;;  %v6726_v41 = vld [vmem:[#allocation10 + $0x388] ss:$16 sps:$4 sm:$0xff]  }
 0x24b   :  { %1392 = vmatmul.mubr.bf16.vlgmr.msra.gmra.mxu0 %v8097_v59  ;;  %1433 = vmatmul.mubr.bf16.vlgmr.msra.gmra.mxu1 %v8099_v60  ;;  %v6731_v44 = vld [vmem:[#allocation10 + $0x16c] ss:$16 sps:$4 sm:$0xff]   ;;  %v6729_v46 = vld [vmem:[#allocation10 + $0x168] ss:$16 sps:$4 sm:$0xff]  }
 0x24c   :  { %1442 = vmatpush1.bf16.msra.mxu0 %v6657_v57  ;;  %1483 = vmatpush1.bf16.msra.mxu1 %v6660_v58  ;;  %v6734_v45 = vld [vmem:[#allocation10 + $0x36c] ss:$16 sps:$4 sm:$0xff]   ;;  %v6732_v48 = vld [vmem:[#allocation10 + $0x368] ss:$16 sps:$4 sm:$0xff]  }
 0x24d   :  { %1473 = vmatprep.mubr.bf16.mxu0 %v566_v54  ;;  %1514 = vmatprep.mubr.bf16.mxu1 %v568_v55  ;;  %v6737_v49 = vld [vmem:[#allocation10 + $0x14c] ss:$16 sps:$4 sm:$0xff]   ;;  %v6735_v52 = vld [vmem:[#allocation10 + $0x148] ss:$16 sps:$4 sm:$0xff]  }
 0x24e   :  { %1443 = vmatprep.subr.bf16.mxu0 %v6665_v61  ;;  %1484 = vmatprep.subr.bf16.mxu1 %v6668_v62  ;;  %v6740_v50 = vld [vmem:[#allocation10 + $0x34c] ss:$16 sps:$4 sm:$0xff]   ;;  %v6738_v54 = vld [vmem:[#allocation10 + $0x348] ss:$16 sps:$4 sm:$0xff]  }
 0x24f   :  { %v6743_v55 = vld [vmem:[#allocation10 + $0x12c] ss:$16 sps:$4 sm:$0xff]   ;;  %v6741_v58 = vld [vmem:[#allocation10 + $0x128] ss:$16 sps:$4 sm:$0xff]  }
 0x250   :  { %1444 = vmatpush1.bf16.msra.mxu0 %v6663_v1  ;;  %1485 = vmatpush1.bf16.msra.mxu1 %v6666_v2  ;;  %v6746_v57 = vld [vmem:[#allocation10 + $0x32c] ss:$16 sps:$4 sm:$0xff]   ;;  %v6744_v61 = vld [vmem:[#allocation10 + $0x328] ss:$16 sps:$4 sm:$0xff]  }
 0x251   :  { %1445 = vmatprep.subr.bf16.mxu0 %v6671_v3  ;;  %1486 = vmatprep.subr.bf16.mxu1 %v6674_v6  ;;  %v6749_v62 = vld [vmem:[#allocation10 + $0x10c] ss:$16 sps:$4 sm:$0xff]   ;;  %v6747_v2 = vld [vmem:[#allocation10 + $0x108] ss:$16 sps:$4 sm:$0xff]  }
 0x252   :  { %v6752_v1 = vld [vmem:[#allocation10 + $0x30c] ss:$16 sps:$4 sm:$0xff]   ;;  %v6750_v3 = vld [vmem:[#allocation10 + $0x308] ss:$16 sps:$4 sm:$0xff]  }
 0x253   :  { %v6755_v6 = vld [vmem:[#allocation13 + $0x4] ss:$16 sps:$4 sm:$0xff]  }
 0x254   :  { %1446 = vmatpush1.bf16.msra.mxu0 %v6669_v8  ;;  %1487 = vmatpush1.bf16.msra.mxu1 %v6672_v9  ;;  %v6753_v8 = vld [vmem:[#allocation13] ss:$16 sps:$4 sm:$0xff]   ;;  %v6758_v9 = vld [vmem:[#allocation13 + $0xc] ss:$16 sps:$4 sm:$0xff]  }
 0x255   :  { %1447 = vmatprep.subr.bf16.mxu0 %v6677_v10  ;;  %1488 = vmatprep.subr.bf16.mxu1 %v6680_v11  ;;  %v6756_v10 = vld [vmem:[#allocation13 + $0x8] ss:$16 sps:$4 sm:$0xff]   ;;  %v6759_v11 = vld [vmem:[#allocation16 + $0xe0] ss:$16 sps:$4 sm:$0xff]  }
 0x258   :  { %1448 = vmatpush1.bf16.msra.mxu0 %v6675_v12  ;;  %1489 = vmatpush1.bf16.msra.mxu1 %v6678_v13  ;;  %v6761_v12 = vld [vmem:[#allocation16 + $0xe4] ss:$16 sps:$4 sm:$0xff]   ;;  %v6762_v13 = vld [vmem:[#allocation16 + $0x2e0] ss:$16 sps:$4 sm:$0xff]  }
 0x259   :  { %1449 = vmatprep.subr.bf16.mxu0 %v6683_v14  ;;  %1490 = vmatprep.subr.bf16.mxu1 %v6686_v15  ;;  %v6767_v14 = vld [vmem:[#allocation16 + $0xc4] ss:$16 sps:$4 sm:$0xff]   ;;  %v6765_v15 = vld [vmem:[#allocation16 + $0xc0] ss:$16 sps:$4 sm:$0xff]  }
 0x25c   :  { %1450 = vmatpush1.bf16.msra.mxu0 %v6681_v16  ;;  %1491 = vmatpush1.bf16.msra.mxu1 %v6684_v17  ;;  %v6768_v16 = vld [vmem:[#allocation16 + $0x2c0] ss:$16 sps:$4 sm:$0xff]   ;;  %v6773_v17 = vld [vmem:[#allocation16 + $0xa4] ss:$16 sps:$4 sm:$0xff]  }
 0x25d   :  { %1451 = vmatprep.subr.bf16.mxu0 %v6689_v18  ;;  %1492 = vmatprep.subr.bf16.mxu1 %v6692_v19  ;;  %v6776_v18 = vld [vmem:[#allocation16 + $0x2a4] ss:$16 sps:$4 sm:$0xff]  }
 0x25e   :  { %v6779_v19 = vld [vmem:[#allocation16 + $0x84] ss:$16 sps:$4 sm:$0xff]  }
 0x260   :  { %1452 = vmatpush1.bf16.msra.mxu0 %v6687_v40  ;;  %1493 = vmatpush1.bf16.msra.mxu1 %v6690_v20  ;;  %v6782_v40 = vld [vmem:[#allocation16 + $0x284] ss:$16 sps:$4 sm:$0xff]   ;;  %v6777_v20 = vld [vmem:[#allocation16 + $0x80] ss:$16 sps:$4 sm:$0xff]  }
 0x261   :  { %1453 = vmatprep.subr.bf16.mxu0 %v6695_v21  ;;  %1494 = vmatprep.subr.bf16.mxu1 %v6698_v22  ;;  %v6780_v21 = vld [vmem:[#allocation16 + $0x280] ss:$16 sps:$4 sm:$0xff]   ;;  %v6785_v22 = vld [vmem:[#allocation16 + $0x64] ss:$16 sps:$4 sm:$0xff]  }
 0x264   :  { %1454 = vmatpush1.bf16.msra.mxu0 %v6693_v23  ;;  %1495 = vmatpush1.bf16.msra.mxu1 %v6696_v24  ;;  %v6788_v23 = vld [vmem:[#allocation16 + $0x264] ss:$16 sps:$4 sm:$0xff]   ;;  %v6783_v24 = vld [vmem:[#allocation16 + $0x60] ss:$16 sps:$4 sm:$0xff]  }
 0x265   :  { %1455 = vmatprep.subr.bf16.mxu0 %v6701_v25  ;;  %1496 = vmatprep.subr.bf16.mxu1 %v6704_v26  ;;  %v6786_v25 = vld [vmem:[#allocation16 + $0x260] ss:$16 sps:$4 sm:$0xff]   ;;  %v6791_v26 = vld [vmem:[#allocation16 + $0x44] ss:$16 sps:$4 sm:$0xff]  }
 0x268   :  { %1456 = vmatpush1.bf16.msra.mxu0 %v6699_v27  ;;  %1497 = vmatpush1.bf16.msra.mxu1 %v6702_v28  ;;  %v6794_v27 = vld [vmem:[#allocation16 + $0x244] ss:$16 sps:$4 sm:$0xff]   ;;  %v6789_v28 = vld [vmem:[#allocation16 + $0x40] ss:$16 sps:$4 sm:$0xff]  }
 0x269   :  { %1457 = vmatprep.subr.bf16.mxu0 %v6707_v29  ;;  %1498 = vmatprep.subr.bf16.mxu1 %v6710_v30  ;;  %v6792_v29 = vld [vmem:[#allocation16 + $0x240] ss:$16 sps:$4 sm:$0xff]   ;;  %v6797_v30 = vld [vmem:[#allocation16 + $0x24] ss:$16 sps:$4 sm:$0xff]  }
 0x26c   :  { %1458 = vmatpush2.bf16.msra.mxu0 %v6705_v31  ;;  %1499 = vmatpush2.bf16.msra.mxu1 %v6708_v32  ;;  %v6800_v31 = vld [vmem:[#allocation16 + $0x224] ss:$16 sps:$4 sm:$0xff]   ;;  %v6795_v32 = vld [vmem:[#allocation16 + $0x20] ss:$16 sps:$4 sm:$0xff]  }
 0x26d   :  { %1459 = vmatprep.subr.bf16.mxu0 %v6713_v33  ;;  %1500 = vmatprep.subr.bf16.mxu1 %v6716_v53  ;;  %v6798_v33 = vld [vmem:[#allocation16 + $0x220] ss:$16 sps:$4 sm:$0xff]   ;;  %v6803_v53 = vld [vmem:[#allocation16 + $0x4] ss:$16 sps:$4 sm:$0xff]  }
 0x270   :  { %1460 = vmatpush2.bf16.msra.mxu0 %v6711_v34  ;;  %1501 = vmatpush2.bf16.msra.mxu1 %v6714_v35  ;;  %v6806_v34 = vld [vmem:[#allocation16 + $0x204] ss:$16 sps:$4 sm:$0xff]   ;;  %v6801_v35 = vld [vmem:[#allocation16] ss:$16 sps:$4 sm:$0xff]  }
 0x271   :  { %1461 = vmatprep.subr.bf16.mxu0 %v6719_v63  ;;  %1502 = vmatprep.subr.bf16.mxu1 %v6722_v36  ;;  %v6804_v63 = vld [vmem:[#allocation16 + $0x200] ss:$16 sps:$4 sm:$0xff]   ;;  %v697_v36 = vld [vmem:[%s8454_s1] sm:$0xf] }
 0x274   :  { %1462 = vmatpush2.bf16.msra.mxu0 %v6717_v5  ;;  %1503 = vmatpush2.bf16.msra.mxu1 %v6720_v56  ;;  %v702_v5 = vrot.slane %v697_v36, %v8040_v42  ;;  %v706_v56 = vrot.slane %v697_v36, %v8043_v43 }
 0x275   :  { %1463 = vmatprep.subr.bf16.mxu0 %v6725_v37  ;;  %1504 = vmatprep.subr.bf16.mxu1 %v6728_v38 }
 0x278   :  { %1464 = vmatpush2.bf16.msra.mxu0 %v6723_v39  ;;  %1505 = vmatpush2.bf16.msra.mxu1 %v6726_v41 }
 0x279   :  { %1465 = vmatprep.subr.bf16.mxu0 %v6731_v44  ;;  %1506 = vmatprep.subr.bf16.mxu1 %v6734_v45 }
 0x27c   :  { %1466 = vmatpush2.bf16.msra.mxu0 %v6729_v46  ;;  %1507 = vmatpush2.bf16.msra.mxu1 %v6732_v48 }
 0x27d   :  { %1467 = vmatprep.subr.bf16.mxu0 %v6737_v49  ;;  %1508 = vmatprep.subr.bf16.mxu1 %v6740_v50 }
 0x280   :  { %1468 = vmatpush2.bf16.msra.mxu0 %v6735_v52  ;;  %1509 = vmatpush2.bf16.msra.mxu1 %v6738_v54 }
 0x281   :  { %1469 = vmatprep.subr.bf16.mxu0 %v6743_v55  ;;  %1510 = vmatprep.subr.bf16.mxu1 %v6746_v57  ;;  %v710_v55 = vrot.slane %v697_v36, %v8048_v47  ;;  %v714_v57 = vrot.slane %v697_v36, %v8051_v51 }
 0x284   :  { %1470 = vmatpush2.bf16.msra.mxu0 %v6741_v58  ;;  %1511 = vmatpush2.bf16.msra.mxu1 %v6744_v61 }
 0x285   :  { %1471 = vmatprep.subr.bf16.mxu0 %v6749_v62  ;;  %1512 = vmatprep.subr.bf16.mxu1 %v6752_v1 }
 0x288   :  { %1472 = vmatpush2.bf16.msra.mxu0 %v6747_v2  ;;  %1513 = vmatpush2.bf16.msra.mxu1 %v6750_v3 }
 0x289   :  { %1737 = vmatprep.subr.bf16.mxu1 %v6755_v6  ;;  %2749 = vmatprep.subr.bf16.mxu0 %v6761_v12 }
 0x28b   :  { %1474 = vmatmul.mubr.bf16.vlgmr.msra.gmra.mxu0 %v8097_v59  ;;  %1515 = vmatmul.mubr.bf16.vlgmr.msra.gmra.mxu1 %v8099_v60  ;;  %v6764_v59 = vld [vmem:[#allocation16 + $0x2e4] ss:$16 sps:$4 sm:$0xff]  }
 0x28c   :  { %1738 = vmatpush1.bf16.msra.mxu1 %v6753_v8  ;;  %1755 = vmatprep.mubr.bf16.mxu1 %v7818_v0  ;;  %v6770_v60 = vld [vmem:[#allocation16 + $0x2c4] ss:$16 sps:$4 sm:$0xff]  }
 0x28d   :  { %1778 = vmatprep.subr.bf16.mxu1 %v6758_v9  ;;  %2750 = vmatpush1.bf16.msra.mxu0 %v6759_v11 }
 0x28e   :  { %2751 = vmatprep.subr.bf16.mxu0 %v6767_v14 }
 0x291   :  { %2752 = vmatpush1.bf16.msra.mxu0 %v6765_v15 }
 0x292   :  { %2753 = vmatprep.subr.bf16.mxu0 %v6773_v17 }
 0x293   :  { %6034 = vmatmul.mubr.msk.bf16.vlgmr.msra.gmra.mxu1 %vm328_vm0, %v8030_v4 }
 0x294   :  { %1779 = vmatpush1.bf16.msra.mxu1 %v6756_v10  ;;  %1796 = vmatprep.mubr.bf16.mxu1 %v7818_v0  ;;  %v6771_v0 = vld [vmem:[#allocation16 + $0xa0] ss:$16 sps:$4 sm:$0xff]   ;;  %v1681_v10 = vld [vmem:[%s8455_s7] sm:$0xf] }
 0x295   :  { %2790 = vmatprep.subr.bf16.mxu1 %v6764_v59  ;;  %2754 = vmatpush1.bf16.msra.mxu0 %v6771_v0  ;;  %v1686_v59 = vrot.slane %v1681_v10, %v8040_v42  ;;  %v1690_v14 = vrot.slane %v1681_v10, %v8043_v43 }
 0x296   :  { %2755 = vmatprep.subr.bf16.mxu0 %v6779_v19 }
 0x299   :  { %2756 = vmatpush1.bf16.msra.mxu0 %v6777_v20  ;;  %v1698_v20 = vrot.slane %v1681_v10, %v8051_v51 }
 0x29a   :  { %2757 = vmatprep.subr.bf16.mxu0 %v6785_v22 }
 0x29b   :  { %6035 = vmatmul.mubr.msk.bf16.vlgmr.msra.gmra.mxu1 %vm328_vm0, %v8030_v4  ;;  %v6774_v4 = vld [vmem:[#allocation16 + $0x2a0] ss:$16 sps:$4 sm:$0xff]  }
 0x29c   :  { %2791 = vmatpush1.bf16.msra.mxu1 %v6762_v13 }
 0x29d   :  { %2792 = vmatprep.subr.bf16.mxu1 %v6770_v60  ;;  %2758 = vmatpush1.bf16.msra.mxu0 %v6783_v24 }
 0x29e   :  { %2759 = vmatprep.subr.bf16.mxu0 %v6791_v26 }
 0x2a0   :  { %2793 = vmatpush1.bf16.msra.mxu1 %v6768_v16 }
 0x2a1   :  { %2794 = vmatprep.subr.bf16.mxu1 %v6776_v18  ;;  %2760 = vmatpush1.bf16.msra.mxu0 %v6789_v28 }
 0x2a2   :  { %2761 = vmatprep.subr.bf16.mxu0 %v6797_v30 }
 0x2a4   :  { %2795 = vmatpush1.bf16.msra.mxu1 %v6774_v4  ;;  %v1694_v4 = vrot.slane %v1681_v10, %v8048_v47  ;;  %v6837_v10 = vld [vmem:[#allocation16 + $0x140] ss:$16 sps:$4 sm:$0xff]  }
 0x2a5   :  { %2796 = vmatprep.subr.bf16.mxu1 %v6782_v40  ;;  %2762 = vmatpush1.bf16.msra.mxu0 %v6795_v32 }
 0x2a6   :  { %2763 = vmatprep.subr.bf16.mxu0 %v6803_v53 }
 0x2a8   :  { %2797 = vmatpush1.bf16.msra.mxu1 %v6780_v21 }
 0x2a9   :  { %2798 = vmatprep.subr.bf16.mxu1 %v6788_v23  ;;  %2764 = vmatpush1.bf16.msra.mxu0 %v6801_v35 }
 0x2ac   :  { %2799 = vmatpush1.bf16.msra.mxu1 %v6786_v25 }
 0x2ad   :  { %2800 = vmatprep.subr.bf16.mxu1 %v6794_v27 }
 0x2b0   :  { %2801 = vmatpush1.bf16.msra.mxu1 %v6792_v29 }
 0x2b1   :  { %2802 = vmatprep.subr.bf16.mxu1 %v6800_v31 }
 0x2b4   :  { %2803 = vmatpush1.bf16.msra.mxu1 %v6798_v33 }
 0x2b5   :  { %2804 = vmatprep.subr.bf16.mxu1 %v6806_v34 }
 0x2b8   :  { %2805 = vmatpush1.bf16.msra.mxu1 %v6804_v63 }
 0x30b   :  { %v1393_v37 = vpop.f32.mrf.mxu0  ;;  %v1434_v38 = vpop.f32.mrf.mxu1 }
 0x30c   :  { %v1394_v39 = vadd.f32 %v1393_v37, %v702_v5  ;;  %v6809_v5 = vld [vmem:[#allocation16 + $0x1e4] ss:$16 sps:$4 sm:$0xff]   ;;  %v6807_v37 = vld [vmem:[#allocation16 + $0x1e0] ss:$16 sps:$4 sm:$0xff]  }
 0x30d   :  { %v1395_v41 = vpop.f32.mrf.mxu0  ;;  %v1436_v44 = vpop.f32.mrf.mxu1  ;;  %2765 = vmatprep.subr.bf16.mxu0 %v6809_v5 }
 0x30e   :  { %v8116_v45 = vadd.f32 %v1434_v38, %v1394_v39  ;;  %v1396_v46 = vadd.f32 %v1395_v41, %v706_v56  ;;  %v6812_v56 = vld [vmem:[#allocation16 + $0x3e4] ss:$16 sps:$4 sm:$0xff]   ;;  %v6810_v38 = vld [vmem:[#allocation16 + $0x3e0] ss:$16 sps:$4 sm:$0xff]   ;;  %2766 = vmatpush2.bf16.msra.mxu0 %v6807_v37 }
 0x30f   :  { %v1397_v48 = vpop.f32.mrf.mxu0  ;;  %v1438_v49 = vpop.f32.mrf.mxu1  ;;  %2806 = vmatprep.subr.bf16.mxu1 %v6812_v56  ;;  %v6815_v39 = vld [vmem:[#allocation16 + $0x1c4] ss:$16 sps:$4 sm:$0xff]  }
 0x310   :  { %v8118_v50 = vadd.f32 %v1436_v44, %v1396_v46  ;;  %2807 = vmatpush2.bf16.msra.mxu1 %v6810_v38  ;;  %v6818_v41 = vld [vmem:[#allocation16 + $0x3c4] ss:$16 sps:$4 sm:$0xff]   ;;  %v6813_v44 = vld [vmem:[#allocation16 + $0x1c0] ss:$16 sps:$4 sm:$0xff]   ;;  %2767 = vmatprep.subr.bf16.mxu0 %v6815_v39 }
 0x311   :  { %v1398_v52 = vpop.f32.mrf.mxu0  ;;  %v1439_v54 = vpop.f32.mrf.mxu1  ;;  %v6816_v46 = vld [vmem:[#allocation16 + $0x3c0] ss:$16 sps:$4 sm:$0xff]   ;;  %2808 = vmatprep.subr.bf16.mxu1 %v6818_v41  ;;  %v6821_v48 = vld [vmem:[#allocation16 + $0x1a4] ss:$16 sps:$4 sm:$0xff]  }
 0x312   :  { %2768 = vmatpush2.bf16.msra.mxu0 %v6813_v44  ;;  %v6824_v49 = vld [vmem:[#allocation16 + $0x3a4] ss:$16 sps:$4 sm:$0xff]   ;;  %v6819_v52 = vld [vmem:[#allocation16 + $0x1a0] ss:$16 sps:$4 sm:$0xff]  }
 0x313   :  { %v6822_v54 = vld [vmem:[#allocation16 + $0x3a0] ss:$16 sps:$4 sm:$0xff]   ;;  %2769 = vmatprep.subr.bf16.mxu0 %v6821_v48 }
 0x314   :  { %2809 = vmatpush2.bf16.msra.mxu1 %v6816_v46 }
 0x315   :  { %2810 = vmatprep.subr.bf16.mxu1 %v6824_v49 }
 0x316   :  { %2770 = vmatpush2.bf16.msra.mxu0 %v6819_v52 }
 0x318   :  { %2811 = vmatpush2.bf16.msra.mxu1 %v6822_v54 }
 0x34b   :  { %v1475_v58 = vpop.f32.mrf.mxu0  ;;  %v1516_v61 = vpop.f32.mrf.mxu1 }
 0x34c   :  { %v1476_v62 = vadd.f32 %v1475_v58, %v710_v55  ;;  %v6827_v55 = vld [vmem:[#allocation16 + $0x184] ss:$16 sps:$4 sm:$0xff]   ;;  %v6825_v58 = vld [vmem:[#allocation16 + $0x180] ss:$16 sps:$4 sm:$0xff]  }
 0x34d   :  { %v1477_v1 = vpop.f32.mrf.mxu0  ;;  %v1518_v2 = vpop.f32.mrf.mxu1  ;;  %2771 = vmatprep.subr.bf16.mxu0 %v6827_v55 }
 0x34e   :  { %v8122_v3 = vadd.f32 %v1516_v61, %v1476_v62  ;;  %v1478_v6 = vadd.f32 %v1477_v1, %v714_v57  ;;  %v6830_v57 = vld [vmem:[#allocation16 + $0x384] ss:$16 sps:$4 sm:$0xff]   ;;  %v6828_v61 = vld [vmem:[#allocation16 + $0x380] ss:$16 sps:$4 sm:$0xff]   ;;  %2772 = vmatpush2.bf16.msra.mxu0 %v6825_v58 }
 0x34f   :  { %v1479_v8 = vpop.f32.mrf.mxu0  ;;  %v1520_v9 = vpop.f32.mrf.mxu1  ;;  %2812 = vmatprep.subr.bf16.mxu1 %v6830_v57  ;;  %v6833_v62 = vld [vmem:[#allocation16 + $0x164] ss:$16 sps:$4 sm:$0xff]  }
 0x350   :  { %v8127_v11 = vadd.f32 %v1518_v2, %v1478_v6  ;;  %2813 = vmatpush2.bf16.msra.mxu1 %v6828_v61  ;;  %v6836_v1 = vld [vmem:[#allocation16 + $0x364] ss:$16 sps:$4 sm:$0xff]   ;;  %v6831_v2 = vld [vmem:[#allocation16 + $0x160] ss:$16 sps:$4 sm:$0xff]   ;;  %2773 = vmatprep.subr.bf16.mxu0 %v6833_v62 }
 0x351   :  { %v1480_v12 = vpop.f32.mrf.mxu0  ;;  %v1521_v13 = vpop.f32.mrf.mxu1  ;;  %v6834_v6 = vld [vmem:[#allocation16 + $0x360] ss:$16 sps:$4 sm:$0xff]   ;;  %2814 = vmatprep.subr.bf16.mxu1 %v6836_v1  ;;  %v6839_v8 = vld [vmem:[#allocation16 + $0x144] ss:$16 sps:$4 sm:$0xff]  }
 0x352   :  { %2774 = vmatpush2.bf16.msra.mxu0 %v6831_v2  ;;  %v6842_v9 = vld [vmem:[#allocation16 + $0x344] ss:$16 sps:$4 sm:$0xff]   ;;  %v6840_v12 = vld [vmem:[#allocation16 + $0x340] ss:$16 sps:$4 sm:$0xff]  }
 0x353   :  { %v1757_v60 = vpop.f32.mrf.mxu1  ;;  %2775 = vmatprep.subr.bf16.mxu0 %v6839_v8  ;;  %v6845_v13 = vld [vmem:[#allocation16 + $0x124] ss:$16 sps:$4 sm:$0xff]  }
 0x354   :  { %v1758_v16 = vadd.f32 %v1757_v60, %v1686_v59  ;;  %2815 = vmatpush2.bf16.msra.mxu1 %v6834_v6  ;;  %v6848_v59 = vld [vmem:[#allocation16 + $0x324] ss:$16 sps:$4 sm:$0xff]   ;;  %v6846_v60 = vld [vmem:[#allocation16 + $0x320] ss:$16 sps:$4 sm:$0xff]  }
 0x355   :  { %v1759_v15 = vpop.f32.mrf.mxu1  ;;  %2816 = vmatprep.subr.bf16.mxu1 %v6842_v9 }
 0x356   :  { %v1760_v17 = vadd.f32 %v1759_v15, %v1690_v14  ;;  %v8134_v40 = vmax.f32 %v1758_v16, 0.0  ;;  %2776 = vmatpush2.bf16.msra.mxu0 %v6837_v10  ;;  %v6843_v14 = vld [vmem:[#allocation16 + $0x120] ss:$16 sps:$4 sm:$0xff]   ;;  %v6851_v15 = vld [vmem:[#allocation16 + $0x104] ss:$16 sps:$4 sm:$0xff]  }
 0x357   :  { %v1761_v18 = vpop.f32.mrf.mxu1  ;;  %2777 = vmatprep.subr.bf16.mxu0 %v6845_v13  ;;  %v6849_v16 = vld [vmem:[#allocation16 + $0x100] ss:$16 sps:$4 sm:$0xff]  }
 0x358   :  { %v8131_v0 = vmax.f32 %v1760_v17, 0.0  ;;  %v1815_v25 = vmul.f32 %v8134_v40, %v8134_v40  ;;  %2817 = vmatpush2.bf16.msra.mxu1 %v6840_v12  ;;  %v6852_v17 = vld [vmem:[#allocation16 + $0x300] ss:$16 sps:$4 sm:$0xff]   ;;  %v6854_v18 = vld [vmem:[#allocation16 + $0x304] ss:$16 sps:$4 sm:$0xff]  }
 0x359   :  { %v1762_v19 = vpop.f32.mrf.mxu1  ;;  %2818 = vmatprep.subr.bf16.mxu1 %v6848_v59 }
 0x35a   :  { %v1816_v22 = vmul.f32 %v8131_v0, %v8131_v0  ;;  %v1809_v28 = vadd.f32 %v8131_v0, %v8134_v40  ;;  %2778 = vmatpush2.bf16.msra.mxu0 %v6843_v14  ;;  %v6860_v19 = vld [vmem:[#allocation16 + $0x2ec] ss:$16 sps:$4 sm:$0xff]  }
 0x35b   :  { %v1798_v21 = vpop.f32.mrf.mxu1  ;;  %2779 = vmatprep.subr.bf16.mxu0 %v6851_v15 }
 0x35c   :  { %v1799_v23 = vadd.f32 %v1798_v21, %v1694_v4  ;;  %v1819_v33 = vadd.f32 %v1816_v22, %v1815_v25  ;;  %2819 = vmatpush2.bf16.msra.mxu1 %v6846_v60  ;;  %v6857_v4 = vld [vmem:[#allocation16 + $0xec] ss:$16 sps:$4 sm:$0xff]  }
 0x35d   :  { %v1800_v24 = vpop.f32.mrf.mxu1  ;;  %2820 = vmatprep.subr.bf16.mxu1 %v6854_v18 }
 0x35e   :  { %v8141_v26 = vmax.f32 %v1799_v23, 0.0  ;;  %v1801_v27 = vadd.f32 %v1800_v24, %v1698_v20  ;;  %2780 = vmatpush2.bf16.msra.mxu0 %v6849_v16 }
 0x35f   :  { %v1802_v29 = vpop.f32.mrf.mxu1  ;;  %2831 = vmatprep.subr.bf16.mxu0 %v6857_v4 }
 0x360   :  { %v8145_v30 = vmax.f32 %v1801_v27, 0.0  ;;  %v1810_v31 = vadd.f32 %v1809_v28, %v8141_v26  ;;  %v1817_v32 = vmul.f32 %v8141_v26, %v8141_v26  ;;  %2821 = vmatpush2.bf16.msra.mxu1 %v6852_v17  ;;  %v6036_v27 = vld.sshfl [vmem:[%s8456_s18] sm:$0x33 pattern:$0x75316420] }
 0x361   :  { %v1803_v53 = vpop.f32.mrf.mxu1  ;;  %2872 = vmatprep.subr.bf16.mxu1 %v6860_v19  ;;  %v6037_v29 = vld.sshfl [vmem:[#allocation14] sm:$0x33 pattern:$0x75316420] }
 0x362   :  { %v1811_v34 = vadd.f32 %v1810_v31, %v8145_v30  ;;  %v1818_v35 = vmul.f32 %v8145_v30, %v8145_v30  ;;  %v1820_v63 = vadd.f32 %v1819_v33, %v1817_v32  ;;  %v1852_v31 = vcombine.high %v6036_v27, %v6036_v27 }
 0x363   :  { %v1910_v33 = vcombine.high %v6037_v29, %v6037_v29 }
 0x364   :  { %1812 = vadd.xlane.f32.xlu1 %v1811_v34  ;;  %v1821_v36 = vadd.f32 %v1820_v63, %v1818_v35  ;;  %v1866_v53 = vrot.slane %v1852_v31, %v8079_v7  ;;  %v1859_v34 = vrot.slane %v6036_v27, %v8079_v7  ;;  %v1917_v63 = vrot.slane %v6037_v29, %v8079_v7  ;;  %v6866_v27 = vld [vmem:[#allocation16 + $0x2cc] ss:$16 sps:$4 sm:$0xff]   ;;  %v6864_v29 = vld [vmem:[#allocation16 + $0x2c8] ss:$16 sps:$4 sm:$0xff]  }
 0x365   :  { %v1924_v35 = vrot.slane %v1910_v33, %v8079_v7  ;;  %v6869_v31 = vld [vmem:[#allocation16 + $0xac] ss:$16 sps:$4 sm:$0xff]   ;;  %v6867_v33 = vld [vmem:[#allocation16 + $0xa8] ss:$16 sps:$4 sm:$0xff]  }
 0x366   :  { %v1867_v5 = vcombine.high %v1859_v34, %v1859_v34  ;;  %v1925_v37 = vcombine.high %v1917_v63, %v1917_v63  ;;  %v1877_v38 = vpack.i.b16 %v1866_v53, %v1866_v53  ;;  %v1870_v44 = vpack.i.b16 %v1859_v34, %v1859_v34  ;;  %v6875_v34 = vld [vmem:[#allocation16 + $0x8c] ss:$16 sps:$4 sm:$0xff]  }
 0x367   :  { %v1926_v56 = vcombine.high %v1924_v35, %v1924_v35  ;;  %v1935_v54 = vpack.i.b16 %v1924_v35, %v1924_v35  ;;  %v1928_v57 = vpack.i.b16 %v1917_v63, %v1917_v63  ;;  %v6878_v35 = vld [vmem:[#allocation16 + $0x28c] ss:$16 sps:$4 sm:$0xff]   ;;  %v6873_v63 = vld [vmem:[#allocation16 + $0x88] ss:$16 sps:$4 sm:$0xff]  }
 0x368   :  { %1822 = vadd.xlane.f32.xlu1 %v1821_v36  ;;  %v1868_v36 = vcombine.high %v1866_v53, %v1866_v53  ;;  %v1884_v46 = vpack.i.b16 %v1867_v5, %v1867_v5  ;;  %v1942_v58 = vpack.i.b16 %v1925_v37, %v1925_v37  ;;  %v1882_v61 = vrot.slane %v1877_v38, %v8040_v42  ;;  %v6870_v53 = vld [vmem:[#allocation16 + $0x2a8] ss:$16 sps:$4 sm:$0xff]   ;;  %v6881_v5 = vld [vmem:[#allocation16 + $0x6c] ss:$16 sps:$4 sm:$0xff]  }
 0x369   :  { %v1949_v55 = vpack.i.b16 %v1926_v56, %v1926_v56  ;;  %v1933_v12 = vrot.slane %v1928_v57, %v8040_v42  ;;  %v6884_v56 = vld [vmem:[#allocation16 + $0x26c] ss:$16 sps:$4 sm:$0xff]   ;;  %v6879_v37 = vld [vmem:[#allocation16 + $0x68] ss:$16 sps:$4 sm:$0xff]  }
 0x36a   :  { %v1891_v41 = vpack.i.b16 %v1868_v36, %v1868_v36  ;;  %v1889_v6 = vrot.slane %v1884_v46, %v8040_v42  ;;  %v1947_v13 = vrot.slane %v1942_v58, %v8040_v42  ;;  %v6876_v36 = vld [vmem:[#allocation16 + $0x288] ss:$16 sps:$4 sm:$0xff]   ;;  %v6902_v57 = vld [vmem:[#allocation16 + $0x20c] ss:$16 sps:$4 sm:$0xff]  }
 0x36b   :  { %v1954_v10 = vrot.slane %v1949_v55, %v8040_v42  ;;  %v6882_v38 = vld [vmem:[#allocation16 + $0x268] ss:$16 sps:$4 sm:$0xff]   ;;  %v6899_v55 = vld [vmem:[#allocation16 + $0xc] ss:$16 sps:$4 sm:$0xff]  }
 0x36c   :  { %v1896_v2 = vrot.slane %v1891_v41, %v8040_v42  ;;  %v6890_v41 = vld [vmem:[#allocation16 + $0x24c] ss:$16 sps:$4 sm:$0xff]   ;;  %v6888_v46 = vld [vmem:[#allocation16 + $0x248] ss:$16 sps:$4 sm:$0xff]  }
 0x36d   :  { %v6897_v58 = vld [vmem:[#allocation16 + $0x8] ss:$16 sps:$4 sm:$0xff]  }
 0x3ed   :  { %v1813_v20 = vpop.xlane.xlu1 %1812 }
 0x3ee   :  { %v1814_v21 = vmul.f32 0.001953125, %v1813_v20 }
 0x3f0   :  { %v1825_v23 = vmul.f32 %v1814_v21, %v1814_v21  ;;  %v1831_v39 = vsub.f32 %v8131_v0, %v1814_v21  ;;  %v1830_v48 = vsub.f32 %v8134_v40, %v1814_v21  ;;  %v1832_v49 = vsub.f32 %v8141_v26, %v1814_v21 }
 0x3f1   :  { %v1823_v22 = vpop.xlane.xlu1 %1822  ;;  %v1833_v52 = vsub.f32 %v8145_v30, %v1814_v21  ;;  %v1875_v0 = vrot.slane %v1870_v44, %v8040_v42  ;;  %v1940_v30 = vrot.slane %v1935_v54, %v8040_v42  ;;  %v6855_v21 = vld [vmem:[#allocation16 + $0xe8] ss:$16 sps:$4 sm:$0xff]  }
 0x3f2   :  { %v1824_v24 = vmul.f32 0.001953125, %v1823_v22  ;;  %v1835_v1 = vpack.c.bf16 %v1831_v39, %v1831_v39  ;;  %v1834_v9 = vpack.c.bf16 %v1830_v48, %v1830_v48  ;;  %v1836_v26 = vpack.c.bf16 %v1832_v49, %v1832_v49  ;;  %v6858_v22 = vld [vmem:[#allocation16 + $0x2e8] ss:$16 sps:$4 sm:$0xff]   ;;  %v6887_v39 = vld [vmem:[#allocation16 + $0x4c] ss:$16 sps:$4 sm:$0xff]  }
 0x3f3   :  { %v1837_v40 = vpack.c.bf16 %v1833_v52, %v1833_v52  ;;  %v6885_v44 = vld [vmem:[#allocation16 + $0x48] ss:$16 sps:$4 sm:$0xff]   ;;  %v6893_v48 = vld [vmem:[#allocation16 + $0x2c] ss:$16 sps:$4 sm:$0xff]  }
 0x3f4   :  { %v1826_v25 = vsub.f32 %v1824_v24, %v1825_v23  ;;  %v6896_v49 = vld [vmem:[#allocation16 + $0x22c] ss:$16 sps:$4 sm:$0xff]   ;;  %v6891_v52 = vld [vmem:[#allocation16 + $0x28] ss:$16 sps:$4 sm:$0xff]  }
 0x3f5   :  { %v6894_v54 = vld [vmem:[#allocation16 + $0x228] ss:$16 sps:$4 sm:$0xff]  }
 0x3f6   :  { %v1827_v28 = vmax.f32 %v1826_v25, 0.0  ;;  %v6863_v25 = vld [vmem:[#allocation16 + $0xcc] ss:$16 sps:$4 sm:$0xff]  }
 0x3f8   :  { %v1828_v32 = vadd.f32 1e-05, %v1827_v28  ;;  %v6861_v28 = vld [vmem:[#allocation16 + $0xc8] ss:$16 sps:$4 sm:$0xff]  }
 0x3fa   :  { %7449 = vrsqrt.f32 %v1828_v32  ;;  %v6872_v32 = vld [vmem:[#allocation16 + $0x2ac] ss:$16 sps:$4 sm:$0xff]  }
 0x407   :  { %v7450_v62 = vpop.eup %7449 }
 0x408   :  { %v1838_v8 = vpack.c.bf16 %v7450_v62, %v7450_v62  ;;  %v6905_v62 = vld [vmem:[#allocation16 + $0x1ec] ss:$16 sps:$4 sm:$0xff]  }
 0x40a   :  { %v1840_v59 = vmul.bf16 %v1838_v8, %v1835_v1  ;;  %v1842_v14 = vmul.bf16 %v1838_v8, %v1837_v40  ;;  %v1839_v60 = vmul.bf16 %v1838_v8, %v1834_v9  ;;  %v1841_v15 = vmul.bf16 %v1838_v8, %v1836_v26  ;;  %v6908_v1 = vld [vmem:[#allocation16 + $0x3ec] ss:$16 sps:$4 sm:$0xff]   ;;  %v6909_v40 = vld [vmem:[#allocation16 + $0x1c8] ss:$16 sps:$4 sm:$0xff]  }
 0x40b   :  { %v6914_v8 = vld [vmem:[#allocation16 + $0x3cc] ss:$16 sps:$4 sm:$0xff]   ;;  %v6912_v9 = vld [vmem:[#allocation16 + $0x3c8] ss:$16 sps:$4 sm:$0xff]  }
 0x40c   :  { %v1898_v16 = vmul.bf16 %v1882_v61, %v1840_v59  ;;  %v1900_v17 = vmul.bf16 %v1896_v2, %v1842_v14  ;;  %v1897_v18 = vmul.bf16 %v1875_v0, %v1839_v60  ;;  %v1899_v4 = vmul.bf16 %v1889_v6, %v1841_v15  ;;  %v6900_v61 = vld [vmem:[#allocation16 + $0x208] ss:$16 sps:$4 sm:$0xff]   ;;  %v6911_v6 = vld [vmem:[#allocation16 + $0x1cc] ss:$16 sps:$4 sm:$0xff]  }
 0x40d   :  { %v6903_v2 = vld [vmem:[#allocation16 + $0x1e8] ss:$16 sps:$4 sm:$0xff]   ;;  %v6917_v26 = vld [vmem:[#allocation16 + $0x1ac] ss:$16 sps:$4 sm:$0xff]  }
 0x40e   :  { %v1956_v19 = vadd.bf16 %v1940_v30, %v1898_v16  ;;  %v1958_v20 = vadd.bf16 %v1954_v10, %v1900_v17  ;;  %v8172_v23 = vadd.bf16 %v1933_v12, %v1897_v18  ;;  %v8174_v24 = vadd.bf16 %v1947_v13, %v1899_v4  ;;  %v6906_v0 = vld [vmem:[#allocation16 + $0x3e8] ss:$16 sps:$4 sm:$0xff]   ;;  %v6920_v30 = vld [vmem:[#allocation16 + $0x3ac] ss:$16 sps:$4 sm:$0xff]  }
 0x40f   :  { %v6915_v10 = vld [vmem:[#allocation16 + $0x1a8] ss:$16 sps:$4 sm:$0xff]   ;;  %v6923_v13 = vld [vmem:[#allocation16 + $0x18c] ss:$16 sps:$4 sm:$0xff]  }
 0x410   :  { %2781 = vmatprep.mubr.bf16.mxu0 %v1956_v19  ;;  %2822 = vmatprep.mubr.bf16.mxu1 %v1958_v20  ;;  %v6918_v12 = vld [vmem:[#allocation16 + $0x3a8] ss:$16 sps:$4 sm:$0xff]   ;;  %v6926_v59 = vld [vmem:[#allocation16 + $0x38c] ss:$16 sps:$4 sm:$0xff]  }
 0x411   :  { %2782 = vmatmul.mubr.bf16.vlgmr.msra.gmra.mxu0 %v8172_v23  ;;  %2823 = vmatmul.mubr.bf16.vlgmr.msra.gmra.mxu1 %v8174_v24  ;;  %v6921_v14 = vld [vmem:[#allocation16 + $0x188] ss:$16 sps:$4 sm:$0xff]   ;;  %v6929_v15 = vld [vmem:[#allocation16 + $0x16c] ss:$16 sps:$4 sm:$0xff]  }
 0x412   :  { %2832 = vmatpush1.bf16.msra.mxu0 %v6855_v21  ;;  %2873 = vmatpush1.bf16.msra.mxu1 %v6858_v22  ;;  %v6924_v60 = vld [vmem:[#allocation16 + $0x388] ss:$16 sps:$4 sm:$0xff]   ;;  %v6932_v16 = vld [vmem:[#allocation16 + $0x36c] ss:$16 sps:$4 sm:$0xff]  }
 0x413   :  { %2863 = vmatprep.mubr.bf16.mxu0 %v1956_v19  ;;  %2904 = vmatprep.mubr.bf16.mxu1 %v1958_v20  ;;  %v6927_v17 = vld [vmem:[#allocation16 + $0x168] ss:$16 sps:$4 sm:$0xff]   ;;  %v6935_v4 = vld [vmem:[#allocation16 + $0x14c] ss:$16 sps:$4 sm:$0xff]  }
 0x414   :  { %2833 = vmatprep.subr.bf16.mxu0 %v6863_v25  ;;  %2874 = vmatprep.subr.bf16.mxu1 %v6866_v27  ;;  %v6930_v18 = vld [vmem:[#allocation16 + $0x368] ss:$16 sps:$4 sm:$0xff]   ;;  %v6938_v19 = vld [vmem:[#allocation16 + $0x34c] ss:$16 sps:$4 sm:$0xff]  }
 0x415   :  { %v6933_v20 = vld [vmem:[#allocation16 + $0x148] ss:$16 sps:$4 sm:$0xff]   ;;  %v6941_v22 = vld [vmem:[#allocation16 + $0x12c] ss:$16 sps:$4 sm:$0xff]  }
 0x416   :  { %2834 = vmatpush1.bf16.msra.mxu0 %v6861_v28  ;;  %2875 = vmatpush1.bf16.msra.mxu1 %v6864_v29  ;;  %v6936_v21 = vld [vmem:[#allocation16 + $0x348] ss:$16 sps:$4 sm:$0xff]   ;;  %v6944_v25 = vld [vmem:[#allocation16 + $0x32c] ss:$16 sps:$4 sm:$0xff]  }
 0x417   :  { %2835 = vmatprep.subr.bf16.mxu0 %v6869_v31  ;;  %2876 = vmatprep.subr.bf16.mxu1 %v6872_v32  ;;  %v6939_v27 = vld [vmem:[#allocation16 + $0x128] ss:$16 sps:$4 sm:$0xff]   ;;  %v6947_v29 = vld [vmem:[#allocation16 + $0x10c] ss:$16 sps:$4 sm:$0xff]  }
 0x418   :  { %v6942_v28 = vld [vmem:[#allocation16 + $0x328] ss:$16 sps:$4 sm:$0xff]   ;;  %v6950_v31 = vld [vmem:[#allocation16 + $0x30c] ss:$16 sps:$4 sm:$0xff]  }
 0x419   :  { %v6945_v32 = vld [vmem:[#allocation16 + $0x108] ss:$16 sps:$4 sm:$0xff]  }
 0x41a   :  { %2836 = vmatpush1.bf16.msra.mxu0 %v6867_v33  ;;  %2877 = vmatpush1.bf16.msra.mxu1 %v6870_v53  ;;  %v6948_v33 = vld [vmem:[#allocation16 + $0x308] ss:$16 sps:$4 sm:$0xff]   ;;  %v6951_v53 = vld [vmem:[#allocation20 + $0xe0] ss:$16 sps:$4 sm:$0xff]  }
 0x41b   :  { %2837 = vmatprep.subr.bf16.mxu0 %v6875_v34  ;;  %2878 = vmatprep.subr.bf16.mxu1 %v6878_v35  ;;  %v6953_v34 = vld [vmem:[#allocation20 + $0xe4] ss:$16 sps:$4 sm:$0xff]   ;;  %v6954_v35 = vld [vmem:[#allocation20 + $0x2e0] ss:$16 sps:$4 sm:$0xff]  }
 0x41e   :  { %2838 = vmatpush1.bf16.msra.mxu0 %v6873_v63  ;;  %2879 = vmatpush1.bf16.msra.mxu1 %v6876_v36  ;;  %v6956_v63 = vld [vmem:[#allocation20 + $0x2e4] ss:$16 sps:$4 sm:$0xff]  }
 0x41f   :  { %2839 = vmatprep.subr.bf16.mxu0 %v6881_v5  ;;  %2880 = vmatprep.subr.bf16.mxu1 %v6884_v56  ;;  %v6959_v36 = vld [vmem:[#allocation20 + $0xc4] ss:$16 sps:$4 sm:$0xff]   ;;  %v6957_v56 = vld [vmem:[#allocation20 + $0xc0] ss:$16 sps:$4 sm:$0xff]  }
 0x420   :  { %v6962_v5 = vld [vmem:[#allocation20 + $0x2c4] ss:$16 sps:$4 sm:$0xff]  }
 0x422   :  { %2840 = vmatpush1.bf16.msra.mxu0 %v6879_v37  ;;  %2881 = vmatpush1.bf16.msra.mxu1 %v6882_v38  ;;  %v6960_v37 = vld [vmem:[#allocation20 + $0x2c0] ss:$16 sps:$4 sm:$0xff]   ;;  %v6965_v38 = vld [vmem:[#allocation20 + $0xa4] ss:$16 sps:$4 sm:$0xff]  }
 0x423   :  { %2841 = vmatprep.subr.bf16.mxu0 %v6887_v39  ;;  %2882 = vmatprep.subr.bf16.mxu1 %v6890_v41  ;;  %v6968_v39 = vld [vmem:[#allocation20 + $0x2a4] ss:$16 sps:$4 sm:$0xff]  }
 0x424   :  { %v6971_v41 = vld [vmem:[#allocation20 + $0x84] ss:$16 sps:$4 sm:$0xff]  }
 0x426   :  { %2842 = vmatpush1.bf16.msra.mxu0 %v6885_v44  ;;  %2883 = vmatpush1.bf16.msra.mxu1 %v6888_v46  ;;  %v6974_v44 = vld [vmem:[#allocation20 + $0x284] ss:$16 sps:$4 sm:$0xff]   ;;  %v6969_v46 = vld [vmem:[#allocation20 + $0x80] ss:$16 sps:$4 sm:$0xff]  }
 0x427   :  { %2843 = vmatprep.subr.bf16.mxu0 %v6893_v48  ;;  %2884 = vmatprep.subr.bf16.mxu1 %v6896_v49  ;;  %v6972_v48 = vld [vmem:[#allocation20 + $0x280] ss:$16 sps:$4 sm:$0xff]   ;;  %v6977_v49 = vld [vmem:[#allocation20 + $0x64] ss:$16 sps:$4 sm:$0xff]  }
 0x42a   :  { %2844 = vmatpush1.bf16.msra.mxu0 %v6891_v52  ;;  %2885 = vmatpush1.bf16.msra.mxu1 %v6894_v54  ;;  %v6980_v52 = vld [vmem:[#allocation20 + $0x264] ss:$16 sps:$4 sm:$0xff]   ;;  %v6975_v54 = vld [vmem:[#allocation20 + $0x60] ss:$16 sps:$4 sm:$0xff]  }
 0x42b   :  { %2845 = vmatprep.subr.bf16.mxu0 %v6899_v55  ;;  %2886 = vmatprep.subr.bf16.mxu1 %v6902_v57  ;;  %v6978_v55 = vld [vmem:[#allocation20 + $0x260] ss:$16 sps:$4 sm:$0xff]   ;;  %v6983_v57 = vld [vmem:[#allocation20 + $0x44] ss:$16 sps:$4 sm:$0xff]  }
 0x42e   :  { %2846 = vmatpush1.bf16.msra.mxu0 %v6897_v58  ;;  %2887 = vmatpush1.bf16.msra.mxu1 %v6900_v61  ;;  %v6986_v58 = vld [vmem:[#allocation20 + $0x244] ss:$16 sps:$4 sm:$0xff]   ;;  %v6981_v61 = vld [vmem:[#allocation20 + $0x40] ss:$16 sps:$4 sm:$0xff]  }
 0x42f   :  { %2847 = vmatprep.subr.bf16.mxu0 %v6905_v62  ;;  %2888 = vmatprep.subr.bf16.mxu1 %v6908_v1  ;;  %v6984_v62 = vld [vmem:[#allocation20 + $0x240] ss:$16 sps:$4 sm:$0xff]   ;;  %v6989_v1 = vld [vmem:[#allocation20 + $0x24] ss:$16 sps:$4 sm:$0xff]  }
 0x432   :  { %2848 = vmatpush2.bf16.msra.mxu0 %v6903_v2  ;;  %2889 = vmatpush2.bf16.msra.mxu1 %v6906_v0  ;;  %v6992_v2 = vld [vmem:[#allocation20 + $0x224] ss:$16 sps:$4 sm:$0xff]   ;;  %v6987_v0 = vld [vmem:[#allocation20 + $0x20] ss:$16 sps:$4 sm:$0xff]  }
 0x433   :  { %2849 = vmatprep.subr.bf16.mxu0 %v6911_v6  ;;  %2890 = vmatprep.subr.bf16.mxu1 %v6914_v8  ;;  %v6990_v6 = vld [vmem:[#allocation20 + $0x220] ss:$16 sps:$4 sm:$0xff]   ;;  %v6995_v8 = vld [vmem:[#allocation20 + $0x4] ss:$16 sps:$4 sm:$0xff]  }
 0x436   :  { %2850 = vmatpush2.bf16.msra.mxu0 %v6909_v40  ;;  %2891 = vmatpush2.bf16.msra.mxu1 %v6912_v9  ;;  %v6998_v40 = vld [vmem:[#allocation20 + $0x204] ss:$16 sps:$4 sm:$0xff]   ;;  %v6993_v9 = vld [vmem:[#allocation20] ss:$16 sps:$4 sm:$0xff]  }
 0x437   :  { %2851 = vmatprep.subr.bf16.mxu0 %v6917_v26  ;;  %2892 = vmatprep.subr.bf16.mxu1 %v6920_v30  ;;  %v6996_v26 = vld [vmem:[#allocation20 + $0x200] ss:$16 sps:$4 sm:$0xff]  }
 0x43a   :  { %2852 = vmatpush2.bf16.msra.mxu0 %v6915_v10  ;;  %2893 = vmatpush2.bf16.msra.mxu1 %v6918_v12 }
 0x43b   :  { %2853 = vmatprep.subr.bf16.mxu0 %v6923_v13  ;;  %2894 = vmatprep.subr.bf16.mxu1 %v6926_v59 }
 0x43e   :  { %2854 = vmatpush2.bf16.msra.mxu0 %v6921_v14  ;;  %2895 = vmatpush2.bf16.msra.mxu1 %v6924_v60 }
 0x43f   :  { %2855 = vmatprep.subr.bf16.mxu0 %v6929_v15  ;;  %2896 = vmatprep.subr.bf16.mxu1 %v6932_v16  ;;  %v2087_v16 = vld [vmem:[%s8414_s14] sm:$0xf] }
 0x442   :  { %2856 = vmatpush2.bf16.msra.mxu0 %v6927_v17  ;;  %2897 = vmatpush2.bf16.msra.mxu1 %v6930_v18  ;;  %v2096_v17 = vrot.slane %v2087_v16, %v8043_v43  ;;  %v2092_v18 = vrot.slane %v2087_v16, %v8040_v42 }
 0x443   :  { %2857 = vmatprep.subr.bf16.mxu0 %v6935_v4  ;;  %2898 = vmatprep.subr.bf16.mxu1 %v6938_v19 }
 0x446   :  { %2858 = vmatpush2.bf16.msra.mxu0 %v6933_v20  ;;  %2899 = vmatpush2.bf16.msra.mxu1 %v6936_v21 }
 0x447   :  { %2859 = vmatprep.subr.bf16.mxu0 %v6941_v22  ;;  %2900 = vmatprep.subr.bf16.mxu1 %v6944_v25  ;;  %v2100_v22 = vrot.slane %v2087_v16, %v8048_v47 }
 0x44a   :  { %2860 = vmatpush2.bf16.msra.mxu0 %v6939_v27  ;;  %2901 = vmatpush2.bf16.msra.mxu1 %v6942_v28  ;;  %v2104_v27 = vrot.slane %v2087_v16, %v8051_v51  ;;  %v8190_v28 = vmax.f32 %v8118_v50, 0.0  ;;  %v7011_v16 = vld [vmem:[#allocation20 + $0x1a0] ss:$16 sps:$4 sm:$0xff]  }
 0x44b   :  { %2861 = vmatprep.subr.bf16.mxu0 %v6947_v29  ;;  %2902 = vmatprep.subr.bf16.mxu1 %v6950_v31 }
 0x44c   :  { %v1534_v50 = vmul.f32 %v8190_v28, %v8190_v28 }
 0x44e   :  { %2862 = vmatpush2.bf16.msra.mxu0 %v6945_v32  ;;  %2903 = vmatpush2.bf16.msra.mxu1 %v6948_v33 }
 0x44f   :  { %3963 = vmatprep.subr.bf16.mxu0 %v6953_v34  ;;  %4004 = vmatprep.subr.bf16.mxu1 %v6956_v63  ;;  %v8198_v34 = vmax.f32 %v8122_v3, 0.0 }
 0x451   :  { %2864 = vmatmul.mubr.bf16.vlgmr.msra.gmra.mxu0 %v8172_v23  ;;  %2905 = vmatmul.mubr.bf16.vlgmr.msra.gmra.mxu1 %v8174_v24  ;;  %v6963_v23 = vld [vmem:[#allocation20 + $0xa0] ss:$16 sps:$4 sm:$0xff]  }
 0x452   :  { %3964 = vmatpush1.bf16.msra.mxu0 %v6951_v53  ;;  %4005 = vmatpush1.bf16.msra.mxu1 %v6954_v35  ;;  %v6966_v24 = vld [vmem:[#allocation20 + $0x2a0] ss:$16 sps:$4 sm:$0xff]   ;;  %v8195_v53 = vmax.f32 %v8116_v45, 0.0 }
 0x453   :  { %3965 = vmatprep.subr.bf16.mxu0 %v6959_v36  ;;  %4006 = vmatprep.subr.bf16.mxu1 %v6962_v5 }
 0x456   :  { %3966 = vmatpush1.bf16.msra.mxu0 %v6957_v56  ;;  %4007 = vmatpush1.bf16.msra.mxu1 %v6960_v37 }
 0x457   :  { %3967 = vmatprep.subr.bf16.mxu0 %v6965_v38  ;;  %4008 = vmatprep.subr.bf16.mxu1 %v6968_v39 }
 0x45a   :  { %3968 = vmatpush1.bf16.msra.mxu0 %v6963_v23  ;;  %4009 = vmatpush1.bf16.msra.mxu1 %v6966_v24  ;;  %v1533_v24 = vmul.f32 %v8195_v53, %v8195_v53 }
 0x45b   :  { %3969 = vmatprep.subr.bf16.mxu0 %v6971_v41  ;;  %4010 = vmatprep.subr.bf16.mxu1 %v6974_v44  ;;  %v8213_v41 = vmax.f32 %v8127_v11, 0.0 }
 0x45e   :  { %3970 = vmatpush1.bf16.msra.mxu0 %v6969_v46  ;;  %4011 = vmatpush1.bf16.msra.mxu1 %v6972_v48  ;;  %v1527_v48 = vadd.f32 %v8190_v28, %v8195_v53 }
 0x45f   :  { %3971 = vmatprep.subr.bf16.mxu0 %v6977_v49  ;;  %4012 = vmatprep.subr.bf16.mxu1 %v6980_v52  ;;  %v1535_v49 = vmul.f32 %v8198_v34, %v8198_v34 }
 0x462   :  { %3972 = vmatpush1.bf16.msra.mxu0 %v6975_v54  ;;  %4013 = vmatpush1.bf16.msra.mxu1 %v6978_v55 }
 0x463   :  { %3973 = vmatprep.subr.bf16.mxu0 %v6983_v57  ;;  %4014 = vmatprep.subr.bf16.mxu1 %v6986_v58  ;;  %v1537_v58 = vadd.f32 %v1534_v50, %v1533_v24  ;;  %v7038_v50 = vld [vmem:[#allocation20 + $0x320] ss:$16 sps:$4 sm:$0xff]   ;;  %v7052_v24 = vld [vmem:[#allocation20 + $0x2ec] ss:$16 sps:$4 sm:$0xff]  }
 0x466   :  { %3974 = vmatpush1.bf16.msra.mxu0 %v6981_v61  ;;  %4015 = vmatpush1.bf16.msra.mxu1 %v6984_v62 }
 0x467   :  { %3975 = vmatprep.subr.bf16.mxu0 %v6989_v1  ;;  %4016 = vmatprep.subr.bf16.mxu1 %v6992_v2  ;;  %v1528_v1 = vadd.f32 %v1527_v48, %v8198_v34 }
 0x46a   :  { %3976 = vmatpush1.bf16.msra.mxu0 %v6987_v0  ;;  %4017 = vmatpush1.bf16.msra.mxu1 %v6990_v6  ;;  %v1536_v0 = vmul.f32 %v8213_v41, %v8213_v41  ;;  %v1538_v6 = vadd.f32 %v1537_v58, %v1535_v49  ;;  %v6167_v58 = vld.sshfl [vmem:[%s8416_s16] sm:$0x33 pattern:$0x75316420] }
 0x46b   :  { %3977 = vmatprep.subr.bf16.mxu0 %v6995_v8  ;;  %4018 = vmatprep.subr.bf16.mxu1 %v6998_v40  ;;  %v1529_v8 = vadd.f32 %v1528_v1, %v8213_v41 }
 0x46c   :  { %v1539_v40 = vadd.f32 %v1538_v6, %v1536_v0  ;;  %v3018_v6 = vcombine.high %v6167_v58, %v6167_v58 }
 0x46e   :  { %3978 = vmatpush1.bf16.msra.mxu0 %v6993_v9  ;;  %4019 = vmatpush1.bf16.msra.mxu1 %v6996_v26  ;;  %v7001_v9 = vld [vmem:[#allocation20 + $0x1e4] ss:$16 sps:$4 sm:$0xff]  }
 0x46f   :  { %v7004_v26 = vld [vmem:[#allocation20 + $0x3e4] ss:$16 sps:$4 sm:$0xff]   ;;  %3979 = vmatprep.subr.bf16.mxu0 %v7001_v9 }
 0x470   :  { %4020 = vmatprep.subr.bf16.mxu1 %v7004_v26 }
 0x4d1   :  { %v2783_v30 = vpop.f32.mrf.mxu0  ;;  %v2824_v10 = vpop.f32.mrf.mxu1 }
 0x4d2   :  { %v2784_v19 = vadd.f32 %v2783_v30, %v2092_v18  ;;  %v6999_v30 = vld [vmem:[#allocation20 + $0x1e0] ss:$16 sps:$4 sm:$0xff]   ;;  %v7019_v18 = vld [vmem:[#allocation20 + $0x184] ss:$16 sps:$4 sm:$0xff]  }
 0x4d3   :  { %v2785_v12 = vpop.f32.mrf.mxu0  ;;  %v2826_v13 = vpop.f32.mrf.mxu1  ;;  %3980 = vmatpush2.bf16.msra.mxu0 %v6999_v30  ;;  %v3032_v30 = vrot.slane %v3018_v6, %v8079_v7 }
 0x4d4   :  { %v2786_v4 = vadd.f32 %v2785_v12, %v2096_v17  ;;  %v2825_v21 = vadd.f32 %v2824_v10, %v2784_v19  ;;  %v7002_v10 = vld [vmem:[#allocation20 + $0x3e0] ss:$16 sps:$4 sm:$0xff]   ;;  %v7007_v12 = vld [vmem:[#allocation20 + $0x1c4] ss:$16 sps:$4 sm:$0xff]  }
 0x4d5   :  { %v2787_v59 = vpop.f32.mrf.mxu0  ;;  %v2828_v14 = vpop.f32.mrf.mxu1  ;;  %4021 = vmatpush2.bf16.msra.mxu1 %v7002_v10  ;;  %3981 = vmatprep.subr.bf16.mxu0 %v7007_v12  ;;  %v7014_v17 = vld [vmem:[#allocation20 + $0x3a0] ss:$16 sps:$4 sm:$0xff]  }
 0x4d6   :  { %v2827_v20 = vadd.f32 %v2826_v13, %v2786_v4  ;;  %v8192_v32 = vmax.f32 %v2825_v21, 0.0  ;;  %v7010_v13 = vld [vmem:[#allocation20 + $0x3c4] ss:$16 sps:$4 sm:$0xff]   ;;  %v7005_v59 = vld [vmem:[#allocation20 + $0x1c0] ss:$16 sps:$4 sm:$0xff]  }
 0x4d7   :  { %v2788_v60 = vpop.f32.mrf.mxu0  ;;  %v2829_v15 = vpop.f32.mrf.mxu1  ;;  %v7008_v14 = vld [vmem:[#allocation20 + $0x3c0] ss:$16 sps:$4 sm:$0xff]   ;;  %4022 = vmatprep.subr.bf16.mxu1 %v7010_v13  ;;  %3982 = vmatpush2.bf16.msra.mxu0 %v7005_v59  ;;  %v7022_v4 = vld [vmem:[#allocation20 + $0x384] ss:$16 sps:$4 sm:$0xff]  }
 0x4d8   :  { %v8186_v25 = vmax.f32 %v2827_v20, 0.0  ;;  %v2923_v39 = vmul.f32 %v8192_v32, %v8192_v32  ;;  %v7013_v60 = vld [vmem:[#allocation20 + $0x1a4] ss:$16 sps:$4 sm:$0xff]   ;;  %v7017_v19 = vld [vmem:[#allocation20 + $0x180] ss:$16 sps:$4 sm:$0xff]  }
 0x4d9   :  { %4023 = vmatpush2.bf16.msra.mxu1 %v7008_v14  ;;  %v7016_v15 = vld [vmem:[#allocation20 + $0x3a4] ss:$16 sps:$4 sm:$0xff]   ;;  %3983 = vmatprep.subr.bf16.mxu0 %v7013_v60  ;;  %v7020_v20 = vld [vmem:[#allocation20 + $0x380] ss:$16 sps:$4 sm:$0xff]   ;;  %v3025_v14 = vrot.slane %v6167_v58, %v8079_v7  ;;  %v3034_v60 = vcombine.high %v3032_v30, %v3032_v30 }
 0x4da   :  { %v2924_v36 = vmul.f32 %v8186_v25, %v8186_v25  ;;  %v2917_v3 = vadd.f32 %v8186_v25, %v8192_v32  ;;  %4024 = vmatprep.subr.bf16.mxu1 %v7016_v15  ;;  %v7025_v21 = vld [vmem:[#allocation20 + $0x164] ss:$16 sps:$4 sm:$0xff]  }
 0x4db   :  { %3984 = vmatpush2.bf16.msra.mxu0 %v7011_v16  ;;  %v8245_v16 = vld.sshfl [vmem:[%s8457_s2] sm:$0x33 pattern:$0x75316420] }
 0x4dc   :  { %v2927_v57 = vadd.f32 %v2924_v36, %v2923_v39  ;;  %3985 = vmatprep.subr.bf16.mxu0 %v7019_v18  ;;  %v7037_v36 = vld [vmem:[#allocation20 + $0x124] ss:$16 sps:$4 sm:$0xff]   ;;  %v7041_v39 = vld [vmem:[#allocation20 + $0x100] ss:$16 sps:$4 sm:$0xff]  }
 0x4dd   :  { %4025 = vmatpush2.bf16.msra.mxu1 %v7014_v17 }
 0x4de   :  { %4026 = vmatprep.subr.bf16.mxu1 %v7022_v4  ;;  %v3033_v4 = vcombine.high %v3025_v14, %v3025_v14 }
 0x4df   :  { %3986 = vmatpush2.bf16.msra.mxu0 %v7017_v19  ;;  %v1577_v19 = vrot.slane %v8245_v16, %v8079_v7 }
 0x4e0   :  { %3987 = vmatprep.subr.bf16.mxu0 %v7025_v21  ;;  %v3057_v21 = vpack.i.b16 %v3034_v60, %v3034_v60 }
 0x4e1   :  { %4027 = vmatpush2.bf16.msra.mxu1 %v7020_v20  ;;  %v3043_v20 = vpack.i.b16 %v3032_v30, %v3032_v30 }
 0x511   :  { %v2865_v29 = vpop.f32.mrf.mxu0  ;;  %v2906_v31 = vpop.f32.mrf.mxu1 }
 0x512   :  { %v2866_v33 = vadd.f32 %v2865_v29, %v2100_v22  ;;  %v7028_v22 = vld [vmem:[#allocation20 + $0x364] ss:$16 sps:$4 sm:$0xff]   ;;  %v7026_v29 = vld [vmem:[#allocation20 + $0x360] ss:$16 sps:$4 sm:$0xff]  }
 0x513   :  { %v2867_v35 = vpop.f32.mrf.mxu0  ;;  %v2908_v63 = vpop.f32.mrf.mxu1  ;;  %4028 = vmatprep.subr.bf16.mxu1 %v7028_v22 }
 0x514   :  { %v2907_v5 = vadd.f32 %v2906_v31, %v2866_v33  ;;  %v2868_v56 = vadd.f32 %v2867_v35, %v2104_v27  ;;  %v7023_v27 = vld [vmem:[#allocation20 + $0x160] ss:$16 sps:$4 sm:$0xff]   ;;  %4029 = vmatpush2.bf16.msra.mxu1 %v7026_v29  ;;  %v7031_v31 = vld [vmem:[#allocation20 + $0x144] ss:$16 sps:$4 sm:$0xff]  }
 0x515   :  { %v2869_v37 = vpop.f32.mrf.mxu0  ;;  %v2910_v38 = vpop.f32.mrf.mxu1  ;;  %3988 = vmatpush2.bf16.msra.mxu0 %v7023_v27  ;;  %v7034_v33 = vld [vmem:[#allocation20 + $0x344] ss:$16 sps:$4 sm:$0xff]   ;;  %v7029_v35 = vld [vmem:[#allocation20 + $0x140] ss:$16 sps:$4 sm:$0xff]  }
 0x516   :  { %v8206_v45 = vmax.f32 %v2907_v5, 0.0  ;;  %v2909_v23 = vadd.f32 %v2908_v63, %v2868_v56  ;;  %v7032_v63 = vld [vmem:[#allocation20 + $0x340] ss:$16 sps:$4 sm:$0xff]   ;;  %3989 = vmatprep.subr.bf16.mxu0 %v7031_v31  ;;  %4030 = vmatprep.subr.bf16.mxu1 %v7034_v33  ;;  %v7040_v5 = vld [vmem:[#allocation20 + $0x324] ss:$16 sps:$4 sm:$0xff]   ;;  %v3036_v33 = vpack.i.b16 %v3025_v14, %v3025_v14 }
 0x517   :  { %v2870_v44 = vpop.f32.mrf.mxu0  ;;  %v2911_v46 = vpop.f32.mrf.mxu1  ;;  %v7035_v56 = vld [vmem:[#allocation20 + $0x120] ss:$16 sps:$4 sm:$0xff]   ;;  %v7043_v37 = vld [vmem:[#allocation20 + $0x104] ss:$16 sps:$4 sm:$0xff]  }
 0x518   :  { %v8219_v52 = vmax.f32 %v2909_v23, 0.0  ;;  %v2918_v54 = vadd.f32 %v2917_v3, %v8206_v45  ;;  %v2925_v55 = vmul.f32 %v8206_v45, %v8206_v45  ;;  %4031 = vmatpush2.bf16.msra.mxu1 %v7032_v63  ;;  %v7046_v38 = vld [vmem:[#allocation20 + $0x304] ss:$16 sps:$4 sm:$0xff]   ;;  %v7044_v23 = vld [vmem:[#allocation20 + $0x300] ss:$16 sps:$4 sm:$0xff]  }
 0x519   :  { %3990 = vmatpush2.bf16.msra.mxu0 %v7029_v35  ;;  %4032 = vmatprep.subr.bf16.mxu1 %v7040_v5  ;;  %v7049_v3 = vld [vmem:[#allocation20 + $0xec] ss:$16 sps:$4 sm:$0xff]   ;;  %v8249_v29 = vld.sshfl [vmem:[#allocation11] sm:$0x33 pattern:$0x75316420] }
 0x51a   :  { %v2919_v11 = vadd.f32 %v2918_v54, %v8219_v52  ;;  %v2926_v61 = vmul.f32 %v8219_v52, %v8219_v52  ;;  %v2928_v62 = vadd.f32 %v2927_v57, %v2925_v55  ;;  %3991 = vmatprep.subr.bf16.mxu0 %v7037_v36  ;;  %v6166_v55 = vld.sshfl [vmem:[#allocation17] sm:$0x33 pattern:$0x75316420]  ;;  %v1635_v35 = vrot.slane %v8249_v29, %v8079_v7 }
 0x51b   :  { %v2960_v1 = vcombine.high %v6166_v55, %v6166_v55  ;;  %v2967_v10 = vrot.slane %v6166_v55, %v8079_v7 }
 0x51c   :  { %2920 = vadd.xlane.f32.xlu0 %v2919_v11  ;;  %v2929_v2 = vadd.f32 %v2928_v62, %v2926_v61  ;;  %4033 = vmatpush2.bf16.msra.mxu1 %v7038_v50 }
 0x51d   :  { %3992 = vmatpush2.bf16.msra.mxu0 %v7035_v56  ;;  %4034 = vmatprep.subr.bf16.mxu1 %v7046_v38  ;;  %v2974_v26 = vrot.slane %v2960_v1, %v8079_v7  ;;  %v2975_v15 = vcombine.high %v2967_v10, %v2967_v10  ;;  %v2978_v22 = vpack.i.b16 %v2967_v10, %v2967_v10 }
 0x51e   :  { %2930 = vadd.xlane.f32.xlu1 %v2929_v2  ;;  %3993 = vmatprep.subr.bf16.mxu0 %v7043_v37  ;;  %v3050_v37 = vpack.i.b16 %v3033_v4, %v3033_v4  ;;  %v1585_v38 = vcombine.high %v1577_v19, %v1577_v19 }
 0x51f   :  { %v2976_v59 = vcombine.high %v2974_v26, %v2974_v26  ;;  %v2985_v17 = vpack.i.b16 %v2974_v26, %v2974_v26  ;;  %v2992_v27 = vpack.i.b16 %v2975_v15, %v2975_v15  ;;  %v7047_v15 = vld [vmem:[#allocation20 + $0xe8] ss:$16 sps:$4 sm:$0xff]  }
 0x520   :  { %1530 = vadd.xlane.f32.xlu0 %v1529_v8  ;;  %4035 = vmatpush2.bf16.msra.mxu1 %v7044_v23  ;;  %v2983_v23 = vrot.slane %v2978_v22, %v8040_v42  ;;  %v3055_v58 = vrot.slane %v3050_v37, %v8040_v42  ;;  %v7055_v22 = vld [vmem:[#allocation20 + $0xcc] ss:$16 sps:$4 sm:$0xff]  }
 0x521   :  { %3994 = vmatpush2.bf16.msra.mxu0 %v7041_v39  ;;  %4086 = vmatprep.subr.bf16.mxu1 %v7052_v24  ;;  %v2999_v18 = vpack.i.b16 %v2976_v59, %v2976_v59  ;;  %v2990_v56 = vrot.slane %v2985_v17, %v8040_v42  ;;  %v3048_v39 = vrot.slane %v3043_v20, %v8040_v42  ;;  %v7050_v17 = vld [vmem:[#allocation20 + $0x2e8] ss:$16 sps:$4 sm:$0xff]  }
 0x522   :  { %1540 = vadd.xlane.f32.xlu1 %v1539_v40  ;;  %4045 = vmatprep.subr.bf16.mxu0 %v7049_v3  ;;  %v2997_v3 = vrot.slane %v2992_v27, %v8040_v42  ;;  %v7058_v27 = vld [vmem:[#allocation20 + $0x2cc] ss:$16 sps:$4 sm:$0xff]  }
 0x523   :  { %v3004_v50 = vrot.slane %v2999_v18, %v8040_v42 }
 0x5a5   :  { %v2921_v44 = vpop.xlane.xlu0 %2920 }
 0x5a6   :  { %v2922_v46 = vmul.f32 0.001953125, %v2921_v44  ;;  %v1588_v44 = vpack.i.b16 %v1577_v19, %v1577_v19 }
 0x5a7   :  { %v2931_v48 = vpop.xlane.xlu1 %2930 }
 0x5a8   :  { %v2932_v49 = vmul.f32 0.001953125, %v2931_v48  ;;  %v2933_v54 = vmul.f32 %v2922_v46, %v2922_v46  ;;  %v2938_v31 = vsub.f32 %v8192_v32, %v2922_v46  ;;  %v2940_v63 = vsub.f32 %v8206_v45, %v2922_v46 }
 0x5a9   :  { %v1531_v57 = vpop.xlane.xlu0 %1530  ;;  %v2939_v36 = vsub.f32 %v8186_v25, %v2922_v46  ;;  %v2941_v5 = vsub.f32 %v8219_v52, %v2922_v46  ;;  %v3062_v32 = vrot.slane %v3057_v21, %v8040_v42  ;;  %v3041_v25 = vrot.slane %v3036_v33, %v8040_v42 }
 0x5aa   :  { %v2934_v11 = vsub.f32 %v2932_v49, %v2933_v54  ;;  %v8234_v61 = vmul.f32 0.001953125, %v1531_v57  ;;  %v2942_v45 = vpack.c.bf16 %v2938_v31, %v2938_v31  ;;  %v1643_v52 = vcombine.high %v1635_v35, %v1635_v35 }
 0x5ab   :  { %v1541_v62 = vpop.xlane.xlu1 %1540  ;;  %v2943_v48 = vpack.c.bf16 %v2939_v36, %v2939_v36  ;;  %v2945_v49 = vpack.c.bf16 %v2941_v5, %v2941_v5  ;;  %v2944_v54 = vpack.c.bf16 %v2940_v63, %v2940_v63  ;;  %v1593_v6 = vrot.slane %v1588_v44, %v8040_v42  ;;  %v7056_v63 = vld [vmem:[#allocation20 + $0x2c8] ss:$16 sps:$4 sm:$0xff]   ;;  %v7061_v5 = vld [vmem:[#allocation20 + $0xac] ss:$16 sps:$4 sm:$0xff]  }
 0x5ac   :  { %v2935_v2 = vmax.f32 %v2934_v11, 0.0  ;;  %v1542_v0 = vmul.f32 0.001953125, %v1541_v62  ;;  %v1543_v8 = vmul.f32 %v8234_v61, %v8234_v61  ;;  %v1548_v55 = vsub.f32 %v8195_v53, %v8234_v61  ;;  %v7071_v44 = vld [vmem:[#allocation20 + $0x68] ss:$16 sps:$4 sm:$0xff]  }
 0x5ad   :  { %v1550_v57 = vsub.f32 %v8198_v34, %v8234_v61  ;;  %v1602_v11 = vpack.i.b16 %v1585_v38, %v1585_v38  ;;  %v7059_v38 = vld [vmem:[#allocation20 + $0xa8] ss:$16 sps:$4 sm:$0xff]  }
 0x5ae   :  { %v2936_v40 = vadd.f32 1e-05, %v2935_v2  ;;  %v1544_v9 = vsub.f32 %v1542_v0, %v1543_v8  ;;  %v1646_v8 = vpack.i.b16 %v1635_v35, %v1635_v35  ;;  %v7053_v35 = vld [vmem:[#allocation20 + $0xc8] ss:$16 sps:$4 sm:$0xff]  }
 0x5af   :  { %v1554_v34 = vpack.c.bf16 %v1550_v57, %v1550_v57  ;;  %v1607_v59 = vrot.slane %v1602_v11, %v8040_v42  ;;  %v7088_v57 = vld [vmem:[#allocation20 + $0x22c] ss:$16 sps:$4 sm:$0xff]   ;;  %v7086_v11 = vld [vmem:[#allocation20 + $0x228] ss:$16 sps:$4 sm:$0xff]  }
 0x5b0   :  { %7451 = vrsqrt.f32 %v2936_v40  ;;  %v1545_v12 = vmax.f32 %v1544_v9, 0.0  ;;  %v1660_v40 = vpack.i.b16 %v1643_v52, %v1643_v52  ;;  %v1651_v20 = vrot.slane %v1646_v8, %v8040_v42  ;;  %v7074_v52 = vld [vmem:[#allocation20 + $0x268] ss:$16 sps:$4 sm:$0xff]   ;;  %v7100_v8 = vld [vmem:[#allocation20 + $0x3ec] ss:$16 sps:$4 sm:$0xff]  }
 0x5b2   :  { %v1546_v13 = vadd.f32 1e-05, %v1545_v12  ;;  %v1665_v31 = vrot.slane %v1660_v40, %v8040_v42  ;;  %v7095_v40 = vld [vmem:[#allocation20 + $0x1e8] ss:$16 sps:$4 sm:$0xff]  }
 0x5b4   :  { %7453 = vrsqrt.f32 %v1546_v13  ;;  %v1552_v13 = vpack.c.bf16 %v1548_v55, %v1548_v55  ;;  %v7085_v55 = vld [vmem:[#allocation20 + $0x2c] ss:$16 sps:$4 sm:$0xff]  }
 0x5bd   :  { %v7452_v24 = vpop.eup %7451 }
 0x5be   :  { %v2946_v46 = vpack.c.bf16 %v7452_v24, %v7452_v24  ;;  %v7068_v24 = vld [vmem:[#allocation20 + $0x288] ss:$16 sps:$4 sm:$0xff]  }
 0x5c0   :  { %v2948_v62 = vmul.bf16 %v2946_v46, %v2943_v48  ;;  %v2950_v1 = vmul.bf16 %v2946_v46, %v2945_v49  ;;  %v2947_v2 = vmul.bf16 %v2946_v46, %v2942_v45  ;;  %v2949_v0 = vmul.bf16 %v2946_v46, %v2944_v54  ;;  %v7073_v45 = vld [vmem:[#allocation20 + $0x6c] ss:$16 sps:$4 sm:$0xff]   ;;  %v7077_v49 = vld [vmem:[#allocation20 + $0x48] ss:$16 sps:$4 sm:$0xff]  }
 0x5c1   :  { %v7454_v9 = vpop.eup %7453  ;;  %v7079_v46 = vld [vmem:[#allocation20 + $0x4c] ss:$16 sps:$4 sm:$0xff]   ;;  %v7080_v54 = vld [vmem:[#allocation20 + $0x248] ss:$16 sps:$4 sm:$0xff]  }
 0x5c2   :  { %v3006_v26 = vmul.bf16 %v2990_v56, %v2948_v62  ;;  %v3008_v30 = vmul.bf16 %v3004_v50, %v2950_v1  ;;  %v3005_v10 = vmul.bf16 %v2983_v23, %v2947_v2  ;;  %v3007_v12 = vmul.bf16 %v2997_v3, %v2949_v0  ;;  %v7064_v56 = vld [vmem:[#allocation20 + $0x2ac] ss:$16 sps:$4 sm:$0xff]   ;;  %v7065_v3 = vld [vmem:[#allocation20 + $0x88] ss:$16 sps:$4 sm:$0xff]  }
 0x5c3   :  { %v8270_v53 = vpack.c.bf16 %v7454_v9, %v7454_v9  ;;  %v7070_v23 = vld [vmem:[#allocation20 + $0x28c] ss:$16 sps:$4 sm:$0xff]   ;;  %v7089_v2 = vld [vmem:[#allocation20 + $0x8] ss:$16 sps:$4 sm:$0xff]  }
 0x5c4   :  { %v3064_v14 = vadd.bf16 %v3048_v39, %v3006_v26  ;;  %v3066_v60 = vadd.bf16 %v3062_v32, %v3008_v30  ;;  %v8273_v18 = vadd.bf16 %v3041_v25, %v3005_v10  ;;  %v8275_v4 = vadd.bf16 %v3055_v58, %v3007_v12  ;;  %v7062_v39 = vld [vmem:[#allocation20 + $0x2a8] ss:$16 sps:$4 sm:$0xff]   ;;  %v7067_v32 = vld [vmem:[#allocation20 + $0x8c] ss:$16 sps:$4 sm:$0xff]  }
 0x5c5   :  { %v1557_v19 = vmul.bf16 %v8270_v53, %v1552_v13  ;;  %v1559_v21 = vmul.bf16 %v8270_v53, %v1554_v34  ;;  %v7076_v25 = vld [vmem:[#allocation20 + $0x26c] ss:$16 sps:$4 sm:$0xff]   ;;  %v7083_v58 = vld [vmem:[#allocation20 + $0x28] ss:$16 sps:$4 sm:$0xff]  }
 0x5c6   :  { %3995 = vmatprep.mubr.bf16.mxu0 %v3064_v14  ;;  %4036 = vmatprep.mubr.bf16.mxu1 %v3066_v60  ;;  %v7082_v48 = vld [vmem:[#allocation20 + $0x24c] ss:$16 sps:$4 sm:$0xff]   ;;  %v7092_v0 = vld [vmem:[#allocation20 + $0x208] ss:$16 sps:$4 sm:$0xff]  }
 0x5c7   :  { %3996 = vmatmul.mubr.bf16.vlgmr.msra.gmra.mxu0 %v8273_v18  ;;  %4037 = vmatmul.mubr.bf16.vlgmr.msra.gmra.mxu1 %v8275_v4  ;;  %v1615_v33 = vmul.bf16 %v1593_v6, %v1557_v19  ;;  %v1617_v36 = vmul.bf16 %v1607_v59, %v1559_v21  ;;  %v7091_v62 = vld [vmem:[#allocation20 + $0xc] ss:$16 sps:$4 sm:$0xff]   ;;  %v7098_v9 = vld [vmem:[#allocation20 + $0x3e8] ss:$16 sps:$4 sm:$0xff]  }
 0x5c8   :  { %4046 = vmatpush1.bf16.msra.mxu0 %v7047_v15  ;;  %4087 = vmatpush1.bf16.msra.mxu1 %v7050_v17  ;;  %v7094_v1 = vld [vmem:[#allocation20 + $0x20c] ss:$16 sps:$4 sm:$0xff]   ;;  %v7101_v10 = vld [vmem:[#allocation20 + $0x1c8] ss:$16 sps:$4 sm:$0xff]   ;;  %v1570_v17 = vcombine.high %v8245_v16, %v8245_v16 }
 0x5c9   :  { %4077 = vmatprep.mubr.bf16.mxu0 %v3064_v14  ;;  %4118 = vmatprep.mubr.bf16.mxu1 %v3066_v60  ;;  %v8283_v50 = vadd.bf16 %v1651_v20, %v1615_v33  ;;  %v8285_v37 = vadd.bf16 %v1665_v31, %v1617_v36  ;;  %v7097_v6 = vld [vmem:[#allocation20 + $0x1ec] ss:$16 sps:$4 sm:$0xff]   ;;  %v7104_v12 = vld [vmem:[#allocation20 + $0x3c8] ss:$16 sps:$4 sm:$0xff]   ;;  %v1628_v31 = vcombine.high %v8249_v29, %v8249_v29 }
 0x5ca   :  { %4047 = vmatprep.subr.bf16.mxu0 %v7055_v22  ;;  %4088 = vmatprep.subr.bf16.mxu1 %v7058_v27  ;;  %v7103_v26 = vld [vmem:[#allocation20 + $0x1cc] ss:$16 sps:$4 sm:$0xff]   ;;  %v7107_v59 = vld [vmem:[#allocation20 + $0x1a8] ss:$16 sps:$4 sm:$0xff]   ;;  %v1584_v27 = vrot.slane %v1570_v17, %v8079_v7  ;;  %v7164_v17 = vld [vmem:[#allocation19 + $0x280] ss:$16 sps:$4 sm:$0xff]  }
 0x5cb   :  { %v7106_v30 = vld [vmem:[#allocation20 + $0x3cc] ss:$16 sps:$4 sm:$0xff]   ;;  %v7110_v14 = vld [vmem:[#allocation20 + $0x3a8] ss:$16 sps:$4 sm:$0xff]   ;;  %v1642_v36 = vrot.slane %v1628_v31, %v8079_v7  ;;  %v7178_v31 = vld [vmem:[#allocation19 + $0x244] ss:$16 sps:$4 sm:$0xff]  }
 0x5cc   :  { %4048 = vmatpush1.bf16.msra.mxu0 %v7053_v35  ;;  %4089 = vmatpush1.bf16.msra.mxu1 %v7056_v63  ;;  %v7109_v13 = vld [vmem:[#allocation20 + $0x1ac] ss:$16 sps:$4 sm:$0xff]   ;;  %v7113_v19 = vld [vmem:[#allocation20 + $0x188] ss:$16 sps:$4 sm:$0xff]  }
 0x5cd   :  { %4049 = vmatprep.subr.bf16.mxu0 %v7061_v5  ;;  %4090 = vmatprep.subr.bf16.mxu1 %v7064_v56  ;;  %v7112_v34 = vld [vmem:[#allocation20 + $0x3ac] ss:$16 sps:$4 sm:$0xff]   ;;  %v7116_v20 = vld [vmem:[#allocation20 + $0x388] ss:$16 sps:$4 sm:$0xff]   ;;  %v1586_v5 = vcombine.high %v1584_v27, %v1584_v27 }
 0x5ce   :  { %v7115_v60 = vld [vmem:[#allocation20 + $0x18c] ss:$16 sps:$4 sm:$0xff]   ;;  %v7119_v33 = vld [vmem:[#allocation20 + $0x168] ss:$16 sps:$4 sm:$0xff]  }
 0x5cf   :  { %v7118_v15 = vld [vmem:[#allocation20 + $0x38c] ss:$16 sps:$4 sm:$0xff]   ;;  %v7122_v35 = vld [vmem:[#allocation20 + $0x368] ss:$16 sps:$4 sm:$0xff]  }
 0x5d0   :  { %4050 = vmatpush1.bf16.msra.mxu0 %v7059_v38  ;;  %4091 = vmatpush1.bf16.msra.mxu1 %v7062_v39  ;;  %v7121_v21 = vld [vmem:[#allocation20 + $0x16c] ss:$16 sps:$4 sm:$0xff]   ;;  %v7125_v56 = vld [vmem:[#allocation20 + $0x148] ss:$16 sps:$4 sm:$0xff]   ;;  %v1549_v39 = vsub.f32 %v8190_v28, %v8234_v61 }
 0x5d1   :  { %4051 = vmatprep.subr.bf16.mxu0 %v7067_v32  ;;  %4092 = vmatprep.subr.bf16.mxu1 %v7070_v23  ;;  %v7124_v22 = vld [vmem:[#allocation20 + $0x36c] ss:$16 sps:$4 sm:$0xff]   ;;  %v7128_v38 = vld [vmem:[#allocation20 + $0x348] ss:$16 sps:$4 sm:$0xff]   ;;  %v1551_v23 = vsub.f32 %v8213_v41, %v8234_v61 }
 0x5d2   :  { %v7127_v16 = vld [vmem:[#allocation20 + $0x14c] ss:$16 sps:$4 sm:$0xff]  }
 0x5d3   :  { %v7130_v63 = vld [vmem:[#allocation20 + $0x34c] ss:$16 sps:$4 sm:$0xff]   ;;  %v1555_v28 = vpack.c.bf16 %v1551_v23, %v1551_v23  ;;  %v7196_v23 = vld [vmem:[#allocation19 + $0x3e4] ss:$16 sps:$4 sm:$0xff]  }
 0x5d4   :  { %4052 = vmatpush1.bf16.msra.mxu0 %v7065_v3  ;;  %4093 = vmatpush1.bf16.msra.mxu1 %v7068_v24  ;;  %v7133_v29 = vld [vmem:[#allocation20 + $0x12c] ss:$16 sps:$4 sm:$0xff]   ;;  %v1595_v3 = vpack.i.b16 %v1584_v27, %v1584_v27  ;;  %v1609_v24 = vpack.i.b16 %v1586_v5, %v1586_v5  ;;  %v7175_v27 = vld [vmem:[#allocation19 + $0x44] ss:$16 sps:$4 sm:$0xff]   ;;  %v7182_v5 = vld [vmem:[#allocation19 + $0x220] ss:$16 sps:$4 sm:$0xff]  }
 0x5d5   :  { %4053 = vmatprep.subr.bf16.mxu0 %v7073_v45  ;;  %4094 = vmatprep.subr.bf16.mxu1 %v7076_v25  ;;  %v7136_v32 = vld [vmem:[#allocation20 + $0x32c] ss:$16 sps:$4 sm:$0xff]   ;;  %v1644_v45 = vcombine.high %v1642_v36, %v1642_v36  ;;  %v7131_v25 = vld [vmem:[#allocation20 + $0x128] ss:$16 sps:$4 sm:$0xff]   ;;  %v1560_v41 = vmul.bf16 %v8270_v53, %v1555_v28  ;;  %v7203_v28 = vld [vmem:[#allocation19 + $0x1a0] ss:$16 sps:$4 sm:$0xff]  }
 0x5d6   :  { %v1614_v61 = vrot.slane %v1609_v24, %v8040_v42  ;;  %v7194_v24 = vld [vmem:[#allocation19 + $0x3e0] ss:$16 sps:$4 sm:$0xff]  }
 0x5d8   :  { %4054 = vmatpush1.bf16.msra.mxu0 %v7071_v44  ;;  %4095 = vmatpush1.bf16.msra.mxu1 %v7074_v52  ;;  %v7134_v44 = vld [vmem:[#allocation20 + $0x328] ss:$16 sps:$4 sm:$0xff]   ;;  %v1553_v52 = vpack.c.bf16 %v1549_v39, %v1549_v39  ;;  %v7185_v39 = vld [vmem:[#allocation19] ss:$16 sps:$4 sm:$0xff]  }
 0x5d9   :  { %4055 = vmatprep.subr.bf16.mxu0 %v7079_v46  ;;  %4096 = vmatprep.subr.bf16.mxu1 %v7082_v48  ;;  %v7139_v46 = vld [vmem:[#allocation20 + $0x10c] ss:$16 sps:$4 sm:$0xff]  }
 0x5da   :  { %v7142_v48 = vld [vmem:[#allocation20 + $0x30c] ss:$16 sps:$4 sm:$0xff]  }
 0x5dc   :  { %4056 = vmatpush1.bf16.msra.mxu0 %v7077_v49  ;;  %4097 = vmatpush1.bf16.msra.mxu1 %v7080_v54  ;;  %v1558_v49 = vmul.bf16 %v8270_v53, %v1553_v52  ;;  %v1600_v54 = vrot.slane %v1595_v3, %v8040_v42  ;;  %v7143_v53 = vld [vmem:[#allocation19 + $0xe0] ss:$16 sps:$4 sm:$0xff]  }
 0x5dd   :  { %4057 = vmatprep.subr.bf16.mxu0 %v7085_v55  ;;  %4098 = vmatprep.subr.bf16.mxu1 %v7088_v57  ;;  %v1653_v55 = vpack.i.b16 %v1642_v36, %v1642_v36  ;;  %v1667_v57 = vpack.i.b16 %v1644_v45, %v1644_v45  ;;  %v7179_v36 = vld [vmem:[#allocation19 + $0x20] ss:$16 sps:$4 sm:$0xff]   ;;  %v7199_v45 = vld [vmem:[#allocation19 + $0x1c4] ss:$16 sps:$4 sm:$0xff]  }
 0x5de   :  { %v7191_v3 = vld [vmem:[#allocation19 + $0x1e0] ss:$16 sps:$4 sm:$0xff]  }
 0x5df   :  { %v7200_v52 = vld [vmem:[#allocation19 + $0x3c0] ss:$16 sps:$4 sm:$0xff]  }
 0x5e0   :  { %4058 = vmatpush1.bf16.msra.mxu0 %v7083_v58  ;;  %4099 = vmatpush1.bf16.msra.mxu1 %v7086_v11  ;;  %v7137_v58 = vld [vmem:[#allocation20 + $0x108] ss:$16 sps:$4 sm:$0xff]  }
 0x5e1   :  { %4059 = vmatprep.subr.bf16.mxu0 %v7091_v62  ;;  %4100 = vmatprep.subr.bf16.mxu1 %v7094_v1  ;;  %v7140_v11 = vld [vmem:[#allocation20 + $0x308] ss:$16 sps:$4 sm:$0xff]   ;;  %v7145_v62 = vld [vmem:[#allocation19 + $0xe4] ss:$16 sps:$4 sm:$0xff]  }
 0x5e2   :  { %v7148_v1 = vld [vmem:[#allocation19 + $0x2e4] ss:$16 sps:$4 sm:$0xff]  }
 0x5e4   :  { %4060 = vmatpush1.bf16.msra.mxu0 %v7089_v2  ;;  %4101 = vmatpush1.bf16.msra.mxu1 %v7092_v0  ;;  %v1616_v2 = vmul.bf16 %v1600_v54, %v1558_v49  ;;  %v1658_v0 = vrot.slane %v1653_v55, %v8040_v42  ;;  %v7206_v49 = vld [vmem:[#allocation19 + $0x3a0] ss:$16 sps:$4 sm:$0xff]   ;;  %v7211_v54 = vld [vmem:[#allocation19 + $0x184] ss:$16 sps:$4 sm:$0xff]  }
 0x5e5   :  { %4061 = vmatprep.subr.bf16.mxu0 %v7097_v6  ;;  %4102 = vmatprep.subr.bf16.mxu1 %v7100_v8  ;;  %v1618_v6 = vmul.bf16 %v1614_v61, %v1560_v41  ;;  %v1672_v8 = vrot.slane %v1667_v57, %v8040_v42  ;;  %v7214_v55 = vld [vmem:[#allocation19 + $0x384] ss:$16 sps:$4 sm:$0xff]   ;;  %v7209_v41 = vld [vmem:[#allocation19 + $0x180] ss:$16 sps:$4 sm:$0xff]  }
 0x5e6   :  { %v7212_v61 = vld [vmem:[#allocation19 + $0x380] ss:$16 sps:$4 sm:$0xff]   ;;  %v7217_v57 = vld [vmem:[#allocation19 + $0x164] ss:$16 sps:$4 sm:$0xff]  }
 0x5e8   :  { %4062 = vmatpush2.bf16.msra.mxu0 %v7095_v40  ;;  %4103 = vmatpush2.bf16.msra.mxu1 %v7098_v9  ;;  %v7146_v40 = vld [vmem:[#allocation19 + $0x2e0] ss:$16 sps:$4 sm:$0xff]   ;;  %v8303_v9 = vadd.bf16 %v1658_v0, %v1616_v2  ;;  %v7226_v2 = vld [vmem:[#allocation19 + $0x344] ss:$16 sps:$4 sm:$0xff]  }
 0x5e9   :  { %4063 = vmatprep.subr.bf16.mxu0 %v7103_v26  ;;  %4104 = vmatprep.subr.bf16.mxu1 %v7106_v30  ;;  %v7151_v26 = vld [vmem:[#allocation19 + $0xc4] ss:$16 sps:$4 sm:$0xff]   ;;  %v7221_v0 = vld [vmem:[#allocation19 + $0x140] ss:$16 sps:$4 sm:$0xff]  }
 0x5ea   :  { %v7154_v30 = vld [vmem:[#allocation19 + $0x2c4] ss:$16 sps:$4 sm:$0xff]  }
 0x5ec   :  { %4064 = vmatpush2.bf16.msra.mxu0 %v7101_v10  ;;  %4105 = vmatpush2.bf16.msra.mxu1 %v7104_v12  ;;  %v8307_v10 = vadd.bf16 %v1672_v8, %v1618_v6  ;;  %v7149_v12 = vld [vmem:[#allocation19 + $0xc0] ss:$16 sps:$4 sm:$0xff]   ;;  %v7229_v8 = vld [vmem:[#allocation19 + $0x124] ss:$16 sps:$4 sm:$0xff]  }
 0x5ed   :  { %4065 = vmatprep.subr.bf16.mxu0 %v7109_v13  ;;  %4106 = vmatprep.subr.bf16.mxu1 %v7112_v34  ;;  %v7152_v13 = vld [vmem:[#allocation19 + $0x2c0] ss:$16 sps:$4 sm:$0xff]   ;;  %v7157_v34 = vld [vmem:[#allocation19 + $0xa4] ss:$16 sps:$4 sm:$0xff]  }
 0x5ee   :  { %v7224_v6 = vld [vmem:[#allocation19 + $0x340] ss:$16 sps:$4 sm:$0xff]  }
 0x5f0   :  { %4066 = vmatpush2.bf16.msra.mxu0 %v7107_v59  ;;  %4107 = vmatpush2.bf16.msra.mxu1 %v7110_v14  ;;  %v7160_v59 = vld [vmem:[#allocation19 + $0x2a4] ss:$16 sps:$4 sm:$0xff]   ;;  %v7155_v14 = vld [vmem:[#allocation19 + $0xa0] ss:$16 sps:$4 sm:$0xff]  }
 0x5f1   :  { %4067 = vmatprep.subr.bf16.mxu0 %v7115_v60  ;;  %4108 = vmatprep.subr.bf16.mxu1 %v7118_v15  ;;  %v7166_v60 = vld [vmem:[#allocation19 + $0x284] ss:$16 sps:$4 sm:$0xff]   ;;  %v7161_v15 = vld [vmem:[#allocation19 + $0x80] ss:$16 sps:$4 sm:$0xff]  }
 0x5f4   :  { %4068 = vmatpush2.bf16.msra.mxu0 %v7113_v19  ;;  %4109 = vmatpush2.bf16.msra.mxu1 %v7116_v20  ;;  %v7169_v19 = vld [vmem:[#allocation19 + $0x64] ss:$16 sps:$4 sm:$0xff]  }
 0x5f5   :  { %4069 = vmatprep.subr.bf16.mxu0 %v7121_v21  ;;  %4110 = vmatprep.subr.bf16.mxu1 %v7124_v22  ;;  %v7172_v20 = vld [vmem:[#allocation19 + $0x264] ss:$16 sps:$4 sm:$0xff]   ;;  %v7167_v21 = vld [vmem:[#allocation19 + $0x60] ss:$16 sps:$4 sm:$0xff]  }
 0x5f6   :  { %v7170_v22 = vld [vmem:[#allocation19 + $0x260] ss:$16 sps:$4 sm:$0xff]  }
 0x5f8   :  { %4070 = vmatpush2.bf16.msra.mxu0 %v7119_v33  ;;  %4111 = vmatpush2.bf16.msra.mxu1 %v7122_v35  ;;  %v7173_v33 = vld [vmem:[#allocation19 + $0x40] ss:$16 sps:$4 sm:$0xff]  }
 0x5f9   :  { %4071 = vmatprep.subr.bf16.mxu0 %v7127_v16  ;;  %4112 = vmatprep.subr.bf16.mxu1 %v7130_v63  ;;  %v7176_v35 = vld [vmem:[#allocation19 + $0x240] ss:$16 sps:$4 sm:$0xff]   ;;  %v7181_v16 = vld [vmem:[#allocation19 + $0x24] ss:$16 sps:$4 sm:$0xff]  }
 0x5fa   :  { %v7184_v63 = vld [vmem:[#allocation19 + $0x224] ss:$16 sps:$4 sm:$0xff]  }
 0x5fc   :  { %4072 = vmatpush2.bf16.msra.mxu0 %v7125_v56  ;;  %4113 = vmatpush2.bf16.msra.mxu1 %v7128_v38  ;;  %v7187_v56 = vld [vmem:[#allocation19 + $0x4] ss:$16 sps:$4 sm:$0xff]  }
 0x5fd   :  { %4073 = vmatprep.subr.bf16.mxu0 %v7133_v29  ;;  %4114 = vmatprep.subr.bf16.mxu1 %v7136_v32  ;;  %v7190_v38 = vld [vmem:[#allocation19 + $0x204] ss:$16 sps:$4 sm:$0xff]   ;;  %v7188_v29 = vld [vmem:[#allocation19 + $0x200] ss:$16 sps:$4 sm:$0xff]  }
 0x5fe   :  { %v7193_v32 = vld [vmem:[#allocation19 + $0x1e4] ss:$16 sps:$4 sm:$0xff]  }
 0x600   :  { %4074 = vmatpush2.bf16.msra.mxu0 %v7131_v25  ;;  %4115 = vmatpush2.bf16.msra.mxu1 %v7134_v44  ;;  %v7202_v25 = vld [vmem:[#allocation19 + $0x3c4] ss:$16 sps:$4 sm:$0xff]   ;;  %v7197_v44 = vld [vmem:[#allocation19 + $0x1c0] ss:$16 sps:$4 sm:$0xff]  }
 0x601   :  { %4075 = vmatprep.subr.bf16.mxu0 %v7139_v46  ;;  %4116 = vmatprep.subr.bf16.mxu1 %v7142_v48  ;;  %v7205_v46 = vld [vmem:[#allocation19 + $0x1a4] ss:$16 sps:$4 sm:$0xff]  }
 0x602   :  { %v7208_v48 = vld [vmem:[#allocation19 + $0x3a4] ss:$16 sps:$4 sm:$0xff]  }
 0x604   :  { %4076 = vmatpush2.bf16.msra.mxu0 %v7137_v58  ;;  %4117 = vmatpush2.bf16.msra.mxu1 %v7140_v11  ;;  %v7220_v58 = vld [vmem:[#allocation19 + $0x364] ss:$16 sps:$4 sm:$0xff]   ;;  %v7215_v11 = vld [vmem:[#allocation19 + $0x160] ss:$16 sps:$4 sm:$0xff]  }
 0x605   :  { %4767 = vmatprep.subr.bf16.mxu0 %v7145_v62  ;;  %4808 = vmatprep.subr.bf16.mxu1 %v7148_v1  ;;  %v7218_v62 = vld [vmem:[#allocation19 + $0x360] ss:$16 sps:$4 sm:$0xff]   ;;  %v7223_v1 = vld [vmem:[#allocation19 + $0x144] ss:$16 sps:$4 sm:$0xff]  }
 0x607   :  { %4078 = vmatmul.mubr.bf16.vlgmr.msra.gmra.mxu0 %v8273_v18  ;;  %4119 = vmatmul.mubr.bf16.vlgmr.msra.gmra.mxu1 %v8275_v4  ;;  %v7158_v18 = vld [vmem:[#allocation19 + $0x2a0] ss:$16 sps:$4 sm:$0xff]   ;;  %v7163_v4 = vld [vmem:[#allocation19 + $0x84] ss:$16 sps:$4 sm:$0xff]  }
 0x608   :  { %4768 = vmatpush1.bf16.msra.mxu0 %v7143_v53  ;;  %4799 = vmatprep.mubr.bf16.mxu0 %v8303_v9  ;;  %v7232_v53 = vld [vmem:[#allocation19 + $0x324] ss:$16 sps:$4 sm:$0xff]  }
 0x609   :  { %4809 = vmatpush1.bf16.msra.mxu1 %v7146_v40  ;;  %4840 = vmatprep.mubr.bf16.mxu1 %v8307_v10  ;;  %v7227_v40 = vld [vmem:[#allocation19 + $0x120] ss:$16 sps:$4 sm:$0xff]  }
 0x60a   :  { %4769 = vmatprep.subr.bf16.mxu0 %v7151_v26  ;;  %4810 = vmatprep.subr.bf16.mxu1 %v7154_v30  ;;  %v7230_v26 = vld [vmem:[#allocation19 + $0x320] ss:$16 sps:$4 sm:$0xff]   ;;  %v7235_v30 = vld [vmem:[#allocation19 + $0x104] ss:$16 sps:$4 sm:$0xff]  }
 0x60c   :  { %4770 = vmatpush1.bf16.msra.mxu0 %v7149_v12  ;;  %v7238_v12 = vld [vmem:[#allocation19 + $0x304] ss:$16 sps:$4 sm:$0xff]  }
 0x60d   :  { %4811 = vmatpush1.bf16.msra.mxu1 %v7152_v13  ;;  %4771 = vmatprep.subr.bf16.mxu0 %v7157_v34  ;;  %v7233_v13 = vld [vmem:[#allocation19 + $0x100] ss:$16 sps:$4 sm:$0xff]  }
 0x60e   :  { %4812 = vmatprep.subr.bf16.mxu1 %v7160_v59  ;;  %v7236_v34 = vld [vmem:[#allocation19 + $0x300] ss:$16 sps:$4 sm:$0xff]   ;;  %v7241_v59 = vld [vmem:[#allocation19 + $0xec] ss:$16 sps:$4 sm:$0xff]  }
 0x610   :  { %4772 = vmatpush1.bf16.msra.mxu0 %v7155_v14  ;;  %v7244_v14 = vld [vmem:[#allocation19 + $0x2ec] ss:$16 sps:$4 sm:$0xff]  }
 0x611   :  { %4813 = vmatpush1.bf16.msra.mxu1 %v7158_v18  ;;  %4773 = vmatprep.subr.bf16.mxu0 %v7163_v4  ;;  %v7239_v18 = vld [vmem:[#allocation19 + $0xe8] ss:$16 sps:$4 sm:$0xff]  }
 0x612   :  { %4814 = vmatprep.subr.bf16.mxu1 %v7166_v60  ;;  %v7242_v4 = vld [vmem:[#allocation19 + $0x2e8] ss:$16 sps:$4 sm:$0xff]   ;;  %v7247_v60 = vld [vmem:[#allocation19 + $0xcc] ss:$16 sps:$4 sm:$0xff]  }
 0x614   :  { %4774 = vmatpush1.bf16.msra.mxu0 %v7161_v15  ;;  %v7250_v15 = vld [vmem:[#allocation19 + $0x2cc] ss:$16 sps:$4 sm:$0xff]  }
 0x615   :  { %4815 = vmatpush1.bf16.msra.mxu1 %v7164_v17  ;;  %4775 = vmatprep.subr.bf16.mxu0 %v7169_v19  ;;  %v7245_v17 = vld [vmem:[#allocation19 + $0xc8] ss:$16 sps:$4 sm:$0xff]  }
 0x616   :  { %4816 = vmatprep.subr.bf16.mxu1 %v7172_v20  ;;  %v7248_v19 = vld [vmem:[#allocation19 + $0x2c8] ss:$16 sps:$4 sm:$0xff]   ;;  %v7253_v20 = vld [vmem:[#allocation19 + $0xac] ss:$16 sps:$4 sm:$0xff]  }
 0x618   :  { %4776 = vmatpush1.bf16.msra.mxu0 %v7167_v21  ;;  %v7256_v21 = vld [vmem:[#allocation19 + $0x2ac] ss:$16 sps:$4 sm:$0xff]  }
 0x619   :  { %4817 = vmatpush1.bf16.msra.mxu1 %v7170_v22  ;;  %4777 = vmatprep.subr.bf16.mxu0 %v7175_v27  ;;  %v7251_v22 = vld [vmem:[#allocation19 + $0xa8] ss:$16 sps:$4 sm:$0xff]  }
 0x61a   :  { %4818 = vmatprep.subr.bf16.mxu1 %v7178_v31  ;;  %v7254_v27 = vld [vmem:[#allocation19 + $0x2a8] ss:$16 sps:$4 sm:$0xff]   ;;  %v7259_v31 = vld [vmem:[#allocation19 + $0x8c] ss:$16 sps:$4 sm:$0xff]  }
 0x61c   :  { %4778 = vmatpush1.bf16.msra.mxu0 %v7173_v33  ;;  %v7262_v33 = vld [vmem:[#allocation19 + $0x28c] ss:$16 sps:$4 sm:$0xff]  }
 0x61d   :  { %4819 = vmatpush1.bf16.msra.mxu1 %v7176_v35  ;;  %4779 = vmatprep.subr.bf16.mxu0 %v7181_v16  ;;  %v7257_v35 = vld [vmem:[#allocation19 + $0x88] ss:$16 sps:$4 sm:$0xff]   ;;  %v7265_v16 = vld [vmem:[#allocation19 + $0x6c] ss:$16 sps:$4 sm:$0xff]  }
 0x61e   :  { %4820 = vmatprep.subr.bf16.mxu1 %v7184_v63  ;;  %v7268_v63 = vld [vmem:[#allocation19 + $0x26c] ss:$16 sps:$4 sm:$0xff]  }
 0x620   :  { %4780 = vmatpush1.bf16.msra.mxu0 %v7179_v36  ;;  %v7266_v36 = vld [vmem:[#allocation19 + $0x268] ss:$16 sps:$4 sm:$0xff]  }
 0x621   :  { %4821 = vmatpush1.bf16.msra.mxu1 %v7182_v5  ;;  %4781 = vmatprep.subr.bf16.mxu0 %v7187_v56  ;;  %v7271_v5 = vld [vmem:[#allocation19 + $0x4c] ss:$16 sps:$4 sm:$0xff]  }
 0x622   :  { %4822 = vmatprep.subr.bf16.mxu1 %v7190_v38  ;;  %v7274_v56 = vld [vmem:[#allocation19 + $0x24c] ss:$16 sps:$4 sm:$0xff]   ;;  %v7269_v38 = vld [vmem:[#allocation19 + $0x48] ss:$16 sps:$4 sm:$0xff]  }
 0x624   :  { %4782 = vmatpush1.bf16.msra.mxu0 %v7185_v39  ;;  %v7272_v39 = vld [vmem:[#allocation19 + $0x248] ss:$16 sps:$4 sm:$0xff]  }
 0x625   :  { %4823 = vmatpush1.bf16.msra.mxu1 %v7188_v29  ;;  %4783 = vmatprep.subr.bf16.mxu0 %v7193_v32  ;;  %v7277_v29 = vld [vmem:[#allocation19 + $0x2c] ss:$16 sps:$4 sm:$0xff]  }
 0x626   :  { %4824 = vmatprep.subr.bf16.mxu1 %v7196_v23  ;;  %v7280_v32 = vld [vmem:[#allocation19 + $0x22c] ss:$16 sps:$4 sm:$0xff]   ;;  %v7275_v23 = vld [vmem:[#allocation19 + $0x28] ss:$16 sps:$4 sm:$0xff]  }
 0x628   :  { %4784 = vmatpush2.bf16.msra.mxu0 %v7191_v3  ;;  %v7278_v3 = vld [vmem:[#allocation19 + $0x228] ss:$16 sps:$4 sm:$0xff]  }
 0x629   :  { %4825 = vmatpush2.bf16.msra.mxu1 %v7194_v24  ;;  %4785 = vmatprep.subr.bf16.mxu0 %v7199_v45  ;;  %v7283_v24 = vld [vmem:[#allocation19 + $0xc] ss:$16 sps:$4 sm:$0xff]  }
 0x62a   :  { %4826 = vmatprep.subr.bf16.mxu1 %v7202_v25  ;;  %v7286_v45 = vld [vmem:[#allocation19 + $0x20c] ss:$16 sps:$4 sm:$0xff]   ;;  %v7281_v25 = vld [vmem:[#allocation19 + $0x8] ss:$16 sps:$4 sm:$0xff]  }
 0x62c   :  { %4786 = vmatpush2.bf16.msra.mxu0 %v7197_v44  ;;  %v7284_v44 = vld [vmem:[#allocation19 + $0x208] ss:$16 sps:$4 sm:$0xff]  }
 0x62d   :  { %4827 = vmatpush2.bf16.msra.mxu1 %v7200_v52  ;;  %4787 = vmatprep.subr.bf16.mxu0 %v7205_v46  ;;  %v7289_v52 = vld [vmem:[#allocation19 + $0x1ec] ss:$16 sps:$4 sm:$0xff]  }
 0x62e   :  { %4828 = vmatprep.subr.bf16.mxu1 %v7208_v48  ;;  %v7292_v46 = vld [vmem:[#allocation19 + $0x3ec] ss:$16 sps:$4 sm:$0xff]   ;;  %v7287_v48 = vld [vmem:[#allocation19 + $0x1e8] ss:$16 sps:$4 sm:$0xff]  }
 0x630   :  { %4788 = vmatpush2.bf16.msra.mxu0 %v7203_v28  ;;  %v7290_v28 = vld [vmem:[#allocation19 + $0x3e8] ss:$16 sps:$4 sm:$0xff]  }
 0x631   :  { %4829 = vmatpush2.bf16.msra.mxu1 %v7206_v49  ;;  %4789 = vmatprep.subr.bf16.mxu0 %v7211_v54  ;;  %v7295_v49 = vld [vmem:[#allocation19 + $0x1cc] ss:$16 sps:$4 sm:$0xff]  }
 0x632   :  { %4830 = vmatprep.subr.bf16.mxu1 %v7214_v55  ;;  %v7298_v54 = vld [vmem:[#allocation19 + $0x3cc] ss:$16 sps:$4 sm:$0xff]   ;;  %v7293_v55 = vld [vmem:[#allocation19 + $0x1c8] ss:$16 sps:$4 sm:$0xff]  }
 0x634   :  { %4790 = vmatpush2.bf16.msra.mxu0 %v7209_v41  ;;  %v7296_v41 = vld [vmem:[#allocation19 + $0x3c8] ss:$16 sps:$4 sm:$0xff]  }
 0x635   :  { %4831 = vmatpush2.bf16.msra.mxu1 %v7212_v61  ;;  %4791 = vmatprep.subr.bf16.mxu0 %v7217_v57  ;;  %v7301_v61 = vld [vmem:[#allocation19 + $0x1ac] ss:$16 sps:$4 sm:$0xff]  }
 0x636   :  { %4832 = vmatprep.subr.bf16.mxu1 %v7220_v58  ;;  %v7304_v57 = vld [vmem:[#allocation19 + $0x3ac] ss:$16 sps:$4 sm:$0xff]   ;;  %v7299_v58 = vld [vmem:[#allocation19 + $0x1a8] ss:$16 sps:$4 sm:$0xff]  }
 0x638   :  { %4792 = vmatpush2.bf16.msra.mxu0 %v7215_v11  ;;  %v7302_v11 = vld [vmem:[#allocation19 + $0x3a8] ss:$16 sps:$4 sm:$0xff]  }
 0x639   :  { %4833 = vmatpush2.bf16.msra.mxu1 %v7218_v62  ;;  %4793 = vmatprep.subr.bf16.mxu0 %v7223_v1  ;;  %v7307_v62 = vld [vmem:[#allocation19 + $0x18c] ss:$16 sps:$4 sm:$0xff]  }
 0x63a   :  { %4834 = vmatprep.subr.bf16.mxu1 %v7226_v2  ;;  %v7310_v1 = vld [vmem:[#allocation19 + $0x38c] ss:$16 sps:$4 sm:$0xff]   ;;  %v7305_v2 = vld [vmem:[#allocation19 + $0x188] ss:$16 sps:$4 sm:$0xff]  }
 0x63c   :  { %4794 = vmatpush2.bf16.msra.mxu0 %v7221_v0  ;;  %v7308_v0 = vld [vmem:[#allocation19 + $0x388] ss:$16 sps:$4 sm:$0xff]  }
 0x63d   :  { %4835 = vmatpush2.bf16.msra.mxu1 %v7224_v6  ;;  %4795 = vmatprep.subr.bf16.mxu0 %v7229_v8  ;;  %v7313_v6 = vld [vmem:[#allocation19 + $0x16c] ss:$16 sps:$4 sm:$0xff]  }
 0x63e   :  { %4836 = vmatprep.subr.bf16.mxu1 %v7232_v53  ;;  %v7316_v8 = vld [vmem:[#allocation19 + $0x36c] ss:$16 sps:$4 sm:$0xff]   ;;  %v7311_v53 = vld [vmem:[#allocation19 + $0x168] ss:$16 sps:$4 sm:$0xff]  }
 0x640   :  { %4796 = vmatpush2.bf16.msra.mxu0 %v7227_v40  ;;  %v7314_v40 = vld [vmem:[#allocation19 + $0x368] ss:$16 sps:$4 sm:$0xff]  }
 0x641   :  { %4837 = vmatpush2.bf16.msra.mxu1 %v7230_v26  ;;  %4797 = vmatprep.subr.bf16.mxu0 %v7235_v30  ;;  %v7319_v26 = vld [vmem:[#allocation19 + $0x14c] ss:$16 sps:$4 sm:$0xff]  }
 0x642   :  { %4838 = vmatprep.subr.bf16.mxu1 %v7238_v12  ;;  %v7322_v30 = vld [vmem:[#allocation19 + $0x34c] ss:$16 sps:$4 sm:$0xff]   ;;  %v7317_v12 = vld [vmem:[#allocation19 + $0x148] ss:$16 sps:$4 sm:$0xff]  }
 0x644   :  { %4798 = vmatpush2.bf16.msra.mxu0 %v7233_v13  ;;  %v7320_v13 = vld [vmem:[#allocation19 + $0x348] ss:$16 sps:$4 sm:$0xff]  }
 0x645   :  { %4839 = vmatpush2.bf16.msra.mxu1 %v7236_v34  ;;  %4849 = vmatprep.subr.bf16.mxu0 %v7241_v59  ;;  %v7325_v34 = vld [vmem:[#allocation19 + $0x12c] ss:$16 sps:$4 sm:$0xff]  }
 0x646   :  { %4890 = vmatprep.subr.bf16.mxu1 %v7244_v14  ;;  %v7328_v59 = vld [vmem:[#allocation19 + $0x32c] ss:$16 sps:$4 sm:$0xff]   ;;  %v7323_v14 = vld [vmem:[#allocation19 + $0x128] ss:$16 sps:$4 sm:$0xff]  }
 0x647   :  { %4800 = vmatmul.mubr.bf16.vlgmr.msra.gmra.mxu0 %v8283_v50 }
 0x648   :  { %4841 = vmatmul.mubr.bf16.vlgmr.msra.gmra.mxu1 %v8285_v37  ;;  %4850 = vmatpush1.bf16.msra.mxu0 %v7239_v18  ;;  %v7326_v18 = vld [vmem:[#allocation19 + $0x328] ss:$16 sps:$4 sm:$0xff]  }
 0x649   :  { %4881 = vmatprep.mubr.bf16.mxu0 %v8303_v9  ;;  %4891 = vmatpush1.bf16.msra.mxu1 %v7242_v4  ;;  %v7260_v9 = vld [vmem:[#allocation19 + $0x288] ss:$16 sps:$4 sm:$0xff]   ;;  %v7331_v4 = vld [vmem:[#allocation19 + $0x10c] ss:$16 sps:$4 sm:$0xff]  }
 0x64a   :  { %4922 = vmatprep.mubr.bf16.mxu1 %v8307_v10  ;;  %4851 = vmatprep.subr.bf16.mxu0 %v7247_v60  ;;  %v7263_v10 = vld [vmem:[#allocation19 + $0x68] ss:$16 sps:$4 sm:$0xff]   ;;  %v7334_v60 = vld [vmem:[#allocation19 + $0x30c] ss:$16 sps:$4 sm:$0xff]  }
 0x64b   :  { %4892 = vmatprep.subr.bf16.mxu1 %v7250_v15  ;;  %v7329_v15 = vld [vmem:[#allocation19 + $0x108] ss:$16 sps:$4 sm:$0xff]  }
 0x64c   :  { %4852 = vmatpush1.bf16.msra.mxu0 %v7245_v17  ;;  %v7332_v17 = vld [vmem:[#allocation19 + $0x308] ss:$16 sps:$4 sm:$0xff]  }
 0x64d   :  { %4893 = vmatpush1.bf16.msra.mxu1 %v7248_v19  ;;  %4853 = vmatprep.subr.bf16.mxu0 %v7253_v20 }
 0x64e   :  { %4894 = vmatprep.subr.bf16.mxu1 %v7256_v21 }
 0x650   :  { %4854 = vmatpush1.bf16.msra.mxu0 %v7251_v22 }
 0x651   :  { %4895 = vmatpush1.bf16.msra.mxu1 %v7254_v27  ;;  %4855 = vmatprep.subr.bf16.mxu0 %v7259_v31 }
 0x652   :  { %4896 = vmatprep.subr.bf16.mxu1 %v7262_v33 }
 0x654   :  { %4856 = vmatpush1.bf16.msra.mxu0 %v7257_v35 }
 0x655   :  { %4897 = vmatpush1.bf16.msra.mxu1 %v7260_v9  ;;  %4857 = vmatprep.subr.bf16.mxu0 %v7265_v16 }
 0x656   :  { %4898 = vmatprep.subr.bf16.mxu1 %v7268_v63 }
 0x658   :  { %4858 = vmatpush1.bf16.msra.mxu0 %v7263_v10 }
 0x659   :  { %4899 = vmatpush1.bf16.msra.mxu1 %v7266_v36  ;;  %4859 = vmatprep.subr.bf16.mxu0 %v7271_v5 }
 0x65a   :  { %4900 = vmatprep.subr.bf16.mxu1 %v7274_v56 }
 0x65c   :  { %4860 = vmatpush1.bf16.msra.mxu0 %v7269_v38 }
 0x65d   :  { %4901 = vmatpush1.bf16.msra.mxu1 %v7272_v39  ;;  %4861 = vmatprep.subr.bf16.mxu0 %v7277_v29 }
 0x65e   :  { %4902 = vmatprep.subr.bf16.mxu1 %v7280_v32  ;;  %v7335_v32 = vld [vmem:[#allocation23 + $0x70] ss:$8 sps:$4 sm:$0xff]  }
 0x660   :  { %4862 = vmatpush1.bf16.msra.mxu0 %v7275_v23  ;;  %v7337_v23 = vld [vmem:[#allocation23 + $0x74] ss:$8 sps:$4 sm:$0xff]  }
 0x661   :  { %4903 = vmatpush1.bf16.msra.mxu1 %v7278_v3  ;;  %4863 = vmatprep.subr.bf16.mxu0 %v7283_v24  ;;  %v7338_v3 = vld [vmem:[#allocation23 + $0x170] ss:$8 sps:$4 sm:$0xff]   ;;  %v7340_v24 = vld [vmem:[#allocation23 + $0x174] ss:$8 sps:$4 sm:$0xff]  }
 0x662   :  { %4904 = vmatprep.subr.bf16.mxu1 %v7286_v45  ;;  %v7343_v45 = vld [vmem:[#allocation23 + $0x64] ss:$8 sps:$4 sm:$0xff]  }
 0x664   :  { %4864 = vmatpush1.bf16.msra.mxu0 %v7281_v25  ;;  %v7346_v25 = vld [vmem:[#allocation23 + $0x164] ss:$8 sps:$4 sm:$0xff]  }
 0x665   :  { %4905 = vmatpush1.bf16.msra.mxu1 %v7284_v44  ;;  %4865 = vmatprep.subr.bf16.mxu0 %v7289_v52  ;;  %v7341_v44 = vld [vmem:[#allocation23 + $0x60] ss:$8 sps:$4 sm:$0xff]  }
 0x666   :  { %4906 = vmatprep.subr.bf16.mxu1 %v7292_v46  ;;  %v7344_v52 = vld [vmem:[#allocation23 + $0x160] ss:$8 sps:$4 sm:$0xff]   ;;  %v7349_v46 = vld [vmem:[#allocation23 + $0x54] ss:$8 sps:$4 sm:$0xff]  }
 0x668   :  { %4866 = vmatpush2.bf16.msra.mxu0 %v7287_v48  ;;  %v7352_v48 = vld [vmem:[#allocation23 + $0x154] ss:$8 sps:$4 sm:$0xff]  }
 0x669   :  { %4907 = vmatpush2.bf16.msra.mxu1 %v7290_v28  ;;  %4867 = vmatprep.subr.bf16.mxu0 %v7295_v49  ;;  %v7347_v28 = vld [vmem:[#allocation23 + $0x50] ss:$8 sps:$4 sm:$0xff]  }
 0x66a   :  { %4908 = vmatprep.subr.bf16.mxu1 %v7298_v54  ;;  %v7350_v49 = vld [vmem:[#allocation23 + $0x150] ss:$8 sps:$4 sm:$0xff]   ;;  %v7355_v54 = vld [vmem:[#allocation23 + $0x44] ss:$8 sps:$4 sm:$0xff]  }
 0x66c   :  { %4868 = vmatpush2.bf16.msra.mxu0 %v7293_v55  ;;  %v7358_v55 = vld [vmem:[#allocation23 + $0x144] ss:$8 sps:$4 sm:$0xff]  }
 0x66d   :  { %4909 = vmatpush2.bf16.msra.mxu1 %v7296_v41  ;;  %4869 = vmatprep.subr.bf16.mxu0 %v7301_v61  ;;  %v7353_v41 = vld [vmem:[#allocation23 + $0x40] ss:$8 sps:$4 sm:$0xff]  }
 0x66e   :  { %4910 = vmatprep.subr.bf16.mxu1 %v7304_v57  ;;  %v7356_v61 = vld [vmem:[#allocation23 + $0x140] ss:$8 sps:$4 sm:$0xff]   ;;  %v7361_v57 = vld [vmem:[#allocation23 + $0x34] ss:$8 sps:$4 sm:$0xff]  }
 0x670   :  { %4870 = vmatpush2.bf16.msra.mxu0 %v7299_v58  ;;  %v7364_v58 = vld [vmem:[#allocation23 + $0x134] ss:$8 sps:$4 sm:$0xff]  }
 0x671   :  { %4911 = vmatpush2.bf16.msra.mxu1 %v7302_v11  ;;  %4871 = vmatprep.subr.bf16.mxu0 %v7307_v62  ;;  %v7359_v11 = vld [vmem:[#allocation23 + $0x30] ss:$8 sps:$4 sm:$0xff]  }
 0x672   :  { %4912 = vmatprep.subr.bf16.mxu1 %v7310_v1  ;;  %v7362_v62 = vld [vmem:[#allocation23 + $0x130] ss:$8 sps:$4 sm:$0xff]   ;;  %v7367_v1 = vld [vmem:[#allocation23 + $0x24] ss:$8 sps:$4 sm:$0xff]  }
 0x674   :  { %4872 = vmatpush2.bf16.msra.mxu0 %v7305_v2  ;;  %v7370_v2 = vld [vmem:[#allocation23 + $0x124] ss:$8 sps:$4 sm:$0xff]  }
 0x675   :  { %4913 = vmatpush2.bf16.msra.mxu1 %v7308_v0  ;;  %4873 = vmatprep.subr.bf16.mxu0 %v7313_v6  ;;  %v7365_v0 = vld [vmem:[#allocation23 + $0x20] ss:$8 sps:$4 sm:$0xff]  }
 0x676   :  { %4914 = vmatprep.subr.bf16.mxu1 %v7316_v8  ;;  %v7368_v6 = vld [vmem:[#allocation23 + $0x120] ss:$8 sps:$4 sm:$0xff]   ;;  %v7373_v8 = vld [vmem:[#allocation23 + $0x14] ss:$8 sps:$4 sm:$0xff]  }
 0x678   :  { %4874 = vmatpush2.bf16.msra.mxu0 %v7311_v53  ;;  %v7376_v53 = vld [vmem:[#allocation23 + $0x114] ss:$8 sps:$4 sm:$0xff]  }
 0x679   :  { %4915 = vmatpush2.bf16.msra.mxu1 %v7314_v40  ;;  %4875 = vmatprep.subr.bf16.mxu0 %v7319_v26  ;;  %v7371_v40 = vld [vmem:[#allocation23 + $0x10] ss:$8 sps:$4 sm:$0xff]  }
 0x67a   :  { %4916 = vmatprep.subr.bf16.mxu1 %v7322_v30  ;;  %v7374_v26 = vld [vmem:[#allocation23 + $0x110] ss:$8 sps:$4 sm:$0xff]   ;;  %v7379_v30 = vld [vmem:[#allocation23 + $0x4] ss:$8 sps:$4 sm:$0xff]  }
 0x67c   :  { %4876 = vmatpush2.bf16.msra.mxu0 %v7317_v12  ;;  %v7382_v12 = vld [vmem:[#allocation23 + $0x104] ss:$8 sps:$4 sm:$0xff]  }
 0x67d   :  { %4917 = vmatpush2.bf16.msra.mxu1 %v7320_v13  ;;  %4877 = vmatprep.subr.bf16.mxu0 %v7325_v34  ;;  %v7377_v13 = vld [vmem:[#allocation23] ss:$8 sps:$4 sm:$0xff]  }
 0x67e   :  { %4918 = vmatprep.subr.bf16.mxu1 %v7328_v59  ;;  %v7380_v34 = vld [vmem:[#allocation23 + $0x100] ss:$8 sps:$4 sm:$0xff]  }
 0x680   :  { %4878 = vmatpush2.bf16.msra.mxu0 %v7323_v14 }
 0x681   :  { %4919 = vmatpush2.bf16.msra.mxu1 %v7326_v18  ;;  %4879 = vmatprep.subr.bf16.mxu0 %v7331_v4 }
 0x682   :  { %4920 = vmatprep.subr.bf16.mxu1 %v7334_v60 }
 0x684   :  { %4880 = vmatpush2.bf16.msra.mxu0 %v7329_v15 }
 0x685   :  { %4921 = vmatpush2.bf16.msra.mxu1 %v7332_v17  ;;  %5507 = vmatprep.subr.bf16.mxu0 %v7337_v23 }
 0x686   :  { %5548 = vmatprep.subr.bf16.mxu1 %v7340_v24 }
 0x687   :  { %4882 = vmatmul.mubr.bf16.vlgmr.msra.gmra.mxu0 %v8283_v50  ;;  %v3997_v19 = vpop.f32.mrf.mxu0  ;;  %v4038_v20 = vpop.f32.mrf.mxu1 }
 0x688   :  { %4923 = vmatmul.mubr.bf16.vlgmr.msra.gmra.mxu1 %v8285_v37  ;;  %v8317_v21 = vadd.f32 %v4038_v20, %v3997_v19  ;;  %5508 = vmatpush1.bf16.msra.mxu0 %v7335_v32 }
 0x689   :  { %v3999_v22 = vpop.f32.mrf.mxu0  ;;  %v4040_v27 = vpop.f32.mrf.mxu1  ;;  %5549 = vmatpush1.bf16.msra.mxu1 %v7338_v3  ;;  %5509 = vmatprep.subr.bf16.mxu0 %v7343_v45 }
 0x68a   :  { %v8319_v31 = vadd.f32 %v4040_v27, %v3999_v22  ;;  %5550 = vmatprep.subr.bf16.mxu1 %v7346_v25  ;;  %v4931_v27 = vld [vmem:[%s8419_s19] sm:$0xf] }
 0x68b   :  { %v4001_v33 = vpop.f32.mrf.mxu0  ;;  %v4042_v35 = vpop.f32.mrf.mxu1  ;;  %v4948_v3 = vrot.slane %v4931_v27, %v8051_v51 }
 0x68c   :  { %5510 = vmatpush1.bf16.msra.mxu0 %v7341_v44  ;;  %v4940_v35 = vrot.slane %v4931_v27, %v8043_v43 }
 0x68d   :  { %v4002_v9 = vpop.f32.mrf.mxu0  ;;  %v4043_v16 = vpop.f32.mrf.mxu1  ;;  %5551 = vmatpush1.bf16.msra.mxu1 %v7344_v52  ;;  %5511 = vmatprep.subr.bf16.mxu0 %v7349_v46 }
 0x68e   :  { %5552 = vmatprep.subr.bf16.mxu1 %v7352_v48  ;;  %v4936_v16 = vrot.slane %v4931_v27, %v8040_v42 }
 0x690   :  { %5512 = vmatpush1.bf16.msra.mxu0 %v7347_v28 }
 0x691   :  { %5553 = vmatpush1.bf16.msra.mxu1 %v7350_v49  ;;  %5513 = vmatprep.subr.bf16.mxu0 %v7355_v54 }
 0x692   :  { %5554 = vmatprep.subr.bf16.mxu1 %v7358_v55 }
 0x694   :  { %5514 = vmatpush1.bf16.msra.mxu0 %v7353_v41 }
 0x695   :  { %5555 = vmatpush1.bf16.msra.mxu1 %v7356_v61  ;;  %5515 = vmatprep.subr.bf16.mxu0 %v7361_v57 }
 0x696   :  { %5556 = vmatprep.subr.bf16.mxu1 %v7364_v58 }
 0x698   :  { %5516 = vmatpush1.bf16.msra.mxu0 %v7359_v11  ;;  %v7385_v11 = vld [vmem:[#allocation23 + $0xf4] ss:$8 sps:$4 sm:$0xff]  }
 0x699   :  { %5557 = vmatpush1.bf16.msra.mxu1 %v7362_v62  ;;  %5517 = vmatprep.subr.bf16.mxu0 %v7367_v1  ;;  %v7388_v62 = vld [vmem:[#allocation23 + $0x1f4] ss:$8 sps:$4 sm:$0xff]   ;;  %v7383_v1 = vld [vmem:[#allocation23 + $0xf0] ss:$8 sps:$4 sm:$0xff]  }
 0x69a   :  { %5558 = vmatprep.subr.bf16.mxu1 %v7370_v2  ;;  %v7386_v2 = vld [vmem:[#allocation23 + $0x1f0] ss:$8 sps:$4 sm:$0xff]  }
 0x69c   :  { %5518 = vmatpush1.bf16.msra.mxu0 %v7365_v0  ;;  %v7391_v0 = vld [vmem:[#allocation23 + $0xe4] ss:$8 sps:$4 sm:$0xff]  }
 0x69d   :  { %5559 = vmatpush1.bf16.msra.mxu1 %v7368_v6  ;;  %5519 = vmatprep.subr.bf16.mxu0 %v7373_v8  ;;  %v7394_v6 = vld [vmem:[#allocation23 + $0x1e4] ss:$8 sps:$4 sm:$0xff]   ;;  %v7389_v8 = vld [vmem:[#allocation23 + $0xe0] ss:$8 sps:$4 sm:$0xff]  }
 0x69e   :  { %5560 = vmatprep.subr.bf16.mxu1 %v7376_v53  ;;  %v7392_v53 = vld [vmem:[#allocation23 + $0x1e0] ss:$8 sps:$4 sm:$0xff]  }
 0x6a0   :  { %5520 = vmatpush1.bf16.msra.mxu0 %v7371_v40  ;;  %v7397_v40 = vld [vmem:[#allocation23 + $0xd4] ss:$8 sps:$4 sm:$0xff]  }
 0x6a1   :  { %5561 = vmatpush1.bf16.msra.mxu1 %v7374_v26  ;;  %5521 = vmatprep.subr.bf16.mxu0 %v7379_v30  ;;  %v7400_v26 = vld [vmem:[#allocation23 + $0x1d4] ss:$8 sps:$4 sm:$0xff]   ;;  %v7395_v30 = vld [vmem:[#allocation23 + $0xd0] ss:$8 sps:$4 sm:$0xff]  }
 0x6a2   :  { %5562 = vmatprep.subr.bf16.mxu1 %v7382_v12  ;;  %v7398_v12 = vld [vmem:[#allocation23 + $0x1d0] ss:$8 sps:$4 sm:$0xff]  }
 0x6a4   :  { %5522 = vmatpush1.bf16.msra.mxu0 %v7377_v13  ;;  %v7403_v13 = vld [vmem:[#allocation23 + $0xc4] ss:$8 sps:$4 sm:$0xff]  }
 0x6a5   :  { %5563 = vmatpush1.bf16.msra.mxu1 %v7380_v34  ;;  %5523 = vmatprep.subr.bf16.mxu0 %v7385_v11  ;;  %v7406_v34 = vld [vmem:[#allocation23 + $0x1c4] ss:$8 sps:$4 sm:$0xff]  }
 0x6a6   :  { %5564 = vmatprep.subr.bf16.mxu1 %v7388_v62 }
 0x6a8   :  { %5524 = vmatpush2.bf16.msra.mxu0 %v7383_v1 }
 0x6a9   :  { %5565 = vmatpush2.bf16.msra.mxu1 %v7386_v2  ;;  %5525 = vmatprep.subr.bf16.mxu0 %v7391_v0 }
 0x6aa   :  { %5566 = vmatprep.subr.bf16.mxu1 %v7394_v6 }
 0x6ac   :  { %5526 = vmatpush2.bf16.msra.mxu0 %v7389_v8 }
 0x6ad   :  { %5567 = vmatpush2.bf16.msra.mxu1 %v7392_v53  ;;  %5527 = vmatprep.subr.bf16.mxu0 %v7397_v40 }
 0x6ae   :  { %5568 = vmatprep.subr.bf16.mxu1 %v7400_v26 }
 0x6b0   :  { %5528 = vmatpush2.bf16.msra.mxu0 %v7395_v30 }
 0x6b1   :  { %5569 = vmatpush2.bf16.msra.mxu1 %v7398_v12  ;;  %5529 = vmatprep.subr.bf16.mxu0 %v7403_v13 }
 0x6b2   :  { %5570 = vmatprep.subr.bf16.mxu1 %v7406_v34 }
 0x6c7   :  { %v4079_v63 = vpop.f32.mrf.mxu0  ;;  %v4120_v10 = vpop.f32.mrf.mxu1 }
 0x6c8   :  { %v8321_v36 = vadd.f32 %v4120_v10, %v4079_v63 }
 0x6c9   :  { %v4081_v5 = vpop.f32.mrf.mxu0  ;;  %v4122_v50 = vpop.f32.mrf.mxu1 }
 0x6ca   :  { %v8323_v56 = vadd.f32 %v4122_v50, %v4081_v5 }
 0x6cb   :  { %v4083_v38 = vpop.f32.mrf.mxu0  ;;  %v4124_v37 = vpop.f32.mrf.mxu1 }
 0x6cd   :  { %v4084_v39 = vpop.f32.mrf.mxu0  ;;  %v4125_v29 = vpop.f32.mrf.mxu1 }
 0x707   :  { %v4801_v59 = vpop.f32.mrf.mxu0 }
 0x708   :  { %v4842_v14 = vpop.f32.mrf.mxu1  ;;  %v4802_v22 = vadd.f32 %v4801_v59, %v8317_v21  ;;  %v4944_v21 = vrot.slane %v4931_v27, %v8048_v47  ;;  %v7401_v59 = vld [vmem:[#allocation23 + $0xc0] ss:$8 sps:$4 sm:$0xff]   ;;  %v7419_v27 = vld [vmem:[#allocation23 + $0x90] ss:$8 sps:$4 sm:$0xff]  }
 0x709   :  { %v4803_v18 = vpop.f32.mrf.mxu0  ;;  %5530 = vmatpush2.bf16.msra.mxu0 %v7401_v59 }
 0x70a   :  { %v4844_v4 = vpop.f32.mrf.mxu1  ;;  %v4804_v20 = vadd.f32 %v4803_v18, %v8319_v31  ;;  %v4843_v9 = vadd.f32 %v4842_v14, %v4802_v22  ;;  %v7404_v14 = vld [vmem:[#allocation23 + $0x1c0] ss:$8 sps:$4 sm:$0xff]   ;;  %v7409_v18 = vld [vmem:[#allocation23 + $0xb4] ss:$8 sps:$4 sm:$0xff]  }
 0x70b   :  { %v4805_v60 = vpop.f32.mrf.mxu0  ;;  %5571 = vmatpush2.bf16.msra.mxu1 %v7404_v14  ;;  %5531 = vmatprep.subr.bf16.mxu0 %v7409_v18  ;;  %v7416_v22 = vld [vmem:[#allocation23 + $0x1a0] ss:$8 sps:$4 sm:$0xff]  }
 0x70c   :  { %v4846_v15 = vpop.f32.mrf.mxu1  ;;  %v4845_v33 = vadd.f32 %v4844_v4, %v4804_v20  ;;  %v4953_v10 = vadd.f32 %v4936_v16, %v4843_v9  ;;  %v7412_v4 = vld [vmem:[#allocation23 + $0x1b4] ss:$8 sps:$4 sm:$0xff]   ;;  %v7407_v60 = vld [vmem:[#allocation23 + $0xb0] ss:$8 sps:$4 sm:$0xff]   ;;  %v7413_v20 = vld [vmem:[#allocation23 + $0xa0] ss:$8 sps:$4 sm:$0xff]  }
 0x70d   :  { %v4806_v17 = vpop.f32.mrf.mxu0  ;;  %v7410_v15 = vld [vmem:[#allocation23 + $0x1b0] ss:$8 sps:$4 sm:$0xff]   ;;  %5572 = vmatprep.subr.bf16.mxu1 %v7412_v4  ;;  %5532 = vmatpush2.bf16.msra.mxu0 %v7407_v60  ;;  %v7424_v9 = vld [vmem:[#allocation23 + $0x194] ss:$8 sps:$4 sm:$0xff]   ;;  %v7427_v16 = vld [vmem:[#allocation23 + $0x84] ss:$8 sps:$4 sm:$0xff]  }
 0x70e   :  { %v4847_v19 = vpop.f32.mrf.mxu1  ;;  %v4954_v63 = vadd.f32 %v4940_v35, %v4845_v33  ;;  %v8336_v39 = vmax.f32 %v4953_v10, 0.0  ;;  %v7415_v17 = vld [vmem:[#allocation23 + $0xa4] ss:$8 sps:$4 sm:$0xff]   ;;  %v7421_v33 = vld [vmem:[#allocation23 + $0x94] ss:$8 sps:$4 sm:$0xff]  }
 0x70f   :  { %5573 = vmatpush2.bf16.msra.mxu1 %v7410_v15  ;;  %v7418_v19 = vld [vmem:[#allocation23 + $0x1a4] ss:$8 sps:$4 sm:$0xff]   ;;  %5533 = vmatprep.subr.bf16.mxu0 %v7415_v17  ;;  %v7422_v35 = vld [vmem:[#allocation23 + $0x190] ss:$8 sps:$4 sm:$0xff]   ;;  %v7425_v10 = vld [vmem:[#allocation23 + $0x80] ss:$8 sps:$4 sm:$0xff]  }
 0x710   :  { %v8332_v50 = vmax.f32 %v4954_v63, 0.0  ;;  %5574 = vmatprep.subr.bf16.mxu1 %v7418_v19  ;;  %v7430_v63 = vld [vmem:[#allocation23 + $0x184] ss:$8 sps:$4 sm:$0xff]  }
 0x711   :  { %5534 = vmatpush2.bf16.msra.mxu0 %v7413_v20 }
 0x712   :  { %v4968_v52 = vmul.f32 %v8332_v50, %v8332_v50  ;;  %v4961_v28 = vadd.f32 %v8332_v50, %v8336_v39  ;;  %5535 = vmatprep.subr.bf16.mxu0 %v7421_v33 }
 0x713   :  { %5575 = vmatpush2.bf16.msra.mxu1 %v7416_v22 }
 0x714   :  { %5576 = vmatprep.subr.bf16.mxu1 %v7424_v9 }
 0x715   :  { %5536 = vmatpush2.bf16.msra.mxu0 %v7419_v27 }
 0x716   :  { %5537 = vmatprep.subr.bf16.mxu0 %v7427_v16 }
 0x717   :  { %5577 = vmatpush2.bf16.msra.mxu1 %v7422_v35 }
 0x718   :  { %5578 = vmatprep.subr.bf16.mxu1 %v7430_v63  ;;  %v5175_v63 = vld [vmem:[%s8423_s23] sm:$0x3] }
 0x719   :  { %5538 = vmatpush2.bf16.msra.mxu0 %v7425_v10  ;;  %v5180_v10 = vrot.slane %v5175_v63, %v8040_v42 }
 0x747   :  { %v4883_v5 = vpop.f32.mrf.mxu0 }
 0x748   :  { %v4884_v38 = vadd.f32 %v4883_v5, %v8321_v36  ;;  %v4924_v31 = vpop.f32.mrf.mxu1  ;;  %v7428_v5 = vld [vmem:[#allocation23 + $0x180] ss:$8 sps:$4 sm:$0xff]  }
 0x749   :  { %v4885_v37 = vpop.f32.mrf.mxu0  ;;  %5579 = vmatpush2.bf16.msra.mxu1 %v7428_v5  ;;  %v5184_v5 = vrot.slane %v5175_v63, %v8043_v43  ;;  %v7431_v43 = vld [vmem:[#allocation25 + $0x78] sm:$0xff]  }
 0x74a   :  { %v4925_v29 = vadd.f32 %v4924_v31, %v4884_v38  ;;  %v4886_v32 = vadd.f32 %v4885_v37, %v8323_v56  ;;  %v4926_v23 = vpop.f32.mrf.mxu1  ;;  %v4967_v56 = vmul.f32 %v8336_v39, %v8336_v39  ;;  %6509 = vmatprep.subr.bf16.mxu0 %v7431_v43 }
 0x74b   :  { %v4887_v24 = vpop.f32.mrf.mxu0 }
 0x74c   :  { %v4955_v45 = vadd.f32 %v4944_v21, %v4925_v29  ;;  %v4927_v25 = vadd.f32 %v4926_v23, %v4886_v32  ;;  %v4928_v44 = vpop.f32.mrf.mxu1  ;;  %v4971_v55 = vadd.f32 %v4968_v52, %v4967_v56  ;;  %v6424_v23 = vld.sshfl [vmem:[%s8420_s20] sm:$0x33 pattern:$0x75316420] }
 0x74d   :  { %v4888_v36 = vpop.f32.mrf.mxu0  ;;  %v6425_v24 = vld.sshfl [vmem:[#allocation22] sm:$0x33 pattern:$0x75316420] }
 0x74e   :  { %v8342_v46 = vmax.f32 %v4955_v45, 0.0  ;;  %v4956_v47 = vadd.f32 %v4948_v3, %v4927_v25  ;;  %v4929_v48 = vpop.f32.mrf.mxu1  ;;  %v5004_v45 = vcombine.high %v6424_v23, %v6424_v23  ;;  %v5062_v44 = vcombine.high %v6425_v24, %v6425_v24 }
 0x74f   :  { %v5011_v36 = vrot.slane %v6424_v23, %v8079_v7  ;;  %v5069_v48 = vrot.slane %v6425_v24, %v8079_v7 }
 0x750   :  { %v8348_v49 = vmax.f32 %v4956_v47, 0.0  ;;  %v4962_v51 = vadd.f32 %v4961_v28, %v8342_v46  ;;  %v4969_v54 = vmul.f32 %v8342_v46, %v8342_v46  ;;  %v5018_v52 = vrot.slane %v5004_v45, %v8079_v7 }
 0x751   :  { %v5076_v47 = vrot.slane %v5062_v44, %v8079_v7  ;;  %v5019_v56 = vcombine.high %v5011_v36, %v5011_v36  ;;  %v5080_v6 = vpack.i.b16 %v5069_v48, %v5069_v48 }
 0x752   :  { %v4963_v41 = vadd.f32 %v4962_v51, %v8348_v49  ;;  %v4970_v61 = vmul.f32 %v8348_v49, %v8348_v49  ;;  %v4972_v57 = vadd.f32 %v4971_v55, %v4969_v54  ;;  %v5020_v28 = vcombine.high %v5018_v52, %v5018_v52 }
 0x753   :  { %v5078_v51 = vcombine.high %v5076_v47, %v5076_v47  ;;  %v5077_v54 = vcombine.high %v5069_v48, %v5069_v48  ;;  %v5029_v55 = vpack.i.b16 %v5018_v52, %v5018_v52  ;;  %v5087_v2 = vpack.i.b16 %v5076_v47, %v5076_v47 }
 0x754   :  { %4964 = vadd.xlane.f32.xlu0 %v4963_v41  ;;  %v4973_v58 = vadd.f32 %v4972_v57, %v4970_v61  ;;  %v5043_v61 = vpack.i.b16 %v5020_v28, %v5020_v28  ;;  %v5022_v57 = vpack.i.b16 %v5011_v36, %v5011_v36  ;;  %v5085_v14 = vrot.slane %v5080_v6, %v8040_v42  ;;  %v7444_v6 = vld [vmem:[#allocation25 + $0x8] sm:$0xff]  }
 0x755   :  { %v5101_v0 = vpack.i.b16 %v5078_v51, %v5078_v51  ;;  %v5094_v8 = vpack.i.b16 %v5077_v54, %v5077_v54  ;;  %v5034_v53 = vrot.slane %v5029_v55, %v8040_v42  ;;  %v7432_v51 = vld [vmem:[#allocation25 + $0x38] sm:$0xff]   ;;  %v7433_v54 = vld [vmem:[#allocation25 + $0x70] sm:$0xff]  }
 0x756   :  { %4974 = vadd.xlane.f32.xlu1 %v4973_v58  ;;  %v5036_v58 = vpack.i.b16 %v5019_v56, %v5019_v56  ;;  %v5048_v26 = vrot.slane %v5043_v61, %v8040_v42  ;;  %v7434_v55 = vld [vmem:[#allocation25 + $0x30] sm:$0xff]   ;;  %v7436_v61 = vld [vmem:[#allocation25 + $0x28] sm:$0xff]  }
 0x757   :  { %v5106_v59 = vrot.slane %v5101_v0, %v8040_v42  ;;  %v5099_v18 = vrot.slane %v5094_v8, %v8040_v42  ;;  %v7443_v0 = vld [vmem:[#allocation25 + $0x48] sm:$0xff]   ;;  %v7445_v8 = vld [vmem:[#allocation25 + $0x40] sm:$0xff]  }
 0x758   :  { %v5041_v12 = vrot.slane %v5036_v58, %v8040_v42  ;;  %v7438_v58 = vld [vmem:[#allocation25 + $0x20] sm:$0xff]  }
 0x7dd   :  { %v4965_v38 = vpop.xlane.xlu0 %4964 }
 0x7de   :  { %v4966_v31 = vmul.f32 0.001953125, %v4965_v38 }
 0x7df   :  { %v4975_v21 = vpop.xlane.xlu1 %4974 }
 0x7e0   :  { %v4976_v37 = vmul.f32 0.001953125, %v4975_v21  ;;  %v4977_v29 = vmul.f32 %v4966_v31, %v4966_v31  ;;  %v4982_v41 = vsub.f32 %v8336_v39, %v4966_v31  ;;  %v4984_v11 = vsub.f32 %v8342_v46, %v4966_v31 }
 0x7e1   :  { %v4983_v62 = vsub.f32 %v8332_v50, %v4966_v31  ;;  %v4985_v1 = vsub.f32 %v8348_v49, %v4966_v31  ;;  %v5027_v39 = vrot.slane %v5022_v57, %v8040_v42  ;;  %v5092_v49 = vrot.slane %v5087_v2, %v8040_v42  ;;  %v7437_v57 = vld [vmem:[#allocation25 + $0x60] sm:$0xff]   ;;  %v7442_v2 = vld [vmem:[#allocation25 + $0x10] sm:$0xff]  }
 0x7e2   :  { %v4978_v32 = vsub.f32 %v4976_v37, %v4977_v29  ;;  %v4986_v30 = vpack.c.bf16 %v4982_v41, %v4982_v41  ;;  %v4988_v50 = vpack.c.bf16 %v4984_v11, %v4984_v11  ;;  %v7435_v41 = vld [vmem:[#allocation25 + $0x68] sm:$0xff]   ;;  %v7439_v11 = vld [vmem:[#allocation25 + $0x58] sm:$0xff]  }
 0x7e3   :  { %v4987_v46 = vpack.c.bf16 %v4983_v62, %v4983_v62  ;;  %v4989_v34 = vpack.c.bf16 %v4985_v1, %v4985_v1  ;;  %v7440_v62 = vld [vmem:[#allocation25 + $0x18] sm:$0xff]   ;;  %v7441_v1 = vld [vmem:[#allocation25 + $0x50] sm:$0xff]  }
 0x7e4   :  { %v4979_v3 = vmax.f32 %v4978_v32, 0.0 }
 0x7e6   :  { %v4980_v25 = vadd.f32 1e-05, %v4979_v3 }
 0x7e8   :  { %7455 = vrsqrt.f32 %v4980_v25 }
 0x7f5   :  { %v7456_v40 = vpop.eup %7455 }
 0x7f6   :  { %v4990_v13 = vpack.c.bf16 %v7456_v40, %v7456_v40 }
 0x7f8   :  { %v4992_v4 = vmul.bf16 %v4990_v13, %v4987_v46  ;;  %v4994_v60 = vmul.bf16 %v4990_v13, %v4989_v34  ;;  %v4991_v15 = vmul.bf16 %v4990_v13, %v4986_v30  ;;  %v4993_v17 = vmul.bf16 %v4990_v13, %v4988_v50  ;;  %v6490_v50 = vld.sshfl [vmem:[%s8424_s24] sm:$0x11 pattern:$0x75316420] }
 0x7fa   :  { %v5050_v19 = vmul.bf16 %v5034_v53, %v4992_v4  ;;  %v5052_v20 = vmul.bf16 %v5048_v26, %v4994_v60  ;;  %v5049_v22 = vmul.bf16 %v5027_v39, %v4991_v15  ;;  %v5051_v27 = vmul.bf16 %v5041_v12, %v4993_v17  ;;  %v7446_v53 = vld [vmem:[#allocation25] sm:$0xff]  }
 0x7fb   :  { %v5630_v4 = vrot.slane %v6490_v50, %v8079_v7 }
 0x7fc   :  { %v5108_v33 = vadd.bf16 %v5092_v49, %v5050_v19  ;;  %v5110_v35 = vadd.bf16 %v5106_v59, %v5052_v20  ;;  %v5107_v9 = vadd.bf16 %v5085_v14, %v5049_v22  ;;  %v5109_v16 = vadd.bf16 %v5099_v18, %v5051_v27  ;;  %v6491_v59 = vld.sshfl [vmem:[%s8425_s25] sm:$0x11 pattern:$0x75316420] }
 0x7fd   :  { %v5623_v49 = vcombine.high %v6490_v50, %v6490_v50  ;;  %v5663_v14 = vcombine.high %v6491_v59, %v6491_v59  ;;  %v5670_v15 = vrot.slane %v6491_v59, %v8079_v7  ;;  %v5639_v22 = vpack.i.b16 %v5630_v4, %v5630_v4 }
 0x7fe   :  { %5539 = vmatprep.mubr.bf16.mxu0 %v5108_v33  ;;  %5580 = vmatprep.mubr.bf16.mxu1 %v5110_v35 }
 0x7ff   :  { %5540 = vmatmul.mubr.bf16.vlgmr.msra.gmra.mxu0 %v5107_v9  ;;  %5581 = vmatmul.mubr.bf16.vlgmr.msra.gmra.mxu1 %v5109_v16  ;;  %v5637_v18 = vrot.slane %v5623_v49, %v8079_v7  ;;  %v5677_v60 = vrot.slane %v5663_v14, %v8079_v7  ;;  %v5679_v33 = vpack.i.b16 %v5670_v15, %v5670_v15 }
 0x800   :  { %6510 = vmatpush3.bf16.msra.mxu0 %v7432_v51 }
 0x801   :  { %6511 = vmatprep.subr.bf16.mxu0 %v7433_v54  ;;  %v5646_v17 = vpack.i.b16 %v5637_v18, %v5637_v18  ;;  %v5686_v27 = vpack.i.b16 %v5677_v60, %v5677_v60  ;;  %v5684_v7 = vrot.slane %v5679_v33, %v8040_v42 }
 0x803   :  { %v5651_v9 = vrot.slane %v5646_v17, %v8040_v42 }
 0x804   :  { %6512 = vmatpush3.bf16.msra.mxu0 %v7434_v55 }
 0x805   :  { %6513 = vmatprep.subr.bf16.mxu0 %v7435_v41 }
 0x808   :  { %6514 = vmatpush3.bf16.msra.mxu0 %v7436_v61 }
 0x809   :  { %6515 = vmatprep.subr.bf16.mxu0 %v7437_v57 }
 0x80c   :  { %6516 = vmatpush3.bf16.msra.mxu0 %v7438_v58 }
 0x80d   :  { %6517 = vmatprep.subr.bf16.mxu0 %v7439_v11 }
 0x810   :  { %6518 = vmatpush3.bf16.msra.mxu0 %v7440_v62 }
 0x811   :  { %6519 = vmatprep.subr.bf16.mxu0 %v7441_v1 }
 0x814   :  { %6520 = vmatpush3.bf16.msra.mxu0 %v7442_v2 }
 0x815   :  { %6521 = vmatprep.subr.bf16.mxu0 %v7443_v0 }
 0x818   :  { %6522 = vmatpush3.bf16.msra.mxu0 %v7444_v6 }
 0x819   :  { %6523 = vmatprep.subr.bf16.mxu0 %v7445_v8 }
 0x81c   :  { %6524 = vmatpush3.bf16.msra.mxu0 %v7446_v53 }
 0x8bf   :  { %v5541_v38 = vpop.f32.mrf.mxu0  ;;  %v5582_v31 = vpop.f32.mrf.mxu1 }
 0x8c0   :  { %v5542_v21 = vadd.f32 %v5541_v38, %v5180_v10 }
 0x8c1   :  { %v5543_v37 = vpop.f32.mrf.mxu0  ;;  %v5584_v29 = vpop.f32.mrf.mxu1 }
 0x8c2   :  { %v5583_v32 = vadd.f32 %v5582_v31, %v5542_v21  ;;  %v5544_v23 = vadd.f32 %v5543_v37, %v5184_v5  ;;  %v5644_v5 = vrot.slane %v5639_v22, %v8040_v42  ;;  %v5691_v21 = vrot.slane %v5686_v27, %v8040_v42 }
 0x8c3   :  { %v5545_v3 = vpop.f32.mrf.mxu0  ;;  %v5586_v24 = vpop.f32.mrf.mxu1 }
 0x8c4   :  { %v5589_v45 = vmax.f32 %v5583_v32, 0.0  ;;  %v5585_v25 = vadd.f32 %v5584_v29, %v5544_v23  ;;  %v6492_v24 = vld [vmem:[%s8427_s27] ss:$0 sm:$0xff] }
 0x8c5   :  { %v5546_v44 = vpop.f32.mrf.mxu0  ;;  %v5587_v52 = vpop.f32.mrf.mxu1 }
 0x8c6   :  { %v5590_v36 = vmax.f32 %v5585_v25, 0.0  ;;  %v5596_v48 = vmul.f32 %v5589_v45, %v5589_v45 }
 0x8c8   :  { %v5591_v47 = vadd.f32 %v5590_v36, %v5589_v45  ;;  %v5597_v28 = vmul.f32 %v5590_v36, %v5590_v36 }
 0x8ca   :  { %5592 = vadd.xlane.f32.xlu0 %v5591_v47  ;;  %v5598_v56 = vadd.f32 %v5597_v28, %v5596_v48 }
 0x8cc   :  { %5599 = vadd.xlane.f32.xlu1 %v5598_v56 }
 0x953   :  { %v5593_v40 = vpop.xlane.xlu0 %5592 }
 0x954   :  { %v5595_v26 = vmul.f32 0.00390625, %v5593_v40 }
 0x955   :  { %v5600_v30 = vpop.xlane.xlu1 %5599 }
 0x956   :  { %v5601_v39 = vmul.f32 0.00390625, %v5600_v30  ;;  %v5602_v12 = vmul.f32 %v5595_v26, %v5595_v26  ;;  %v5607_v19 = vsub.f32 %v5589_v45, %v5595_v26  ;;  %v5608_v20 = vsub.f32 %v5590_v36, %v5595_v26 }
 0x958   :  { %v5603_v13 = vsub.f32 %v5601_v39, %v5602_v12  ;;  %v5609_v16 = vpack.c.bf16 %v5607_v19, %v5607_v19  ;;  %v5610_v63 = vpack.c.bf16 %v5608_v20, %v5608_v20 }
 0x95a   :  { %v5604_v46 = vmax.f32 %v5603_v13, 0.0 }
 0x95c   :  { %v5605_v34 = vadd.f32 1e-05, %v5604_v46 }
 0x95e   :  { %7457 = vrsqrt.f32 %v5605_v34 }
 0x96b   :  { %v7458_v35 = vpop.eup %7457 }
 0x96c   :  { %v5611_v10 = vpack.c.bf16 %v7458_v35, %v7458_v35 }
 0x96e   :  { %v5612_v38 = vmul.bf16 %v5611_v10, %v5609_v16  ;;  %v5613_v31 = vmul.bf16 %v5611_v10, %v5610_v63 }
 0x970   :  { %v5653_v37 = vmul.bf16 %v5651_v9, %v5613_v31  ;;  %v5652_v29 = vmul.bf16 %v5644_v5, %v5612_v38 }
 0x972   :  { %v5693_v32 = vadd.bf16 %v5691_v21, %v5653_v37  ;;  %v5692_v23 = vadd.bf16 %v5684_v7, %v5652_v29 }
 0x974   :  { %5861 = vmatprep.mubr.bf16.mxu0 %v5693_v32 }
 0x975   :  { %5862 = vmatmul.mubr.bf16.vlgmr.msra.gmra.mxu0 %v5692_v23 }
 0xa35   :  { %v6525_v3 = vpop.f32.mrf.mxu0 }
 0xa37   :  { %v6526_v45 = vpop.f32.mrf.mxu0 }
 0xa38   :  { %v6527_v25 = vadd.f32 %v6526_v45, %v6525_v3 }
 0xa39   :  { %v6528_v44 = vpop.f32.mrf.mxu0 }
 0xa3a   :  { %v5864_v52 = vadd.f32 %v6527_v25, %v6492_v24 }
 0xa3b   :  { %v6529_v36 = vpop.f32.mrf.mxu0 }
 0xa3c   :  { %5869 = vst [vmem:[#allocation26] sm:$0xff] %v5864_v52 }
 0xa3d   :  { %7770 = shalt.err (!%p7767_p9)
}
 0xa3e   :  { %5879 = dma.vmem_to_hbm [thread:$0]  %s5877_s15, 128, %s8428_s28, [#allocation4]  }
 0xa3f   :  { %7795 = dma.done.wait [#allocation4], 128  }
 0xa40   :  { %7796 = vsyncadd [#allocation4], 4294967168 }
 0xa41   :  { %5883 = vsyncpa [#allocation3], 1 }
 0xa42   :  { %5884 = vsyncpa [#allocation6], 1 }
 0xa43   :  { %5885 = vsyncpa [#allocation9], 1 }
 0xa44   :  { %5886 = vsyncpa [#allocation12], 1 }
 0xa45   :  { %5887 = vsyncpa [#allocation15], 1 }
 0xa46   :  { %5888 = vsyncpa [#allocation18], 1 }
 0xa47   :  { %5889 = vsyncpa [#allocation21], 1 }
 0xa48   :  { %5890 = vsyncpa [#allocation24], 1 }
 0xa49   :  { %5891 = vsyncpa [#allocation4], 1 }

</bundles_post_ra>
